<compile_context>
chip_gen: v5e
topology: v5e:2x2
jax: 0.10.0
libtpu: 0.0.40
codegen_flags: <defaults>
</compile_context>

<pallas_src>
import jax
import jax.numpy as jnp
from jax.experimental import pallas as pl
from jax.experimental.pallas import tpu as pltpu

BN_EPS = 1e-5
LANE = 128

# --------------------- pipeline_mode feature probe --------------------------

_BUFFERED_OK = None


def _probe_buffered():
    """Check whether pl.BlockSpec(pipeline_mode=pl.Buffered(1)) works here."""
    if not hasattr(pl, "Buffered"):
        return False

    def _copy(i_ref, o_ref):
        o_ref[...] = i_ref[...]

    try:
        fn = pl.pallas_call(
            _copy,
            out_shape=jax.ShapeDtypeStruct((8, LANE), jnp.float32),
            grid=(1,),
            in_specs=[pl.BlockSpec((8, LANE), lambda i: (0, 0),
                                   pipeline_mode=pl.Buffered(1))],
            out_specs=pl.BlockSpec((8, LANE), lambda i: (0, 0)),
        )
        jax.block_until_ready(fn(jnp.zeros((8, LANE), jnp.float32)))
        return True
    except Exception:
        return False


def _resident_spec(shape, index_map):
    """Single-buffered BlockSpec for grid-invariant (resident) operands."""
    global _BUFFERED_OK
    if _BUFFERED_OK is None:
        _BUFFERED_OK = _probe_buffered()
    if _BUFFERED_OK:
        return pl.BlockSpec(shape, index_map, pipeline_mode=pl.Buffered(1))
    return pl.BlockSpec(shape, index_map)


# ----------------------------- Pallas kernels -------------------------------

def _make_block_kernel(taps, ho, wo, pool):
    """Fused 3x3 conv (re-parameterized) + bias + ReLU (+ optional global avg
    pool).  taps[t] = (parity_selector, dy, dx) into the prepped input."""
    rows = ho * wo

    def kernel(x_ref, w_ref, b_ref, o_ref):
        # x_ref: (1, s*s, Hs, Ws, Cin) bf16     w_ref: (9, Cin, Cout_pad) bf16
        # b_ref: (1, Cout_pad) f32              o_ref: spatial bf16 | pooled f32
        acc = None
        for t, (ts, dy, dx) in enumerate(taps):
            xt = x_ref[0, ts, dy:dy + ho, dx:dx + wo, :]      # (ho, wo, Cin)
            xt = xt.reshape(rows, xt.shape[-1])
            d = jnp.dot(xt, w_ref[t], preferred_element_type=jnp.float32)
            acc = d if acc is None else acc + d
        acc = jnp.maximum(acc + b_ref[...], 0.0)              # f32 bias + ReLU
        if pool:
            pooled = jnp.mean(acc, axis=0, keepdims=True)     # (1, Cout_pad)
            o_ref[...] = pooled.reshape(1, 1, -1).astype(o_ref.dtype)
        else:
            o_ref[...] = acc.reshape(1, ho, wo, -1).astype(o_ref.dtype)

    return kernel


def _linear_kernel(x_ref, w_ref, b_ref, o_ref):
    o_ref[...] = (jnp.dot(x_ref[...], w_ref[...],
                          preferred_element_type=jnp.float32) + b_ref[...])


# ------------------------------- wrappers ------------------------------------

def _round_up(x, m):
    return ((x + m - 1) // m) * m


def repvgg_block(x, blk, pool=False):
    """x: (N, H, W, C>=Cin_real) bf16 -> (N, Ho, Wo, Cout_pad) bf16,
    or (N, 1, Cout_pad) f32 (global-avg-pooled) when pool=True."""
    s = blk['stride']
    cin = blk['w'].shape[1]
    cout_pad = blk['w'].shape[2]

    x = x[..., :cin]                     # drop lane padding from previous block
    N, H, W, _ = x.shape
    xp = jnp.pad(x, ((0, 0), (1, 1), (1, 1), (0, 0)))          # zero pad = 1
    hp, wp = H + 2, W + 2

    if s == 1:
        hs, ws, ho, wo = hp, wp, H, W
        prep = xp.reshape(N, 1, hs, ws, cin)
    else:
        assert s == 2 and H % 2 == 0 and W % 2 == 0
        hs, ws = hp // 2, wp // 2
        ho, wo = H // 2, W // 2
        # parity (space-to-depth) split so every stride-2 tap is contiguous
        prep = xp.reshape(N, hs, 2, ws, 2, cin)
        prep = prep.transpose(0, 2, 4, 1, 3, 5).reshape(N, 4, hs, ws, cin)

    taps = [((ky % s) * s + (kx % s), ky // s, kx // s)
            for ky in range(3) for kx in range(3)]

    if pool:
        out_shape = jax.ShapeDtypeStruct((N, 1, cout_pad), jnp.float32)
        out_spec = pl.BlockSpec((1, 1, cout_pad), lambda n: (n, 0, 0))
        out_bytes = cout_pad * 4
    else:
        out_shape = jax.ShapeDtypeStruct((N, ho, wo, cout_pad), jnp.bfloat16)
        out_spec = pl.BlockSpec((1, ho, wo, cout_pad), lambda n: (n, 0, 0, 0))
        out_bytes = ho * wo * cout_pad * 2

    # VMEM budget from the actual per-step footprint: 2x input block
    # (double-buffered) + 2x output block + f32 accumulator + resident w/b.
    in_bytes = s * s * hs * ws * cin * 2
    acc_bytes = ho * wo * cout_pad * 4
    wb_bytes = blk['w'].size * 2 + blk['b'].size * 4
    need = 2 * in_bytes + 2 * out_bytes + acc_bytes + wb_bytes
    vmem_limit = int(min(64 << 20, max(32 << 20, 2 * need)))

    cost = pl.CostEstimate(
        flops=2 * N * ho * wo * 9 * cin * cout_pad,
        transcendentals=0,
        bytes_accessed=int(prep.size) * 2 + wb_bytes + N * out_bytes)

    return pl.pallas_call(
        _make_block_kernel(taps, ho, wo, pool),
        out_shape=out_shape,
        grid=(N,),
        in_specs=[
            pl.BlockSpec((1, s * s, hs, ws, cin),
                         lambda n: (n, 0, 0, 0, 0)),           # activation
            _resident_spec((9, cin, cout_pad), lambda n: (0, 0, 0)),   # weights
            _resident_spec((1, cout_pad), lambda n: (0, 0)),           # bias
        ],
        out_specs=out_spec,
        compiler_params=pltpu.CompilerParams(
            dimension_semantics=("parallel",),                 # megacore on v7x
            vmem_limit_bytes=vmem_limit),
        cost_estimate=cost,
    )(prep, blk['w'], blk['b'])


def repvgg_head(pooled, w, b, num_cls):
    """pooled: (N, C_pad) f32, w: (C_pad, ncls_pad) f32 -> (N, num_cls) f32."""
    N, C = pooled.shape
    ncls_pad = w.shape[1]
    out = pl.pallas_call(
        _linear_kernel,
        out_shape=jax.ShapeDtypeStruct((N, ncls_pad), jnp.float32),
        grid=(1,),
        in_specs=[pl.BlockSpec((N, C), lambda i: (0, 0)),
                  pl.BlockSpec((C, ncls_pad), lambda i: (0, 0)),
                  pl.BlockSpec((1, ncls_pad), lambda i: (0, 0))],
        out_specs=pl.BlockSpec((N, ncls_pad), lambda i: (0, 0)),
        compiler_params=pltpu.CompilerParams(
            dimension_semantics=("arbitrary",)),
    )(pooled, w, b)
    return out[:, :num_cls]


def repvgg_forward(x_nchw, params):
    x = jnp.transpose(x_nchw, (0, 2, 3, 1)).astype(jnp.bfloat16)  # NCHW->NHWC
    blocks = params['blocks']
    for blk in blocks[:-1]:
        x = repvgg_block(x, blk)
    pooled = repvgg_block(x, blocks[-1], pool=True)      # GAP fused in epilogue
    pooled = pooled.reshape(pooled.shape[0], pooled.shape[2])
    return repvgg_head(pooled, params['head_w'], params['head_b'],
                       params['num_cls'])


# ------------------------------ parameter setup -----------------------------

def _bn_fold(gamma, beta, mean, var):
    scale = gamma / jnp.sqrt(var + BN_EPS)
    return scale, beta - mean * scale


def _init_bn(key, c):
    k1, k2, k3, k4 = jax.random.split(key, 4)
    gamma = 1.0 + 0.1 * jax.random.normal(k1, (c,), jnp.float32)
    beta = 0.1 * jax.random.normal(k2, (c,), jnp.float32)
    mean = 0.1 * jax.random.normal(k3, (c,), jnp.float32)
    var = jax.random.uniform(k4, (c,), jnp.float32, 0.5, 1.5)
    return gamma, beta, mean, var


def make_repvgg_params(key, layers, width, num_cls):
    """Replicates RepVGG.__init__ block plan (gr_map empty -> groups=1) and
    applies the exact RepVGG re-parameterization.  Only output channels are
    zero-padded to the 128-lane width; Cin stays real."""
    assert len(width) == 4
    cfgs = []
    inp = min(64, int(64 * width[0]))
    cfgs.append((3, inp, 2))                                   # stage0
    cur = inp
    for oup, n in [(int(64 * width[0]), layers[0]),
                   (int(128 * width[1]), layers[1]),
                   (int(256 * width[2]), layers[2]),
                   (int(512 * width[3]), layers[3])]:
        for s in [2] + [1] * (n - 1):
            cfgs.append((cur, oup, s))
            cur = oup

    blocks = []
    for (cin, cout, s) in cfgs:
        cout_pad = _round_up(cout, LANE)
        has_id = (cin == cout and s == 1)
        key, kw3, kb3, kw1, kb1, kid = jax.random.split(key, 6)

        # rbr_dense: 3x3 conv (no bias) + BN  -> fold into weight/bias
        w3 = 0.1 * jax.random.normal(kw3, (3, 3, cin, cout), jnp.float32)
        g3, b3, m3, v3 = _init_bn(kb3, cout)
        s3, bias3 = _bn_fold(g3, b3, m3, v3)
        W4 = w3 * s3
        bias = bias3

        # rbr_1x1: 1x1 conv (no bias) + BN  -> fold into the center tap
        w1 = 0.1 * jax.random.normal(kw1, (cin, cout), jnp.float32)
        g1, b1, m1, v1 = _init_bn(kb1, cout)
        s1, bias1 = _bn_fold(g1, b1, m1, v1)
        W4 = W4.at[1, 1].add(w1 * s1)
        bias = bias + bias1

        if has_id:                                             # rbr_identity BN
            gi, bi, mi, vi = _init_bn(kid, cin)
            si, biasi = _bn_fold(gi, bi, mi, vi)
            W4 = W4.at[1, 1].add(jnp.diag(si))
            bias = bias + biasi

        # pad OUTPUT channels only (lane-dense stores); Cin stays at real size
        Wp = jnp.zeros((3, 3, cin, cout_pad), jnp.float32)
        Wp = Wp.at[..., :cout].set(W4)
        bp = jnp.zeros((1, cout_pad), jnp.float32).at[0, :cout].set(bias)

        blocks.append(dict(
            stride=s,
            w=Wp.reshape(9, cin, cout_pad).astype(jnp.bfloat16),
            b=bp))

    c_final = cfgs[-1][1]
    c_final_pad = _round_up(c_final, LANE)
    ncls_pad = _round_up(num_cls, LANE)
    key, kw, kb = jax.random.split(key, 3)
    head_w = 0.05 * jax.random.normal(kw, (c_final, num_cls), jnp.float32)
    head_b = 0.05 * jax.random.normal(kb, (num_cls,), jnp.float32)
    head_wp = jnp.zeros((c_final_pad, ncls_pad), jnp.float32)
    head_wp = head_wp.at[:c_final, :num_cls].set(head_w)
    head_bp = jnp.zeros((1, ncls_pad), jnp.float32).at[0, :num_cls].set(head_b)
    return dict(blocks=blocks, head_w=head_wp, head_b=head_bp, num_cls=num_cls)


# ----------------------------------- main ------------------------------------

if __name__ == "__main__":
    key = jax.random.PRNGKey(0)
    kp, kx = jax.random.split(key)

    layers = [1, 2, 1, 1]                 # small RepVGG: 6 blocks total
    width = [0.25, 0.25, 0.25, 0.25]      # channels: 16 -> 16 -> 32 -> 64 -> 128
    num_cls = 10

    params = make_repvgg_params(kp, layers, width, num_cls)
    x = jax.random.normal(kx, (2, 3, 32, 32), jnp.float32)    # NCHW, like PyTorch

    # probe pipeline_mode support once, outside of tracing
    _resident_spec((1, LANE), lambda n: (0, 0))

    fwd = jax.jit(lambda inp: repvgg_forward(inp, params))
    out = jax.block_until_ready(fwd(x))
    assert out.shape == (2, num_cls) and out.dtype == jnp.float32
    print("KERNEL_OK")
</pallas_src>

<mosaic_0001>
module attributes {stable_mosaic.version = 11 : i64} {
  func.func @_copy(%arg0: i32, %arg1: memref<8x128xf32, #tpu.memory_space<vmem>>, %arg2: memref<8x128xf32, #tpu.memory_space<vmem>>) attributes {dimension_semantics = [#tpu.dimension_semantics<arbitrary>], iteration_bounds = array<i64: 1>, scalar_prefetch = 0 : i64, scratch_operands = 0 : i64, tpu.core_type = #tpu.core_type<tc>, window_params = [{pipeline_mode = #tpu.pipeline_mode<synchronous>, transform_indices = @transform_0, window_bounds = array<i64: 8, 128>}, {pipeline_mode = #tpu.pipeline_mode<synchronous>, transform_indices = @transform_1, window_bounds = array<i64: 8, 128>}]} {
    %c0 = arith.constant 0 : index
    %c0_0 = arith.constant 0 : index
    %0 = vector.load %arg1[%c0, %c0_0] : memref<8x128xf32, #tpu.memory_space<vmem>>, vector<8x128xf32>
    %c0_1 = arith.constant 0 : index
    %c0_2 = arith.constant 0 : index
    %1 = vector.load %arg2[%c0_1, %c0_2] : memref<8x128xf32, #tpu.memory_space<vmem>>, vector<8x128xf32>
    tpu.vector_store %arg2[%c0_1, %c0_2], %0 {strides = array<i32>} : memref<8x128xf32, #tpu.memory_space<vmem>>, vector<8x128xf32>,
    return
  }
  func.func @transform_0(%arg0: i32) -> (i32, i32) {
    %c0_i32 = arith.constant 0 : i32
    %c0_i32_0 = arith.constant 0 : i32
    %c0_i32_1 = arith.constant 0 : i32
    return %c0_i32, %c0_i32_0 : i32, i32
  }
  func.func @transform_1(%arg0: i32) -> (i32, i32) {
    %c0_i32 = arith.constant 0 : i32
    %c0_i32_0 = arith.constant 0 : i32
    %c0_i32_1 = arith.constant 0 : i32
    return %c0_i32, %c0_i32_0 : i32, i32
  }
}

module attributes {stable_mosaic.version = 11 : i64} {
  func.func @kernel(%arg0: i32, %arg1: memref<1x4x17x17x3xbf16, #tpu.memory_space<vmem>>, %arg2: memref<9x3x128xbf16, #tpu.memory_space<vmem>>, %arg3: memref<1x128xf32, #tpu.memory_space<vmem>>, %arg4: memref<1x16x16x128xbf16, #tpu.memory_space<vmem>>) attributes {dimension_semantics = [#tpu.dimension_semantics<parallel>], iteration_bounds = array<i64: 2>, scalar_prefetch = 0 : i64, scratch_operands = 0 : i64, tpu.core_type = #tpu.core_type<tc>, window_params = [{transform_indices = @transform_0, window_bounds = array<i64: 1, 4, 17, 17, 3>}, {pipeline_mode = #tpu.pipeline_mode<synchronous>, transform_indices = @transform_1, window_bounds = array<i64: 9, 3, 128>}, {pipeline_mode = #tpu.pipeline_mode<synchronous>, transform_indices = @transform_2, window_bounds = array<i64: 1, 128>}, {transform_indices = @transform_3, window_bounds = array<i64: 1, 16, 16, 128>}]} {
    %c0 = arith.constant 0 : index
    %c0_0 = arith.constant 0 : index
    %c0_1 = arith.constant 0 : index
    %c0_2 = arith.constant 0 : index
    %c0_3 = arith.constant 0 : index
    %0 = vector.load %arg1[%c0, %c0_0, %c0_1, %c0_2, %c0_3] : memref<1x4x17x17x3xbf16, #tpu.memory_space<vmem>>, vector<1x1x16x16x3xbf16>
    %1 = vector.shape_cast %0 : vector<1x1x16x16x3xbf16> to vector<16x16x3xbf16>
    %2 = vector.shape_cast %1 : vector<16x16x3xbf16> to vector<256x3xbf16>
    %c0_4 = arith.constant 0 : index
    %c0_5 = arith.constant 0 : index
    %c0_6 = arith.constant 0 : index
    %3 = vector.load %arg2[%c0_4, %c0_5, %c0_6] : memref<9x3x128xbf16, #tpu.memory_space<vmem>>, vector<1x3x128xbf16>
    %4 = vector.shape_cast %3 : vector<1x3x128xbf16> to vector<3x128xbf16>
    %cst = arith.constant dense<0.000000e+00> : vector<256x128xf32>
    %5 = tpu.matmul %2, %4, %cst {dimension_numbers = #tpu.dot_dimension_numbers<[1], [0], [0], [1], [0, 0, 1, 1], [], []>} : vector<256x3xbf16>, vector<3x128xbf16>, vector<256x128xf32> -> vector<256x128xf32>
    %c0_7 = arith.constant 0 : index
    %c1 = arith.constant 1 : index
    %c0_8 = arith.constant 0 : index
    %c0_9 = arith.constant 0 : index
    %c0_10 = arith.constant 0 : index
    %6 = vector.load %arg1[%c0_7, %c1, %c0_8, %c0_9, %c0_10] : memref<1x4x17x17x3xbf16, #tpu.memory_space<vmem>>, vector<1x1x16x16x3xbf16>
    %7 = vector.shape_cast %6 : vector<1x1x16x16x3xbf16> to vector<16x16x3xbf16>
    %8 = vector.shape_cast %7 : vector<16x16x3xbf16> to vector<256x3xbf16>
    %c1_11 = arith.constant 1 : index
    %c0_12 = arith.constant 0 : index
    %c0_13 = arith.constant 0 : index
    %9 = vector.load %arg2[%c1_11, %c0_12, %c0_13] : memref<9x3x128xbf16, #tpu.memory_space<vmem>>, vector<1x3x128xbf16>
    %10 = vector.shape_cast %9 : vector<1x3x128xbf16> to vector<3x128xbf16>
    %cst_14 = arith.constant dense<0.000000e+00> : vector<256x128xf32>
    %11 = tpu.matmul %8, %10, %cst_14 {dimension_numbers = #tpu.dot_dimension_numbers<[1], [0], [0], [1], [0, 0, 1, 1], [], []>} : vector<256x3xbf16>, vector<3x128xbf16>, vector<256x128xf32> -> vector<256x128xf32>
    %12 = arith.addf %5, %11 : vector<256x128xf32>
    %c0_15 = arith.constant 0 : index
    %c0_16 = arith.constant 0 : index
    %c0_17 = arith.constant 0 : index
    %c1_18 = arith.constant 1 : index
    %c0_19 = arith.constant 0 : index
    %13 = vector.load %arg1[%c0_15, %c0_16, %c0_17, %c1_18, %c0_19] : memref<1x4x17x17x3xbf16, #tpu.memory_space<vmem>>, vector<1x1x16x16x3xbf16>
    %14 = vector.shape_cast %13 : vector<1x1x16x16x3xbf16> to vector<16x16x3xbf16>
    %15 = vector.shape_cast %14 : vector<16x16x3xbf16> to vector<256x3xbf16>
    %c2 = arith.constant 2 : index
    %c0_20 = arith.constant 0 : index
    %c0_21 = arith.constant 0 : index
    %16 = vector.load %arg2[%c2, %c0_20, %c0_21] : memref<9x3x128xbf16, #tpu.memory_space<vmem>>, vector<1x3x128xbf16>
    %17 = vector.shape_cast %16 : vector<1x3x128xbf16> to vector<3x128xbf16>
    %cst_22 = arith.constant dense<0.000000e+00> : vector<256x128xf32>
    %18 = tpu.matmul %15, %17, %cst_22 {dimension_numbers = #tpu.dot_dimension_numbers<[1], [0], [0], [1], [0, 0, 1, 1], [], []>} : vector<256x3xbf16>, vector<3x128xbf16>, vector<256x128xf32> -> vector<256x128xf32>
    %19 = arith.addf %12, %18 : vector<256x128xf32>
    %c0_23 = arith.constant 0 : index
    %c2_24 = arith.constant 2 : index
    %c0_25 = arith.constant 0 : index
    %c0_26 = arith.constant 0 : index
    %c0_27 = arith.constant 0 : index
    %20 = vector.load %arg1[%c0_23, %c2_24, %c0_25, %c0_26, %c0_27] : memref<1x4x17x17x3xbf16, #tpu.memory_space<vmem>>, vector<1x1x16x16x3xbf16>
    %21 = vector.shape_cast %20 : vector<1x1x16x16x3xbf16> to vector<16x16x3xbf16>
    %22 = vector.shape_cast %21 : vector<16x16x3xbf16> to vector<256x3xbf16>
    %c3 = arith.constant 3 : index
    %c0_28 = arith.constant 0 : index
    %c0_29 = arith.constant 0 : index
    %23 = vector.load %arg2[%c3, %c0_28, %c0_29] : memref<9x3x128xbf16, #tpu.memory_space<vmem>>, vector<1x3x128xbf16>
    %24 = vector.shape_cast %23 : vector<1x3x128xbf16> to vector<3x128xbf16>
    %cst_30 = arith.constant dense<0.000000e+00> : vector<256x128xf32>
    %25 = tpu.matmul %22, %24, %cst_30 {dimension_numbers = #tpu.dot_dimension_numbers<[1], [0], [0], [1], [0, 0, 1, 1], [], []>} : vector<256x3xbf16>, vector<3x128xbf16>, vector<256x128xf32> -> vector<256x128xf32>
    %26 = arith.addf %19, %25 : vector<256x128xf32>
    %c0_31 = arith.constant 0 : index
    %c3_32 = arith.constant 3 : index
    %c0_33 = arith.constant 0 : index
    %c0_34 = arith.constant 0 : index
    %c0_35 = arith.constant 0 : index
    %27 = vector.load %arg1[%c0_31, %c3_32, %c0_33, %c0_34, %c0_35] : memref<1x4x17x17x3xbf16, #tpu.memory_space<vmem>>, vector<1x1x16x16x3xbf16>
    %28 = vector.shape_cast %27 : vector<1x1x16x16x3xbf16> to vector<16x16x3xbf16>
    %29 = vector.shape_cast %28 : vector<16x16x3xbf16> to vector<256x3xbf16>
    %c4 = arith.constant 4 : index
    %c0_36 = arith.constant 0 : index
    %c0_37 = arith.constant 0 : index
    %30 = vector.load %arg2[%c4, %c0_36, %c0_37] : memref<9x3x128xbf16, #tpu.memory_space<vmem>>, vector<1x3x128xbf16>
    %31 = vector.shape_cast %30 : vector<1x3x128xbf16> to vector<3x128xbf16>
    %cst_38 = arith.constant dense<0.000000e+00> : vector<256x128xf32>
    %32 = tpu.matmul %29, %31, %cst_38 {dimension_numbers = #tpu.dot_dimension_numbers<[1], [0], [0], [1], [0, 0, 1, 1], [], []>} : vector<256x3xbf16>, vector<3x128xbf16>, vector<256x128xf32> -> vector<256x128xf32>
    %33 = arith.addf %26, %32 : vector<256x128xf32>
    %c0_39 = arith.constant 0 : index
    %c2_40 = arith.constant 2 : index
    %c0_41 = arith.constant 0 : index
    %c1_42 = arith.constant 1 : index
    %c0_43 = arith.constant 0 : index
    %34 = vector.load %arg1[%c0_39, %c2_40, %c0_41, %c1_42, %c0_43] : memref<1x4x17x17x3xbf16, #tpu.memory_space<vmem>>, vector<1x1x16x16x3xbf16>
    %35 = vector.shape_cast %34 : vector<1x1x16x16x3xbf16> to vector<16x16x3xbf16>
    %36 = vector.shape_cast %35 : vector<16x16x3xbf16> to vector<256x3xbf16>
    %c5 = arith.constant 5 : index
    %c0_44 = arith.constant 0 : index
    %c0_45 = arith.constant 0 : index
    %37 = vector.load %arg2[%c5, %c0_44, %c0_45] : memref<9x3x128xbf16, #tpu.memory_space<vmem>>, vector<1x3x128xbf16>
    %38 = vector.shape_cast %37 : vector<1x3x128xbf16> to vector<3x128xbf16>
    %cst_46 = arith.constant dense<0.000000e+00> : vector<256x128xf32>
    %39 = tpu.matmul %36, %38, %cst_46 {dimension_numbers = #tpu.dot_dimension_numbers<[1], [0], [0], [1], [0, 0, 1, 1], [], []>} : vector<256x3xbf16>, vector<3x128xbf16>, vector<256x128xf32> -> vector<256x128xf32>
    %40 = arith.addf %33, %39 : vector<256x128xf32>
    %c0_47 = arith.constant 0 : index
    %c0_48 = arith.constant 0 : index
    %c1_49 = arith.constant 1 : index
    %c0_50 = arith.constant 0 : index
    %c0_51 = arith.constant 0 : index
    %41 = vector.load %arg1[%c0_47, %c0_48, %c1_49, %c0_50, %c0_51] : memref<1x4x17x17x3xbf16, #tpu.memory_space<vmem>>, vector<1x1x16x16x3xbf16>
    %42 = vector.shape_cast %41 : vector<1x1x16x16x3xbf16> to vector<16x16x3xbf16>
    %43 = vector.shape_cast %42 : vector<16x16x3xbf16> to vector<256x3xbf16>
    %c6 = arith.constant 6 : index
    %c0_52 = arith.constant 0 : index
    %c0_53 = arith.constant 0 : index
    %44 = vector.load %arg2[%c6, %c0_52, %c0_53] : memref<9x3x128xbf16, #tpu.memory_space<vmem>>, vector<1x3x128xbf16>
    %45 = vector.shape_cast %44 : vector<1x3x128xbf16> to vector<3x128xbf16>
    %cst_54 = arith.constant dense<0.000000e+00> : vector<256x128xf32>
    %46 = tpu.matmul %43, %45, %cst_54 {dimension_numbers = #tpu.dot_dimension_numbers<[1], [0], [0], [1], [0, 0, 1, 1], [], []>} : vector<256x3xbf16>, vector<3x128xbf16>, vector<256x128xf32> -> vector<256x128xf32>
    %47 = arith.addf %40, %46 : vector<256x128xf32>
    %c0_55 = arith.constant 0 : index
    %c1_56 = arith.constant 1 : index
    %c1_57 = arith.constant 1 : index
    %c0_58 = arith.constant 0 : index
    %c0_59 = arith.constant 0 : index
    %48 = vector.load %arg1[%c0_55, %c1_56, %c1_57, %c0_58, %c0_59] : memref<1x4x17x17x3xbf16, #tpu.memory_space<vmem>>, vector<1x1x16x16x3xbf16>
    %49 = vector.shape_cast %48 : vector<1x1x16x16x3xbf16> to vector<16x16x3xbf16>
    %50 = vector.shape_cast %49 : vector<16x16x3xbf16> to vector<256x3xbf16>
    %c7 = arith.constant 7 : index
    %c0_60 = arith.constant 0 : index
    %c0_61 = arith.constant 0 : index
    %51 = vector.load %arg2[%c7, %c0_60, %c0_61] : memref<9x3x128xbf16, #tpu.memory_space<vmem>>, vector<1x3x128xbf16>
    %52 = vector.shape_cast %51 : vector<1x3x128xbf16> to vector<3x128xbf16>
    %cst_62 = arith.constant dense<0.000000e+00> : vector<256x128xf32>
    %53 = tpu.matmul %50, %52, %cst_62 {dimension_numbers = #tpu.dot_dimension_numbers<[1], [0], [0], [1], [0, 0, 1, 1], [], []>} : vector<256x3xbf16>, vector<3x128xbf16>, vector<256x128xf32> -> vector<256x128xf32>
    %54 = arith.addf %47, %53 : vector<256x128xf32>
    %c0_63 = arith.constant 0 : index
    %c0_64 = arith.constant 0 : index
    %c1_65 = arith.constant 1 : index
    %c1_66 = arith.constant 1 : index
    %c0_67 = arith.constant 0 : index
    %55 = vector.load %arg1[%c0_63, %c0_64, %c1_65, %c1_66, %c0_67] : memref<1x4x17x17x3xbf16, #tpu.memory_space<vmem>>, vector<1x1x16x16x3xbf16>
    %56 = vector.shape_cast %55 : vector<1x1x16x16x3xbf16> to vector<16x16x3xbf16>
    %57 = vector.shape_cast %56 : vector<16x16x3xbf16> to vector<256x3xbf16>
    %c8 = arith.constant 8 : index
    %c0_68 = arith.constant 0 : index
    %c0_69 = arith.constant 0 : index
    %58 = vector.load %arg2[%c8, %c0_68, %c0_69] : memref<9x3x128xbf16, #tpu.memory_space<vmem>>, vector<1x3x128xbf16>
    %59 = vector.shape_cast %58 : vector<1x3x128xbf16> to vector<3x128xbf16>
    %cst_70 = arith.constant dense<0.000000e+00> : vector<256x128xf32>
    %60 = tpu.matmul %57, %59, %cst_70 {dimension_numbers = #tpu.dot_dimension_numbers<[1], [0], [0], [1], [0, 0, 1, 1], [], []>} : vector<256x3xbf16>, vector<3x128xbf16>, vector<256x128xf32> -> vector<256x128xf32>
    %61 = arith.addf %54, %60 : vector<256x128xf32>
    %c0_71 = arith.constant 0 : index
    %c0_72 = arith.constant 0 : index
    %62 = vector.load %arg3[%c0_71, %c0_72] : memref<1x128xf32, #tpu.memory_space<vmem>>, vector<1x128xf32>
    %63 = vector.broadcast %62 : vector<1x128xf32> to vector<256x128xf32>
    %64 = arith.addf %61, %63 : vector<256x128xf32>
    %cst_73 = arith.constant 0.000000e+00 : f32
    %65 = vector.broadcast %cst_73 : f32 to vector<256x128xf32>
    %66 = arith.maximumf %64, %65 : vector<256x128xf32>
    %67 = vector.shape_cast %66 : vector<256x128xf32> to vector<1x16x16x128xf32>
    %68 = arith.truncf %67 : vector<1x16x16x128xf32> to vector<1x16x16x128xbf16>
    %c0_74 = arith.constant 0 : index
    %c0_75 = arith.constant 0 : index
    %c0_76 = arith.constant 0 : index
    %c0_77 = arith.constant 0 : index
    %69 = vector.load %arg4[%c0_74, %c0_75, %c0_76, %c0_77] : memref<1x16x16x128xbf16, #tpu.memory_space<vmem>>, vector<1x16x16x128xbf16>
    tpu.vector_store %arg4[%c0_74, %c0_75, %c0_76, %c0_77], %68 {strides = array<i32>} : memref<1x16x16x128xbf16, #tpu.memory_space<vmem>>, vector<1x16x16x128xbf16>,
    return
  }
  func.func @transform_0(%arg0: i32) -> (i32, i32, i32, i32, i32) {
    %c0_i32 = arith.constant 0 : i32
    %c0_i32_0 = arith.constant 0 : i32
    %c0_i32_1 = arith.constant 0 : i32
    %c0_i32_2 = arith.constant 0 : i32
    %c0_i32_3 = arith.constant 0 : i32
    return %arg0, %c0_i32, %c0_i32_0, %c0_i32_1, %c0_i32_2 : i32, i32, i32, i32, i32
  }
  func.func @transform_1(%arg0: i32) -> (i32, i32, i32) {
    %c0_i32 = arith.constant 0 : i32
    %c0_i32_0 = arith.constant 0 : i32
    %c0_i32_1 = arith.constant 0 : i32
    %c0_i32_2 = arith.constant 0 : i32
    return %c0_i32, %c0_i32_0, %c0_i32_1 : i32, i32, i32
  }
  func.func @transform_2(%arg0: i32) -> (i32, i32) {
    %c0_i32 = arith.constant 0 : i32
    %c0_i32_0 = arith.constant 0 : i32
    %c0_i32_1 = arith.constant 0 : i32
    return %c0_i32, %c0_i32_0 : i32, i32
  }
  func.func @transform_3(%arg0: i32) -> (i32, i32, i32, i32) {
    %c0_i32 = arith.constant 0 : i32
    %c0_i32_0 = arith.constant 0 : i32
    %c0_i32_1 = arith.constant 0 : i32
    %c0_i32_2 = arith.constant 0 : i32
    return %arg0, %c0_i32, %c0_i32_0, %c0_i32_1 : i32, i32, i32, i32
  }
}

module attributes {stable_mosaic.version = 11 : i64} {
  func.func @kernel(%arg0: i32, %arg1: memref<1x4x9x9x16xbf16, #tpu.memory_space<vmem>>, %arg2: memref<9x16x128xbf16, #tpu.memory_space<vmem>>, %arg3: memref<1x128xf32, #tpu.memory_space<vmem>>, %arg4: memref<1x8x8x128xbf16, #tpu.memory_space<vmem>>) attributes {dimension_semantics = [#tpu.dimension_semantics<parallel>], iteration_bounds = array<i64: 2>, scalar_prefetch = 0 : i64, scratch_operands = 0 : i64, tpu.core_type = #tpu.core_type<tc>, window_params = [{transform_indices = @transform_0, window_bounds = array<i64: 1, 4, 9, 9, 16>}, {pipeline_mode = #tpu.pipeline_mode<synchronous>, transform_indices = @transform_1, window_bounds = array<i64: 9, 16, 128>}, {pipeline_mode = #tpu.pipeline_mode<synchronous>, transform_indices = @transform_2, window_bounds = array<i64: 1, 128>}, {transform_indices = @transform_3, window_bounds = array<i64: 1, 8, 8, 128>}]} {
    %c0 = arith.constant 0 : index
    %c0_0 = arith.constant 0 : index
    %c0_1 = arith.constant 0 : index
    %c0_2 = arith.constant 0 : index
    %c0_3 = arith.constant 0 : index
    %0 = vector.load %arg1[%c0, %c0_0, %c0_1, %c0_2, %c0_3] : memref<1x4x9x9x16xbf16, #tpu.memory_space<vmem>>, vector<1x1x8x8x16xbf16>
    %1 = vector.shape_cast %0 : vector<1x1x8x8x16xbf16> to vector<8x8x16xbf16>
    %2 = vector.shape_cast %1 : vector<8x8x16xbf16> to vector<64x16xbf16>
    %c0_4 = arith.constant 0 : index
    %c0_5 = arith.constant 0 : index
    %c0_6 = arith.constant 0 : index
    %3 = vector.load %arg2[%c0_4, %c0_5, %c0_6] : memref<9x16x128xbf16, #tpu.memory_space<vmem>>, vector<1x16x128xbf16>
    %4 = vector.shape_cast %3 : vector<1x16x128xbf16> to vector<16x128xbf16>
    %cst = arith.constant dense<0.000000e+00> : vector<64x128xf32>
    %5 = tpu.matmul %2, %4, %cst {dimension_numbers = #tpu.dot_dimension_numbers<[1], [0], [0], [1], [0, 0, 1, 1], [], []>} : vector<64x16xbf16>, vector<16x128xbf16>, vector<64x128xf32> -> vector<64x128xf32>
    %c0_7 = arith.constant 0 : index
    %c1 = arith.constant 1 : index
    %c0_8 = arith.constant 0 : index
    %c0_9 = arith.constant 0 : index
    %c0_10 = arith.constant 0 : index
    %6 = vector.load %arg1[%c0_7, %c1, %c0_8, %c0_9, %c0_10] : memref<1x4x9x9x16xbf16, #tpu.memory_space<vmem>>, vector<1x1x8x8x16xbf16>
    %7 = vector.shape_cast %6 : vector<1x1x8x8x16xbf16> to vector<8x8x16xbf16>
    %8 = vector.shape_cast %7 : vector<8x8x16xbf16> to vector<64x16xbf16>
    %c1_11 = arith.constant 1 : index
    %c0_12 = arith.constant 0 : index
    %c0_13 = arith.constant 0 : index
    %9 = vector.load %arg2[%c1_11, %c0_12, %c0_13] : memref<9x16x128xbf16, #tpu.memory_space<vmem>>, vector<1x16x128xbf16>
    %10 = vector.shape_cast %9 : vector<1x16x128xbf16> to vector<16x128xbf16>
    %cst_14 = arith.constant dense<0.000000e+00> : vector<64x128xf32>
    %11 = tpu.matmul %8, %10, %cst_14 {dimension_numbers = #tpu.dot_dimension_numbers<[1], [0], [0], [1], [0, 0, 1, 1], [], []>} : vector<64x16xbf16>, vector<16x128xbf16>, vector<64x128xf32> -> vector<64x128xf32>
    %12 = arith.addf %5, %11 : vector<64x128xf32>
    %c0_15 = arith.constant 0 : index
    %c0_16 = arith.constant 0 : index
    %c0_17 = arith.constant 0 : index
    %c1_18 = arith.constant 1 : index
    %c0_19 = arith.constant 0 : index
    %13 = vector.load %arg1[%c0_15, %c0_16, %c0_17, %c1_18, %c0_19] : memref<1x4x9x9x16xbf16, #tpu.memory_space<vmem>>, vector<1x1x8x8x16xbf16>
    %14 = vector.shape_cast %13 : vector<1x1x8x8x16xbf16> to vector<8x8x16xbf16>
    %15 = vector.shape_cast %14 : vector<8x8x16xbf16> to vector<64x16xbf16>
    %c2 = arith.constant 2 : index
    %c0_20 = arith.constant 0 : index
    %c0_21 = arith.constant 0 : index
    %16 = vector.load %arg2[%c2, %c0_20, %c0_21] : memref<9x16x128xbf16, #tpu.memory_space<vmem>>, vector<1x16x128xbf16>
    %17 = vector.shape_cast %16 : vector<1x16x128xbf16> to vector<16x128xbf16>
    %cst_22 = arith.constant dense<0.000000e+00> : vector<64x128xf32>
    %18 = tpu.matmul %15, %17, %cst_22 {dimension_numbers = #tpu.dot_dimension_numbers<[1], [0], [0], [1], [0, 0, 1, 1], [], []>} : vector<64x16xbf16>, vector<16x128xbf16>, vector<64x128xf32> -> vector<64x128xf32>
    %19 = arith.addf %12, %18 : vector<64x128xf32>
    %c0_23 = arith.constant 0 : index
    %c2_24 = arith.constant 2 : index
    %c0_25 = arith.constant 0 : index
    %c0_26 = arith.constant 0 : index
    %c0_27 = arith.constant 0 : index
    %20 = vector.load %arg1[%c0_23, %c2_24, %c0_25, %c0_26, %c0_27] : memref<1x4x9x9x16xbf16, #tpu.memory_space<vmem>>, vector<1x1x8x8x16xbf16>
    %21 = vector.shape_cast %20 : vector<1x1x8x8x16xbf16> to vector<8x8x16xbf16>
    %22 = vector.shape_cast %21 : vector<8x8x16xbf16> to vector<64x16xbf16>
    %c3 = arith.constant 3 : index
    %c0_28 = arith.constant 0 : index
    %c0_29 = arith.constant 0 : index
    %23 = vector.load %arg2[%c3, %c0_28, %c0_29] : memref<9x16x128xbf16, #tpu.memory_space<vmem>>, vector<1x16x128xbf16>
    %24 = vector.shape_cast %23 : vector<1x16x128xbf16> to vector<16x128xbf16>
    %cst_30 = arith.constant dense<0.000000e+00> : vector<64x128xf32>
    %25 = tpu.matmul %22, %24, %cst_30 {dimension_numbers = #tpu.dot_dimension_numbers<[1], [0], [0], [1], [0, 0, 1, 1], [], []>} : vector<64x16xbf16>, vector<16x128xbf16>, vector<64x128xf32> -> vector<64x128xf32>
    %26 = arith.addf %19, %25 : vector<64x128xf32>
    %c0_31 = arith.constant 0 : index
    %c3_32 = arith.constant 3 : index
    %c0_33 = arith.constant 0 : index
    %c0_34 = arith.constant 0 : index
    %c0_35 = arith.constant 0 : index
    %27 = vector.load %arg1[%c0_31, %c3_32, %c0_33, %c0_34, %c0_35] : memref<1x4x9x9x16xbf16, #tpu.memory_space<vmem>>, vector<1x1x8x8x16xbf16>
    %28 = vector.shape_cast %27 : vector<1x1x8x8x16xbf16> to vector<8x8x16xbf16>
    %29 = vector.shape_cast %28 : vector<8x8x16xbf16> to vector<64x16xbf16>
    %c4 = arith.constant 4 : index
    %c0_36 = arith.constant 0 : index
    %c0_37 = arith.constant 0 : index
    %30 = vector.load %arg2[%c4, %c0_36, %c0_37] : memref<9x16x128xbf16, #tpu.memory_space<vmem>>, vector<1x16x128xbf16>
    %31 = vector.shape_cast %30 : vector<1x16x128xbf16> to vector<16x128xbf16>
    %cst_38 = arith.constant dense<0.000000e+00> : vector<64x128xf32>
    %32 = tpu.matmul %29, %31, %cst_38 {dimension_numbers = #tpu.dot_dimension_numbers<[1], [0], [0], [1], [0, 0, 1, 1], [], []>} : vector<64x16xbf16>, vector<16x128xbf16>, vector<64x128xf32> -> vector<64x128xf32>
    %33 = arith.addf %26, %32 : vector<64x128xf32>
    %c0_39 = arith.constant 0 : index
    %c2_40 = arith.constant 2 : index
    %c0_41 = arith.constant 0 : index
    %c1_42 = arith.constant 1 : index
    %c0_43 = arith.constant 0 : index
    %34 = vector.load %arg1[%c0_39, %c2_40, %c0_41, %c1_42, %c0_43] : memref<1x4x9x9x16xbf16, #tpu.memory_space<vmem>>, vector<1x1x8x8x16xbf16>
    %35 = vector.shape_cast %34 : vector<1x1x8x8x16xbf16> to vector<8x8x16xbf16>
    %36 = vector.shape_cast %35 : vector<8x8x16xbf16> to vector<64x16xbf16>
    %c5 = arith.constant 5 : index
    %c0_44 = arith.constant 0 : index
    %c0_45 = arith.constant 0 : index
    %37 = vector.load %arg2[%c5, %c0_44, %c0_45] : memref<9x16x128xbf16, #tpu.memory_space<vmem>>, vector<1x16x128xbf16>
    %38 = vector.shape_cast %37 : vector<1x16x128xbf16> to vector<16x128xbf16>
    %cst_46 = arith.constant dense<0.000000e+00> : vector<64x128xf32>
    %39 = tpu.matmul %36, %38, %cst_46 {dimension_numbers = #tpu.dot_dimension_numbers<[1], [0], [0], [1], [0, 0, 1, 1], [], []>} : vector<64x16xbf16>, vector<16x128xbf16>, vector<64x128xf32> -> vector<64x128xf32>
    %40 = arith.addf %33, %39 : vector<64x128xf32>
    %c0_47 = arith.constant 0 : index
    %c0_48 = arith.constant 0 : index
    %c1_49 = arith.constant 1 : index
    %c0_50 = arith.constant 0 : index
    %c0_51 = arith.constant 0 : index
    %41 = vector.load %arg1[%c0_47, %c0_48, %c1_49, %c0_50, %c0_51] : memref<1x4x9x9x16xbf16, #tpu.memory_space<vmem>>, vector<1x1x8x8x16xbf16>
    %42 = vector.shape_cast %41 : vector<1x1x8x8x16xbf16> to vector<8x8x16xbf16>
    %43 = vector.shape_cast %42 : vector<8x8x16xbf16> to vector<64x16xbf16>
    %c6 = arith.constant 6 : index
    %c0_52 = arith.constant 0 : index
    %c0_53 = arith.constant 0 : index
    %44 = vector.load %arg2[%c6, %c0_52, %c0_53] : memref<9x16x128xbf16, #tpu.memory_space<vmem>>, vector<1x16x128xbf16>
    %45 = vector.shape_cast %44 : vector<1x16x128xbf16> to vector<16x128xbf16>
    %cst_54 = arith.constant dense<0.000000e+00> : vector<64x128xf32>
    %46 = tpu.matmul %43, %45, %cst_54 {dimension_numbers = #tpu.dot_dimension_numbers<[1], [0], [0], [1], [0, 0, 1, 1], [], []>} : vector<64x16xbf16>, vector<16x128xbf16>, vector<64x128xf32> -> vector<64x128xf32>
    %47 = arith.addf %40, %46 : vector<64x128xf32>
    %c0_55 = arith.constant 0 : index
    %c1_56 = arith.constant 1 : index
    %c1_57 = arith.constant 1 : index
    %c0_58 = arith.constant 0 : index
    %c0_59 = arith.constant 0 : index
    %48 = vector.load %arg1[%c0_55, %c1_56, %c1_57, %c0_58, %c0_59] : memref<1x4x9x9x16xbf16, #tpu.memory_space<vmem>>, vector<1x1x8x8x16xbf16>
    %49 = vector.shape_cast %48 : vector<1x1x8x8x16xbf16> to vector<8x8x16xbf16>
    %50 = vector.shape_cast %49 : vector<8x8x16xbf16> to vector<64x16xbf16>
    %c7 = arith.constant 7 : index
    %c0_60 = arith.constant 0 : index
    %c0_61 = arith.constant 0 : index
    %51 = vector.load %arg2[%c7, %c0_60, %c0_61] : memref<9x16x128xbf16, #tpu.memory_space<vmem>>, vector<1x16x128xbf16>
    %52 = vector.shape_cast %51 : vector<1x16x128xbf16> to vector<16x128xbf16>
    %cst_62 = arith.constant dense<0.000000e+00> : vector<64x128xf32>
    %53 = tpu.matmul %50, %52, %cst_62 {dimension_numbers = #tpu.dot_dimension_numbers<[1], [0], [0], [1], [0, 0, 1, 1], [], []>} : vector<64x16xbf16>, vector<16x128xbf16>, vector<64x128xf32> -> vector<64x128xf32>
    %54 = arith.addf %47, %53 : vector<64x128xf32>
    %c0_63 = arith.constant 0 : index
    %c0_64 = arith.constant 0 : index
    %c1_65 = arith.constant 1 : index
    %c1_66 = arith.constant 1 : index
    %c0_67 = arith.constant 0 : index
    %55 = vector.load %arg1[%c0_63, %c0_64, %c1_65, %c1_66, %c0_67] : memref<1x4x9x9x16xbf16, #tpu.memory_space<vmem>>, vector<1x1x8x8x16xbf16>
    %56 = vector.shape_cast %55 : vector<1x1x8x8x16xbf16> to vector<8x8x16xbf16>
    %57 = vector.shape_cast %56 : vector<8x8x16xbf16> to vector<64x16xbf16>
    %c8 = arith.constant 8 : index
    %c0_68 = arith.constant 0 : index
    %c0_69 = arith.constant 0 : index
    %58 = vector.load %arg2[%c8, %c0_68, %c0_69] : memref<9x16x128xbf16, #tpu.memory_space<vmem>>, vector<1x16x128xbf16>
    %59 = vector.shape_cast %58 : vector<1x16x128xbf16> to vector<16x128xbf16>
    %cst_70 = arith.constant dense<0.000000e+00> : vector<64x128xf32>
    %60 = tpu.matmul %57, %59, %cst_70 {dimension_numbers = #tpu.dot_dimension_numbers<[1], [0], [0], [1], [0, 0, 1, 1], [], []>} : vector<64x16xbf16>, vector<16x128xbf16>, vector<64x128xf32> -> vector<64x128xf32>
    %61 = arith.addf %54, %60 : vector<64x128xf32>
    %c0_71 = arith.constant 0 : index
    %c0_72 = arith.constant 0 : index
    %62 = vector.load %arg3[%c0_71, %c0_72] : memref<1x128xf32, #tpu.memory_space<vmem>>, vector<1x128xf32>
    %63 = vector.broadcast %62 : vector<1x128xf32> to vector<64x128xf32>
    %64 = arith.addf %61, %63 : vector<64x128xf32>
    %cst_73 = arith.constant 0.000000e+00 : f32
    %65 = vector.broadcast %cst_73 : f32 to vector<64x128xf32>
    %66 = arith.maximumf %64, %65 : vector<64x128xf32>
    %67 = vector.shape_cast %66 : vector<64x128xf32> to vector<1x8x8x128xf32>
    %68 = arith.truncf %67 : vector<1x8x8x128xf32> to vector<1x8x8x128xbf16>
    %c0_74 = arith.constant 0 : index
    %c0_75 = arith.constant 0 : index
    %c0_76 = arith.constant 0 : index
    %c0_77 = arith.constant 0 : index
    %69 = vector.load %arg4[%c0_74, %c0_75, %c0_76, %c0_77] : memref<1x8x8x128xbf16, #tpu.memory_space<vmem>>, vector<1x8x8x128xbf16>
    tpu.vector_store %arg4[%c0_74, %c0_75, %c0_76, %c0_77], %68 {strides = array<i32>} : memref<1x8x8x128xbf16, #tpu.memory_space<vmem>>, vector<1x8x8x128xbf16>,
    return
  }
  func.func @transform_0(%arg0: i32) -> (i32, i32, i32, i32, i32) {
    %c0_i32 = arith.constant 0 : i32
    %c0_i32_0 = arith.constant 0 : i32
    %c0_i32_1 = arith.constant 0 : i32
    %c0_i32_2 = arith.constant 0 : i32
    %c0_i32_3 = arith.constant 0 : i32
    return %arg0, %c0_i32, %c0_i32_0, %c0_i32_1, %c0_i32_2 : i32, i32, i32, i32, i32
  }
  func.func @transform_1(%arg0: i32) -> (i32, i32, i32) {
    %c0_i32 = arith.constant 0 : i32
    %c0_i32_0 = arith.constant 0 : i32
    %c0_i32_1 = arith.constant 0 : i32
    %c0_i32_2 = arith.constant 0 : i32
    return %c0_i32, %c0_i32_0, %c0_i32_1 : i32, i32, i32
  }
  func.func @transform_2(%arg0: i32) -> (i32, i32) {
    %c0_i32 = arith.constant 0 : i32
    %c0_i32_0 = arith.constant 0 : i32
    %c0_i32_1 = arith.constant 0 : i32
    return %c0_i32, %c0_i32_0 : i32, i32
  }
  func.func @transform_3(%arg0: i32) -> (i32, i32, i32, i32) {
    %c0_i32 = arith.constant 0 : i32
    %c0_i32_0 = arith.constant 0 : i32
    %c0_i32_1 = arith.constant 0 : i32
    %c0_i32_2 = arith.constant 0 : i32
    return %arg0, %c0_i32, %c0_i32_0, %c0_i32_1 : i32, i32, i32, i32
  }
}

module attributes {stable_mosaic.version = 11 : i64} {
  func.func @kernel(%arg0: i32, %arg1: memref<1x4x5x5x16xbf16, #tpu.memory_space<vmem>>, %arg2: memref<9x16x128xbf16, #tpu.memory_space<vmem>>, %arg3: memref<1x128xf32, #tpu.memory_space<vmem>>, %arg4: memref<1x4x4x128xbf16, #tpu.memory_space<vmem>>) attributes {dimension_semantics = [#tpu.dimension_semantics<parallel>], iteration_bounds = array<i64: 2>, scalar_prefetch = 0 : i64, scratch_operands = 0 : i64, tpu.core_type = #tpu.core_type<tc>, window_params = [{transform_indices = @transform_0, window_bounds = array<i64: 1, 4, 5, 5, 16>}, {pipeline_mode = #tpu.pipeline_mode<synchronous>, transform_indices = @transform_1, window_bounds = array<i64: 9, 16, 128>}, {pipeline_mode = #tpu.pipeline_mode<synchronous>, transform_indices = @transform_2, window_bounds = array<i64: 1, 128>}, {transform_indices = @transform_3, window_bounds = array<i64: 1, 4, 4, 128>}]} {
    %c0 = arith.constant 0 : index
    %c0_0 = arith.constant 0 : index
    %c0_1 = arith.constant 0 : index
    %c0_2 = arith.constant 0 : index
    %c0_3 = arith.constant 0 : index
    %0 = vector.load %arg1[%c0, %c0_0, %c0_1, %c0_2, %c0_3] : memref<1x4x5x5x16xbf16, #tpu.memory_space<vmem>>, vector<1x1x4x4x16xbf16>
    %1 = vector.shape_cast %0 : vector<1x1x4x4x16xbf16> to vector<4x4x16xbf16>
    %2 = vector.shape_cast %1 : vector<4x4x16xbf16> to vector<16x16xbf16>
    %c0_4 = arith.constant 0 : index
    %c0_5 = arith.constant 0 : index
    %c0_6 = arith.constant 0 : index
    %3 = vector.load %arg2[%c0_4, %c0_5, %c0_6] : memref<9x16x128xbf16, #tpu.memory_space<vmem>>, vector<1x16x128xbf16>
    %4 = vector.shape_cast %3 : vector<1x16x128xbf16> to vector<16x128xbf16>
    %cst = arith.constant dense<0.000000e+00> : vector<16x128xf32>
    %5 = tpu.matmul %2, %4, %cst {dimension_numbers = #tpu.dot_dimension_numbers<[1], [0], [0], [1], [0, 0, 1, 1], [], []>} : vector<16x16xbf16>, vector<16x128xbf16>, vector<16x128xf32> -> vector<16x128xf32>
    %c0_7 = arith.constant 0 : index
    %c1 = arith.constant 1 : index
    %c0_8 = arith.constant 0 : index
    %c0_9 = arith.constant 0 : index
    %c0_10 = arith.constant 0 : index
    %6 = vector.load %arg1[%c0_7, %c1, %c0_8, %c0_9, %c0_10] : memref<1x4x5x5x16xbf16, #tpu.memory_space<vmem>>, vector<1x1x4x4x16xbf16>
    %7 = vector.shape_cast %6 : vector<1x1x4x4x16xbf16> to vector<4x4x16xbf16>
    %8 = vector.shape_cast %7 : vector<4x4x16xbf16> to vector<16x16xbf16>
    %c1_11 = arith.constant 1 : index
    %c0_12 = arith.constant 0 : index
    %c0_13 = arith.constant 0 : index
    %9 = vector.load %arg2[%c1_11, %c0_12, %c0_13] : memref<9x16x128xbf16, #tpu.memory_space<vmem>>, vector<1x16x128xbf16>
    %10 = vector.shape_cast %9 : vector<1x16x128xbf16> to vector<16x128xbf16>
    %cst_14 = arith.constant dense<0.000000e+00> : vector<16x128xf32>
    %11 = tpu.matmul %8, %10, %cst_14 {dimension_numbers = #tpu.dot_dimension_numbers<[1], [0], [0], [1], [0, 0, 1, 1], [], []>} : vector<16x16xbf16>, vector<16x128xbf16>, vector<16x128xf32> -> vector<16x128xf32>
    %12 = arith.addf %5, %11 : vector<16x128xf32>
    %c0_15 = arith.constant 0 : index
    %c0_16 = arith.constant 0 : index
    %c0_17 = arith.constant 0 : index
    %c1_18 = arith.constant 1 : index
    %c0_19 = arith.constant 0 : index
    %13 = vector.load %arg1[%c0_15, %c0_16, %c0_17, %c1_18, %c0_19] : memref<1x4x5x5x16xbf16, #tpu.memory_space<vmem>>, vector<1x1x4x4x16xbf16>
    %14 = vector.shape_cast %13 : vector<1x1x4x4x16xbf16> to vector<4x4x16xbf16>
    %15 = vector.shape_cast %14 : vector<4x4x16xbf16> to vector<16x16xbf16>
    %c2 = arith.constant 2 : index
    %c0_20 = arith.constant 0 : index
    %c0_21 = arith.constant 0 : index
    %16 = vector.load %arg2[%c2, %c0_20, %c0_21] : memref<9x16x128xbf16, #tpu.memory_space<vmem>>, vector<1x16x128xbf16>
    %17 = vector.shape_cast %16 : vector<1x16x128xbf16> to vector<16x128xbf16>
    %cst_22 = arith.constant dense<0.000000e+00> : vector<16x128xf32>
    %18 = tpu.matmul %15, %17, %cst_22 {dimension_numbers = #tpu.dot_dimension_numbers<[1], [0], [0], [1], [0, 0, 1, 1], [], []>} : vector<16x16xbf16>, vector<16x128xbf16>, vector<16x128xf32> -> vector<16x128xf32>
    %19 = arith.addf %12, %18 : vector<16x128xf32>
    %c0_23 = arith.constant 0 : index
    %c2_24 = arith.constant 2 : index
    %c0_25 = arith.constant 0 : index
    %c0_26 = arith.constant 0 : index
    %c0_27 = arith.constant 0 : index
    %20 = vector.load %arg1[%c0_23, %c2_24, %c0_25, %c0_26, %c0_27] : memref<1x4x5x5x16xbf16, #tpu.memory_space<vmem>>, vector<1x1x4x4x16xbf16>
    %21 = vector.shape_cast %20 : vector<1x1x4x4x16xbf16> to vector<4x4x16xbf16>
    %22 = vector.shape_cast %21 : vector<4x4x16xbf16> to vector<16x16xbf16>
    %c3 = arith.constant 3 : index
    %c0_28 = arith.constant 0 : index
    %c0_29 = arith.constant 0 : index
    %23 = vector.load %arg2[%c3, %c0_28, %c0_29] : memref<9x16x128xbf16, #tpu.memory_space<vmem>>, vector<1x16x128xbf16>
    %24 = vector.shape_cast %23 : vector<1x16x128xbf16> to vector<16x128xbf16>
    %cst_30 = arith.constant dense<0.000000e+00> : vector<16x128xf32>
    %25 = tpu.matmul %22, %24, %cst_30 {dimension_numbers = #tpu.dot_dimension_numbers<[1], [0], [0], [1], [0, 0, 1, 1], [], []>} : vector<16x16xbf16>, vector<16x128xbf16>, vector<16x128xf32> -> vector<16x128xf32>
    %26 = arith.addf %19, %25 : vector<16x128xf32>
    %c0_31 = arith.constant 0 : index
    %c3_32 = arith.constant 3 : index
    %c0_33 = arith.constant 0 : index
    %c0_34 = arith.constant 0 : index
    %c0_35 = arith.constant 0 : index
    %27 = vector.load %arg1[%c0_31, %c3_32, %c0_33, %c0_34, %c0_35] : memref<1x4x5x5x16xbf16, #tpu.memory_space<vmem>>, vector<1x1x4x4x16xbf16>
    %28 = vector.shape_cast %27 : vector<1x1x4x4x16xbf16> to vector<4x4x16xbf16>
    %29 = vector.shape_cast %28 : vector<4x4x16xbf16> to vector<16x16xbf16>
    %c4 = arith.constant 4 : index
    %c0_36 = arith.constant 0 : index
    %c0_37 = arith.constant 0 : index
    %30 = vector.load %arg2[%c4, %c0_36, %c0_37] : memref<9x16x128xbf16, #tpu.memory_space<vmem>>, vector<1x16x128xbf16>
    %31 = vector.shape_cast %30 : vector<1x16x128xbf16> to vector<16x128xbf16>
    %cst_38 = arith.constant dense<0.000000e+00> : vector<16x128xf32>
    %32 = tpu.matmul %29, %31, %cst_38 {dimension_numbers = #tpu.dot_dimension_numbers<[1], [0], [0], [1], [0, 0, 1, 1], [], []>} : vector<16x16xbf16>, vector<16x128xbf16>, vector<16x128xf32> -> vector<16x128xf32>
    %33 = arith.addf %26, %32 : vector<16x128xf32>
    %c0_39 = arith.constant 0 : index
    %c2_40 = arith.constant 2 : index
    %c0_41 = arith.constant 0 : index
    %c1_42 = arith.constant 1 : index
    %c0_43 = arith.constant 0 : index
    %34 = vector.load %arg1[%c0_39, %c2_40, %c0_41, %c1_42, %c0_43] : memref<1x4x5x5x16xbf16, #tpu.memory_space<vmem>>, vector<1x1x4x4x16xbf16>
    %35 = vector.shape_cast %34 : vector<1x1x4x4x16xbf16> to vector<4x4x16xbf16>
    %36 = vector.shape_cast %35 : vector<4x4x16xbf16> to vector<16x16xbf16>
    %c5 = arith.constant 5 : index
    %c0_44 = arith.constant 0 : index
    %c0_45 = arith.constant 0 : index
    %37 = vector.load %arg2[%c5, %c0_44, %c0_45] : memref<9x16x128xbf16, #tpu.memory_space<vmem>>, vector<1x16x128xbf16>
    %38 = vector.shape_cast %37 : vector<1x16x128xbf16> to vector<16x128xbf16>
    %cst_46 = arith.constant dense<0.000000e+00> : vector<16x128xf32>
    %39 = tpu.matmul %36, %38, %cst_46 {dimension_numbers = #tpu.dot_dimension_numbers<[1], [0], [0], [1], [0, 0, 1, 1], [], []>} : vector<16x16xbf16>, vector<16x128xbf16>, vector<16x128xf32> -> vector<16x128xf32>
    %40 = arith.addf %33, %39 : vector<16x128xf32>
    %c0_47 = arith.constant 0 : index
    %c0_48 = arith.constant 0 : index
    %c1_49 = arith.constant 1 : index
    %c0_50 = arith.constant 0 : index
    %c0_51 = arith.constant 0 : index
    %41 = vector.load %arg1[%c0_47, %c0_48, %c1_49, %c0_50, %c0_51] : memref<1x4x5x5x16xbf16, #tpu.memory_space<vmem>>, vector<1x1x4x4x16xbf16>
    %42 = vector.shape_cast %41 : vector<1x1x4x4x16xbf16> to vector<4x4x16xbf16>
    %43 = vector.shape_cast %42 : vector<4x4x16xbf16> to vector<16x16xbf16>
    %c6 = arith.constant 6 : index
    %c0_52 = arith.constant 0 : index
    %c0_53 = arith.constant 0 : index
    %44 = vector.load %arg2[%c6, %c0_52, %c0_53] : memref<9x16x128xbf16, #tpu.memory_space<vmem>>, vector<1x16x128xbf16>
    %45 = vector.shape_cast %44 : vector<1x16x128xbf16> to vector<16x128xbf16>
    %cst_54 = arith.constant dense<0.000000e+00> : vector<16x128xf32>
    %46 = tpu.matmul %43, %45, %cst_54 {dimension_numbers = #tpu.dot_dimension_numbers<[1], [0], [0], [1], [0, 0, 1, 1], [], []>} : vector<16x16xbf16>, vector<16x128xbf16>, vector<16x128xf32> -> vector<16x128xf32>
    %47 = arith.addf %40, %46 : vector<16x128xf32>
    %c0_55 = arith.constant 0 : index
    %c1_56 = arith.constant 1 : index
    %c1_57 = arith.constant 1 : index
    %c0_58 = arith.constant 0 : index
    %c0_59 = arith.constant 0 : index
    %48 = vector.load %arg1[%c0_55, %c1_56, %c1_57, %c0_58, %c0_59] : memref<1x4x5x5x16xbf16, #tpu.memory_space<vmem>>, vector<1x1x4x4x16xbf16>
    %49 = vector.shape_cast %48 : vector<1x1x4x4x16xbf16> to vector<4x4x16xbf16>
    %50 = vector.shape_cast %49 : vector<4x4x16xbf16> to vector<16x16xbf16>
    %c7 = arith.constant 7 : index
    %c0_60 = arith.constant 0 : index
    %c0_61 = arith.constant 0 : index
    %51 = vector.load %arg2[%c7, %c0_60, %c0_61] : memref<9x16x128xbf16, #tpu.memory_space<vmem>>, vector<1x16x128xbf16>
    %52 = vector.shape_cast %51 : vector<1x16x128xbf16> to vector<16x128xbf16>
    %cst_62 = arith.constant dense<0.000000e+00> : vector<16x128xf32>
    %53 = tpu.matmul %50, %52, %cst_62 {dimension_numbers = #tpu.dot_dimension_numbers<[1], [0], [0], [1], [0, 0, 1, 1], [], []>} : vector<16x16xbf16>, vector<16x128xbf16>, vector<16x128xf32> -> vector<16x128xf32>
    %54 = arith.addf %47, %53 : vector<16x128xf32>
    %c0_63 = arith.constant 0 : index
    %c0_64 = arith.constant 0 : index
    %c1_65 = arith.constant 1 : index
    %c1_66 = arith.constant 1 : index
    %c0_67 = arith.constant 0 : index
    %55 = vector.load %arg1[%c0_63, %c0_64, %c1_65, %c1_66, %c0_67] : memref<1x4x5x5x16xbf16, #tpu.memory_space<vmem>>, vector<1x1x4x4x16xbf16>
    %56 = vector.shape_cast %55 : vector<1x1x4x4x16xbf16> to vector<4x4x16xbf16>
    %57 = vector.shape_cast %56 : vector<4x4x16xbf16> to vector<16x16xbf16>
    %c8 = arith.constant 8 : index
    %c0_68 = arith.constant 0 : index
    %c0_69 = arith.constant 0 : index
    %58 = vector.load %arg2[%c8, %c0_68, %c0_69] : memref<9x16x128xbf16, #tpu.memory_space<vmem>>, vector<1x16x128xbf16>
    %59 = vector.shape_cast %58 : vector<1x16x128xbf16> to vector<16x128xbf16>
    %cst_70 = arith.constant dense<0.000000e+00> : vector<16x128xf32>
    %60 = tpu.matmul %57, %59, %cst_70 {dimension_numbers = #tpu.dot_dimension_numbers<[1], [0], [0], [1], [0, 0, 1, 1], [], []>} : vector<16x16xbf16>, vector<16x128xbf16>, vector<16x128xf32> -> vector<16x128xf32>
    %61 = arith.addf %54, %60 : vector<16x128xf32>
    %c0_71 = arith.constant 0 : index
    %c0_72 = arith.constant 0 : index
    %62 = vector.load %arg3[%c0_71, %c0_72] : memref<1x128xf32, #tpu.memory_space<vmem>>, vector<1x128xf32>
    %63 = vector.broadcast %62 : vector<1x128xf32> to vector<16x128xf32>
    %64 = arith.addf %61, %63 : vector<16x128xf32>
    %cst_73 = arith.constant 0.000000e+00 : f32
    %65 = vector.broadcast %cst_73 : f32 to vector<16x128xf32>
    %66 = arith.maximumf %64, %65 : vector<16x128xf32>
    %67 = vector.shape_cast %66 : vector<16x128xf32> to vector<1x4x4x128xf32>
    %68 = arith.truncf %67 : vector<1x4x4x128xf32> to vector<1x4x4x128xbf16>
    %c0_74 = arith.constant 0 : index
    %c0_75 = arith.constant 0 : index
    %c0_76 = arith.constant 0 : index
    %c0_77 = arith.constant 0 : index
    %69 = vector.load %arg4[%c0_74, %c0_75, %c0_76, %c0_77] : memref<1x4x4x128xbf16, #tpu.memory_space<vmem>>, vector<1x4x4x128xbf16>
    tpu.vector_store %arg4[%c0_74, %c0_75, %c0_76, %c0_77], %68 {strides = array<i32>} : memref<1x4x4x128xbf16, #tpu.memory_space<vmem>>, vector<1x4x4x128xbf16>,
    return
  }
  func.func @transform_0(%arg0: i32) -> (i32, i32, i32, i32, i32) {
    %c0_i32 = arith.constant 0 : i32
    %c0_i32_0 = arith.constant 0 : i32
    %c0_i32_1 = arith.constant 0 : i32
    %c0_i32_2 = arith.constant 0 : i32
    %c0_i32_3 = arith.constant 0 : i32
    return %arg0, %c0_i32, %c0_i32_0, %c0_i32_1, %c0_i32_2 : i32, i32, i32, i32, i32
  }
  func.func @transform_1(%arg0: i32) -> (i32, i32, i32) {
    %c0_i32 = arith.constant 0 : i32
    %c0_i32_0 = arith.constant 0 : i32
    %c0_i32_1 = arith.constant 0 : i32
    %c0_i32_2 = arith.constant 0 : i32
    return %c0_i32, %c0_i32_0, %c0_i32_1 : i32, i32, i32
  }
  func.func @transform_2(%arg0: i32) -> (i32, i32) {
    %c0_i32 = arith.constant 0 : i32
    %c0_i32_0 = arith.constant 0 : i32
    %c0_i32_1 = arith.constant 0 : i32
    return %c0_i32, %c0_i32_0 : i32, i32
  }
  func.func @transform_3(%arg0: i32) -> (i32, i32, i32, i32) {
    %c0_i32 = arith.constant 0 : i32
    %c0_i32_0 = arith.constant 0 : i32
    %c0_i32_1 = arith.constant 0 : i32
    %c0_i32_2 = arith.constant 0 : i32
    return %arg0, %c0_i32, %c0_i32_0, %c0_i32_1 : i32, i32, i32, i32
  }
}

module attributes {stable_mosaic.version = 11 : i64} {
  func.func @kernel(%arg0: i32, %arg1: memref<1x1x6x6x32xbf16, #tpu.memory_space<vmem>>, %arg2: memref<9x32x128xbf16, #tpu.memory_space<vmem>>, %arg3: memref<1x128xf32, #tpu.memory_space<vmem>>, %arg4: memref<1x4x4x128xbf16, #tpu.memory_space<vmem>>) attributes {dimension_semantics = [#tpu.dimension_semantics<parallel>], iteration_bounds = array<i64: 2>, scalar_prefetch = 0 : i64, scratch_operands = 0 : i64, tpu.core_type = #tpu.core_type<tc>, window_params = [{transform_indices = @transform_0, window_bounds = array<i64: 1, 1, 6, 6, 32>}, {pipeline_mode = #tpu.pipeline_mode<synchronous>, transform_indices = @transform_1, window_bounds = array<i64: 9, 32, 128>}, {pipeline_mode = #tpu.pipeline_mode<synchronous>, transform_indices = @transform_2, window_bounds = array<i64: 1, 128>}, {transform_indices = @transform_3, window_bounds = array<i64: 1, 4, 4, 128>}]} {
    %c0 = arith.constant 0 : index
    %c0_0 = arith.constant 0 : index
    %c0_1 = arith.constant 0 : index
    %c0_2 = arith.constant 0 : index
    %c0_3 = arith.constant 0 : index
    %0 = vector.load %arg1[%c0, %c0_0, %c0_1, %c0_2, %c0_3] : memref<1x1x6x6x32xbf16, #tpu.memory_space<vmem>>, vector<1x1x4x4x32xbf16>
    %1 = vector.shape_cast %0 : vector<1x1x4x4x32xbf16> to vector<4x4x32xbf16>
    %2 = vector.shape_cast %1 : vector<4x4x32xbf16> to vector<16x32xbf16>
    %c0_4 = arith.constant 0 : index
    %c0_5 = arith.constant 0 : index
    %c0_6 = arith.constant 0 : index
    %3 = vector.load %arg2[%c0_4, %c0_5, %c0_6] : memref<9x32x128xbf16, #tpu.memory_space<vmem>>, vector<1x32x128xbf16>
    %4 = vector.shape_cast %3 : vector<1x32x128xbf16> to vector<32x128xbf16>
    %cst = arith.constant dense<0.000000e+00> : vector<16x128xf32>
    %5 = tpu.matmul %2, %4, %cst {dimension_numbers = #tpu.dot_dimension_numbers<[1], [0], [0], [1], [0, 0, 1, 1], [], []>} : vector<16x32xbf16>, vector<32x128xbf16>, vector<16x128xf32> -> vector<16x128xf32>
    %c0_7 = arith.constant 0 : index
    %c0_8 = arith.constant 0 : index
    %c0_9 = arith.constant 0 : index
    %c1 = arith.constant 1 : index
    %c0_10 = arith.constant 0 : index
    %6 = vector.load %arg1[%c0_7, %c0_8, %c0_9, %c1, %c0_10] : memref<1x1x6x6x32xbf16, #tpu.memory_space<vmem>>, vector<1x1x4x4x32xbf16>
    %7 = vector.shape_cast %6 : vector<1x1x4x4x32xbf16> to vector<4x4x32xbf16>
    %8 = vector.shape_cast %7 : vector<4x4x32xbf16> to vector<16x32xbf16>
    %c1_11 = arith.constant 1 : index
    %c0_12 = arith.constant 0 : index
    %c0_13 = arith.constant 0 : index
    %9 = vector.load %arg2[%c1_11, %c0_12, %c0_13] : memref<9x32x128xbf16, #tpu.memory_space<vmem>>, vector<1x32x128xbf16>
    %10 = vector.shape_cast %9 : vector<1x32x128xbf16> to vector<32x128xbf16>
    %cst_14 = arith.constant dense<0.000000e+00> : vector<16x128xf32>
    %11 = tpu.matmul %8, %10, %cst_14 {dimension_numbers = #tpu.dot_dimension_numbers<[1], [0], [0], [1], [0, 0, 1, 1], [], []>} : vector<16x32xbf16>, vector<32x128xbf16>, vector<16x128xf32> -> vector<16x128xf32>
    %12 = arith.addf %5, %11 : vector<16x128xf32>
    %c0_15 = arith.constant 0 : index
    %c0_16 = arith.constant 0 : index
    %c0_17 = arith.constant 0 : index
    %c2 = arith.constant 2 : index
    %c0_18 = arith.constant 0 : index
    %13 = vector.load %arg1[%c0_15, %c0_16, %c0_17, %c2, %c0_18] : memref<1x1x6x6x32xbf16, #tpu.memory_space<vmem>>, vector<1x1x4x4x32xbf16>
    %14 = vector.shape_cast %13 : vector<1x1x4x4x32xbf16> to vector<4x4x32xbf16>
    %15 = vector.shape_cast %14 : vector<4x4x32xbf16> to vector<16x32xbf16>
    %c2_19 = arith.constant 2 : index
    %c0_20 = arith.constant 0 : index
    %c0_21 = arith.constant 0 : index
    %16 = vector.load %arg2[%c2_19, %c0_20, %c0_21] : memref<9x32x128xbf16, #tpu.memory_space<vmem>>, vector<1x32x128xbf16>
    %17 = vector.shape_cast %16 : vector<1x32x128xbf16> to vector<32x128xbf16>
    %cst_22 = arith.constant dense<0.000000e+00> : vector<16x128xf32>
    %18 = tpu.matmul %15, %17, %cst_22 {dimension_numbers = #tpu.dot_dimension_numbers<[1], [0], [0], [1], [0, 0, 1, 1], [], []>} : vector<16x32xbf16>, vector<32x128xbf16>, vector<16x128xf32> -> vector<16x128xf32>
    %19 = arith.addf %12, %18 : vector<16x128xf32>
    %c0_23 = arith.constant 0 : index
    %c0_24 = arith.constant 0 : index
    %c1_25 = arith.constant 1 : index
    %c0_26 = arith.constant 0 : index
    %c0_27 = arith.constant 0 : index
    %20 = vector.load %arg1[%c0_23, %c0_24, %c1_25, %c0_26, %c0_27] : memref<1x1x6x6x32xbf16, #tpu.memory_space<vmem>>, vector<1x1x4x4x32xbf16>
    %21 = vector.shape_cast %20 : vector<1x1x4x4x32xbf16> to vector<4x4x32xbf16>
    %22 = vector.shape_cast %21 : vector<4x4x32xbf16> to vector<16x32xbf16>
    %c3 = arith.constant 3 : index
    %c0_28 = arith.constant 0 : index
    %c0_29 = arith.constant 0 : index
    %23 = vector.load %arg2[%c3, %c0_28, %c0_29] : memref<9x32x128xbf16, #tpu.memory_space<vmem>>, vector<1x32x128xbf16>
    %24 = vector.shape_cast %23 : vector<1x32x128xbf16> to vector<32x128xbf16>
    %cst_30 = arith.constant dense<0.000000e+00> : vector<16x128xf32>
    %25 = tpu.matmul %22, %24, %cst_30 {dimension_numbers = #tpu.dot_dimension_numbers<[1], [0], [0], [1], [0, 0, 1, 1], [], []>} : vector<16x32xbf16>, vector<32x128xbf16>, vector<16x128xf32> -> vector<16x128xf32>
    %26 = arith.addf %19, %25 : vector<16x128xf32>
    %c0_31 = arith.constant 0 : index
    %c0_32 = arith.constant 0 : index
    %c1_33 = arith.constant 1 : index
    %c1_34 = arith.constant 1 : index
    %c0_35 = arith.constant 0 : index
    %27 = vector.load %arg1[%c0_31, %c0_32, %c1_33, %c1_34, %c0_35] : memref<1x1x6x6x32xbf16, #tpu.memory_space<vmem>>, vector<1x1x4x4x32xbf16>
    %28 = vector.shape_cast %27 : vector<1x1x4x4x32xbf16> to vector<4x4x32xbf16>
    %29 = vector.shape_cast %28 : vector<4x4x32xbf16> to vector<16x32xbf16>
    %c4 = arith.constant 4 : index
    %c0_36 = arith.constant 0 : index
    %c0_37 = arith.constant 0 : index
    %30 = vector.load %arg2[%c4, %c0_36, %c0_37] : memref<9x32x128xbf16, #tpu.memory_space<vmem>>, vector<1x32x128xbf16>
    %31 = vector.shape_cast %30 : vector<1x32x128xbf16> to vector<32x128xbf16>
    %cst_38 = arith.constant dense<0.000000e+00> : vector<16x128xf32>
    %32 = tpu.matmul %29, %31, %cst_38 {dimension_numbers = #tpu.dot_dimension_numbers<[1], [0], [0], [1], [0, 0, 1, 1], [], []>} : vector<16x32xbf16>, vector<32x128xbf16>, vector<16x128xf32> -> vector<16x128xf32>
    %33 = arith.addf %26, %32 : vector<16x128xf32>
    %c0_39 = arith.constant 0 : index
    %c0_40 = arith.constant 0 : index
    %c1_41 = arith.constant 1 : index
    %c2_42 = arith.constant 2 : index
    %c0_43 = arith.constant 0 : index
    %34 = vector.load %arg1[%c0_39, %c0_40, %c1_41, %c2_42, %c0_43] : memref<1x1x6x6x32xbf16, #tpu.memory_space<vmem>>, vector<1x1x4x4x32xbf16>
    %35 = vector.shape_cast %34 : vector<1x1x4x4x32xbf16> to vector<4x4x32xbf16>
    %36 = vector.shape_cast %35 : vector<4x4x32xbf16> to vector<16x32xbf16>
    %c5 = arith.constant 5 : index
    %c0_44 = arith.constant 0 : index
    %c0_45 = arith.constant 0 : index
    %37 = vector.load %arg2[%c5, %c0_44, %c0_45] : memref<9x32x128xbf16, #tpu.memory_space<vmem>>, vector<1x32x128xbf16>
    %38 = vector.shape_cast %37 : vector<1x32x128xbf16> to vector<32x128xbf16>
    %cst_46 = arith.constant dense<0.000000e+00> : vector<16x128xf32>
    %39 = tpu.matmul %36, %38, %cst_46 {dimension_numbers = #tpu.dot_dimension_numbers<[1], [0], [0], [1], [0, 0, 1, 1], [], []>} : vector<16x32xbf16>, vector<32x128xbf16>, vector<16x128xf32> -> vector<16x128xf32>
    %40 = arith.addf %33, %39 : vector<16x128xf32>
    %c0_47 = arith.constant 0 : index
    %c0_48 = arith.constant 0 : index
    %c2_49 = arith.constant 2 : index
    %c0_50 = arith.constant 0 : index
    %c0_51 = arith.constant 0 : index
    %41 = vector.load %arg1[%c0_47, %c0_48, %c2_49, %c0_50, %c0_51] : memref<1x1x6x6x32xbf16, #tpu.memory_space<vmem>>, vector<1x1x4x4x32xbf16>
    %42 = vector.shape_cast %41 : vector<1x1x4x4x32xbf16> to vector<4x4x32xbf16>
    %43 = vector.shape_cast %42 : vector<4x4x32xbf16> to vector<16x32xbf16>
    %c6 = arith.constant 6 : index
    %c0_52 = arith.constant 0 : index
    %c0_53 = arith.constant 0 : index
    %44 = vector.load %arg2[%c6, %c0_52, %c0_53] : memref<9x32x128xbf16, #tpu.memory_space<vmem>>, vector<1x32x128xbf16>
    %45 = vector.shape_cast %44 : vector<1x32x128xbf16> to vector<32x128xbf16>
    %cst_54 = arith.constant dense<0.000000e+00> : vector<16x128xf32>
    %46 = tpu.matmul %43, %45, %cst_54 {dimension_numbers = #tpu.dot_dimension_numbers<[1], [0], [0], [1], [0, 0, 1, 1], [], []>} : vector<16x32xbf16>, vector<32x128xbf16>, vector<16x128xf32> -> vector<16x128xf32>
    %47 = arith.addf %40, %46 : vector<16x128xf32>
    %c0_55 = arith.constant 0 : index
    %c0_56 = arith.constant 0 : index
    %c2_57 = arith.constant 2 : index
    %c1_58 = arith.constant 1 : index
    %c0_59 = arith.constant 0 : index
    %48 = vector.load %arg1[%c0_55, %c0_56, %c2_57, %c1_58, %c0_59] : memref<1x1x6x6x32xbf16, #tpu.memory_space<vmem>>, vector<1x1x4x4x32xbf16>
    %49 = vector.shape_cast %48 : vector<1x1x4x4x32xbf16> to vector<4x4x32xbf16>
    %50 = vector.shape_cast %49 : vector<4x4x32xbf16> to vector<16x32xbf16>
    %c7 = arith.constant 7 : index
    %c0_60 = arith.constant 0 : index
    %c0_61 = arith.constant 0 : index
    %51 = vector.load %arg2[%c7, %c0_60, %c0_61] : memref<9x32x128xbf16, #tpu.memory_space<vmem>>, vector<1x32x128xbf16>
    %52 = vector.shape_cast %51 : vector<1x32x128xbf16> to vector<32x128xbf16>
    %cst_62 = arith.constant dense<0.000000e+00> : vector<16x128xf32>
    %53 = tpu.matmul %50, %52, %cst_62 {dimension_numbers = #tpu.dot_dimension_numbers<[1], [0], [0], [1], [0, 0, 1, 1], [], []>} : vector<16x32xbf16>, vector<32x128xbf16>, vector<16x128xf32> -> vector<16x128xf32>
    %54 = arith.addf %47, %53 : vector<16x128xf32>
    %c0_63 = arith.constant 0 : index
    %c0_64 = arith.constant 0 : index
    %c2_65 = arith.constant 2 : index
    %c2_66 = arith.constant 2 : index
    %c0_67 = arith.constant 0 : index
    %55 = vector.load %arg1[%c0_63, %c0_64, %c2_65, %c2_66, %c0_67] : memref<1x1x6x6x32xbf16, #tpu.memory_space<vmem>>, vector<1x1x4x4x32xbf16>
    %56 = vector.shape_cast %55 : vector<1x1x4x4x32xbf16> to vector<4x4x32xbf16>
    %57 = vector.shape_cast %56 : vector<4x4x32xbf16> to vector<16x32xbf16>
    %c8 = arith.constant 8 : index
    %c0_68 = arith.constant 0 : index
    %c0_69 = arith.constant 0 : index
    %58 = vector.load %arg2[%c8, %c0_68, %c0_69] : memref<9x32x128xbf16, #tpu.memory_space<vmem>>, vector<1x32x128xbf16>
    %59 = vector.shape_cast %58 : vector<1x32x128xbf16> to vector<32x128xbf16>
    %cst_70 = arith.constant dense<0.000000e+00> : vector<16x128xf32>
    %60 = tpu.matmul %57, %59, %cst_70 {dimension_numbers = #tpu.dot_dimension_numbers<[1], [0], [0], [1], [0, 0, 1, 1], [], []>} : vector<16x32xbf16>, vector<32x128xbf16>, vector<16x128xf32> -> vector<16x128xf32>
    %61 = arith.addf %54, %60 : vector<16x128xf32>
    %c0_71 = arith.constant 0 : index
    %c0_72 = arith.constant 0 : index
    %62 = vector.load %arg3[%c0_71, %c0_72] : memref<1x128xf32, #tpu.memory_space<vmem>>, vector<1x128xf32>
    %63 = vector.broadcast %62 : vector<1x128xf32> to vector<16x128xf32>
    %64 = arith.addf %61, %63 : vector<16x128xf32>
    %cst_73 = arith.constant 0.000000e+00 : f32
    %65 = vector.broadcast %cst_73 : f32 to vector<16x128xf32>
    %66 = arith.maximumf %64, %65 : vector<16x128xf32>
    %67 = vector.shape_cast %66 : vector<16x128xf32> to vector<1x4x4x128xf32>
    %68 = arith.truncf %67 : vector<1x4x4x128xf32> to vector<1x4x4x128xbf16>
    %c0_74 = arith.constant 0 : index
    %c0_75 = arith.constant 0 : index
    %c0_76 = arith.constant 0 : index
    %c0_77 = arith.constant 0 : index
    %69 = vector.load %arg4[%c0_74, %c0_75, %c0_76, %c0_77] : memref<1x4x4x128xbf16, #tpu.memory_space<vmem>>, vector<1x4x4x128xbf16>
    tpu.vector_store %arg4[%c0_74, %c0_75, %c0_76, %c0_77], %68 {strides = array<i32>} : memref<1x4x4x128xbf16, #tpu.memory_space<vmem>>, vector<1x4x4x128xbf16>,
    return
  }
  func.func @transform_0(%arg0: i32) -> (i32, i32, i32, i32, i32) {
    %c0_i32 = arith.constant 0 : i32
    %c0_i32_0 = arith.constant 0 : i32
    %c0_i32_1 = arith.constant 0 : i32
    %c0_i32_2 = arith.constant 0 : i32
    %c0_i32_3 = arith.constant 0 : i32
    return %arg0, %c0_i32, %c0_i32_0, %c0_i32_1, %c0_i32_2 : i32, i32, i32, i32, i32
  }
  func.func @transform_1(%arg0: i32) -> (i32, i32, i32) {
    %c0_i32 = arith.constant 0 : i32
    %c0_i32_0 = arith.constant 0 : i32
    %c0_i32_1 = arith.constant 0 : i32
    %c0_i32_2 = arith.constant 0 : i32
    return %c0_i32, %c0_i32_0, %c0_i32_1 : i32, i32, i32
  }
  func.func @transform_2(%arg0: i32) -> (i32, i32) {
    %c0_i32 = arith.constant 0 : i32
    %c0_i32_0 = arith.constant 0 : i32
    %c0_i32_1 = arith.constant 0 : i32
    return %c0_i32, %c0_i32_0 : i32, i32
  }
  func.func @transform_3(%arg0: i32) -> (i32, i32, i32, i32) {
    %c0_i32 = arith.constant 0 : i32
    %c0_i32_0 = arith.constant 0 : i32
    %c0_i32_1 = arith.constant 0 : i32
    %c0_i32_2 = arith.constant 0 : i32
    return %arg0, %c0_i32, %c0_i32_0, %c0_i32_1 : i32, i32, i32, i32
  }
}

module attributes {stable_mosaic.version = 11 : i64} {
  func.func @kernel(%arg0: i32, %arg1: memref<1x4x3x3x32xbf16, #tpu.memory_space<vmem>>, %arg2: memref<9x32x128xbf16, #tpu.memory_space<vmem>>, %arg3: memref<1x128xf32, #tpu.memory_space<vmem>>, %arg4: memref<1x2x2x128xbf16, #tpu.memory_space<vmem>>) attributes {dimension_semantics = [#tpu.dimension_semantics<parallel>], iteration_bounds = array<i64: 2>, scalar_prefetch = 0 : i64, scratch_operands = 0 : i64, tpu.core_type = #tpu.core_type<tc>, window_params = [{transform_indices = @transform_0, window_bounds = array<i64: 1, 4, 3, 3, 32>}, {pipeline_mode = #tpu.pipeline_mode<synchronous>, transform_indices = @transform_1, window_bounds = array<i64: 9, 32, 128>}, {pipeline_mode = #tpu.pipeline_mode<synchronous>, transform_indices = @transform_2, window_bounds = array<i64: 1, 128>}, {transform_indices = @transform_3, window_bounds = array<i64: 1, 2, 2, 128>}]} {
    %c0 = arith.constant 0 : index
    %c0_0 = arith.constant 0 : index
    %c0_1 = arith.constant 0 : index
    %c0_2 = arith.constant 0 : index
    %c0_3 = arith.constant 0 : index
    %0 = vector.load %arg1[%c0, %c0_0, %c0_1, %c0_2, %c0_3] : memref<1x4x3x3x32xbf16, #tpu.memory_space<vmem>>, vector<1x1x2x2x32xbf16>
    %1 = vector.shape_cast %0 : vector<1x1x2x2x32xbf16> to vector<2x2x32xbf16>
    %2 = vector.shape_cast %1 : vector<2x2x32xbf16> to vector<4x32xbf16>
    %c0_4 = arith.constant 0 : index
    %c0_5 = arith.constant 0 : index
    %c0_6 = arith.constant 0 : index
    %3 = vector.load %arg2[%c0_4, %c0_5, %c0_6] : memref<9x32x128xbf16, #tpu.memory_space<vmem>>, vector<1x32x128xbf16>
    %4 = vector.shape_cast %3 : vector<1x32x128xbf16> to vector<32x128xbf16>
    %cst = arith.constant dense<0.000000e+00> : vector<4x128xf32>
    %5 = tpu.matmul %2, %4, %cst {dimension_numbers = #tpu.dot_dimension_numbers<[1], [0], [0], [1], [0, 0, 1, 1], [], []>} : vector<4x32xbf16>, vector<32x128xbf16>, vector<4x128xf32> -> vector<4x128xf32>
    %c0_7 = arith.constant 0 : index
    %c1 = arith.constant 1 : index
    %c0_8 = arith.constant 0 : index
    %c0_9 = arith.constant 0 : index
    %c0_10 = arith.constant 0 : index
    %6 = vector.load %arg1[%c0_7, %c1, %c0_8, %c0_9, %c0_10] : memref<1x4x3x3x32xbf16, #tpu.memory_space<vmem>>, vector<1x1x2x2x32xbf16>
    %7 = vector.shape_cast %6 : vector<1x1x2x2x32xbf16> to vector<2x2x32xbf16>
    %8 = vector.shape_cast %7 : vector<2x2x32xbf16> to vector<4x32xbf16>
    %c1_11 = arith.constant 1 : index
    %c0_12 = arith.constant 0 : index
    %c0_13 = arith.constant 0 : index
    %9 = vector.load %arg2[%c1_11, %c0_12, %c0_13] : memref<9x32x128xbf16, #tpu.memory_space<vmem>>, vector<1x32x128xbf16>
    %10 = vector.shape_cast %9 : vector<1x32x128xbf16> to vector<32x128xbf16>
    %cst_14 = arith.constant dense<0.000000e+00> : vector<4x128xf32>
    %11 = tpu.matmul %8, %10, %cst_14 {dimension_numbers = #tpu.dot_dimension_numbers<[1], [0], [0], [1], [0, 0, 1, 1], [], []>} : vector<4x32xbf16>, vector<32x128xbf16>, vector<4x128xf32> -> vector<4x128xf32>
    %12 = arith.addf %5, %11 : vector<4x128xf32>
    %c0_15 = arith.constant 0 : index
    %c0_16 = arith.constant 0 : index
    %c0_17 = arith.constant 0 : index
    %c1_18 = arith.constant 1 : index
    %c0_19 = arith.constant 0 : index
    %13 = vector.load %arg1[%c0_15, %c0_16, %c0_17, %c1_18, %c0_19] : memref<1x4x3x3x32xbf16, #tpu.memory_space<vmem>>, vector<1x1x2x2x32xbf16>
    %14 = vector.shape_cast %13 : vector<1x1x2x2x32xbf16> to vector<2x2x32xbf16>
    %15 = vector.shape_cast %14 : vector<2x2x32xbf16> to vector<4x32xbf16>
    %c2 = arith.constant 2 : index
    %c0_20 = arith.constant 0 : index
    %c0_21 = arith.constant 0 : index
    %16 = vector.load %arg2[%c2, %c0_20, %c0_21] : memref<9x32x128xbf16, #tpu.memory_space<vmem>>, vector<1x32x128xbf16>
    %17 = vector.shape_cast %16 : vector<1x32x128xbf16> to vector<32x128xbf16>
    %cst_22 = arith.constant dense<0.000000e+00> : vector<4x128xf32>
    %18 = tpu.matmul %15, %17, %cst_22 {dimension_numbers = #tpu.dot_dimension_numbers<[1], [0], [0], [1], [0, 0, 1, 1], [], []>} : vector<4x32xbf16>, vector<32x128xbf16>, vector<4x128xf32> -> vector<4x128xf32>
    %19 = arith.addf %12, %18 : vector<4x128xf32>
    %c0_23 = arith.constant 0 : index
    %c2_24 = arith.constant 2 : index
    %c0_25 = arith.constant 0 : index
    %c0_26 = arith.constant 0 : index
    %c0_27 = arith.constant 0 : index
    %20 = vector.load %arg1[%c0_23, %c2_24, %c0_25, %c0_26, %c0_27] : memref<1x4x3x3x32xbf16, #tpu.memory_space<vmem>>, vector<1x1x2x2x32xbf16>
    %21 = vector.shape_cast %20 : vector<1x1x2x2x32xbf16> to vector<2x2x32xbf16>
    %22 = vector.shape_cast %21 : vector<2x2x32xbf16> to vector<4x32xbf16>
    %c3 = arith.constant 3 : index
    %c0_28 = arith.constant 0 : index
    %c0_29 = arith.constant 0 : index
    %23 = vector.load %arg2[%c3, %c0_28, %c0_29] : memref<9x32x128xbf16, #tpu.memory_space<vmem>>, vector<1x32x128xbf16>
    %24 = vector.shape_cast %23 : vector<1x32x128xbf16> to vector<32x128xbf16>
    %cst_30 = arith.constant dense<0.000000e+00> : vector<4x128xf32>
    %25 = tpu.matmul %22, %24, %cst_30 {dimension_numbers = #tpu.dot_dimension_numbers<[1], [0], [0], [1], [0, 0, 1, 1], [], []>} : vector<4x32xbf16>, vector<32x128xbf16>, vector<4x128xf32> -> vector<4x128xf32>
    %26 = arith.addf %19, %25 : vector<4x128xf32>
    %c0_31 = arith.constant 0 : index
    %c3_32 = arith.constant 3 : index
    %c0_33 = arith.constant 0 : index
    %c0_34 = arith.constant 0 : index
    %c0_35 = arith.constant 0 : index
    %27 = vector.load %arg1[%c0_31, %c3_32, %c0_33, %c0_34, %c0_35] : memref<1x4x3x3x32xbf16, #tpu.memory_space<vmem>>, vector<1x1x2x2x32xbf16>
    %28 = vector.shape_cast %27 : vector<1x1x2x2x32xbf16> to vector<2x2x32xbf16>
    %29 = vector.shape_cast %28 : vector<2x2x32xbf16> to vector<4x32xbf16>
    %c4 = arith.constant 4 : index
    %c0_36 = arith.constant 0 : index
    %c0_37 = arith.constant 0 : index
    %30 = vector.load %arg2[%c4, %c0_36, %c0_37] : memref<9x32x128xbf16, #tpu.memory_space<vmem>>, vector<1x32x128xbf16>
    %31 = vector.shape_cast %30 : vector<1x32x128xbf16> to vector<32x128xbf16>
    %cst_38 = arith.constant dense<0.000000e+00> : vector<4x128xf32>
    %32 = tpu.matmul %29, %31, %cst_38 {dimension_numbers = #tpu.dot_dimension_numbers<[1], [0], [0], [1], [0, 0, 1, 1], [], []>} : vector<4x32xbf16>, vector<32x128xbf16>, vector<4x128xf32> -> vector<4x128xf32>
    %33 = arith.addf %26, %32 : vector<4x128xf32>
    %c0_39 = arith.constant 0 : index
    %c2_40 = arith.constant 2 : index
    %c0_41 = arith.constant 0 : index
    %c1_42 = arith.constant 1 : index
    %c0_43 = arith.constant 0 : index
    %34 = vector.load %arg1[%c0_39, %c2_40, %c0_41, %c1_42, %c0_43] : memref<1x4x3x3x32xbf16, #tpu.memory_space<vmem>>, vector<1x1x2x2x32xbf16>
    %35 = vector.shape_cast %34 : vector<1x1x2x2x32xbf16> to vector<2x2x32xbf16>
    %36 = vector.shape_cast %35 : vector<2x2x32xbf16> to vector<4x32xbf16>
    %c5 = arith.constant 5 : index
    %c0_44 = arith.constant 0 : index
    %c0_45 = arith.constant 0 : index
    %37 = vector.load %arg2[%c5, %c0_44, %c0_45] : memref<9x32x128xbf16, #tpu.memory_space<vmem>>, vector<1x32x128xbf16>
    %38 = vector.shape_cast %37 : vector<1x32x128xbf16> to vector<32x128xbf16>
    %cst_46 = arith.constant dense<0.000000e+00> : vector<4x128xf32>
    %39 = tpu.matmul %36, %38, %cst_46 {dimension_numbers = #tpu.dot_dimension_numbers<[1], [0], [0], [1], [0, 0, 1, 1], [], []>} : vector<4x32xbf16>, vector<32x128xbf16>, vector<4x128xf32> -> vector<4x128xf32>
    %40 = arith.addf %33, %39 : vector<4x128xf32>
    %c0_47 = arith.constant 0 : index
    %c0_48 = arith.constant 0 : index
    %c1_49 = arith.constant 1 : index
    %c0_50 = arith.constant 0 : index
    %c0_51 = arith.constant 0 : index
    %41 = vector.load %arg1[%c0_47, %c0_48, %c1_49, %c0_50, %c0_51] : memref<1x4x3x3x32xbf16, #tpu.memory_space<vmem>>, vector<1x1x2x2x32xbf16>
    %42 = vector.shape_cast %41 : vector<1x1x2x2x32xbf16> to vector<2x2x32xbf16>
    %43 = vector.shape_cast %42 : vector<2x2x32xbf16> to vector<4x32xbf16>
    %c6 = arith.constant 6 : index
    %c0_52 = arith.constant 0 : index
    %c0_53 = arith.constant 0 : index
    %44 = vector.load %arg2[%c6, %c0_52, %c0_53] : memref<9x32x128xbf16, #tpu.memory_space<vmem>>, vector<1x32x128xbf16>
    %45 = vector.shape_cast %44 : vector<1x32x128xbf16> to vector<32x128xbf16>
    %cst_54 = arith.constant dense<0.000000e+00> : vector<4x128xf32>
    %46 = tpu.matmul %43, %45, %cst_54 {dimension_numbers = #tpu.dot_dimension_numbers<[1], [0], [0], [1], [0, 0, 1, 1], [], []>} : vector<4x32xbf16>, vector<32x128xbf16>, vector<4x128xf32> -> vector<4x128xf32>
    %47 = arith.addf %40, %46 : vector<4x128xf32>
    %c0_55 = arith.constant 0 : index
    %c1_56 = arith.constant 1 : index
    %c1_57 = arith.constant 1 : index
    %c0_58 = arith.constant 0 : index
    %c0_59 = arith.constant 0 : index
    %48 = vector.load %arg1[%c0_55, %c1_56, %c1_57, %c0_58, %c0_59] : memref<1x4x3x3x32xbf16, #tpu.memory_space<vmem>>, vector<1x1x2x2x32xbf16>
    %49 = vector.shape_cast %48 : vector<1x1x2x2x32xbf16> to vector<2x2x32xbf16>
    %50 = vector.shape_cast %49 : vector<2x2x32xbf16> to vector<4x32xbf16>
    %c7 = arith.constant 7 : index
    %c0_60 = arith.constant 0 : index
    %c0_61 = arith.constant 0 : index
    %51 = vector.load %arg2[%c7, %c0_60, %c0_61] : memref<9x32x128xbf16, #tpu.memory_space<vmem>>, vector<1x32x128xbf16>
    %52 = vector.shape_cast %51 : vector<1x32x128xbf16> to vector<32x128xbf16>
    %cst_62 = arith.constant dense<0.000000e+00> : vector<4x128xf32>
    %53 = tpu.matmul %50, %52, %cst_62 {dimension_numbers = #tpu.dot_dimension_numbers<[1], [0], [0], [1], [0, 0, 1, 1], [], []>} : vector<4x32xbf16>, vector<32x128xbf16>, vector<4x128xf32> -> vector<4x128xf32>
    %54 = arith.addf %47, %53 : vector<4x128xf32>
    %c0_63 = arith.constant 0 : index
    %c0_64 = arith.constant 0 : index
    %c1_65 = arith.constant 1 : index
    %c1_66 = arith.constant 1 : index
    %c0_67 = arith.constant 0 : index
    %55 = vector.load %arg1[%c0_63, %c0_64, %c1_65, %c1_66, %c0_67] : memref<1x4x3x3x32xbf16, #tpu.memory_space<vmem>>, vector<1x1x2x2x32xbf16>
    %56 = vector.shape_cast %55 : vector<1x1x2x2x32xbf16> to vector<2x2x32xbf16>
    %57 = vector.shape_cast %56 : vector<2x2x32xbf16> to vector<4x32xbf16>
    %c8 = arith.constant 8 : index
    %c0_68 = arith.constant 0 : index
    %c0_69 = arith.constant 0 : index
    %58 = vector.load %arg2[%c8, %c0_68, %c0_69] : memref<9x32x128xbf16, #tpu.memory_space<vmem>>, vector<1x32x128xbf16>
    %59 = vector.shape_cast %58 : vector<1x32x128xbf16> to vector<32x128xbf16>
    %cst_70 = arith.constant dense<0.000000e+00> : vector<4x128xf32>
    %60 = tpu.matmul %57, %59, %cst_70 {dimension_numbers = #tpu.dot_dimension_numbers<[1], [0], [0], [1], [0, 0, 1, 1], [], []>} : vector<4x32xbf16>, vector<32x128xbf16>, vector<4x128xf32> -> vector<4x128xf32>
    %61 = arith.addf %54, %60 : vector<4x128xf32>
    %c0_71 = arith.constant 0 : index
    %c0_72 = arith.constant 0 : index
    %62 = vector.load %arg3[%c0_71, %c0_72] : memref<1x128xf32, #tpu.memory_space<vmem>>, vector<1x128xf32>
    %63 = vector.broadcast %62 : vector<1x128xf32> to vector<4x128xf32>
    %64 = arith.addf %61, %63 : vector<4x128xf32>
    %cst_73 = arith.constant 0.000000e+00 : f32
    %65 = vector.broadcast %cst_73 : f32 to vector<4x128xf32>
    %66 = arith.maximumf %64, %65 : vector<4x128xf32>
    %67 = vector.shape_cast %66 : vector<4x128xf32> to vector<1x2x2x128xf32>
    %68 = arith.truncf %67 : vector<1x2x2x128xf32> to vector<1x2x2x128xbf16>
    %c0_74 = arith.constant 0 : index
    %c0_75 = arith.constant 0 : index
    %c0_76 = arith.constant 0 : index
    %c0_77 = arith.constant 0 : index
    %69 = vector.load %arg4[%c0_74, %c0_75, %c0_76, %c0_77] : memref<1x2x2x128xbf16, #tpu.memory_space<vmem>>, vector<1x2x2x128xbf16>
    tpu.vector_store %arg4[%c0_74, %c0_75, %c0_76, %c0_77], %68 {strides = array<i32>} : memref<1x2x2x128xbf16, #tpu.memory_space<vmem>>, vector<1x2x2x128xbf16>,
    return
  }
  func.func @transform_0(%arg0: i32) -> (i32, i32, i32, i32, i32) {
    %c0_i32 = arith.constant 0 : i32
    %c0_i32_0 = arith.constant 0 : i32
    %c0_i32_1 = arith.constant 0 : i32
    %c0_i32_2 = arith.constant 0 : i32
    %c0_i32_3 = arith.constant 0 : i32
    return %arg0, %c0_i32, %c0_i32_0, %c0_i32_1, %c0_i32_2 : i32, i32, i32, i32, i32
  }
  func.func @transform_1(%arg0: i32) -> (i32, i32, i32) {
    %c0_i32 = arith.constant 0 : i32
    %c0_i32_0 = arith.constant 0 : i32
    %c0_i32_1 = arith.constant 0 : i32
    %c0_i32_2 = arith.constant 0 : i32
    return %c0_i32, %c0_i32_0, %c0_i32_1 : i32, i32, i32
  }
  func.func @transform_2(%arg0: i32) -> (i32, i32) {
    %c0_i32 = arith.constant 0 : i32
    %c0_i32_0 = arith.constant 0 : i32
    %c0_i32_1 = arith.constant 0 : i32
    return %c0_i32, %c0_i32_0 : i32, i32
  }
  func.func @transform_3(%arg0: i32) -> (i32, i32, i32, i32) {
    %c0_i32 = arith.constant 0 : i32
    %c0_i32_0 = arith.constant 0 : i32
    %c0_i32_1 = arith.constant 0 : i32
    %c0_i32_2 = arith.constant 0 : i32
    return %arg0, %c0_i32, %c0_i32_0, %c0_i32_1 : i32, i32, i32, i32
  }
}

module attributes {stable_mosaic.version = 11 : i64} {
  func.func @kernel(%arg0: i32, %arg1: memref<1x4x2x2x64xbf16, #tpu.memory_space<vmem>>, %arg2: memref<9x64x128xbf16, #tpu.memory_space<vmem>>, %arg3: memref<1x128xf32, #tpu.memory_space<vmem>>, %arg4: memref<1x1x128xf32, #tpu.memory_space<vmem>>) attributes {dimension_semantics = [#tpu.dimension_semantics<parallel>], iteration_bounds = array<i64: 2>, scalar_prefetch = 0 : i64, scratch_operands = 0 : i64, tpu.core_type = #tpu.core_type<tc>, window_params = [{transform_indices = @transform_0, window_bounds = array<i64: 1, 4, 2, 2, 64>}, {pipeline_mode = #tpu.pipeline_mode<synchronous>, transform_indices = @transform_1, window_bounds = array<i64: 9, 64, 128>}, {pipeline_mode = #tpu.pipeline_mode<synchronous>, transform_indices = @transform_2, window_bounds = array<i64: 1, 128>}, {transform_indices = @transform_3, window_bounds = array<i64: 1, 1, 128>}]} {
    %c0 = arith.constant 0 : index
    %c0_0 = arith.constant 0 : index
    %c0_1 = arith.constant 0 : index
    %c0_2 = arith.constant 0 : index
    %c0_3 = arith.constant 0 : index
    %0 = vector.load %arg1[%c0, %c0_0, %c0_1, %c0_2, %c0_3] : memref<1x4x2x2x64xbf16, #tpu.memory_space<vmem>>, vector<1x1x1x1x64xbf16>
    %1 = vector.shape_cast %0 : vector<1x1x1x1x64xbf16> to vector<1x1x64xbf16>
    %2 = vector.shape_cast %1 : vector<1x1x64xbf16> to vector<1x64xbf16>
    %c0_4 = arith.constant 0 : index
    %c0_5 = arith.constant 0 : index
    %c0_6 = arith.constant 0 : index
    %3 = vector.load %arg2[%c0_4, %c0_5, %c0_6] : memref<9x64x128xbf16, #tpu.memory_space<vmem>>, vector<1x64x128xbf16>
    %4 = vector.shape_cast %3 : vector<1x64x128xbf16> to vector<64x128xbf16>
    %cst = arith.constant dense<0.000000e+00> : vector<1x128xf32>
    %5 = tpu.matmul %2, %4, %cst {dimension_numbers = #tpu.dot_dimension_numbers<[1], [0], [0], [1], [0, 0, 1, 1], [], []>} : vector<1x64xbf16>, vector<64x128xbf16>, vector<1x128xf32> -> vector<1x128xf32>
    %c0_7 = arith.constant 0 : index
    %c1 = arith.constant 1 : index
    %c0_8 = arith.constant 0 : index
    %c0_9 = arith.constant 0 : index
    %c0_10 = arith.constant 0 : index
    %6 = vector.load %arg1[%c0_7, %c1, %c0_8, %c0_9, %c0_10] : memref<1x4x2x2x64xbf16, #tpu.memory_space<vmem>>, vector<1x1x1x1x64xbf16>
    %7 = vector.shape_cast %6 : vector<1x1x1x1x64xbf16> to vector<1x1x64xbf16>
    %8 = vector.shape_cast %7 : vector<1x1x64xbf16> to vector<1x64xbf16>
    %c1_11 = arith.constant 1 : index
    %c0_12 = arith.constant 0 : index
    %c0_13 = arith.constant 0 : index
    %9 = vector.load %arg2[%c1_11, %c0_12, %c0_13] : memref<9x64x128xbf16, #tpu.memory_space<vmem>>, vector<1x64x128xbf16>
    %10 = vector.shape_cast %9 : vector<1x64x128xbf16> to vector<64x128xbf16>
    %cst_14 = arith.constant dense<0.000000e+00> : vector<1x128xf32>
    %11 = tpu.matmul %8, %10, %cst_14 {dimension_numbers = #tpu.dot_dimension_numbers<[1], [0], [0], [1], [0, 0, 1, 1], [], []>} : vector<1x64xbf16>, vector<64x128xbf16>, vector<1x128xf32> -> vector<1x128xf32>
    %12 = arith.addf %5, %11 : vector<1x128xf32>
    %c0_15 = arith.constant 0 : index
    %c0_16 = arith.constant 0 : index
    %c0_17 = arith.constant 0 : index
    %c1_18 = arith.constant 1 : index
    %c0_19 = arith.constant 0 : index
    %13 = vector.load %arg1[%c0_15, %c0_16, %c0_17, %c1_18, %c0_19] : memref<1x4x2x2x64xbf16, #tpu.memory_space<vmem>>, vector<1x1x1x1x64xbf16>
    %14 = vector.shape_cast %13 : vector<1x1x1x1x64xbf16> to vector<1x1x64xbf16>
    %15 = vector.shape_cast %14 : vector<1x1x64xbf16> to vector<1x64xbf16>
    %c2 = arith.constant 2 : index
    %c0_20 = arith.constant 0 : index
    %c0_21 = arith.constant 0 : index
    %16 = vector.load %arg2[%c2, %c0_20, %c0_21] : memref<9x64x128xbf16, #tpu.memory_space<vmem>>, vector<1x64x128xbf16>
    %17 = vector.shape_cast %16 : vector<1x64x128xbf16> to vector<64x128xbf16>
    %cst_22 = arith.constant dense<0.000000e+00> : vector<1x128xf32>
    %18 = tpu.matmul %15, %17, %cst_22 {dimension_numbers = #tpu.dot_dimension_numbers<[1], [0], [0], [1], [0, 0, 1, 1], [], []>} : vector<1x64xbf16>, vector<64x128xbf16>, vector<1x128xf32> -> vector<1x128xf32>
    %19 = arith.addf %12, %18 : vector<1x128xf32>
    %c0_23 = arith.constant 0 : index
    %c2_24 = arith.constant 2 : index
    %c0_25 = arith.constant 0 : index
    %c0_26 = arith.constant 0 : index
    %c0_27 = arith.constant 0 : index
    %20 = vector.load %arg1[%c0_23, %c2_24, %c0_25, %c0_26, %c0_27] : memref<1x4x2x2x64xbf16, #tpu.memory_space<vmem>>, vector<1x1x1x1x64xbf16>
    %21 = vector.shape_cast %20 : vector<1x1x1x1x64xbf16> to vector<1x1x64xbf16>
    %22 = vector.shape_cast %21 : vector<1x1x64xbf16> to vector<1x64xbf16>
    %c3 = arith.constant 3 : index
    %c0_28 = arith.constant 0 : index
    %c0_29 = arith.constant 0 : index
    %23 = vector.load %arg2[%c3, %c0_28, %c0_29] : memref<9x64x128xbf16, #tpu.memory_space<vmem>>, vector<1x64x128xbf16>
    %24 = vector.shape_cast %23 : vector<1x64x128xbf16> to vector<64x128xbf16>
    %cst_30 = arith.constant dense<0.000000e+00> : vector<1x128xf32>
    %25 = tpu.matmul %22, %24, %cst_30 {dimension_numbers = #tpu.dot_dimension_numbers<[1], [0], [0], [1], [0, 0, 1, 1], [], []>} : vector<1x64xbf16>, vector<64x128xbf16>, vector<1x128xf32> -> vector<1x128xf32>
    %26 = arith.addf %19, %25 : vector<1x128xf32>
    %c0_31 = arith.constant 0 : index
    %c3_32 = arith.constant 3 : index
    %c0_33 = arith.constant 0 : index
    %c0_34 = arith.constant 0 : index
    %c0_35 = arith.constant 0 : index
    %27 = vector.load %arg1[%c0_31, %c3_32, %c0_33, %c0_34, %c0_35] : memref<1x4x2x2x64xbf16, #tpu.memory_space<vmem>>, vector<1x1x1x1x64xbf16>
    %28 = vector.shape_cast %27 : vector<1x1x1x1x64xbf16> to vector<1x1x64xbf16>
    %29 = vector.shape_cast %28 : vector<1x1x64xbf16> to vector<1x64xbf16>
    %c4 = arith.constant 4 : index
    %c0_36 = arith.constant 0 : index
    %c0_37 = arith.constant 0 : index
    %30 = vector.load %arg2[%c4, %c0_36, %c0_37] : memref<9x64x128xbf16, #tpu.memory_space<vmem>>, vector<1x64x128xbf16>
    %31 = vector.shape_cast %30 : vector<1x64x128xbf16> to vector<64x128xbf16>
    %cst_38 = arith.constant dense<0.000000e+00> : vector<1x128xf32>
    %32 = tpu.matmul %29, %31, %cst_38 {dimension_numbers = #tpu.dot_dimension_numbers<[1], [0], [0], [1], [0, 0, 1, 1], [], []>} : vector<1x64xbf16>, vector<64x128xbf16>, vector<1x128xf32> -> vector<1x128xf32>
    %33 = arith.addf %26, %32 : vector<1x128xf32>
    %c0_39 = arith.constant 0 : index
    %c2_40 = arith.constant 2 : index
    %c0_41 = arith.constant 0 : index
    %c1_42 = arith.constant 1 : index
    %c0_43 = arith.constant 0 : index
    %34 = vector.load %arg1[%c0_39, %c2_40, %c0_41, %c1_42, %c0_43] : memref<1x4x2x2x64xbf16, #tpu.memory_space<vmem>>, vector<1x1x1x1x64xbf16>
    %35 = vector.shape_cast %34 : vector<1x1x1x1x64xbf16> to vector<1x1x64xbf16>
    %36 = vector.shape_cast %35 : vector<1x1x64xbf16> to vector<1x64xbf16>
    %c5 = arith.constant 5 : index
    %c0_44 = arith.constant 0 : index
    %c0_45 = arith.constant 0 : index
    %37 = vector.load %arg2[%c5, %c0_44, %c0_45] : memref<9x64x128xbf16, #tpu.memory_space<vmem>>, vector<1x64x128xbf16>
    %38 = vector.shape_cast %37 : vector<1x64x128xbf16> to vector<64x128xbf16>
    %cst_46 = arith.constant dense<0.000000e+00> : vector<1x128xf32>
    %39 = tpu.matmul %36, %38, %cst_46 {dimension_numbers = #tpu.dot_dimension_numbers<[1], [0], [0], [1], [0, 0, 1, 1], [], []>} : vector<1x64xbf16>, vector<64x128xbf16>, vector<1x128xf32> -> vector<1x128xf32>
    %40 = arith.addf %33, %39 : vector<1x128xf32>
    %c0_47 = arith.constant 0 : index
    %c0_48 = arith.constant 0 : index
    %c1_49 = arith.constant 1 : index
    %c0_50 = arith.constant 0 : index
    %c0_51 = arith.constant 0 : index
    %41 = vector.load %arg1[%c0_47, %c0_48, %c1_49, %c0_50, %c0_51] : memref<1x4x2x2x64xbf16, #tpu.memory_space<vmem>>, vector<1x1x1x1x64xbf16>
    %42 = vector.shape_cast %41 : vector<1x1x1x1x64xbf16> to vector<1x1x64xbf16>
    %43 = vector.shape_cast %42 : vector<1x1x64xbf16> to vector<1x64xbf16>
    %c6 = arith.constant 6 : index
    %c0_52 = arith.constant 0 : index
    %c0_53 = arith.constant 0 : index
    %44 = vector.load %arg2[%c6, %c0_52, %c0_53] : memref<9x64x128xbf16, #tpu.memory_space<vmem>>, vector<1x64x128xbf16>
    %45 = vector.shape_cast %44 : vector<1x64x128xbf16> to vector<64x128xbf16>
    %cst_54 = arith.constant dense<0.000000e+00> : vector<1x128xf32>
    %46 = tpu.matmul %43, %45, %cst_54 {dimension_numbers = #tpu.dot_dimension_numbers<[1], [0], [0], [1], [0, 0, 1, 1], [], []>} : vector<1x64xbf16>, vector<64x128xbf16>, vector<1x128xf32> -> vector<1x128xf32>
    %47 = arith.addf %40, %46 : vector<1x128xf32>
    %c0_55 = arith.constant 0 : index
    %c1_56 = arith.constant 1 : index
    %c1_57 = arith.constant 1 : index
    %c0_58 = arith.constant 0 : index
    %c0_59 = arith.constant 0 : index
    %48 = vector.load %arg1[%c0_55, %c1_56, %c1_57, %c0_58, %c0_59] : memref<1x4x2x2x64xbf16, #tpu.memory_space<vmem>>, vector<1x1x1x1x64xbf16>
    %49 = vector.shape_cast %48 : vector<1x1x1x1x64xbf16> to vector<1x1x64xbf16>
    %50 = vector.shape_cast %49 : vector<1x1x64xbf16> to vector<1x64xbf16>
    %c7 = arith.constant 7 : index
    %c0_60 = arith.constant 0 : index
    %c0_61 = arith.constant 0 : index
    %51 = vector.load %arg2[%c7, %c0_60, %c0_61] : memref<9x64x128xbf16, #tpu.memory_space<vmem>>, vector<1x64x128xbf16>
    %52 = vector.shape_cast %51 : vector<1x64x128xbf16> to vector<64x128xbf16>
    %cst_62 = arith.constant dense<0.000000e+00> : vector<1x128xf32>
    %53 = tpu.matmul %50, %52, %cst_62 {dimension_numbers = #tpu.dot_dimension_numbers<[1], [0], [0], [1], [0, 0, 1, 1], [], []>} : vector<1x64xbf16>, vector<64x128xbf16>, vector<1x128xf32> -> vector<1x128xf32>
    %54 = arith.addf %47, %53 : vector<1x128xf32>
    %c0_63 = arith.constant 0 : index
    %c0_64 = arith.constant 0 : index
    %c1_65 = arith.constant 1 : index
    %c1_66 = arith.constant 1 : index
    %c0_67 = arith.constant 0 : index
    %55 = vector.load %arg1[%c0_63, %c0_64, %c1_65, %c1_66, %c0_67] : memref<1x4x2x2x64xbf16, #tpu.memory_space<vmem>>, vector<1x1x1x1x64xbf16>
    %56 = vector.shape_cast %55 : vector<1x1x1x1x64xbf16> to vector<1x1x64xbf16>
    %57 = vector.shape_cast %56 : vector<1x1x64xbf16> to vector<1x64xbf16>
    %c8 = arith.constant 8 : index
    %c0_68 = arith.constant 0 : index
    %c0_69 = arith.constant 0 : index
    %58 = vector.load %arg2[%c8, %c0_68, %c0_69] : memref<9x64x128xbf16, #tpu.memory_space<vmem>>, vector<1x64x128xbf16>
    %59 = vector.shape_cast %58 : vector<1x64x128xbf16> to vector<64x128xbf16>
    %cst_70 = arith.constant dense<0.000000e+00> : vector<1x128xf32>
    %60 = tpu.matmul %57, %59, %cst_70 {dimension_numbers = #tpu.dot_dimension_numbers<[1], [0], [0], [1], [0, 0, 1, 1], [], []>} : vector<1x64xbf16>, vector<64x128xbf16>, vector<1x128xf32> -> vector<1x128xf32>
    %61 = arith.addf %54, %60 : vector<1x128xf32>
    %c0_71 = arith.constant 0 : index
    %c0_72 = arith.constant 0 : index
    %62 = vector.load %arg3[%c0_71, %c0_72] : memref<1x128xf32, #tpu.memory_space<vmem>>, vector<1x128xf32>
    %63 = arith.addf %61, %62 : vector<1x128xf32>
    %cst_73 = arith.constant 0.000000e+00 : f32
    %64 = vector.broadcast %cst_73 : f32 to vector<1x128xf32>
    %65 = arith.maximumf %63, %64 : vector<1x128xf32>
    %cst_74 = arith.constant dense<0.000000e+00> : vector<128xf32>
    %66 = vector.multi_reduction <add>, %65, %cst_74 [0] : vector<1x128xf32> to vector<128xf32>
    %67 = vector.shape_cast %66 : vector<128xf32> to vector<1x128xf32>
    %cst_75 = arith.constant 1.000000e+00 : f32
    %68 = vector.broadcast %cst_75 : f32 to vector<1x128xf32>
    %69 = arith.divf %67, %68 : vector<1x128xf32>
    %70 = vector.shape_cast %69 : vector<1x128xf32> to vector<1x1x128xf32>
    %c0_76 = arith.constant 0 : index
    %c0_77 = arith.constant 0 : index
    %c0_78 = arith.constant 0 : index
    %71 = vector.load %arg4[%c0_76, %c0_77, %c0_78] : memref<1x1x128xf32, #tpu.memory_space<vmem>>, vector<1x1x128xf32>
    tpu.vector_store %arg4[%c0_76, %c0_77, %c0_78], %70 {strides = array<i32>} : memref<1x1x128xf32, #tpu.memory_space<vmem>>, vector<1x1x128xf32>,
    return
  }
  func.func @transform_0(%arg0: i32) -> (i32, i32, i32, i32, i32) {
    %c0_i32 = arith.constant 0 : i32
    %c0_i32_0 = arith.constant 0 : i32
    %c0_i32_1 = arith.constant 0 : i32
    %c0_i32_2 = arith.constant 0 : i32
    %c0_i32_3 = arith.constant 0 : i32
    return %arg0, %c0_i32, %c0_i32_0, %c0_i32_1, %c0_i32_2 : i32, i32, i32, i32, i32
  }
  func.func @transform_1(%arg0: i32) -> (i32, i32, i32) {
    %c0_i32 = arith.constant 0 : i32
    %c0_i32_0 = arith.constant 0 : i32
    %c0_i32_1 = arith.constant 0 : i32
    %c0_i32_2 = arith.constant 0 : i32
    return %c0_i32, %c0_i32_0, %c0_i32_1 : i32, i32, i32
  }
  func.func @transform_2(%arg0: i32) -> (i32, i32) {
    %c0_i32 = arith.constant 0 : i32
    %c0_i32_0 = arith.constant 0 : i32
    %c0_i32_1 = arith.constant 0 : i32
    return %c0_i32, %c0_i32_0 : i32, i32
  }
  func.func @transform_3(%arg0: i32) -> (i32, i32, i32) {
    %c0_i32 = arith.constant 0 : i32
    %c0_i32_0 = arith.constant 0 : i32
    %c0_i32_1 = arith.constant 0 : i32
    return %arg0, %c0_i32, %c0_i32_0 : i32, i32, i32
  }
}

module attributes {stable_mosaic.version = 11 : i64} {
  func.func @_linear_kernel(%arg0: i32, %arg1: memref<2x128xf32, #tpu.memory_space<vmem>>, %arg2: memref<128x128xf32, #tpu.memory_space<vmem>>, %arg3: memref<1x128xf32, #tpu.memory_space<vmem>>, %arg4: memref<2x128xf32, #tpu.memory_space<vmem>>) attributes {dimension_semantics = [#tpu.dimension_semantics<arbitrary>], iteration_bounds = array<i64: 1>, scalar_prefetch = 0 : i64, scratch_operands = 0 : i64, tpu.core_type = #tpu.core_type<tc>, window_params = [{pipeline_mode = #tpu.pipeline_mode<synchronous>, transform_indices = @transform_0, window_bounds = array<i64: 2, 128>}, {pipeline_mode = #tpu.pipeline_mode<synchronous>, transform_indices = @transform_1, window_bounds = array<i64: 128, 128>}, {pipeline_mode = #tpu.pipeline_mode<synchronous>, transform_indices = @transform_2, window_bounds = array<i64: 1, 128>}, {pipeline_mode = #tpu.pipeline_mode<synchronous>, transform_indices = @transform_3, window_bounds = array<i64: 2, 128>}]} {
    %c0 = arith.constant 0 : index
    %c0_0 = arith.constant 0 : index
    %0 = vector.load %arg1[%c0, %c0_0] : memref<2x128xf32, #tpu.memory_space<vmem>>, vector<2x128xf32>
    %c0_1 = arith.constant 0 : index
    %c0_2 = arith.constant 0 : index
    %1 = vector.load %arg2[%c0_1, %c0_2] : memref<128x128xf32, #tpu.memory_space<vmem>>, vector<128x128xf32>
    %cst = arith.constant dense<0.000000e+00> : vector<2x128xf32>
    %2 = tpu.matmul %0, %1, %cst {dimension_numbers = #tpu.dot_dimension_numbers<[1], [0], [0], [1], [0, 0, 1, 1], [], []>} : vector<2x128xf32>, vector<128x128xf32>, vector<2x128xf32> -> vector<2x128xf32>
    %c0_3 = arith.constant 0 : index
    %c0_4 = arith.constant 0 : index
    %3 = vector.load %arg3[%c0_3, %c0_4] : memref<1x128xf32, #tpu.memory_space<vmem>>, vector<1x128xf32>
    %4 = vector.broadcast %3 : vector<1x128xf32> to vector<2x128xf32>
    %5 = arith.addf %2, %4 : vector<2x128xf32>
    %c0_5 = arith.constant 0 : index
    %c0_6 = arith.constant 0 : index
    %6 = vector.load %arg4[%c0_5, %c0_6] : memref<2x128xf32, #tpu.memory_space<vmem>>, vector<2x128xf32>
    tpu.vector_store %arg4[%c0_5, %c0_6], %5 {strides = array<i32>} : memref<2x128xf32, #tpu.memory_space<vmem>>, vector<2x128xf32>,
    return
  }
  func.func @transform_0(%arg0: i32) -> (i32, i32) {
    %c0_i32 = arith.constant 0 : i32
    %c0_i32_0 = arith.constant 0 : i32
    %c0_i32_1 = arith.constant 0 : i32
    return %c0_i32, %c0_i32_0 : i32, i32
  }
  func.func @transform_1(%arg0: i32) -> (i32, i32) {
    %c0_i32 = arith.constant 0 : i32
    %c0_i32_0 = arith.constant 0 : i32
    %c0_i32_1 = arith.constant 0 : i32
    return %c0_i32, %c0_i32_0 : i32, i32
  }
  func.func @transform_2(%arg0: i32) -> (i32, i32) {
    %c0_i32 = arith.constant 0 : i32
    %c0_i32_0 = arith.constant 0 : i32
    %c0_i32_1 = arith.constant 0 : i32
    return %c0_i32, %c0_i32_0 : i32, i32
  }
  func.func @transform_3(%arg0: i32) -> (i32, i32) {
    %c0_i32 = arith.constant 0 : i32
    %c0_i32_0 = arith.constant 0 : i32
    %c0_i32_1 = arith.constant 0 : i32
    return %c0_i32, %c0_i32_0 : i32, i32
  }
}

</mosaic_0001>

<bundles_post_ra>
// kernel: tpu_custom_call.1
= control target key start
LH: loop header
LB: loop body
LE: loop exit
PB: predicated region body
PF: predicated region fallthrough
CT: control target
= control target key end

     0   :  { %6 = vsyncpa [#allocation3], 0  ;;  %s114_s0 = inlined_call_operand.hbm [shape: f32[8,128], index: 0, kind: input, shape index: {}]   ;;  %s115_s1 = inlined_call_operand.hbm [shape: f32[8,128], index: 1, kind: output, shape index: {}]  }
   0x1   :  { %7 = vsyncpa [#allocation4], 0  ;;  %s13_s8 = sshll.u32 %s114_s0, 4  ;;  %s96_s9 = smov [#allocation2]   ;;  %s14_s8 = int_to_ptr.hbm [resolvable:$true] %s13_s8 }
   0x2   :  { %s15_s10 = sshll.u32 %s96_s9, 4  ;;  %s16_s10 = int_to_ptr.vmem [resolvable:$true] %s15_s10 }
   0x3   :  { %18 = dma.hbm_to_vmem [thread:$0]  %s14_s8, 128, %s16_s10, [#allocation3]  }
   0x4   :  { %92 = dma.done.wait [#allocation3], 128  }
   0x5   :  { %93 = vsyncadd [#allocation3], 4294967168  ;;  %s97_s11 = smov [#allocation5]   ;;  %s32_s15 = sshll.u32 %s115_s1, 4  ;;  %v23_v0 = vld [vmem:[#allocation2] sm:$0xff]  ;;  %s33_s15 = int_to_ptr.hbm [resolvable:$true] %s32_s15 }
   0x6   :  { %s30_s12 = sshll.u32 %s97_s11, 4  ;;  %24 = vst [vmem:[#allocation5] sm:$0xff] %v23_v0  ;;  %s31_s12 = int_to_ptr.vmem [resolvable:$true] %s30_s12 }
   0x7   :  { %35 = dma.vmem_to_hbm [thread:$0]  %s31_s12, 128, %s33_s15, [#allocation4]  }
   0x8   :  { %94 = dma.done.wait [#allocation4], 128  }
   0x9   :  { %95 = vsyncadd [#allocation4], 4294967168 }
   0xa   :  { %40 = vsyncpa [#allocation3], 1 }
   0xb   :  { %41 = vsyncpa [#allocation4], 1 }

// kernel: _lambda_.7
= control target key start
LH: loop header
LB: loop body
LE: loop exit
PB: predicated region body
PF: predicated region fallthrough
CT: control target
= control target key end

     0   :  { %s5023_s12 = smov 0   ;;  %s5999_s0 = inlined_call_operand.vmem [shape: bf16[2,4,17,17,3], index: 0, kind: input, shape index: {}]   ;;  %s6000_s1 = inlined_call_operand.vmem [shape: bf16[9,3,128], index: 1, kind: input, shape index: {}]   ;;  %s6001_s2 = inlined_call_operand.vmem [shape: f32[1,128], index: 2, kind: input, shape index: {}]   ;;  %s6002_s3 = inlined_call_operand.vmem [shape: bf16[2,16,16,128], index: 3, kind: output, shape index: {}]  }
   0x1 LB: > { %s3985_s13 = sadd.s32 4294967295, %s5000_s12   ;;  %p3989_p0 = scmp.ge.s32.totalorder %s5000_s12, 1  ;;  %s5000_s12 = sphi %s5023_s12, %s13_s12  }
   0x2   : > { %p137_p1 = scmp.lt.s32.totalorder %s5000_s12, 3 }
   0x4   : > { %p138_p2 = pnand %p3989_p0, %p137_p1 }
   0x6   : > { %141 = sbr.rel (%p138_p2) target bundleno = 733 (0x2dd), region = 32 }
   0xb   : > { %v4025_v0 = vld [vmem:[%s6000_s1 + $0x2] sm:$0x3]  ;;  %vm369_vm0 = vcmask 1040384   ;;  %vm370_vm1 = vcmask 1041408   ;;  %p161_p3 = scmp.lt.s32.totalorder %s3985_s13, 1  ;;  %v5002_v1 = vmov 65535  }
   0xc   : > { %v371_v2 = vsel %vm369_vm0, 4294967295, %v5002_v1  ;;  %v4186_v3 = vld [vmem:[%s6000_s1 + $0x4] sm:$0x3]  ;;  %v4235_v4 = vld [vmem:[%s6000_s1 + $0x6] sm:$0x3]  ;;  %vm320_vm2 = vcmask 23552  }
   0xd   : > { %v372_v5 = vsel %vm370_vm1, %v371_v2, 0  ;;  %s6012_s13 = smov (!%p161_p3, %s3985_s13), 1  ;;  %v204_v6 = vld [vmem:[%s6000_s1] sm:$0x3]  ;;  %v4348_v7 = vld [vmem:[%s6000_s1 + $0x8] sm:$0x3] }
   0xe   : > { %v374_v8 = vand.u32 %v4025_v0, %v372_v5  ;;  %v1219_v9 = vand.u32 %v4186_v3, %v372_v5  ;;  %v1506_v10 = vand.u32 %v4235_v4, %v372_v5  ;;  %s4982_s24 = smul.u32 816, %s6012_s13  ;;  %v594_v11 = vand.u32 %v372_v5, %v204_v6  ;;  %v4526_v27 = vld [vmem:[%s6000_s1 + $0xc] sm:$0x3]  ;;  %v4639_v28 = vld [vmem:[%s6000_s1 + $0xe] sm:$0x3]  ;;  %s4787_s11 = sshll.u32 %s6012_s13, 7 }
   0xf   : > { %v1793_v12 = vand.u32 %v4348_v7, %v372_v5  ;;  %v2734_v31 = vand.u32 %v4526_v27, %v372_v5  ;;  %v3021_v32 = vand.u32 %v4639_v28, %v372_v5  ;;  %v4477_v33 = vld [vmem:[%s6000_s1 + $0xa] sm:$0x3]  ;;  %v4768_v34 = vld [vmem:[%s6000_s1 + $0x10] sm:$0x3]  ;;  %vm733_vm3 = vsmask.f32 3328  ;;  %s5769_s13 = scalar_lea.vmem %s6002_s3, %s4787_s11 }
  0x10   : > { %4979 = vmatpush.bf16.msra.mxu1 %v374_v8  ;;  %4980 = vmatpush.bf16.msra.mxu2 %v374_v8  ;;  %s5052_s27 = scalar_lea.vmem %s5999_s0, %s4982_s24  ;;  %v2447_v37 = vand.u32 %v4477_v33, %v372_v5  ;;  %v3675_v38 = vand.u32 %v4768_v34, %v372_v5  ;;  %vm734_vm4 = vsmask.f32 7440 }
  0x11   : > { %4981 = vmatpush.bf16.msra.mxu3 %v374_v8  ;;  %383 = vmatpush.bf16.msra.mxu0 %v374_v8  ;;  %v4808_v13 = vld [vmem:[%s5052_s27 + $0xfc] sm:$0xff]  ;;  %v4812_v14 = vld [vmem:[%s5052_s27 + $0x12c] sm:$0xff]  ;;  %v4810_v21 = vld [vmem:[%s5052_s27 + $0x114] sm:$0xff] }
  0x12   : > { %v4816_v15 = vld [vmem:[%s5052_s27 + $0x15c] sm:$0xff]  ;;  %v4804_v16 = vld [vmem:[%s5052_s27 + $0xcc] sm:$0xff]  ;;  %v4814_v22 = vld [vmem:[%s5052_s27 + $0x144] sm:$0xff] }
  0x13   : > { %4094 = vmatmul.msk.bf16.vlgmr.msra.gmra.mxu1 %vm320_vm2, %v4808_v13  ;;  %4098 = vmatmul.msk.bf16.vlgmr.msra.gmra.mxu2 %vm320_vm2, %v4812_v14  ;;  %v4809_v17 = vld [vmem:[%s5052_s27 + $0x108] sm:$0xff]  ;;  %v4813_v18 = vld [vmem:[%s5052_s27 + $0x138] sm:$0xff]  ;;  %v685_v25 = vld [vmem:[%s5052_s27] sm:$0xf] }
  0x14   : > { %1228 = vmatpush.bf16.msrb.mxu2 %v1219_v9  ;;  %603 = vmatpush.bf16.msrb.mxu1 %v594_v11  ;;  %v4817_v19 = vld [vmem:[%s5052_s27 + $0x168] sm:$0xff]  ;;  %v4805_v20 = vld [vmem:[%s5052_s27 + $0xd8] sm:$0xff]  ;;  %v686_v26 = vld [vmem:[%s5052_s27 + $0x4] sm:$0xf]  ;;  %v737_v29 = vshrl.u32 %v685_v25, 16  ;;  %v740_v30 = vshll.u32 %v685_v25, 16 }
  0x15   : > { %1515 = vmatpush.bf16.msrb.mxu3 %v1506_v10  ;;  %1802 = vmatpush.bf16.msrb.mxu0 %v1793_v12  ;;  %v4818_v23 = vld [vmem:[%s5052_s27 + $0x174] sm:$0xff]  ;;  %v4806_v24 = vld [vmem:[%s5052_s27 + $0xe4] sm:$0xff]  ;;  %v746_v35 = vshll.u32 %v686_v26, 16  ;;  %v750_v36 = vshrl.u32 %v686_v26, 16  ;;  %vm5099_vm5 = vmor %vm733_vm3, %vm734_vm4 }
  0x16   : > { %4102 = vmatmul.msk.bf16.vlgmr.msra.gmra.mxu3 %vm320_vm2, %v4816_v15  ;;  %4090 = vmatmul.msk.bf16.vlgmr.msra.gmra.mxu0 %vm320_vm2, %v4804_v16  ;;  %v739_v39 = vrot.slane %v737_v29, 4  ;;  %v742_v40 = vrot.slane %v740_v30, 5  ;;  %v687_v43 = vld [vmem:[%s5052_s27 + $0x8] sm:$0x1]  ;;  %v4811_v47 = vld [vmem:[%s5052_s27 + $0x120] sm:$0xff]  ;;  %v4815_v48 = vld [vmem:[%s5052_s27 + $0x150] sm:$0xff] }
  0x17   : > { %v748_v41 = vrot.slane %v746_v35, 5  ;;  %v752_v42 = vrot.slane %v750_v36, 4  ;;  %v756_v46 = vshll.u32 %v687_v43, 16  ;;  %v4819_v49 = vld [vmem:[%s5052_s27 + $0x180] sm:$0xff]  ;;  %v4807_v50 = vld [vmem:[%s5052_s27 + $0xf0] sm:$0xff]  ;;  %v4820_v11 = vld [vmem:[%s5052_s27 + $0x198] sm:$0xff] }
  0x18   : > { %2743 = vmatpush.bf16.msra.mxu2 %v2734_v31  ;;  %2456 = vmatpush.bf16.msra.mxu1 %v2447_v37  ;;  %v743_v44 = vor.u32 %v742_v40, %v739_v39  ;;  %v688_v55 = vld [vmem:[%s5052_s27 + $0xc] sm:$0xf]  ;;  %v689_v56 = vld [vmem:[%s5052_s27 + $0x10] sm:$0xf]  ;;  %v690_v5 = vld [vmem:[%s5052_s27 + $0x14] sm:$0x1] }
  0x19   : > { %3030 = vmatpush.bf16.msra.mxu3 %v3021_v32  ;;  %3684 = vmatpush.bf16.msra.mxu0 %v3675_v38  ;;  %v753_v45 = vor.u32 %v752_v42, %v748_v41  ;;  %v758_v53 = vrot.slane %v756_v46, 5  ;;  %v761_v59 = vshrl.u32 %v688_v55, 16  ;;  %v764_v60 = vshll.u32 %v688_v55, 16  ;;  %v4788_v6 = vld [vmem:[%s5052_s27] sm:$0xff]  ;;  %v691_v16 = vld [vmem:[%s5052_s27 + $0x18] sm:$0xf] }
  0x1a   : > { %v744_v51 = vrot.slane %v743_v44, 4  ;;  %v770_v61 = vshll.u32 %v689_v56, 16  ;;  %v774_v62 = vshrl.u32 %v689_v56, 16  ;;  %v780_v10 = vshll.u32 %v690_v5, 16  ;;  %v4836_v12 = vld [vmem:[%s5052_s27 + $0x264] sm:$0xff]  ;;  %v4789_v31 = vld [vmem:[%s5052_s27 + $0xc] sm:$0xff] }
  0x1b   : > { %v754_v52 = vrot.slane %v753_v45, 4  ;;  %v763_v1 = vrot.slane %v761_v59, 4  ;;  %v766_v2 = vrot.slane %v764_v60, 5  ;;  %v693_v30 = vld [vmem:[%s5052_s27 + $0x20] sm:$0x1]  ;;  %v4821_v33 = vld [vmem:[%s5052_s27 + $0x1a4] sm:$0xff] }
  0x1c   : > { %v749_v57 = vsel %vm5099_vm5, %v744_v51, %v748_v41  ;;  %v772_v3 = vrot.slane %v770_v61, 5  ;;  %v776_v4 = vrot.slane %v774_v62, 4  ;;  %v782_v15 = vrot.slane %v780_v10, 5  ;;  %v4837_v34 = vld [vmem:[%s5052_s27 + $0x270] sm:$0xff]  ;;  %v694_v38 = vld [vmem:[%s5052_s27 + $0x24] sm:$0xf] }
  0x1d   : > { %v759_v58 = vsel %vm5099_vm5, %v754_v52, %v758_v53  ;;  %v1122_v63 = vunpack.c.l.b16 %v749_v57  ;;  %v767_v8 = vor.u32 %v766_v2, %v763_v1  ;;  %v804_v37 = vshll.u32 %v693_v30, 16  ;;  %v695_v39 = vld [vmem:[%s5052_s27 + $0x28] sm:$0xf]  ;;  %v696_v56 = vld [vmem:[%s5052_s27 + $0x2c] sm:$0x1]  ;;  %v4790_v60 = vld [vmem:[%s5052_s27 + $0x18] sm:$0xff] }
  0x1e   : > { %v1123_v0 = vunpack.c.l.b16 %v759_v58  ;;  %v777_v9 = vor.u32 %v776_v4, %v772_v3  ;;  %v809_v43 = vshrl.u32 %v694_v38, 16  ;;  %v812_v44 = vshll.u32 %v694_v38, 16  ;;  %v4822_v62 = vld [vmem:[%s5052_s27 + $0x1b0] sm:$0xff] }
  0x1f   : > { %v768_v13 = vrot.slane %v767_v8, 4  ;;  %v806_v42 = vrot.slane %v804_v37, 5  ;;  %v818_v45 = vshll.u32 %v695_v39, 16  ;;  %v822_v46 = vshrl.u32 %v695_v39, 16  ;;  %v698_v4 = vld [vmem:[%s5052_s27 + $0x34] sm:$0xf] }
  0x20   : > { %v1154_v7 = vpack.c.b16 %v1123_v0, %v1122_v63  ;;  %v778_v14 = vrot.slane %v777_v9, 4  ;;  %v828_v59 = vshll.u32 %v696_v56, 16  ;;  %v4838_v63 = vld [vmem:[%s5052_s27 + $0x27c] sm:$0xff]  ;;  %v842_v9 = vshll.u32 %v698_v4, 16 }
  0x21   : > { %v820_v51 = vrot.slane %v818_v45, 5  ;;  %v824_v52 = vrot.slane %v822_v46, 4  ;;  %v846_v10 = vshrl.u32 %v698_v4, 16  ;;  %v4824_v46 = vld [vmem:[%s5052_s27 + $0x1c8] sm:$0xff] }
  0x22   : > { %v830_v2 = vrot.slane %v828_v59, 5 }
  0x23   : > { %4095 = vmatmul.msk.bf16.gmra.mxu1 %vm320_vm2, %v4809_v17  ;;  %4099 = vmatmul.msk.bf16.gmra.mxu2 %vm320_vm2, %v4813_v18  ;;  %v692_v17 = vld [vmem:[%s5052_s27 + $0x1c] sm:$0xf]  ;;  %v773_v18 = vsel %vm5099_vm5, %v768_v13, %v772_v3  ;;  %v825_v58 = vor.u32 %v824_v52, %v820_v51  ;;  %v697_v3 = vld [vmem:[%s5052_s27 + $0x30] sm:$0xf]  ;;  %v703_v52 = vld [vmem:[%s5052_s27 + $0x48] sm:$0xf] }
  0x24   : > { %v836_v8 = vshll.u32 %v697_v3, 16  ;;  %v881_v59 = vshrl.u32 %v703_v52, 16 }
  0x25   : > { %v826_v1 = vrot.slane %v825_v58, 4 }
  0x26   : > { %4103 = vmatmul.msk.bf16.gmra.mxu3 %vm320_vm2, %v4817_v19  ;;  %4091 = vmatmul.msk.bf16.gmra.mxu0 %vm320_vm2, %v4805_v20  ;;  %v783_v19 = vsel %vm5099_vm5, %v778_v14, %v782_v15  ;;  %v785_v20 = vshrl.u32 %v691_v16, 16  ;;  %v838_v14 = vrot.slane %v836_v8, 5  ;;  %v844_v15 = vrot.slane %v842_v9, 5 }
  0x27   : > { %v1125_v25 = vunpack.c.l.b16 %v783_v19  ;;  %v883_v4 = vrot.slane %v881_v59, 4 }
  0x28   : > { %v787_v26 = vrot.slane %v785_v20, 4 }
  0x33   : > { %4096 = vmatmul.msk.bf16.gmra.mxu1 %vm320_vm2, %v4810_v21  ;;  %4100 = vmatmul.msk.bf16.gmra.mxu2 %vm320_vm2, %v4814_v22  ;;  %v788_v21 = vshll.u32 %v691_v16, 16  ;;  %v794_v22 = vshll.u32 %v692_v17, 16  ;;  %v848_v16 = vrot.slane %v846_v10, 4  ;;  %v705_v10 = vld [vmem:[%s5052_s27 + $0x50] sm:$0x1] }
  0x35   : > { %v790_v27 = vrot.slane %v788_v21, 5  ;;  %v796_v28 = vrot.slane %v794_v22, 5  ;;  %v849_v21 = vor.u32 %v848_v16, %v844_v15  ;;  %v4793_v16 = vld [vmem:[%s5052_s27 + $0x3c] sm:$0xff] }
  0x36   : > { %4104 = vmatmul.msk.bf16.gmra.mxu3 %vm320_vm2, %v4818_v23  ;;  %4092 = vmatmul.msk.bf16.gmra.mxu0 %vm320_vm2, %v4806_v24  ;;  %v798_v23 = vshrl.u32 %v692_v17, 16  ;;  %v1124_v24 = vunpack.c.l.b16 %v773_v18  ;;  %v699_v17 = vld [vmem:[%s5052_s27 + $0x38] sm:$0x1]  ;;  %v4791_v18 = vld [vmem:[%s5052_s27 + $0x24] sm:$0xff] }
  0x37   : > { %v791_v35 = vor.u32 %v790_v27, %v787_v26  ;;  %v852_v22 = vshll.u32 %v699_v17, 16  ;;  %v850_v26 = vrot.slane %v849_v21, 4 }
  0x38   : > { %v800_v29 = vrot.slane %v798_v23, 4  ;;  %v1155_v32 = vpack.c.b16 %v1125_v25, %v1124_v24  ;;  %v4823_v23 = vld [vmem:[%s5052_s27 + $0x1bc] sm:$0xff]  ;;  %v4839_v24 = vld [vmem:[%s5052_s27 + $0x288] sm:$0xff] }
  0x39   : > { %v792_v40 = vrot.slane %v791_v35, 4  ;;  %v854_v27 = vrot.slane %v852_v22, 5 }
  0x3a   : > { %v801_v36 = vor.u32 %v800_v29, %v796_v28  ;;  %v701_v29 = vld [vmem:[%s5052_s27 + $0x40] sm:$0xf] }
  0x3b   : > { %v870_v35 = vshrl.u32 %v701_v29, 16 }
  0x3c   : > { %v802_v41 = vrot.slane %v801_v36, 4 }
  0x43   : > { %4097 = vmatmul.msk.bf16.gmra.mxu1 %vm320_vm2, %v4811_v47  ;;  %4101 = vmatmul.msk.bf16.gmra.mxu2 %vm320_vm2, %v4815_v48  ;;  %v797_v47 = vsel %vm5099_vm5, %v792_v40, %v796_v28  ;;  %v807_v48 = vsel %vm5099_vm5, %v802_v41, %v806_v42  ;;  %v700_v28 = vld [vmem:[%s5052_s27 + $0x3c] sm:$0xf]  ;;  %v872_v41 = vrot.slane %v870_v35, 4  ;;  %v702_v42 = vld [vmem:[%s5052_s27 + $0x44] sm:$0x1] }
  0x44   : > { %v1126_v53 = vunpack.c.l.b16 %v797_v47  ;;  %v1127_v55 = vunpack.c.l.b16 %v807_v48  ;;  %v4840_v47 = vld [vmem:[%s5052_s27 + $0x294] sm:$0xff] }
  0x46   : > { %4105 = vmatmul.msk.bf16.gmra.mxu3 %vm320_vm2, %v4819_v49  ;;  %4093 = vmatmul.msk.bf16.gmra.mxu0 %vm320_vm2, %v4807_v50  ;;  %v811_v49 = vrot.slane %v809_v43, 4  ;;  %v814_v50 = vrot.slane %v812_v44, 5  ;;  %v1156_v61 = vpack.c.b16 %v1127_v55, %v1126_v53  ;;  %v4792_v43 = vld [vmem:[%s5052_s27 + $0x30] sm:$0xff]  ;;  %v704_v53 = vld [vmem:[%s5052_s27 + $0x4c] sm:$0xf] }
  0x48   : > { %v815_v57 = vor.u32 %v814_v50, %v811_v49  ;;  %v876_v50 = vshll.u32 %v702_v42, 16 }
  0x4a   : > { %v816_v0 = vrot.slane %v815_v57, 4  ;;  %v878_v57 = vrot.slane %v876_v50, 5 }
  0x4c   : > { %v821_v5 = vsel %vm5099_vm5, %v816_v0, %v820_v51 }
  0x53   : > { %4170 = vmatmul.msk.bf16.vlgmr.msrb.gmra.mxu1 %vm320_vm2, %v4788_v6  ;;  %4187 = vmatmul.msk.bf16.vlgmr.msrb.gmra.mxu2 %vm320_vm2, %v1154_v7  ;;  %v831_v6 = vsel %vm5099_vm5, %v826_v1, %v830_v2  ;;  %v833_v7 = vshrl.u32 %v697_v3, 16 }
  0x55   : > { %v835_v13 = vrot.slane %v833_v7, 4 }
  0x56   : > { %4300 = vmatmul.msk.bf16.vlgmr.msrb.gmra.mxu3 %vm320_vm2, %v4820_v11  ;;  %4413 = vmatmul.msk.bf16.vlgmr.msrb.gmra.mxu0 %vm320_vm2, %v4836_v12  ;;  %v1128_v11 = vunpack.c.l.b16 %v821_v5  ;;  %v1129_v12 = vunpack.c.l.b16 %v831_v6 }
  0x57   : > { %v839_v20 = vor.u32 %v838_v14, %v835_v13  ;;  %v900_v14 = vshll.u32 %v705_v10, 16 }
  0x58   : > { %v1157_v19 = vpack.c.b16 %v1129_v12, %v1128_v11 }
  0x59   : > { %v840_v25 = vrot.slane %v839_v20, 4  ;;  %v4841_v20 = vld [vmem:[%s5052_s27 + $0x2a0] sm:$0xff] }
  0x5b   : > { %v845_v30 = vsel %vm5099_vm5, %v840_v25, %v844_v15  ;;  %v706_v25 = vld [vmem:[%s5052_s27 + $0x54] sm:$0xf] }
  0x5c   : > { %v1130_v36 = vunpack.c.l.b16 %v845_v30 }
  0x63   : > { %4171 = vmatmul.msk.bf16.gmra.mxu1 %vm320_vm2, %v4789_v31  ;;  %4188 = vmatmul.msk.bf16.gmra.mxu2 %vm320_vm2, %v1155_v32  ;;  %v855_v31 = vsel %vm5099_vm5, %v850_v26, %v854_v27  ;;  %v857_v32 = vshrl.u32 %v700_v28, 16  ;;  %v707_v26 = vld [vmem:[%s5052_s27 + $0x58] sm:$0xf] }
  0x64   : > { %v1131_v37 = vunpack.c.l.b16 %v855_v31  ;;  %v905_v31 = vshrl.u32 %v706_v25, 16 }
  0x65   : > { %v859_v38 = vrot.slane %v857_v32, 4  ;;  %v908_v32 = vshll.u32 %v706_v25, 16 }
  0x66   : > { %4301 = vmatmul.msk.bf16.gmra.mxu3 %vm320_vm2, %v4821_v33  ;;  %4414 = vmatmul.msk.bf16.gmra.mxu0 %vm320_vm2, %v4837_v34  ;;  %v860_v33 = vshll.u32 %v700_v28, 16  ;;  %v866_v34 = vshll.u32 %v701_v29, 16  ;;  %v1158_v44 = vpack.c.b16 %v1131_v37, %v1130_v36 }
  0x68   : > { %v862_v39 = vrot.slane %v860_v33, 5  ;;  %v868_v40 = vrot.slane %v866_v34, 5  ;;  %v914_v33 = vshll.u32 %v707_v26, 16  ;;  %v918_v34 = vshrl.u32 %v707_v26, 16  ;;  %v4795_v26 = vld [vmem:[%s5052_s27 + $0x54] sm:$0xff] }
  0x6a   : > { %v863_v48 = vor.u32 %v862_v39, %v859_v38  ;;  %v873_v49 = vor.u32 %v872_v41, %v868_v40  ;;  %v907_v39 = vrot.slane %v905_v31, 4  ;;  %v916_v41 = vrot.slane %v914_v33, 5  ;;  %v4827_v31 = vld [vmem:[%s5052_s27 + $0x1ec] sm:$0xff] }
  0x6b   : > { %v920_v42 = vrot.slane %v918_v34, 4 }
  0x6c   : > { %v864_v55 = vrot.slane %v863_v48, 4  ;;  %v874_v56 = vrot.slane %v873_v49, 4 }
  0x6d   : > { %v921_v50 = vor.u32 %v920_v42, %v916_v41 }
  0x6e   : > { %v869_v1 = vsel %vm5099_vm5, %v864_v55, %v868_v40  ;;  %v879_v2 = vsel %vm5099_vm5, %v874_v56, %v878_v57  ;;  %v910_v40 = vrot.slane %v908_v32, 5  ;;  %v4826_v55 = vld [vmem:[%s5052_s27 + $0x1e0] sm:$0xff]  ;;  %v4842_v56 = vld [vmem:[%s5052_s27 + $0x2ac] sm:$0xff]  ;;  %v4843_v32 = vld [vmem:[%s5052_s27 + $0x2b8] sm:$0xff] }
  0x6f   : > { %v1132_v8 = vunpack.c.l.b16 %v869_v1  ;;  %v1133_v9 = vunpack.c.l.b16 %v879_v2  ;;  %v710_v1 = vld [vmem:[%s5052_s27 + $0x64] sm:$0xf] }
  0x70   : > { %v911_v49 = vor.u32 %v910_v40, %v907_v39  ;;  %v938_v10 = vshll.u32 %v710_v1, 16  ;;  %v712_v39 = vld [vmem:[%s5052_s27 + $0x6c] sm:$0xf]  ;;  %v713_v40 = vld [vmem:[%s5052_s27 + $0x70] sm:$0xf] }
  0x71   : > { %v1159_v17 = vpack.c.b16 %v1133_v9, %v1132_v8 }
  0x72   : > { %v912_v59 = vrot.slane %v911_v49, 4  ;;  %v956_v49 = vshll.u32 %v712_v39, 16 }
  0x73   : > { %4172 = vmatmul.msk.bf16.gmra.mxu1 %vm320_vm2, %v4790_v60  ;;  %4189 = vmatmul.msk.bf16.gmra.mxu2 %vm320_vm2, %v1156_v61  ;;  %v884_v60 = vshll.u32 %v703_v52, 16  ;;  %v890_v61 = vshll.u32 %v704_v53, 16 }
  0x75   : > { %v886_v5 = vrot.slane %v884_v60, 5  ;;  %v892_v6 = vrot.slane %v890_v61, 5  ;;  %v922_v60 = vrot.slane %v921_v50, 4  ;;  %v962_v50 = vshll.u32 %v713_v40, 16 }
  0x76   : > { %4302 = vmatmul.msk.bf16.gmra.mxu3 %vm320_vm2, %v4822_v62  ;;  %4415 = vmatmul.msk.bf16.gmra.mxu0 %vm320_vm2, %v4838_v63  ;;  %v894_v62 = vshrl.u32 %v704_v53, 16 }
  0x77   : > { %v887_v12 = vor.u32 %v886_v5, %v883_v4  ;;  %v917_v5 = vsel %vm5099_vm5, %v912_v59, %v916_v41 }
  0x78   : > { %v896_v7 = vrot.slane %v894_v62, 4  ;;  %v709_v62 = vld [vmem:[%s5052_s27 + $0x60] sm:$0xf] }
  0x79   : > { %v888_v22 = vrot.slane %v887_v12, 4  ;;  %v929_v8 = vshrl.u32 %v709_v62, 16  ;;  %v932_v9 = vshll.u32 %v709_v62, 16  ;;  %v942_v12 = vshrl.u32 %v710_v1, 16 }
  0x7a   : > { %v897_v13 = vor.u32 %v896_v7, %v892_v6  ;;  %v958_v1 = vrot.slane %v956_v49, 5 }
  0x7b   : > { %v893_v28 = vsel %vm5099_vm5, %v888_v22, %v892_v6  ;;  %v944_v22 = vrot.slane %v942_v12, 4 }
  0x7c   : > { %v1134_v37 = vunpack.c.l.b16 %v893_v28 }
  0x83   : > { %4173 = vmatmul.msk.bf16.gmra.mxu1 %vm320_vm2, %v4791_v18  ;;  %4190 = vmatmul.msk.bf16.gmra.mxu2 %vm320_vm2, %v1157_v19  ;;  %v4825_v19 = vld [vmem:[%s5052_s27 + $0x1d4] sm:$0xff] }
  0x86   : > { %4303 = vmatmul.msk.bf16.gmra.mxu3 %vm320_vm2, %v4823_v23  ;;  %4416 = vmatmul.msk.bf16.gmra.mxu0 %vm320_vm2, %v4839_v24  ;;  %v898_v23 = vrot.slane %v897_v13, 4  ;;  %v902_v24 = vrot.slane %v900_v14, 5  ;;  %v1136_v14 = vunpack.c.l.b16 %v917_v5  ;;  %v964_v5 = vrot.slane %v962_v50, 5 }
  0x88   : > { %v903_v29 = vsel %vm5099_vm5, %v898_v23, %v902_v24  ;;  %v711_v23 = vld [vmem:[%s5052_s27 + $0x68] sm:$0x1] }
  0x89   : > { %v1135_v38 = vunpack.c.l.b16 %v903_v29 }
  0x8b   : > { %v1160_v48 = vpack.c.b16 %v1135_v38, %v1134_v37  ;;  %v948_v37 = vshll.u32 %v711_v23, 16 }
  0x90   : > { %v5169_v45 = vpop.f32.mrf.mxu1 }
  0x93   : > { %v5173_v51 = vpop.f32.mrf.mxu0  ;;  %4174 = vmatmul.msk.bf16.gmra.mxu1 %vm320_vm2, %v4792_v43  ;;  %4191 = vmatmul.msk.bf16.gmra.mxu2 %vm320_vm2, %v1158_v44  ;;  %v708_v43 = vld [vmem:[%s5052_s27 + $0x5c] sm:$0x1] }
  0x94   : > { %v924_v52 = vshll.u32 %v708_v43, 16  ;;  %v950_v43 = vrot.slane %v948_v37, 5 }
  0x96   : > { %4304 = vmatmul.msk.bf16.gmra.mxu3 %vm320_vm2, %v4824_v46  ;;  %4417 = vmatmul.msk.bf16.gmra.mxu0 %vm320_vm2, %v4840_v47  ;;  %v5181_v58 = vpop.f32.mrf.mxu2  ;;  %v4794_v47 = vld [vmem:[%s5052_s27 + $0x48] sm:$0xff]  ;;  %v926_v61 = vrot.slane %v924_v52, 5  ;;  %v966_v52 = vshrl.u32 %v713_v40, 16  ;;  %v716_v40 = vld [vmem:[%s5052_s27 + $0x7c] sm:$0xf] }
  0x98   : > { %v5185_v0 = vpop.f32.mrf.mxu1  ;;  %v927_v6 = vsel %vm5099_vm5, %v922_v60, %v926_v61 }
  0x99   : > { %v5183_v63 = vpop.f32.mrf.mxu3 }
  0x9b   : > { %v5191_v3 = vpop.f32.mrf.mxu0 }
  0x9e   : > { %v5194_v11 = vpop.f32.mrf.mxu2 }
  0xa0   : > { %v5199_v18 = vpop.f32.mrf.mxu1 }
  0xa1   : > { %v5196_v15 = vpop.f32.mrf.mxu3 }
  0xa3   : > { %v5203_v21 = vpop.f32.mrf.mxu0  ;;  %4175 = vmatmul.msk.bf16.gmra.mxu1 %vm320_vm2, %v4793_v16  ;;  %4192 = vmatmul.msk.bf16.gmra.mxu2 %vm320_vm2, %v1159_v17  ;;  %v1137_v16 = vunpack.c.l.b16 %v927_v6  ;;  %v931_v17 = vrot.slane %v929_v8, 4  ;;  %v968_v6 = vrot.slane %v966_v52, 4  ;;  %v986_v52 = vshll.u32 %v716_v40, 16 }
  0xa5   : > { %v1161_v28 = vpack.c.b16 %v1137_v16, %v1136_v14  ;;  %v969_v16 = vor.u32 %v968_v6, %v964_v5 }
  0xa6   : > { %4305 = vmatmul.msk.bf16.gmra.mxu3 %vm320_vm2, %v4825_v19  ;;  %4418 = vmatmul.msk.bf16.gmra.mxu0 %vm320_vm2, %v4841_v20  ;;  %v5211_v27 = vpop.f32.mrf.mxu2  ;;  %v934_v19 = vrot.slane %v932_v9, 5  ;;  %v940_v20 = vrot.slane %v938_v10, 5  ;;  %v714_v10 = vld [vmem:[%s5052_s27 + $0x74] sm:$0x1] }
  0xa8   : > { %v5219_v35 = vpop.f32.mrf.mxu1  ;;  %v935_v33 = vor.u32 %v934_v19, %v931_v17  ;;  %v945_v34 = vor.u32 %v944_v22, %v940_v20  ;;  %v972_v17 = vshll.u32 %v714_v10, 16 }
  0xa9   : > { %v5217_v30 = vpop.f32.mrf.mxu3 }
  0xaa   : > { %v936_v41 = vrot.slane %v935_v33, 4  ;;  %v946_v42 = vrot.slane %v945_v34, 4  ;;  %v970_v34 = vrot.slane %v969_v16, 4  ;;  %v974_v37 = vrot.slane %v972_v17, 5 }
  0xab   : > { %v5221_v36 = vpop.f32.mrf.mxu0 }
  0xac   : > { %v941_v59 = vsel %vm5099_vm5, %v936_v41, %v940_v20  ;;  %v951_v60 = vsel %vm5099_vm5, %v946_v42, %v950_v43  ;;  %v4796_v20 = vld [vmem:[%s5052_s27 + $0x60] sm:$0xff] }
  0xad   : > { %v1138_v8 = vunpack.c.l.b16 %v941_v59  ;;  %v1139_v9 = vunpack.c.l.b16 %v951_v60  ;;  %v990_v59 = vshrl.u32 %v716_v40, 16  ;;  %v4845_v40 = vld [vmem:[%s5052_s27 + $0x2d0] sm:$0xff] }
  0xae   : > { %v5224_v44 = vpop.f32.mrf.mxu2 }
  0xaf   : > { %v1162_v22 = vpack.c.b16 %v1139_v9, %v1138_v8  ;;  %v992_v16 = vrot.slane %v990_v59, 4 }
  0xb0   : > { %v5229_v53 = vpop.f32.mrf.mxu1 }
  0xb1   : > { %v5226_v46 = vpop.f32.mrf.mxu3 }
  0xb3   : > { %v5233_v57 = vpop.f32.mrf.mxu0  ;;  %4176 = vmatmul.msk.bf16.gmra.mxu1 %vm320_vm2, %v4794_v47  ;;  %4193 = vmatmul.msk.bf16.gmra.mxu2 %vm320_vm2, %v1160_v48  ;;  %v953_v48 = vshrl.u32 %v712_v39, 16  ;;  %v715_v39 = vld [vmem:[%s5052_s27 + $0x78] sm:$0xf] }
  0xb4   : > { %v977_v43 = vshrl.u32 %v715_v39, 16  ;;  %v980_v50 = vshll.u32 %v715_v39, 16  ;;  %v4829_v39 = vld [vmem:[%s5052_s27 + $0x204] sm:$0xff] }
  0xb5   : > { %v955_v62 = vrot.slane %v953_v48, 4 }
  0xb6   : > { %4306 = vmatmul.msk.bf16.gmra.mxu3 %vm320_vm2, %v4826_v55  ;;  %4419 = vmatmul.msk.bf16.gmra.mxu0 %vm320_vm2, %v4842_v56  ;;  %v5241_v2 = vpop.f32.mrf.mxu2  ;;  %v982_v10 = vrot.slane %v980_v50, 5  ;;  %v718_v50 = vld [vmem:[%s5052_s27 + $0x84] sm:$0xf] }
  0xb7   : > { %v959_v14 = vor.u32 %v958_v1, %v955_v62 }
  0xb8   : > { %v5249_v7 = vpop.f32.mrf.mxu1 }
  0xb9   : > { %v5243_v4 = vpop.f32.mrf.mxu3  ;;  %v960_v33 = vrot.slane %v959_v14, 4  ;;  %v988_v14 = vrot.slane %v986_v52, 5  ;;  %v719_v52 = vld [vmem:[%s5052_s27 + $0x88] sm:$0xf] }
  0xbb   : > { %v5251_v13 = vpop.f32.mrf.mxu0  ;;  %v965_v42 = vsel %vm5099_vm5, %v960_v33, %v964_v5  ;;  %v979_v5 = vrot.slane %v977_v43, 4 }
  0xbc   : > { %v1140_v8 = vunpack.c.l.b16 %v965_v42 }
  0xbd   : > { %v983_v33 = vor.u32 %v982_v10, %v979_v5  ;;  %v1010_v5 = vshll.u32 %v719_v52, 16  ;;  %v1014_v10 = vshrl.u32 %v719_v52, 16 }
  0xbe   : > { %v5254_v24 = vpop.f32.mrf.mxu2 }
  0xc0   : > { %v5259_v29 = vpop.f32.mrf.mxu1 }
  0xc1   : > { %v5256_v25 = vpop.f32.mrf.mxu3 }
  0xc3   : > { %v5263_v38 = vpop.f32.mrf.mxu0  ;;  %4177 = vmatmul.msk.bf16.gmra.mxu1 %vm320_vm2, %v4795_v26  ;;  %4194 = vmatmul.msk.bf16.gmra.mxu2 %vm320_vm2, %v1161_v28  ;;  %v4828_v26 = vld [vmem:[%s5052_s27 + $0x1f8] sm:$0xff]  ;;  %v4844_v28 = vld [vmem:[%s5052_s27 + $0x2c4] sm:$0xff] }
  0xc6   : > { %4307 = vmatmul.msk.bf16.gmra.mxu3 %vm320_vm2, %v4827_v31  ;;  %4420 = vmatmul.msk.bf16.gmra.mxu0 %vm320_vm2, %v4843_v32  ;;  %v5271_v47 = vpop.f32.mrf.mxu2 }
  0xc8   : > { %v5275_v56 = vpop.f32.mrf.mxu1 }
  0xc9   : > { %v5273_v55 = vpop.f32.mrf.mxu3 }
  0xcb   : > { %v5281_v61 = vpop.f32.mrf.mxu0 }
  0xce   : > { %v5284_v12 = vpop.f32.mrf.mxu2 }
  0xd0   : > { %v605_v23 = vpop.f32.mrf.mxu1 }
  0xd1   : > { %v5286_v19 = vpop.f32.mrf.mxu3  ;;  %v606_v31 = vadd.f32 %v605_v23, %v5173_v51  ;;  %v975_v51 = vsel %vm5099_vm5, %v970_v34, %v974_v37  ;;  %v993_v34 = vor.u32 %v992_v16, %v988_v14 }
  0xd2   : > { %v1141_v9 = vunpack.c.l.b16 %v975_v51 }
  0xd3   : > { %v1804_v32 = vpop.f32.mrf.mxu0  ;;  %4178 = vmatmul.msk.bf16.gmra.mxu1 %vm320_vm2, %v4796_v20  ;;  %4195 = vmatmul.msk.bf16.gmra.mxu2 %vm320_vm2, %v1162_v22  ;;  %v717_v20 = vld [vmem:[%s5052_s27 + $0x80] sm:$0x1]  ;;  %v994_v43 = vrot.slane %v993_v34, 4  ;;  %v1016_v34 = vrot.slane %v1014_v10, 4 }
  0xd4   : > { %v1163_v23 = vpack.c.b16 %v1141_v9, %v1140_v8  ;;  %v1001_v9 = vshrl.u32 %v718_v50, 16 }
  0xd6   : > { %4308 = vmatmul.msk.bf16.gmra.mxu3 %vm320_vm2, %v4828_v26  ;;  %4421 = vmatmul.msk.bf16.gmra.mxu0 %vm320_vm2, %v4844_v28  ;;  %v1230_v41 = vpop.f32.mrf.mxu2 }
  0xd7   : > { %v1310_v48 = vadd.f32 %v1230_v41, %v606_v31  ;;  %v4797_v31 = vld [vmem:[%s5052_s27 + $0x6c] sm:$0xff] }
  0xd8   : > { %v607_v60 = vpop.f32.mrf.mxu1 }
  0xd9   : > { %v1517_v49 = vpop.f32.mrf.mxu3  ;;  %v608_v1 = vadd.f32 %v607_v60, %v5191_v3  ;;  %v996_v3 = vshll.u32 %v717_v20, 16 }
  0xda   : > { %v1597_v62 = vadd.f32 %v1517_v49, %v1310_v48 }
  0xdb   : > { %v1806_v6 = vpop.f32.mrf.mxu0  ;;  %v998_v48 = vrot.slane %v996_v3, 5  ;;  %v720_v3 = vld [vmem:[%s5052_s27 + $0x8c] sm:$0x1] }
  0xdc   : > { %v5303_v17 = vadd.f32 %v1804_v32, %v1597_v62  ;;  %v984_v32 = vrot.slane %v983_v33, 4  ;;  %v1012_v33 = vrot.slane %v1010_v5, 5  ;;  %v1020_v52 = vshll.u32 %v720_v3, 16 }
  0xde   : > { %v1232_v22 = vpop.f32.mrf.mxu2 }
  0xdf   : > { %v1311_v26 = vadd.f32 %v1232_v22, %v608_v1  ;;  %v999_v1 = vsel %vm5099_vm5, %v994_v43, %v998_v48  ;;  %v4846_v43 = vld [vmem:[%s5052_s27 + $0x2dc] sm:$0xff] }
  0xe0   : > { %v610_v37 = vpop.f32.mrf.mxu1 }
  0xe1   : > { %v1519_v28 = vpop.f32.mrf.mxu3  ;;  %v611_v42 = vadd.f32 %v610_v37, %v5203_v21  ;;  %v989_v21 = vsel %vm5099_vm5, %v984_v32, %v988_v14  ;;  %v1003_v14 = vrot.slane %v1001_v9, 4  ;;  %v4830_v32 = vld [vmem:[%s5052_s27 + $0x210] sm:$0xff] }
  0xe2   : > { %v1598_v41 = vadd.f32 %v1519_v28, %v1311_v26  ;;  %v1143_v26 = vunpack.c.l.b16 %v999_v1 }
  0xe3   : > { %v1809_v51 = vpop.f32.mrf.mxu0  ;;  %4179 = vmatmul.msk.bf16.gmra.mxu1 %vm320_vm2, %v4797_v31  ;;  %4196 = vmatmul.msk.bf16.gmra.mxu2 %vm320_vm2, %v1163_v23  ;;  %v1142_v23 = vunpack.c.l.b16 %v989_v21  ;;  %v722_v21 = vld [vmem:[%s5052_s27 + $0x94] sm:$0xf] }
  0xe4   : > { %v5312_v49 = vadd.f32 %v1806_v6, %v1598_v41  ;;  %v1004_v6 = vshll.u32 %v718_v50, 16  ;;  %v4798_v41 = vld [vmem:[%s5052_s27 + $0x78] sm:$0xff]  ;;  %v1017_v50 = vor.u32 %v1016_v34, %v1012_v33 }
  0xe6   : > { %4309 = vmatmul.msk.bf16.gmra.mxu3 %vm320_vm2, %v4829_v39  ;;  %4422 = vmatmul.msk.bf16.gmra.mxu0 %vm320_vm2, %v4845_v40  ;;  %v1235_v59 = vpop.f32.mrf.mxu2  ;;  %v1006_v31 = vrot.slane %v1004_v6, 5  ;;  %v1018_v9 = vrot.slane %v1017_v50, 4  ;;  %v1022_v6 = vrot.slane %v1020_v52, 5 }
  0xe7   : > { %v1312_v60 = vadd.f32 %v1235_v59, %v611_v42  ;;  %v1164_v42 = vpack.c.b16 %v1143_v26, %v1142_v23 }
  0xe8   : > { %v612_v8 = vpop.f32.mrf.mxu1  ;;  %v1007_v48 = vor.u32 %v1006_v31, %v1003_v14  ;;  %v1023_v31 = vsel %vm5099_vm5, %v1018_v9, %v1022_v6  ;;  %v4831_v9 = vld [vmem:[%s5052_s27 + $0x21c] sm:$0xff]  ;;  %v4847_v6 = vld [vmem:[%s5052_s27 + $0x2e8] sm:$0xff] }
  0xe9   : > { %v1522_v62 = vpop.f32.mrf.mxu3  ;;  %v613_v20 = vadd.f32 %v612_v8, %v5221_v36 }
  0xea   : > { %v1599_v16 = vadd.f32 %v1522_v62, %v1312_v60  ;;  %v721_v62 = vld [vmem:[%s5052_s27 + $0x90] sm:$0xf]  ;;  %v1008_v8 = vrot.slane %v1007_v48, 4 }
  0xeb   : > { %v1811_v22 = vpop.f32.mrf.mxu0  ;;  %v1025_v10 = vshrl.u32 %v721_v62, 16 }
  0xec   : > { %v5323_v28 = vadd.f32 %v1809_v51, %v1599_v16  ;;  %v1028_v16 = vshll.u32 %v721_v62, 16  ;;  %v4799_v62 = vld [vmem:[%s5052_s27 + $0x84] sm:$0xff] }
  0xee   : > { %v1237_v37 = vpop.f32.mrf.mxu2 }
  0xef   : > { %v1313_v39 = vadd.f32 %v1237_v37, %v613_v20  ;;  %v1038_v20 = vshrl.u32 %v722_v21, 16 }
  0xf0   : > { %v615_v36 = vpop.f32.mrf.mxu1 }
  0xf1   : > { %v1524_v40 = vpop.f32.mrf.mxu3  ;;  %v616_v59 = vadd.f32 %v615_v36, %v5233_v57  ;;  %v1034_v57 = vshll.u32 %v722_v21, 16 }
  0xf2   : > { %v1600_v51 = vadd.f32 %v1524_v40, %v1313_v39  ;;  %v1027_v39 = vrot.slane %v1025_v10, 4  ;;  %v1030_v40 = vrot.slane %v1028_v16, 5 }
  0xf3   : > { %v1814_v60 = vpop.f32.mrf.mxu0  ;;  %4180 = vmatmul.msk.bf16.gmra.mxu1 %vm320_vm2, %v4798_v41  ;;  %4197 = vmatmul.msk.bf16.gmra.mxu2 %vm320_vm2, %v1164_v42  ;;  %v1036_v41 = vrot.slane %v1034_v57, 5  ;;  %v1040_v42 = vrot.slane %v1038_v20, 4 }
  0xf4   : > { %v5334_v1 = vadd.f32 %v1811_v22, %v1600_v51  ;;  %v1013_v22 = vsel %vm5099_vm5, %v1008_v8, %v1012_v33  ;;  %v1031_v50 = vor.u32 %v1030_v40, %v1027_v39 }
  0xf5   : > { %v1144_v36 = vunpack.c.l.b16 %v1013_v22  ;;  %v1041_v52 = vor.u32 %v1040_v42, %v1036_v41 }
  0xf6   : > { %4310 = vmatmul.msk.bf16.gmra.mxu3 %vm320_vm2, %v4830_v32  ;;  %4423 = vmatmul.msk.bf16.gmra.mxu0 %vm320_vm2, %v4846_v43  ;;  %v1240_v5 = vpop.f32.mrf.mxu2  ;;  %v1145_v32 = vunpack.c.l.b16 %v1023_v31  ;;  %v723_v43 = vld [vmem:[%s5052_s27 + $0x98] sm:$0x1]  ;;  %v1032_v57 = vrot.slane %v1031_v50, 4 }
  0xf7   : > { %v1314_v23 = vadd.f32 %v1240_v5, %v616_v59  ;;  %v1044_v51 = vshll.u32 %v723_v43, 16 }
  0xf8   : > { %v617_v14 = vpop.f32.mrf.mxu1  ;;  %v1165_v21 = vpack.c.b16 %v1145_v32, %v1144_v36 }
  0xf9   : > { %v1527_v26 = vpop.f32.mrf.mxu3  ;;  %v618_v3 = vadd.f32 %v617_v14, %v5251_v13  ;;  %v1046_v20 = vrot.slane %v1044_v51, 5  ;;  %v725_v14 = vld [vmem:[%s5052_s27 + $0xa0] sm:$0xf] }
  0xfa   : > { %v1601_v34 = vadd.f32 %v1527_v26, %v1314_v23  ;;  %v724_v23 = vld [vmem:[%s5052_s27 + $0x9c] sm:$0xf]  ;;  %v1058_v42 = vshll.u32 %v725_v14, 16 }
  0xfb   : > { %v1816_v37 = vpop.f32.mrf.mxu0  ;;  %v1052_v40 = vshll.u32 %v724_v23, 16 }
  0xfc   : > { %v5344_v48 = vadd.f32 %v1814_v60, %v1601_v34  ;;  %v1042_v60 = vrot.slane %v1041_v52, 4  ;;  %v1049_v34 = vshrl.u32 %v724_v23, 16  ;;  %v4832_v23 = vld [vmem:[%s5052_s27 + $0x228] sm:$0xff] }
  0xfd   : > { %v1054_v51 = vrot.slane %v1052_v40, 5  ;;  %v727_v40 = vld [vmem:[%s5052_s27 + $0xa8] sm:$0xf] }
  0xfe   : > { %v1242_v33 = vpop.f32.mrf.mxu2  ;;  %v1047_v31 = vsel %vm5099_vm5, %v1042_v60, %v1046_v20 }
  0xff   : > { %v1315_v59 = vadd.f32 %v1242_v33, %v618_v3  ;;  %v1147_v52 = vunpack.c.l.b16 %v1047_v31 }
 0x100   : > { %v620_v8 = vpop.f32.mrf.mxu1 }
 0x101   : > { %v1529_v13 = vpop.f32.mrf.mxu3  ;;  %v621_v10 = vadd.f32 %v620_v8, %v5263_v38  ;;  %v1037_v38 = vsel %vm5099_vm5, %v1032_v57, %v1036_v41  ;;  %v1051_v41 = vrot.slane %v1049_v34, 4 }
 0x102   : > { %v1602_v5 = vadd.f32 %v1529_v13, %v1315_v59  ;;  %v1146_v50 = vunpack.c.l.b16 %v1037_v38  ;;  %v1060_v59 = vrot.slane %v1058_v42, 5  ;;  %v728_v42 = vld [vmem:[%s5052_s27 + $0xac] sm:$0xf] }
 0x103   : > { %v1819_v16 = vpop.f32.mrf.mxu0  ;;  %4181 = vmatmul.msk.bf16.gmra.mxu1 %vm320_vm2, %v4799_v62  ;;  %4198 = vmatmul.msk.bf16.gmra.mxu2 %vm320_vm2, %v1165_v21  ;;  %v726_v21 = vld [vmem:[%s5052_s27 + $0xa4] sm:$0x1]  ;;  %v1055_v57 = vor.u32 %v1054_v51, %v1051_v41  ;;  %v1076_v41 = vshll.u32 %v727_v40, 16  ;;  %v1082_v51 = vshll.u32 %v728_v42, 16 }
 0x104   : > { %v5353_v26 = vadd.f32 %v1816_v37, %v1602_v5  ;;  %v1062_v37 = vshrl.u32 %v725_v14, 16  ;;  %v4848_v14 = vld [vmem:[%s5052_s27 + $0x2f4] sm:$0xff] }
 0x106   : > { %4311 = vmatmul.msk.bf16.gmra.mxu3 %vm320_vm2, %v4831_v9  ;;  %4424 = vmatmul.msk.bf16.gmra.mxu0 %vm320_vm2, %v4847_v6  ;;  %v1245_v22 = vpop.f32.mrf.mxu2  ;;  %v1064_v13 = vrot.slane %v1062_v37, 4  ;;  %v1166_v9 = vpack.c.b16 %v1147_v52, %v1146_v50  ;;  %v1073_v52 = vshrl.u32 %v727_v40, 16 }
 0x107   : > { %v1316_v3 = vadd.f32 %v1245_v22, %v621_v10  ;;  %v4800_v10 = vld [vmem:[%s5052_s27 + $0x90] sm:$0xff] }
 0x108   : > { %v622_v36 = vpop.f32.mrf.mxu1  ;;  %v1065_v60 = vor.u32 %v1064_v13, %v1060_v59  ;;  %v1086_v13 = vshrl.u32 %v728_v42, 16 }
 0x109   : > { %v1532_v39 = vpop.f32.mrf.mxu3  ;;  %v623_v43 = vadd.f32 %v622_v36, %v5281_v61  ;;  %v1068_v61 = vshll.u32 %v726_v21, 16 }
 0x10a   : > { %v1603_v32 = vadd.f32 %v1532_v39, %v1316_v3  ;;  %v1066_v31 = vrot.slane %v1065_v60, 4 }
 0x10b   : > { %v1821_v33 = vpop.f32.mrf.mxu0  ;;  %v1070_v34 = vrot.slane %v1068_v61, 5  ;;  %v729_v61 = vld [vmem:[%s5052_s27 + $0xb0] sm:$0x1] }
 0x10c   : > { %v5363_v62 = vadd.f32 %v1819_v16, %v1603_v32  ;;  %v1056_v16 = vrot.slane %v1055_v57, 4  ;;  %v1088_v57 = vrot.slane %v1086_v13, 4  ;;  %v1092_v42 = vshll.u32 %v729_v61, 16 }
 0x10d   : > { %v1071_v50 = vsel %vm5099_vm5, %v1066_v31, %v1070_v34  ;;  %v4833_v34 = vld [vmem:[%s5052_s27 + $0x234] sm:$0xff] }
 0x10e   : > { %v1247_v8 = vpop.f32.mrf.mxu2 }
 0x10f   : > { %v1317_v6 = vadd.f32 %v1247_v8, %v623_v43  ;;  %v1061_v43 = vsel %vm5099_vm5, %v1056_v16, %v1060_v59  ;;  %v1078_v59 = vrot.slane %v1076_v41, 5  ;;  %v731_v41 = vld [vmem:[%s5052_s27 + $0xb8] sm:$0xf] }
 0x110   : > { %v625_v20 = vpop.f32.mrf.mxu1  ;;  %v1148_v8 = vunpack.c.l.b16 %v1061_v43 }
 0x111   : > { %v1534_v5 = vpop.f32.mrf.mxu3  ;;  %v626_v39 = vadd.f32 %v625_v20, %v5169_v45 }
 0x112   : > { %v1604_v22 = vadd.f32 %v1534_v5, %v1317_v6  ;;  %v1075_v5 = vrot.slane %v1073_v52, 4 }
 0x113   : > { %v1824_v38 = vpop.f32.mrf.mxu0  ;;  %4182 = vmatmul.msk.bf16.gmra.mxu1 %vm320_vm2, %v4800_v10  ;;  %4199 = vmatmul.msk.bf16.gmra.mxu2 %vm320_vm2, %v1166_v9  ;;  %v1149_v9 = vunpack.c.l.b16 %v1071_v50  ;;  %v1084_v10 = vrot.slane %v1082_v51, 5 }
 0x114   : > { %v5371_v3 = vadd.f32 %v1821_v33, %v1604_v22  ;;  %v4801_v22 = vld [vmem:[%s5052_s27 + $0x9c] sm:$0xff]  ;;  %v1079_v40 = vor.u32 %v1078_v59, %v1075_v5 }
 0x115   : > { %v1167_v16 = vpack.c.b16 %v1149_v9, %v1148_v8 }
 0x116   : > { %4312 = vmatmul.msk.bf16.gmra.mxu3 %vm320_vm2, %v4832_v23  ;;  %4425 = vmatmul.msk.bf16.gmra.mxu0 %vm320_vm2, %v4848_v14  ;;  %v1250_v37 = vpop.f32.mrf.mxu2  ;;  %v1080_v43 = vrot.slane %v1079_v40, 4 }
 0x117   : > { %v1318_v36 = vadd.f32 %v1250_v37, %v626_v39  ;;  %v4849_v39 = vld [vmem:[%s5052_s27 + $0x300] sm:$0xff] }
 0x118   : > { %v627_v33 = vpop.f32.mrf.mxu1 }
 0x119   : > { %v1537_v32 = vpop.f32.mrf.mxu3  ;;  %v628_v60 = vadd.f32 %v627_v33, %v5185_v0  ;;  %v730_v0 = vld [vmem:[%s5052_s27 + $0xb4] sm:$0xf]  ;;  %v1094_v33 = vrot.slane %v1092_v42, 5 }
 0x11a   : > { %v1605_v21 = vadd.f32 %v1537_v32, %v1318_v36  ;;  %v1097_v13 = vshrl.u32 %v730_v0, 16 }
 0x11b   : > { %v1826_v45 = vpop.f32.mrf.mxu0 }
 0x11c   : > { %v5382_v6 = vadd.f32 %v1824_v38, %v1605_v21  ;;  %v1089_v38 = vor.u32 %v1088_v57, %v1084_v10  ;;  %v1100_v21 = vshll.u32 %v730_v0, 16  ;;  %v1106_v57 = vshll.u32 %v731_v41, 16  ;;  %v4802_v0 = vld [vmem:[%s5052_s27 + $0xa8] sm:$0xff] }
 0x11e   : > { %v1252_v20 = vpop.f32.mrf.mxu2  ;;  %v1090_v50 = vrot.slane %v1089_v38, 4 }
 0x11f   : > { %v1319_v23 = vadd.f32 %v1252_v20, %v628_v60  ;;  %v1110_v60 = vshrl.u32 %v731_v41, 16 }
 0x120   : > { %v630_v31 = vpop.f32.mrf.mxu1  ;;  %v1095_v59 = vsel %vm5099_vm5, %v1090_v50, %v1094_v33  ;;  %v4834_v33 = vld [vmem:[%s5052_s27 + $0x240] sm:$0xff] }
 0x121   : > { %v1539_v14 = vpop.f32.mrf.mxu3  ;;  %v631_v52 = vadd.f32 %v630_v31, %v5199_v18  ;;  %v1099_v18 = vrot.slane %v1097_v13, 4  ;;  %v1112_v31 = vrot.slane %v1110_v60, 4 }
 0x122   : > { %v1606_v37 = vadd.f32 %v1539_v14, %v1319_v23  ;;  %v1102_v23 = vrot.slane %v1100_v21, 5 }
 0x123   : > { %v1829_v36 = vpop.f32.mrf.mxu0  ;;  %4183 = vmatmul.msk.bf16.gmra.mxu1 %vm320_vm2, %v4801_v22  ;;  %4200 = vmatmul.msk.bf16.gmra.mxu2 %vm320_vm2, %v1167_v16  ;;  %v1151_v22 = vunpack.c.l.b16 %v1095_v59  ;;  %v1108_v16 = vrot.slane %v1106_v57, 5  ;;  %v4720_v57 = vld [vmem:[%s5052_s27 + $0xc] sm:$0xf] }
 0x124   : > { %v5392_v32 = vadd.f32 %v1826_v45, %v1606_v37  ;;  %v1085_v45 = vsel %vm5099_vm5, %v1080_v43, %v1084_v10  ;;  %v1103_v38 = vor.u32 %v1102_v23, %v1099_v18  ;;  %v4721_v18 = vld [vmem:[%s5052_s27 + $0x10] sm:$0xf] }
 0x125   : > { %v1150_v14 = vunpack.c.l.b16 %v1085_v45  ;;  %v1113_v41 = vor.u32 %v1112_v31, %v1108_v16  ;;  %v4430_v45 = vld [vmem:[%s5052_s27 + $0x19c] sm:$0xf] }
 0x126   : > { %4313 = vmatmul.msk.bf16.gmra.mxu3 %vm320_vm2, %v4833_v34  ;;  %4426 = vmatmul.msk.bf16.gmra.mxu0 %vm320_vm2, %v4849_v39  ;;  %v1255_v51 = vpop.f32.mrf.mxu2  ;;  %v732_v39 = vld [vmem:[%s5052_s27 + $0xbc] sm:$0x1]  ;;  %v1104_v21 = vrot.slane %v1103_v38, 4  ;;  %v1974_v31 = vshll.u32 %v4430_v45, 16  ;;  %v3193_v38 = vshrl.u32 %v4720_v57, 16 }
 0x127   : > { %v1320_v8 = vadd.f32 %v1255_v51, %v631_v52  ;;  %v1168_v43 = vpack.c.b16 %v1151_v22, %v1150_v14  ;;  %v4850_v52 = vld [vmem:[%s5052_s27 + $0x30c] sm:$0xff]  ;;  %v1116_v51 = vshll.u32 %v732_v39, 16 }
 0x128   : > { %v632_v5 = vpop.f32.mrf.mxu1 }
 0x129   : > { %v1542_v9 = vpop.f32.mrf.mxu3  ;;  %v633_v10 = vadd.f32 %v632_v5, %v5219_v35  ;;  %v4429_v5 = vld [vmem:[%s5052_s27 + $0x198] sm:$0xf] }
 0x12a   : > { %v1607_v61 = vadd.f32 %v1542_v9, %v1320_v8  ;;  %v1114_v8 = vrot.slane %v1113_v41, 4  ;;  %v1118_v9 = vrot.slane %v1116_v51, 5  ;;  %v1968_v22 = vshll.u32 %v4429_v5, 16 }
 0x12b   : > { %v1831_v20 = vpop.f32.mrf.mxu0  ;;  %v5424_v41 = vrot.slane %v1974_v31, 5  ;;  %v4835_v31 = vld [vmem:[%s5052_s27 + $0x24c] sm:$0xff] }
 0x12c   : > { %v5402_v34 = vadd.f32 %v1829_v36, %v1607_v61  ;;  %v1109_v61 = vsel %vm5099_vm5, %v1104_v21, %v1108_v16  ;;  %v1119_v39 = vsel %vm5099_vm5, %v1114_v8, %v1118_v9 }
 0x12d   : > { %v1152_v16 = vunpack.c.l.b16 %v1109_v61 }
 0x12e   : > { %v1257_v40 = vpop.f32.mrf.mxu2 }
 0x12f   : > { %v1321_v42 = vadd.f32 %v1257_v40, %v633_v10  ;;  %v1978_v40 = vshrl.u32 %v4430_v45, 16  ;;  %v4722_v45 = vld [vmem:[%s5052_s27 + $0x14] sm:$0x1] }
 0x130   : > { %v635_v50 = vpop.f32.mrf.mxu1 }
 0x131   : > { %v1544_v37 = vpop.f32.mrf.mxu3  ;;  %v636_v59 = vadd.f32 %v635_v50, %v5229_v53  ;;  %v1153_v50 = vunpack.c.l.b16 %v1119_v39  ;;  %v1980_v51 = vrot.slane %v1978_v40, 4  ;;  %v4851_v39 = vld [vmem:[%s5052_s27 + $0x318] sm:$0xff] }
 0x132   : > { %v1608_v13 = vadd.f32 %v1544_v37, %v1321_v42  ;;  %v3196_v42 = vshll.u32 %v4720_v57, 16 }
 0x133   : > { %v1834_v36 = vpop.f32.mrf.mxu0  ;;  %4184 = vmatmul.msk.bf16.gmra.mxu1 %vm320_vm2, %v4802_v0  ;;  %4201 = vmatmul.msk.bf16.gmra.mxu2 %vm320_vm2, %v1168_v43  ;;  %v3202_v0 = vshll.u32 %v4721_v18, 16  ;;  %v3206_v43 = vshrl.u32 %v4721_v18, 16 }
 0x134   : > { %v5411_v35 = vadd.f32 %v1831_v20, %v1608_v13  ;;  %v1965_v20 = vshrl.u32 %v4429_v5, 16  ;;  %v3195_v13 = vrot.slane %v3193_v38, 4  ;;  %v3198_v21 = vrot.slane %v3196_v42, 5  ;;  %v4431_v5 = vld [vmem:[%s5052_s27 + $0x1a0] sm:$0x1] }
 0x135   : > { %v3208_v57 = vrot.slane %v3206_v43, 4  ;;  %v1984_v40 = vshll.u32 %v4431_v5, 16 }
 0x136   : > { %4314 = vmatmul.msk.bf16.gmra.mxu3 %vm320_vm2, %v4834_v33  ;;  %4427 = vmatmul.msk.bf16.gmra.mxu0 %vm320_vm2, %v4850_v52  ;;  %v1260_v60 = vpop.f32.mrf.mxu2  ;;  %v1967_v33 = vrot.slane %v1965_v20, 4  ;;  %v1970_v52 = vrot.slane %v1968_v22, 5 }
 0x137   : > { %v1322_v23 = vadd.f32 %v1260_v60, %v636_v59  ;;  %v3204_v59 = vrot.slane %v3202_v0, 5  ;;  %v4432_v0 = vld [vmem:[%s5052_s27 + $0x1a4] sm:$0xf] }
 0x138   : > { %v637_v10 = vpop.f32.mrf.mxu1  ;;  %v1971_v20 = vor.u32 %v1970_v52, %v1967_v33 }
 0x139   : > { %v1547_v14 = vpop.f32.mrf.mxu3  ;;  %v638_v9 = vadd.f32 %v637_v10, %v5249_v7  ;;  %v3199_v7 = vor.u32 %v3198_v21, %v3195_v13  ;;  %v3212_v10 = vshll.u32 %v4722_v45, 16  ;;  %v1989_v45 = vshrl.u32 %v4432_v0, 16 }
 0x13a   : > { %v1609_v53 = vadd.f32 %v1547_v14, %v1322_v23  ;;  %v4803_v23 = vld [vmem:[%s5052_s27 + $0xb4] sm:$0xff]  ;;  %v1169_v14 = vpack.c.b16 %v1153_v50, %v1152_v16  ;;  %v1972_v43 = vrot.slane %v1971_v20, 4  ;;  %v4433_v16 = vld [vmem:[%s5052_s27 + $0x1a8] sm:$0xf] }
 0x13b   : > { %v1836_v37 = vpop.f32.mrf.mxu0  ;;  %v4723_v50 = vld [vmem:[%s5052_s27 + $0x18] sm:$0xf]  ;;  %v3200_v13 = vrot.slane %v3199_v7, 4  ;;  %v3214_v21 = vrot.slane %v3212_v10, 5 }
 0x13c   : > { %v5426_v8 = vadd.f32 %v1834_v36, %v1609_v53  ;;  %v1981_v36 = vor.u32 %v1980_v51, %v5424_v41  ;;  %v3209_v53 = vor.u32 %v3208_v57, %v3204_v59  ;;  %v1986_v51 = vrot.slane %v1984_v40, 5 }
 0x13d   : > { %v1992_v57 = vshll.u32 %v4432_v0, 16  ;;  %v1991_v0 = vrot.slane %v1989_v45, 4 }
 0x13e   : > { %6005 = vst [vmem:[#allocation2_spill] sm:$0xff] %v5426_v8  ;;  %v1262_v60 = vpop.f32.mrf.mxu2  ;;  %v1982_v52 = vrot.slane %v1981_v36, 4  ;;  %v3210_v5 = vrot.slane %v3209_v53, 4 }
 0x13f   : > { %v1323_v61 = vadd.f32 %v1262_v60, %v638_v9  ;;  %v4724_v60 = vld [vmem:[%s5052_s27 + $0x1c] sm:$0xf] }
 0x140   : > { %v640_v22 = vpop.f32.mrf.mxu1  ;;  %v1987_v36 = vsel %vm5099_vm5, %v1982_v52, %v1986_v51  ;;  %v3230_v40 = vshrl.u32 %v4724_v60, 16  ;;  %v3215_v53 = vsel %vm5099_vm5, %v3210_v5, %v3214_v21  ;;  %v4725_v5 = vld [vmem:[%s5052_s27 + $0x20] sm:$0x1] }
 0x141   : > { %v1549_v18 = vpop.f32.mrf.mxu3  ;;  %v641_v9 = vadd.f32 %v640_v22, %v5259_v29  ;;  %v3205_v29 = vsel %vm5099_vm5, %v3200_v13, %v3204_v59  ;;  %v3226_v22 = vshll.u32 %v4724_v60, 16  ;;  %v2351_v51 = vunpack.c.l.b16 %v1987_v36  ;;  %v4434_v59 = vld [vmem:[%s5052_s27 + $0x1ac] sm:$0x1] }
 0x142   : > { %v1610_v38 = vadd.f32 %v1549_v18, %v1323_v61  ;;  %v1998_v18 = vshll.u32 %v4433_v16, 16  ;;  %v3579_v13 = vunpack.c.l.b16 %v3215_v53  ;;  %v4868_v53 = vld [vmem:[%s5052_s27 + $0xd8] sm:$0xff] }
 0x143   : > { %v1839_v42 = vpop.f32.mrf.mxu0  ;;  %4185 = vmatmul.msk.bf16.gmra.mxu1 %vm320_vm2, %v4803_v23  ;;  %4202 = vmatmul.msk.bf16.gmra.mxu2 %vm320_vm2, %v1169_v14  ;;  %v2002_v23 = vshrl.u32 %v4433_v16, 16  ;;  %v3217_v14 = vshrl.u32 %v4723_v50, 16  ;;  %v1994_v16 = vrot.slane %v1992_v57, 5  ;;  %v3228_v60 = vrot.slane %v3226_v22, 5 }
 0x144   : > { %v5440_v33 = vadd.f32 %v1836_v37, %v1610_v38  ;;  %v3220_v37 = vshll.u32 %v4723_v50, 16  ;;  %v5455_v50 = vrot.slane %v1998_v18, 5 }
 0x145   : > { %v1995_v57 = vor.u32 %v1994_v16, %v1991_v0 }
 0x146   : > { %6006 = vst [vmem:[#allocation3_spill] sm:$0xff] %v5440_v33  ;;  %4315 = vmatmul.msk.bf16.gmra.mxu3 %vm320_vm2, %v4835_v31  ;;  %4428 = vmatmul.msk.bf16.gmra.mxu0 %vm320_vm2, %v4851_v39  ;;  %v1265_v61 = vpop.f32.mrf.mxu2  ;;  %v1977_v31 = vsel %vm5099_vm5, %v1972_v43, %v5424_v41  ;;  %v2004_v41 = vrot.slane %v2002_v23, 4  ;;  %v3219_v43 = vrot.slane %v3217_v14, 4  ;;  %v2008_v23 = vshll.u32 %v4434_v59, 16  ;;  %v4726_v59 = vld [vmem:[%s5052_s27 + $0x24] sm:$0xf] }
 0x147   : > { %v1324_v20 = vadd.f32 %v1265_v61, %v641_v9  ;;  %v3222_v9 = vrot.slane %v3220_v37, 5  ;;  %v2350_v52 = vunpack.c.l.b16 %v1977_v31  ;;  %v3578_v61 = vunpack.c.l.b16 %v3205_v29  ;;  %v4852_v29 = vld [vmem:[%s5052_s27 + $0xc] sm:$0xff] }
 0x148   : > { %v642_v39 = vpop.f32.mrf.mxu1  ;;  %v2005_v18 = vor.u32 %v2004_v41, %v5455_v50  ;;  %v2010_v0 = vrot.slane %v2008_v23, 5 }
 0x149   : > { %v1552_v38 = vpop.f32.mrf.mxu3  ;;  %v643_v21 = vadd.f32 %v642_v39, %v5275_v56  ;;  %v3223_v14 = vor.u32 %v3222_v9, %v3219_v43  ;;  %v2382_v36 = vpack.c.b16 %v2351_v51, %v2350_v52  ;;  %v3610_v8 = vpack.c.b16 %v3579_v13, %v3578_v61  ;;  %v4435_v52 = vld [vmem:[%s5052_s27 + $0x1b0] sm:$0xf]  ;;  %v4436_v51 = vld [vmem:[%s5052_s27 + $0x1b4] sm:$0xf] }
 0x14a   : > { %v1611_v7 = vadd.f32 %v1552_v38, %v1324_v20  ;;  %v3232_v20 = vrot.slane %v3230_v40, 4  ;;  %v1996_v39 = vrot.slane %v1995_v57, 4  ;;  %v2013_v57 = vshrl.u32 %v4435_v52, 16 }
 0x14b   : > { %v1841_v10 = vpop.f32.mrf.mxu0  ;;  %v3224_v16 = vrot.slane %v3223_v14, 4  ;;  %v2022_v23 = vshll.u32 %v4436_v51, 16 }
 0x14c   : > { %v5458_v38 = vadd.f32 %v1839_v42, %v1611_v7  ;;  %v3233_v22 = vor.u32 %v3232_v20, %v3228_v60  ;;  %v3236_v42 = vshll.u32 %v4725_v5, 16  ;;  %v2006_v7 = vrot.slane %v2005_v18, 4  ;;  %v4727_v5 = vld [vmem:[%s5052_s27 + $0x28] sm:$0xf] }
 0x14d   : > { %v2001_v20 = vsel %vm5099_vm5, %v1996_v39, %v5455_v50  ;;  %v2016_v18 = vshll.u32 %v4435_v52, 16  ;;  %v2015_v39 = vrot.slane %v2013_v57, 4 }
 0x14e   : > { %v1267_v45 = vpop.f32.mrf.mxu2  ;;  %v3234_v43 = vrot.slane %v3233_v22, 4  ;;  %v3238_v9 = vrot.slane %v3236_v42, 5 }
 0x14f   : > { %v1325_v37 = vadd.f32 %v1267_v45, %v643_v21  ;;  %v3229_v21 = vsel %vm5099_vm5, %v3224_v16, %v3228_v60  ;;  %v2352_v60 = vunpack.c.l.b16 %v2001_v20 }
 0x150   : > { %v645_v33 = vpop.f32.mrf.mxu1  ;;  %v3580_v42 = vunpack.c.l.b16 %v3229_v21 }
 0x151   : > { %v1554_v31 = vpop.f32.mrf.mxu3  ;;  %v646_v61 = vadd.f32 %v645_v33, %v5181_v58  ;;  %v3239_v58 = vsel %vm5099_vm5, %v3234_v43, %v3238_v9  ;;  %v2026_v33 = vshrl.u32 %v4436_v51, 16 }
 0x152   : > { %v1612_v40 = vadd.f32 %v1554_v31, %v1325_v37  ;;  %v3241_v37 = vshrl.u32 %v4726_v59, 16  ;;  %v3244_v31 = vshll.u32 %v4726_v59, 16  ;;  %v4728_v59 = vld [vmem:[%s5052_s27 + $0x2c] sm:$0x1] }
 0x153   : > { %v1844_v56 = vpop.f32.mrf.mxu0  ;;  %4478 = vmatmul.msk.bf16.vlgmr.msra.gmra.mxu1 %vm320_vm2, %v2382_v36  ;;  %4591 = vmatmul.msk.bf16.vlgmr.msra.gmra.mxu2 %vm320_vm2, %v4852_v29  ;;  %v3250_v29 = vshll.u32 %v4727_v5, 16  ;;  %v2028_v16 = vrot.slane %v2026_v33, 4 }
 0x154   : > { %v5467_v41 = vadd.f32 %v1841_v10, %v1612_v40  ;;  %v2011_v10 = vsel %vm5099_vm5, %v2006_v7, %v2010_v0  ;;  %v3581_v40 = vunpack.c.l.b16 %v3239_v58  ;;  %v2018_v7 = vrot.slane %v2016_v18, 5  ;;  %v4869_v58 = vld [vmem:[%s5052_s27 + $0xe4] sm:$0xff] }
 0x155   : > { %v2353_v22 = vunpack.c.l.b16 %v2011_v10  ;;  %v5485_v0 = vrot.slane %v2022_v23, 5  ;;  %v3243_v43 = vrot.slane %v3241_v37, 4  ;;  %v3246_v9 = vrot.slane %v3244_v31, 5 }
 0x156   : > { %4704 = vmatmul.msk.bf16.vlgmr.msra.gmra.mxu3 %vm320_vm2, %v4868_v53  ;;  %4769 = vmatmul.msk.bf16.vlgmr.msra.gmra.mxu0 %vm320_vm2, %v3610_v8  ;;  %v1270_v13 = vpop.f32.mrf.mxu2  ;;  %v3254_v53 = vshrl.u32 %v4727_v5, 16  ;;  %v3611_v57 = vpack.c.b16 %v3581_v40, %v3580_v42  ;;  %v2019_v18 = vor.u32 %v2018_v7, %v2015_v39 }
 0x157   : > { %v1326_v8 = vadd.f32 %v1270_v13, %v646_v61  ;;  %v4437_v61 = vld [vmem:[%s5052_s27 + $0x1b8] sm:$0x1]  ;;  %v3252_v13 = vrot.slane %v3250_v29, 5  ;;  %v4438_v29 = vld [vmem:[%s5052_s27 + $0x1bc] sm:$0xf] }
 0x158   : > { %v647_v14 = vpop.f32.mrf.mxu1  ;;  %v3256_v20 = vrot.slane %v3254_v53, 4  ;;  %v2032_v33 = vshll.u32 %v4437_v61, 16  ;;  %v2020_v53 = vrot.slane %v2019_v18, 4  ;;  %v2040_v61 = vshll.u32 %v4438_v29, 16 }
 0x159   : > { %v1557_v45 = vpop.f32.mrf.mxu3  ;;  %v648_v51 = vadd.f32 %v647_v14, %v5194_v11  ;;  %v3247_v11 = vor.u32 %v3246_v9, %v3243_v43  ;;  %v3260_v14 = vshll.u32 %v4728_v59, 16  ;;  %v4730_v59 = vld [vmem:[%s5052_s27 + $0x34] sm:$0xf] }
 0x15a   : > { %v1613_v50 = vadd.f32 %v1557_v45, %v1326_v8  ;;  %v2383_v8 = vpack.c.b16 %v2353_v22, %v2352_v60  ;;  %v4853_v45 = vld [vmem:[%s5052_s27 + $0x18] sm:$0xff]  ;;  %v4439_v60 = vld [vmem:[%s5052_s27 + $0x1c0] sm:$0xf]  ;;  %v4729_v22 = vld [vmem:[%s5052_s27 + $0x30] sm:$0xf]  ;;  %v2034_v39 = vrot.slane %v2032_v33, 5 }
 0x15b   : > { %v1846_v36 = vpop.f32.mrf.mxu0  ;;  %v3248_v7 = vrot.slane %v3247_v11, 4 }
 0x15c   : > { %v5487_v52 = vadd.f32 %v1844_v56, %v1613_v50  ;;  %v2029_v56 = vor.u32 %v2028_v16, %v5485_v0  ;;  %v3257_v50 = vor.u32 %v3256_v20, %v3252_v13  ;;  %v3262_v16 = vrot.slane %v3260_v14, 5 }
 0x15e   : > { %v1272_v10 = vpop.f32.mrf.mxu2  ;;  %v2030_v40 = vrot.slane %v2029_v56, 4  ;;  %v3258_v9 = vrot.slane %v3257_v50, 4  ;;  %v3278_v56 = vshrl.u32 %v4730_v59, 16  ;;  %v2042_v50 = vrot.slane %v2040_v61, 5 }
 0x15f   : > { %v1327_v21 = vadd.f32 %v1272_v10, %v648_v51  ;;  %v2037_v51 = vshrl.u32 %v4438_v29, 16  ;;  %v2046_v10 = vshll.u32 %v4439_v60, 16 }
 0x160   : > { %v650_v23 = vpop.f32.mrf.mxu1  ;;  %v3263_v14 = vsel %vm5099_vm5, %v3258_v9, %v3262_v16  ;;  %v4731_v9 = vld [vmem:[%s5052_s27 + $0x38] sm:$0x1] }
 0x161   : > { %v1559_v5 = vpop.f32.mrf.mxu3  ;;  %v651_v43 = vadd.f32 %v650_v23, %v5211_v27  ;;  %v3253_v27 = vsel %vm5099_vm5, %v3248_v7, %v3252_v13  ;;  %v3274_v23 = vshll.u32 %v4730_v59, 16  ;;  %v5515_v29 = vrot.slane %v2046_v10, 5  ;;  %v4440_v13 = vld [vmem:[%s5052_s27 + $0x1c4] sm:$0x1] }
 0x162   : > { %v1614_v37 = vadd.f32 %v1559_v5, %v1327_v21  ;;  %v2050_v21 = vshrl.u32 %v4439_v60, 16  ;;  %v3265_v5 = vshrl.u32 %v4729_v22, 16  ;;  %v3583_v7 = vunpack.c.l.b16 %v3263_v14 }
 0x163   : > { %v1849_v31 = vpop.f32.mrf.mxu0  ;;  %4479 = vmatmul.msk.bf16.gmra.mxu1 %vm320_vm2, %v2383_v8  ;;  %4592 = vmatmul.msk.bf16.gmra.mxu2 %vm320_vm2, %v4853_v45  ;;  %v3280_v59 = vrot.slane %v3278_v56, 4 }
 0x164   : > { %v5500_v42 = vadd.f32 %v1846_v36, %v1614_v37  ;;  %v3268_v36 = vshll.u32 %v4729_v22, 16  ;;  %v2039_v37 = vrot.slane %v2037_v51, 4 }
 0x166   : > { %4705 = vmatmul.msk.bf16.gmra.mxu3 %vm320_vm2, %v4869_v58  ;;  %4770 = vmatmul.msk.bf16.gmra.mxu0 %vm320_vm2, %v3611_v57  ;;  %v1275_v20 = vpop.f32.mrf.mxu2  ;;  %v2025_v57 = vsel %vm5099_vm5, %v2020_v53, %v5485_v0  ;;  %v2035_v58 = vsel %vm5099_vm5, %v2030_v40, %v2034_v39  ;;  %v2052_v0 = vrot.slane %v2050_v21, 4  ;;  %v3267_v53 = vrot.slane %v3265_v5, 4 }
 0x167   : > { %v1328_v8 = vadd.f32 %v1275_v20, %v651_v43  ;;  %v3270_v60 = vrot.slane %v3268_v36, 5  ;;  %v2354_v22 = vunpack.c.l.b16 %v2025_v57  ;;  %v2355_v40 = vunpack.c.l.b16 %v2035_v58  ;;  %v4854_v57 = vld [vmem:[%s5052_s27 + $0x24] sm:$0xff] }
 0x168   : > { %v652_v18 = vpop.f32.mrf.mxu1  ;;  %v3582_v39 = vunpack.c.l.b16 %v3253_v27  ;;  %v3276_v43 = vrot.slane %v3274_v23, 5  ;;  %v2043_v61 = vor.u32 %v2042_v50, %v2039_v37  ;;  %v2053_v10 = vor.u32 %v2052_v0, %v5515_v29  ;;  %v4870_v27 = vld [vmem:[%s5052_s27 + $0xf0] sm:$0xff] }
 0x169   : > { %v1562_v45 = vpop.f32.mrf.mxu3  ;;  %v653_v16 = vadd.f32 %v652_v18, %v5224_v44  ;;  %v2056_v21 = vshll.u32 %v4440_v13, 16  ;;  %v3271_v5 = vor.u32 %v3270_v60, %v3267_v53  ;;  %v4732_v13 = vld [vmem:[%s5052_s27 + $0x3c] sm:$0xf] }
 0x16a   : > { %v1615_v33 = vadd.f32 %v1562_v45, %v1328_v8  ;;  %v2384_v45 = vpack.c.b16 %v2355_v40, %v2354_v22  ;;  %v3612_v14 = vpack.c.b16 %v3583_v7, %v3582_v39  ;;  %v3281_v23 = vor.u32 %v3280_v59, %v3276_v43  ;;  %v4441_v22 = vld [vmem:[%s5052_s27 + $0x1c8] sm:$0xf]  ;;  %v4442_v40 = vld [vmem:[%s5052_s27 + $0x1cc] sm:$0xf] }
 0x16b   : > { %v1851_v11 = vpop.f32.mrf.mxu0  ;;  %v2044_v18 = vrot.slane %v2043_v61, 4  ;;  %v2058_v37 = vrot.slane %v2056_v21, 5  ;;  %v3272_v50 = vrot.slane %v3271_v5, 4  ;;  %v2064_v21 = vshll.u32 %v4441_v22, 16 }
 0x16c   : > { %v5518_v20 = vadd.f32 %v1849_v31, %v1615_v33  ;;  %v3284_v31 = vshll.u32 %v4731_v9, 16  ;;  %v2054_v33 = vrot.slane %v2053_v10, 4  ;;  %v3282_v53 = vrot.slane %v3281_v23, 4  ;;  %v4733_v9 = vld [vmem:[%s5052_s27 + $0x40] sm:$0xf] }
 0x16d   : > { %v2049_v59 = vsel %vm5099_vm5, %v2044_v18, %v5515_v29  ;;  %v2061_v10 = vshrl.u32 %v4441_v22, 16  ;;  %v2070_v5 = vshll.u32 %v4442_v40, 16 }
 0x16e   : > { %v1277_v51 = vpop.f32.mrf.mxu2  ;;  %v3286_v60 = vrot.slane %v3284_v31, 5 }
 0x16f   : > { %v1329_v36 = vadd.f32 %v1277_v51, %v653_v16  ;;  %v3277_v16 = vsel %vm5099_vm5, %v3272_v50, %v3276_v43  ;;  %v2356_v43 = vunpack.c.l.b16 %v2049_v59  ;;  %v2063_v18 = vrot.slane %v2061_v10, 4 }
 0x170   : > { %v655_v58 = vpop.f32.mrf.mxu1  ;;  %v3584_v31 = vunpack.c.l.b16 %v3277_v16 }
 0x171   : > { %v1564_v8 = vpop.f32.mrf.mxu3  ;;  %v656_v39 = vadd.f32 %v655_v58, %v5241_v2  ;;  %v3287_v2 = vsel %vm5099_vm5, %v3282_v53, %v3286_v60 }
 0x172   : > { %v1616_v56 = vadd.f32 %v1564_v8, %v1329_v36  ;;  %v2074_v8 = vshrl.u32 %v4442_v40, 16 }
 0x173   : > { %v1854_v44 = vpop.f32.mrf.mxu0  ;;  %4480 = vmatmul.msk.bf16.gmra.mxu1 %vm320_vm2, %v2384_v45  ;;  %4593 = vmatmul.msk.bf16.gmra.mxu2 %vm320_vm2, %v4854_v57  ;;  %v3289_v45 = vshrl.u32 %v4732_v13, 16  ;;  %v3292_v57 = vshll.u32 %v4732_v13, 16  ;;  %v4734_v13 = vld [vmem:[%s5052_s27 + $0x44] sm:$0x1] }
 0x174   : > { %v5527_v0 = vadd.f32 %v1851_v11, %v1616_v56  ;;  %v2059_v11 = vsel %vm5099_vm5, %v2054_v33, %v2058_v37  ;;  %v3585_v56 = vunpack.c.l.b16 %v3287_v2  ;;  %v2066_v33 = vrot.slane %v2064_v21, 5  ;;  %v4871_v2 = vld [vmem:[%s5052_s27 + $0xfc] sm:$0xff] }
 0x175   : > { %v2357_v23 = vunpack.c.l.b16 %v2059_v11  ;;  %v5545_v37 = vrot.slane %v2070_v5, 5  ;;  %v2076_v50 = vrot.slane %v2074_v8, 4  ;;  %v3291_v53 = vrot.slane %v3289_v45, 4 }
 0x176   : > { %4706 = vmatmul.msk.bf16.gmra.mxu3 %vm320_vm2, %v4870_v27  ;;  %4771 = vmatmul.msk.bf16.gmra.mxu0 %vm320_vm2, %v3612_v14  ;;  %v1280_v7 = vpop.f32.mrf.mxu2  ;;  %v3298_v27 = vshll.u32 %v4733_v9, 16  ;;  %v3302_v14 = vshrl.u32 %v4733_v9, 16  ;;  %v3294_v60 = vrot.slane %v3292_v57, 5  ;;  %v3613_v10 = vpack.c.b16 %v3585_v56, %v3584_v31 }
 0x177   : > { %v1330_v51 = vadd.f32 %v1280_v7, %v656_v39  ;;  %v4443_v39 = vld [vmem:[%s5052_s27 + $0x1d0] sm:$0x1]  ;;  %v2067_v21 = vor.u32 %v2066_v33, %v2063_v18 }
 0x178   : > { %v657_v36 = vpop.f32.mrf.mxu1  ;;  %v3300_v7 = vrot.slane %v3298_v27, 5  ;;  %v3304_v59 = vrot.slane %v3302_v14, 4  ;;  %v2080_v8 = vshll.u32 %v4443_v39, 16  ;;  %v4444_v27 = vld [vmem:[%s5052_s27 + $0x1d4] sm:$0xf] }
 0x179   : > { %v1567_v61 = vpop.f32.mrf.mxu3  ;;  %v658_v40 = vadd.f32 %v657_v36, %v5254_v24  ;;  %v3295_v24 = vor.u32 %v3294_v60, %v3291_v53  ;;  %v3308_v36 = vshll.u32 %v4734_v13, 16  ;;  %v2068_v14 = vrot.slane %v2067_v21, 4  ;;  %v4736_v13 = vld [vmem:[%s5052_s27 + $0x4c] sm:$0xf] }
 0x17a   : > { %v1617_v29 = vadd.f32 %v1567_v61, %v1330_v51  ;;  %v2385_v51 = vpack.c.b16 %v2357_v23, %v2356_v43  ;;  %v4855_v61 = vld [vmem:[%s5052_s27 + $0x30] sm:$0xff]  ;;  %v4445_v43 = vld [vmem:[%s5052_s27 + $0x1d8] sm:$0xf]  ;;  %v4735_v23 = vld [vmem:[%s5052_s27 + $0x48] sm:$0xf]  ;;  %v2082_v18 = vrot.slane %v2080_v8, 5 }
 0x17b   : > { %v1856_v58 = vpop.f32.mrf.mxu0  ;;  %v3296_v33 = vrot.slane %v3295_v24, 4  ;;  %v2088_v39 = vshll.u32 %v4444_v27, 16 }
 0x17c   : > { %v5547_v22 = vadd.f32 %v1854_v44, %v1617_v29  ;;  %v2077_v44 = vor.u32 %v2076_v50, %v5545_v37  ;;  %v3305_v29 = vor.u32 %v3304_v59, %v3300_v7  ;;  %v3310_v50 = vrot.slane %v3308_v36, 5 }
 0x17e   : > { %v1282_v11 = vpop.f32.mrf.mxu2  ;;  %v2078_v56 = vrot.slane %v2077_v44, 4  ;;  %v3306_v60 = vrot.slane %v3305_v29, 4  ;;  %v3326_v44 = vshrl.u32 %v4736_v13, 16  ;;  %v2090_v29 = vrot.slane %v2088_v39, 5 }
 0x17f   : > { %v1331_v16 = vadd.f32 %v1282_v11, %v658_v40  ;;  %v2085_v40 = vshrl.u32 %v4444_v27, 16  ;;  %v2094_v11 = vshll.u32 %v4445_v43, 16 }
 0x180   : > { %v660_v5 = vpop.f32.mrf.mxu1  ;;  %v3311_v36 = vsel %vm5099_vm5, %v3306_v60, %v3310_v50 }
 0x181   : > { %v1569_v9 = vpop.f32.mrf.mxu3  ;;  %v661_v53 = vadd.f32 %v660_v5, %v5271_v47  ;;  %v3301_v47 = vsel %vm5099_vm5, %v3296_v33, %v3300_v7  ;;  %v3322_v5 = vshll.u32 %v4736_v13, 16  ;;  %v5575_v27 = vrot.slane %v2094_v11, 5  ;;  %v4446_v7 = vld [vmem:[%s5052_s27 + $0x1dc] sm:$0x1] }
 0x182   : > { %v1618_v45 = vadd.f32 %v1569_v9, %v1331_v16  ;;  %v2098_v16 = vshrl.u32 %v4445_v43, 16  ;;  %v3313_v9 = vshrl.u32 %v4735_v23, 16  ;;  %v3587_v33 = vunpack.c.l.b16 %v3311_v36 }
 0x183   : > { %v1859_v57 = vpop.f32.mrf.mxu0  ;;  %4481 = vmatmul.msk.bf16.gmra.mxu1 %vm320_vm2, %v2385_v51  ;;  %4594 = vmatmul.msk.bf16.gmra.mxu2 %vm320_vm2, %v4855_v61  ;;  %v3328_v13 = vrot.slane %v3326_v44, 4 }
 0x184   : > { %v5560_v31 = vadd.f32 %v1856_v58, %v1618_v45  ;;  %v3316_v58 = vshll.u32 %v4735_v23, 16  ;;  %v2087_v45 = vrot.slane %v2085_v40, 4  ;;  %v4737_v40 = vld [vmem:[%s5052_s27 + $0x50] sm:$0x1] }
 0x186   : > { %4707 = vmatmul.msk.bf16.gmra.mxu3 %vm320_vm2, %v4871_v2  ;;  %4772 = vmatmul.msk.bf16.gmra.mxu0 %vm320_vm2, %v3613_v10  ;;  %v1285_v59 = vpop.f32.mrf.mxu2  ;;  %v2073_v10 = vsel %vm5099_vm5, %v2068_v14, %v5545_v37  ;;  %v2083_v2 = vsel %vm5099_vm5, %v2078_v56, %v2082_v18  ;;  %v2100_v37 = vrot.slane %v2098_v16, 4  ;;  %v3315_v14 = vrot.slane %v3313_v9, 4 }
 0x187   : > { %v1332_v51 = vadd.f32 %v1285_v59, %v661_v53  ;;  %v3318_v43 = vrot.slane %v3316_v58, 5  ;;  %v2358_v23 = vunpack.c.l.b16 %v2073_v10  ;;  %v2359_v56 = vunpack.c.l.b16 %v2083_v2  ;;  %v4856_v10 = vld [vmem:[%s5052_s27 + $0x3c] sm:$0xff] }
 0x188   : > { %v662_v21 = vpop.f32.mrf.mxu1  ;;  %v3586_v18 = vunpack.c.l.b16 %v3301_v47  ;;  %v3324_v53 = vrot.slane %v3322_v5, 5  ;;  %v2091_v60 = vor.u32 %v2090_v29, %v2087_v45  ;;  %v2101_v11 = vor.u32 %v2100_v37, %v5575_v27  ;;  %v4872_v47 = vld [vmem:[%s5052_s27 + $0x108] sm:$0xff]  ;;  %v4447_v37 = vld [vmem:[%s5052_s27 + $0x1e0] sm:$0xf] }
 0x189   : > { %v1572_v61 = vpop.f32.mrf.mxu3  ;;  %v663_v50 = vadd.f32 %v662_v21, %v5284_v12  ;;  %v2104_v16 = vshll.u32 %v4446_v7, 16  ;;  %v3319_v9 = vor.u32 %v3318_v43, %v3315_v14 }
 0x18a   : > { %v1619_v8 = vadd.f32 %v1572_v61, %v1332_v51  ;;  %v2386_v61 = vpack.c.b16 %v2359_v56, %v2358_v23  ;;  %v3614_v5 = vpack.c.b16 %v3587_v33, %v3586_v18  ;;  %v3329_v44 = vor.u32 %v3328_v13, %v3324_v53  ;;  %v4448_v56 = vld [vmem:[%s5052_s27 + $0x1e4] sm:$0xf]  ;;  %v4738_v18 = vld [vmem:[%s5052_s27 + $0x54] sm:$0xf]  ;;  %v4739_v13 = vld [vmem:[%s5052_s27 + $0x58] sm:$0xf] }
 0x18b   : > { %v1861_v24 = vpop.f32.mrf.mxu0  ;;  %v2102_v36 = vrot.slane %v2101_v11, 4  ;;  %v2106_v45 = vrot.slane %v2104_v16, 5  ;;  %v3320_v29 = vrot.slane %v3319_v9, 4  ;;  %v2118_v9 = vshll.u32 %v4448_v56, 16 }
 0x18c   : > { %v5578_v59 = vadd.f32 %v1859_v57, %v1619_v8  ;;  %v3332_v57 = vshll.u32 %v4737_v40, 16  ;;  %v2092_v8 = vrot.slane %v2091_v60, 4  ;;  %v3330_v43 = vrot.slane %v3329_v44, 4 }
 0x18d   : > { %v3325_v60 = vsel %vm5099_vm5, %v3320_v29, %v3324_v53  ;;  %v2109_v40 = vshrl.u32 %v4447_v37, 16 }
 0x18e   : > { %v1287_v39 = vpop.f32.mrf.mxu2  ;;  %v3334_v23 = vrot.slane %v3332_v57, 5  ;;  %v2097_v33 = vsel %vm5099_vm5, %v2092_v8, %v5575_v27  ;;  %v3588_v57 = vunpack.c.l.b16 %v3325_v60 }
 0x18f   : > { %v1333_v58 = vadd.f32 %v1287_v39, %v663_v50  ;;  %v2112_v39 = vshll.u32 %v4447_v37, 16  ;;  %v2360_v44 = vunpack.c.l.b16 %v2097_v33 }
 0x190   : > { %v665_v2 = vpop.f32.mrf.mxu1  ;;  %v3335_v27 = vsel %vm5099_vm5, %v3330_v43, %v3334_v23 }
 0x191   : > { %v1574_v51 = vpop.f32.mrf.mxu3  ;;  %v666_v7 = vadd.f32 %v665_v2, %v5183_v63  ;;  %v3350_v2 = vshrl.u32 %v4739_v13, 16  ;;  %v2114_v8 = vrot.slane %v2112_v39, 5 }
 0x192   : > { %v1620_v12 = vadd.f32 %v1574_v51, %v1333_v58  ;;  %v2122_v58 = vshrl.u32 %v4448_v56, 16  ;;  %v3337_v51 = vshrl.u32 %v4738_v18, 16  ;;  %v4449_v56 = vld [vmem:[%s5052_s27 + $0x1e8] sm:$0x1] }
 0x193   : > { %v1864_v21 = vpop.f32.mrf.mxu0  ;;  %4482 = vmatmul.msk.bf16.gmra.mxu1 %vm320_vm2, %v2386_v61  ;;  %4595 = vmatmul.msk.bf16.gmra.mxu2 %vm320_vm2, %v4856_v10  ;;  %v3340_v61 = vshll.u32 %v4738_v18, 16  ;;  %v3346_v10 = vshll.u32 %v4739_v13, 16  ;;  %v3352_v18 = vrot.slane %v3350_v2, 4  ;;  %v4740_v13 = vld [vmem:[%s5052_s27 + $0x5c] sm:$0x1] }
 0x194   : > { %v5588_v14 = vadd.f32 %v1861_v24, %v1620_v12  ;;  %v2107_v24 = vsel %vm5099_vm5, %v2102_v36, %v2106_v45  ;;  %v2111_v12 = vrot.slane %v2109_v40, 4  ;;  %v3589_v36 = vunpack.c.l.b16 %v3335_v27  ;;  %v4450_v2 = vld [vmem:[%s5052_s27 + $0x1ec] sm:$0xf] }
 0x195   : > { %v2361_v53 = vunpack.c.l.b16 %v2107_v24  ;;  %v5605_v45 = vrot.slane %v2118_v9, 5  ;;  %v2124_v29 = vrot.slane %v2122_v58, 4  ;;  %v3339_v37 = vrot.slane %v3337_v51, 4  ;;  %v4873_v51 = vld [vmem:[%s5052_s27 + $0x114] sm:$0xff] }
 0x196   : > { %4708 = vmatmul.msk.bf16.gmra.mxu3 %vm320_vm2, %v4872_v47  ;;  %4773 = vmatmul.msk.bf16.gmra.mxu0 %vm320_vm2, %v3614_v5  ;;  %v1290_v50 = vpop.f32.mrf.mxu2  ;;  %v3342_v43 = vrot.slane %v3340_v61, 5  ;;  %v5608_v23 = vrot.slane %v3346_v10, 5  ;;  %v2115_v24 = vor.u32 %v2114_v8, %v2111_v12  ;;  %v2128_v9 = vshll.u32 %v4449_v56, 16  ;;  %v4451_v12 = vld [vmem:[%s5052_s27 + $0x1f0] sm:$0xf] }
 0x197   : > { %v1334_v11 = vadd.f32 %v1290_v50, %v666_v7  ;;  %v2387_v39 = vpack.c.b16 %v2361_v53, %v2360_v44  ;;  %v4741_v8 = vld [vmem:[%s5052_s27 + $0x60] sm:$0xf] }
 0x198   : > { %v667_v63 = vpop.f32.mrf.mxu1  ;;  %v3343_v27 = vor.u32 %v3342_v43, %v3339_v37  ;;  %v2130_v53 = vrot.slane %v2128_v9, 5  ;;  %v2133_v43 = vshrl.u32 %v4450_v2, 16 }
 0x199   : > { %v1577_v16 = vpop.f32.mrf.mxu3  ;;  %v668_v33 = vadd.f32 %v667_v63, %v5196_v15  ;;  %v3353_v15 = vor.u32 %v3352_v18, %v5608_v23  ;;  %v3356_v63 = vshll.u32 %v4740_v13, 16  ;;  %v2142_v13 = vshll.u32 %v4451_v12, 16 }
 0x19a   : > { %v1621_v47 = vadd.f32 %v1577_v16, %v1334_v11  ;;  %v4857_v11 = vld [vmem:[%s5052_s27 + $0x48] sm:$0xff]  ;;  %v2125_v16 = vor.u32 %v2124_v29, %v5605_v45  ;;  %v4742_v29 = vld [vmem:[%s5052_s27 + $0x64] sm:$0xf] }
 0x19b   : > { %v1866_v5 = vpop.f32.mrf.mxu0  ;;  %v3358_v37 = vrot.slane %v3356_v63, 5 }
 0x19c   : > { %v5610_v7 = vadd.f32 %v1864_v21, %v1621_v47  ;;  %v3615_v21 = vpack.c.b16 %v3589_v36, %v3588_v57  ;;  %v2116_v47 = vrot.slane %v2115_v24, 4  ;;  %v2126_v44 = vrot.slane %v2125_v16, 4 }
 0x19d   : > { %v3344_v57 = vrot.slane %v3343_v27, 4  ;;  %v3354_v36 = vrot.slane %v3353_v15, 4  ;;  %v2135_v27 = vrot.slane %v2133_v43, 4 }
 0x19e   : > { %v1292_v50 = vpop.f32.mrf.mxu2  ;;  %v2121_v9 = vsel %vm5099_vm5, %v2116_v47, %v5605_v45  ;;  %v4452_v45 = vld [vmem:[%s5052_s27 + $0x1f4] sm:$0x1] }
 0x19f   : > { %v1335_v60 = vadd.f32 %v1292_v50, %v668_v33  ;;  %v2136_v33 = vshll.u32 %v4450_v2, 16  ;;  %v2146_v50 = vshrl.u32 %v4451_v12, 16  ;;  %v5639_v2 = vrot.slane %v2142_v13, 5 }
 0x1a0   : > { %v670_v58 = vpop.f32.mrf.mxu1  ;;  %v2152_v13 = vshll.u32 %v4452_v45, 16 }
 0x1a1   : > { %v1579_v40 = vpop.f32.mrf.mxu3  ;;  %v671_v18 = vadd.f32 %v670_v58, %v5217_v30  ;;  %v3349_v30 = vsel %vm5099_vm5, %v3344_v57, %v5608_v23  ;;  %v3359_v58 = vsel %vm5099_vm5, %v3354_v36, %v3358_v37  ;;  %v2148_v12 = vrot.slane %v2146_v50, 4 }
 0x1a2   : > { %v1622_v61 = vadd.f32 %v1579_v40, %v1335_v60  ;;  %v3361_v60 = vshrl.u32 %v4741_v8, 16  ;;  %v3364_v40 = vshll.u32 %v4741_v8, 16  ;;  %v3590_v23 = vunpack.c.l.b16 %v3349_v30  ;;  %v4874_v30 = vld [vmem:[%s5052_s27 + $0x120] sm:$0xff] }
 0x1a3   : > { %v1869_v10 = vpop.f32.mrf.mxu0  ;;  %4483 = vmatmul.msk.bf16.gmra.mxu1 %vm320_vm2, %v2387_v39  ;;  %4596 = vmatmul.msk.bf16.gmra.mxu2 %vm320_vm2, %v4857_v11  ;;  %v3370_v39 = vshll.u32 %v4742_v29, 16  ;;  %v3591_v57 = vunpack.c.l.b16 %v3359_v58 }
 0x1a4   : > { %v5624_v56 = vadd.f32 %v1866_v5, %v1622_v61  ;;  %v3374_v5 = vshrl.u32 %v4742_v29, 16  ;;  %v2138_v61 = vrot.slane %v2136_v33, 5  ;;  %v3363_v47 = vrot.slane %v3361_v60, 4 }
 0x1a5   : > { %v3366_v8 = vrot.slane %v3364_v40, 5  ;;  %v3372_v29 = vrot.slane %v3370_v39, 5  ;;  %v2149_v33 = vor.u32 %v2148_v12, %v5639_v2 }
 0x1a6   : > { %4709 = vmatmul.msk.bf16.gmra.mxu3 %vm320_vm2, %v4873_v51  ;;  %4774 = vmatmul.msk.bf16.gmra.mxu0 %vm320_vm2, %v3615_v21  ;;  %v1295_v24 = vpop.f32.mrf.mxu2  ;;  %v2131_v21 = vsel %vm5099_vm5, %v2126_v44, %v2130_v53  ;;  %v3376_v44 = vrot.slane %v3374_v5, 4  ;;  %v2362_v53 = vunpack.c.l.b16 %v2121_v9  ;;  %v2139_v43 = vor.u32 %v2138_v61, %v2135_v27  ;;  %v4858_v9 = vld [vmem:[%s5052_s27 + $0x54] sm:$0xff] }
 0x1a7   : > { %v1336_v11 = vadd.f32 %v1295_v24, %v671_v18  ;;  %v2363_v18 = vunpack.c.l.b16 %v2131_v21  ;;  %v4743_v24 = vld [vmem:[%s5052_s27 + $0x68] sm:$0x1]  ;;  %v3367_v60 = vor.u32 %v3366_v8, %v3363_v47  ;;  %v2150_v27 = vrot.slane %v2149_v33, 4  ;;  %v4453_v47 = vld [vmem:[%s5052_s27 + $0x1f8] sm:$0xf] }
 0x1a8   : > { %v672_v51 = vpop.f32.mrf.mxu1  ;;  %v3377_v40 = vor.u32 %v3376_v44, %v3372_v29  ;;  %v3380_v39 = vshll.u32 %v4743_v24, 16  ;;  %v4454_v44 = vld [vmem:[%s5052_s27 + $0x1fc] sm:$0xf]  ;;  %v2157_v33 = vshrl.u32 %v4453_v47, 16 }
 0x1a9   : > { %v1582_v16 = vpop.f32.mrf.mxu3  ;;  %v673_v37 = vadd.f32 %v672_v51, %v5226_v46  ;;  %v2140_v51 = vrot.slane %v2139_v43, 4  ;;  %v3368_v61 = vrot.slane %v3367_v60, 4 }
 0x1aa   : > { %v1623_v15 = vadd.f32 %v1582_v16, %v1336_v11  ;;  %v2388_v16 = vpack.c.b16 %v2363_v18, %v2362_v53  ;;  %v3378_v12 = vrot.slane %v3377_v40, 4  ;;  %v3382_v45 = vrot.slane %v3380_v39, 5  ;;  %v4744_v53 = vld [vmem:[%s5052_s27 + $0x6c] sm:$0xf] }
 0x1ab   : > { %v1871_v63 = vpop.f32.mrf.mxu0  ;;  %v2145_v24 = vsel %vm5099_vm5, %v2140_v51, %v5639_v2  ;;  %v2170_v40 = vshrl.u32 %v4454_v44, 16  ;;  %v3385_v39 = vshrl.u32 %v4744_v53, 16  ;;  %v2159_v51 = vrot.slane %v2157_v33, 4  ;;  %v4859_v33 = vld [vmem:[%s5052_s27 + $0x60] sm:$0xff] }
 0x1ac   : > { %v5643_v36 = vadd.f32 %v1869_v10, %v1623_v15  ;;  %v3616_v10 = vpack.c.b16 %v3591_v57, %v3590_v23  ;;  %v2154_v15 = vrot.slane %v2152_v13, 5  ;;  %v4745_v57 = vld [vmem:[%s5052_s27 + $0x70] sm:$0xf]  ;;  %v3383_v43 = vsel %vm5099_vm5, %v3378_v12, %v3382_v45  ;;  %v4455_v45 = vld [vmem:[%s5052_s27 + $0x200] sm:$0x1] }
 0x1ad   : > { %v2160_v13 = vshll.u32 %v4453_v47, 16  ;;  %v3387_v12 = vrot.slane %v3385_v39, 4 }
 0x1ae   : > { %v1297_v50 = vpop.f32.mrf.mxu2  ;;  %v2155_v23 = vsel %vm5099_vm5, %v2150_v27, %v2154_v15 }
 0x1af   : > { %v1337_v5 = vadd.f32 %v1297_v50, %v673_v37  ;;  %v2162_v27 = vrot.slane %v2160_v13, 5 }
 0x1b0   : > { %v675_v21 = vpop.f32.mrf.mxu1 }
 0x1b1   : > { %v1584_v11 = vpop.f32.mrf.mxu3  ;;  %v676_v18 = vadd.f32 %v675_v21, %v5243_v4  ;;  %v2166_v4 = vshll.u32 %v4454_v44, 16  ;;  %v2163_v13 = vor.u32 %v2162_v27, %v2159_v51  ;;  %v4747_v27 = vld [vmem:[%s5052_s27 + $0x78] sm:$0xf] }
 0x1b2   : > { %v1624_v58 = vadd.f32 %v1584_v11, %v1337_v5  ;;  %v3388_v5 = vshll.u32 %v4744_v53, 16  ;;  %v3394_v11 = vshll.u32 %v4745_v57, 16 }
 0x1b3   : > { %v1874_v46 = vpop.f32.mrf.mxu0  ;;  %4484 = vmatmul.msk.bf16.gmra.mxu1 %vm320_vm2, %v2388_v16  ;;  %4597 = vmatmul.msk.bf16.gmra.mxu2 %vm320_vm2, %v4858_v9  ;;  %v3398_v16 = vshrl.u32 %v4745_v57, 16  ;;  %v5669_v15 = vrot.slane %v2166_v4, 5 }
 0x1b4   : > { %v5652_v8 = vadd.f32 %v1871_v63, %v1624_v58  ;;  %v3373_v63 = vsel %vm5099_vm5, %v3368_v61, %v3372_v29  ;;  %v2365_v29 = vunpack.c.l.b16 %v2155_v23  ;;  %v3593_v58 = vunpack.c.l.b16 %v3383_v43  ;;  %v4746_v23 = vld [vmem:[%s5052_s27 + $0x74] sm:$0x1] }
 0x1b5   : > { %v2172_v61 = vrot.slane %v2170_v40, 4  ;;  %v3390_v47 = vrot.slane %v3388_v5, 5  ;;  %v5672_v44 = vrot.slane %v3394_v11, 5  ;;  %v3400_v53 = vrot.slane %v3398_v16, 4  ;;  %v4875_v40 = vld [vmem:[%s5052_s27 + $0x12c] sm:$0xff] }
 0x1b6   : > { %4710 = vmatmul.msk.bf16.gmra.mxu3 %vm320_vm2, %v4874_v30  ;;  %4775 = vmatmul.msk.bf16.gmra.mxu0 %vm320_vm2, %v3616_v10  ;;  %v1300_v37 = vpop.f32.mrf.mxu2  ;;  %v2364_v30 = vunpack.c.l.b16 %v2145_v24  ;;  %v3592_v10 = vunpack.c.l.b16 %v3373_v63  ;;  %v4456_v16 = vld [vmem:[%s5052_s27 + $0x204] sm:$0xf] }
 0x1b7   : > { %v1338_v50 = vadd.f32 %v1300_v37, %v676_v18  ;;  %v3401_v5 = vor.u32 %v3400_v53, %v5672_v44 }
 0x1b8   : > { %v677_v2 = vpop.f32.mrf.mxu1  ;;  %v2389_v37 = vpack.c.b16 %v2365_v29, %v2364_v30  ;;  %v3617_v39 = vpack.c.b16 %v3593_v58, %v3592_v10  ;;  %v2164_v30 = vrot.slane %v2163_v13, 4 }
 0x1b9   : > { %v1587_v60 = vpop.f32.mrf.mxu3  ;;  %v678_v24 = vadd.f32 %v677_v2, %v5256_v25  ;;  %v3404_v25 = vshll.u32 %v4746_v23, 16  ;;  %v3402_v58 = vrot.slane %v3401_v5, 4 }
 0x1ba   : > { %v1625_v9 = vadd.f32 %v1587_v60, %v1338_v50  ;;  %v2173_v50 = vor.u32 %v2172_v61, %v5669_v15  ;;  %v2176_v60 = vshll.u32 %v4455_v45, 16  ;;  %v2181_v45 = vshrl.u32 %v4456_v16, 16 }
 0x1bb   : > { %v1876_v21 = vpop.f32.mrf.mxu0  ;;  %v2169_v13 = vsel %vm5099_vm5, %v2164_v30, %v5669_v15 }
 0x1bc   : > { %v5674_v18 = vadd.f32 %v1874_v46, %v1625_v9  ;;  %v3391_v46 = vor.u32 %v3390_v47, %v3387_v12  ;;  %v4457_v9 = vld [vmem:[%s5052_s27 + $0x208] sm:$0xf]  ;;  %v2174_v29 = vrot.slane %v2173_v50, 4  ;;  %v2178_v51 = vrot.slane %v2176_v60, 5  ;;  %v4748_v47 = vld [vmem:[%s5052_s27 + $0x7c] sm:$0xf] }
 0x1bd   : > { %v3406_v12 = vrot.slane %v3404_v25, 5  ;;  %v2190_v23 = vshll.u32 %v4457_v9, 16  ;;  %v3418_v50 = vshll.u32 %v4748_v47, 16  ;;  %v3422_v60 = vshrl.u32 %v4748_v47, 16 }
 0x1be   : > { %v1302_v57 = vpop.f32.mrf.mxu2  ;;  %v3392_v10 = vrot.slane %v3391_v46, 4  ;;  %v2183_v46 = vrot.slane %v2181_v45, 4  ;;  %v2366_v47 = vunpack.c.l.b16 %v2169_v13 }
 0x1bf   : > { %v1339_v63 = vadd.f32 %v1302_v57, %v678_v24  ;;  %v2184_v24 = vshll.u32 %v4456_v16, 16  ;;  %v2194_v57 = vshrl.u32 %v4457_v9, 16  ;;  %v5703_v16 = vrot.slane %v2190_v23, 5  ;;  %v4458_v9 = vld [vmem:[%s5052_s27 + $0x20c] sm:$0x1] }
 0x1c0   : > { %v680_v4 = vpop.f32.mrf.mxu1  ;;  %v2200_v23 = vshll.u32 %v4458_v9, 16 }
 0x1c1   : > { %v1589_v43 = vpop.f32.mrf.mxu3  ;;  %v681_v53 = vadd.f32 %v680_v4, %v5273_v55  ;;  %v2179_v55 = vsel %vm5099_vm5, %v2174_v29, %v2178_v51  ;;  %v3397_v4 = vsel %vm5099_vm5, %v3392_v10, %v5672_v44  ;;  %v2196_v15 = vrot.slane %v2194_v57, 4  ;;  %v4749_v29 = vld [vmem:[%s5052_s27 + $0x80] sm:$0x1] }
 0x1c2   : > { %v1626_v2 = vadd.f32 %v1589_v43, %v1339_v63  ;;  %v3409_v63 = vshrl.u32 %v4747_v27, 16  ;;  %v3412_v43 = vshll.u32 %v4747_v27, 16  ;;  %v3420_v51 = vrot.slane %v3418_v50, 5  ;;  %v4860_v50 = vld [vmem:[%s5052_s27 + $0x6c] sm:$0xff] }
 0x1c3   : > { %v1879_v11 = vpop.f32.mrf.mxu0  ;;  %4485 = vmatmul.msk.bf16.gmra.mxu1 %vm320_vm2, %v2389_v37  ;;  %4598 = vmatmul.msk.bf16.gmra.mxu2 %vm320_vm2, %v4859_v33  ;;  %v3594_v44 = vunpack.c.l.b16 %v3397_v4 }
 0x1c4   : > { %v5687_v61 = vadd.f32 %v1876_v21, %v1626_v2  ;;  %v2186_v2 = vrot.slane %v2184_v24, 5  ;;  %v3411_v30 = vrot.slane %v3409_v63, 4  ;;  %v3414_v27 = vrot.slane %v3412_v43, 5 }
 0x1c5   : > { %v2197_v24 = vor.u32 %v2196_v15, %v5703_v16  ;;  %v3428_v43 = vshll.u32 %v4749_v29, 16 }
 0x1c6   : > { %4711 = vmatmul.msk.bf16.gmra.mxu3 %vm320_vm2, %v4875_v40  ;;  %4776 = vmatmul.msk.bf16.gmra.mxu0 %vm320_vm2, %v3617_v39  ;;  %v1305_v37 = vpop.f32.mrf.mxu2  ;;  %v3407_v39 = vsel %vm5099_vm5, %v3402_v58, %v3406_v12  ;;  %v2187_v45 = vor.u32 %v2186_v2, %v2183_v46  ;;  %v3415_v63 = vor.u32 %v3414_v27, %v3411_v30  ;;  %v2202_v2 = vrot.slane %v2200_v23, 5 }
 0x1c7   : > { %v1340_v21 = vadd.f32 %v1305_v37, %v681_v53  ;;  %v2367_v53 = vunpack.c.l.b16 %v2179_v55  ;;  %v3424_v37 = vrot.slane %v3422_v60, 4  ;;  %v3595_v10 = vunpack.c.l.b16 %v3407_v39  ;;  %v4459_v55 = vld [vmem:[%s5052_s27 + $0x210] sm:$0xf]  ;;  %v4876_v39 = vld [vmem:[%s5052_s27 + $0x138] sm:$0xff] }
 0x1c8   : > { %v682_v40 = vpop.f32.mrf.mxu1  ;;  %v2198_v46 = vrot.slane %v2197_v24, 4  ;;  %v3416_v15 = vrot.slane %v3415_v63, 4  ;;  %v3430_v9 = vrot.slane %v3428_v43, 5  ;;  %v2205_v30 = vshrl.u32 %v4459_v55, 16 }
 0x1c9   : > { %v1592_v33 = vpop.f32.mrf.mxu3  ;;  %v683_v12 = vadd.f32 %v682_v40, %v5286_v19  ;;  %v2390_v13 = vpack.c.b16 %v2367_v53, %v2366_v47  ;;  %v3425_v60 = vor.u32 %v3424_v37, %v3420_v51  ;;  %v2188_v40 = vrot.slane %v2187_v45, 4  ;;  %v4751_v45 = vld [vmem:[%s5052_s27 + $0x88] sm:$0xf] }
 0x1ca   : > { %v1627_v5 = vadd.f32 %v1592_v33, %v1340_v21  ;;  %v2208_v27 = vshll.u32 %v4459_v55, 16  ;;  %v2203_v23 = vsel %vm5099_vm5, %v2198_v46, %v2202_v2  ;;  %v3442_v55 = vshll.u32 %v4751_v45, 16 }
 0x1cb   : > { %v1881_v25 = vpop.f32.mrf.mxu0  ;;  %v3426_v47 = vrot.slane %v3425_v60, 4 }
 0x1cc   : > { %v5707_v58 = vadd.f32 %v1879_v11, %v1627_v5  ;;  %v3618_v11 = vpack.c.b16 %v3595_v10, %v3594_v44  ;;  %v4460_v5 = vld [vmem:[%s5052_s27 + $0x214] sm:$0xf]  ;;  %v2193_v10 = vsel %vm5099_vm5, %v2188_v40, %v5703_v16 }
 0x1cd   : > { %v2214_v53 = vshll.u32 %v4460_v5, 16  ;;  %v2218_v29 = vshrl.u32 %v4460_v5, 16 }
 0x1ce   : > { %6007 = vst [vmem:[#allocation4_spill] sm:$0xff] %v5707_v58  ;;  %v1307_v57 = vpop.f32.mrf.mxu2 }
 0x1cf   : > { %v1341_v21 = vadd.f32 %v1307_v57, %v683_v12  ;;  %v4750_v12 = vld [vmem:[%s5052_s27 + $0x84] sm:$0xf]  ;;  %v2210_v57 = vrot.slane %v2208_v27, 5 }
 0x1d0   : > { %v2458_v4 = vpop.f32.mrf.mxu1  ;;  %v3436_v60 = vshll.u32 %v4750_v12, 16 }
 0x1d1   : > { %v1594_v33 = vpop.f32.mrf.mxu3  ;;  %v2538_v44 = vadd.f32 %v2458_v4, %v5303_v17  ;;  %v3431_v17 = vsel %vm5099_vm5, %v3426_v47, %v3430_v9  ;;  %v3446_v4 = vshrl.u32 %v4751_v45, 16  ;;  %v5737_v47 = vrot.slane %v3442_v55, 5  ;;  %v4462_v55 = vld [vmem:[%s5052_s27 + $0x21c] sm:$0xf] }
 0x1d2   : > { %v1628_v58 = vadd.f32 %v1594_v33, %v1341_v21  ;;  %v5733_v21 = vrot.slane %v2214_v53, 5  ;;  %v2220_v33 = vrot.slane %v2218_v29, 4  ;;  %v3597_v2 = vunpack.c.l.b16 %v3431_v17 }
 0x1d3   : > { %v3686_v19 = vpop.f32.mrf.mxu0  ;;  %4486 = vmatmul.msk.bf16.gmra.mxu1 %vm320_vm2, %v2390_v13  ;;  %4599 = vmatmul.msk.bf16.gmra.mxu2 %vm320_vm2, %v4860_v50  ;;  %v4461_v13 = vld [vmem:[%s5052_s27 + $0x218] sm:$0x1]  ;;  %v3433_v50 = vshrl.u32 %v4750_v12, 16  ;;  %v3438_v27 = vrot.slane %v3436_v60, 5  ;;  %v3448_v53 = vrot.slane %v3446_v4, 4 }
 0x1d4   : > { %v5717_v37 = vadd.f32 %v1881_v25, %v1628_v58  ;;  %v3421_v25 = vsel %vm5099_vm5, %v3416_v15, %v3420_v51  ;;  %v2207_v58 = vrot.slane %v2205_v30, 4  ;;  %v2369_v51 = vunpack.c.l.b16 %v2203_v23  ;;  %v5744_v23 = vld [vmem:[%s6001_s2] ss:$0 sm:$0xff] }
 0x1d5   : > { %v3596_v5 = vunpack.c.l.b16 %v3421_v25  ;;  %v2221_v15 = vor.u32 %v2220_v33, %v5733_v21  ;;  %v2224_v9 = vshll.u32 %v4461_v13, 16  ;;  %v3435_v30 = vrot.slane %v3433_v50, 4 }
 0x1d6   : > { %4712 = vmatmul.msk.bf16.gmra.mxu3 %vm320_vm2, %v4876_v39  ;;  %4777 = vmatmul.msk.bf16.gmra.mxu0 %vm320_vm2, %v3618_v11  ;;  %v2745_v24 = vpop.f32.mrf.mxu2  ;;  %v2368_v11 = vunpack.c.l.b16 %v2193_v10  ;;  %v2211_v40 = vor.u32 %v2210_v57, %v2207_v58  ;;  %v4861_v57 = vld [vmem:[%s5052_s27 + $0x78] sm:$0xff]  ;;  %v3449_v13 = vor.u32 %v3448_v53, %v5737_v47  ;;  %v2232_v53 = vshll.u32 %v4462_v55, 16 }
 0x1d7   : > { %v2825_v63 = vadd.f32 %v2745_v24, %v2538_v44  ;;  %v4752_v44 = vld [vmem:[%s5052_s27 + $0x8c] sm:$0x1]  ;;  %v3619_v33 = vpack.c.b16 %v3597_v2, %v3596_v5  ;;  %v4754_v2 = vld [vmem:[%s5052_s27 + $0x94] sm:$0xf] }
 0x1d8   : > { %v2460_v16 = vpop.f32.mrf.mxu1  ;;  %v2391_v10 = vpack.c.b16 %v2369_v51, %v2368_v11  ;;  %v2212_v45 = vrot.slane %v2211_v40, 4  ;;  %v4463_v11 = vld [vmem:[%s5052_s27 + $0x220] sm:$0xf] }
 0x1d9   : > { %v3032_v43 = vpop.f32.mrf.mxu3  ;;  %v2539_v29 = vadd.f32 %v2460_v16, %v5312_v49  ;;  %v4877_v49 = vld [vmem:[%s5052_s27 + $0x144] sm:$0xff]  ;;  %v3439_v16 = vor.u32 %v3438_v27, %v3435_v30  ;;  %v2229_v30 = vshrl.u32 %v4462_v55, 16  ;;  %v2234_v55 = vrot.slane %v2232_v53, 5 }
 0x1da   : > { %v3112_v46 = vadd.f32 %v3032_v43, %v2825_v63  ;;  %v2222_v63 = vrot.slane %v2221_v15, 4  ;;  %v2226_v43 = vrot.slane %v2224_v9, 5  ;;  %v2217_v4 = vsel %vm5099_vm5, %v2212_v45, %v5733_v21 }
 0x1db   : > { %v3688_v39 = vpop.f32.mrf.mxu0  ;;  %v3440_v15 = vrot.slane %v3439_v16, 4  ;;  %v3450_v9 = vrot.slane %v3449_v13, 4 }
 0x1dc   : > { %v3766_v24 = vadd.f32 %v3686_v19, %v3112_v46  ;;  %v3452_v19 = vshll.u32 %v4752_v44, 16  ;;  %v2227_v5 = vsel %vm5099_vm5, %v2222_v63, %v2226_v43  ;;  %v4753_v46 = vld [vmem:[%s5052_s27 + $0x90] sm:$0xf]  ;;  %v3470_v43 = vshrl.u32 %v4754_v2, 16 }
 0x1dd   : > { %v3460_v45 = vshll.u32 %v4753_v46, 16 }
 0x1de   : > { %v2747_v12 = vpop.f32.mrf.mxu2  ;;  %v3802_v51 = vadd.f32 %v5744_v23, %v3766_v24  ;;  %v3454_v21 = vrot.slane %v3452_v19, 5  ;;  %v3466_v24 = vshll.u32 %v4754_v2, 16 }
 0x1df   : > { %v2826_v25 = vadd.f32 %v2747_v12, %v2539_v29  ;;  %v2238_v29 = vshll.u32 %v4463_v11, 16  ;;  %v2242_v12 = vshrl.u32 %v4463_v11, 16 }
 0x1e0   : > { %v2463_v17 = vpop.f32.mrf.mxu1  ;;  %v3455_v19 = vsel %vm5099_vm5, %v3450_v9, %v3454_v21  ;;  %v5780_v2 = vrot.slane %v3466_v24, 5 }
 0x1e1   : > { %v3034_v58 = vpop.f32.mrf.mxu3  ;;  %v2540_v27 = vadd.f32 %v2463_v17, %v5323_v28  ;;  %v2370_v17 = vunpack.c.l.b16 %v2217_v4  ;;  %v5776_v11 = vrot.slane %v2238_v29, 5 }
 0x1e2   : > { %v3113_v50 = vadd.f32 %v3034_v58, %v2826_v25  ;;  %v3834_v25 = vmax.f32 %v3802_v51, 0.0  ;;  %v2244_v51 = vrot.slane %v2242_v12, 4 }
 0x1e3   : > { %v3691_v60 = vpop.f32.mrf.mxu0  ;;  %4487 = vmatmul.msk.bf16.gmra.mxu1 %vm320_vm2, %v2391_v10  ;;  %4600 = vmatmul.msk.bf16.gmra.mxu2 %vm320_vm2, %v4861_v57  ;;  %v3457_v10 = vshrl.u32 %v4753_v46, 16  ;;  %v3462_v46 = vrot.slane %v3460_v45, 5 }
 0x1e4   : > { %v3767_v40 = vadd.f32 %v3688_v39, %v3113_v50  ;;  %v2231_v50 = vrot.slane %v2229_v30, 4  ;;  %v2245_v29 = vor.u32 %v2244_v51, %v5776_v11 }
 0x1e6   : > { %4713 = vmatmul.msk.bf16.gmra.mxu3 %vm320_vm2, %v4877_v49  ;;  %4778 = vmatmul.msk.bf16.gmra.mxu0 %vm320_vm2, %v3619_v33  ;;  %v3803_v39 = vadd.f32 %v5744_v23, %v3767_v40  ;;  %v2750_v44 = vpop.f32.mrf.mxu2  ;;  %v2371_v49 = vunpack.c.l.b16 %v2227_v5  ;;  %v3445_v33 = vsel %vm5099_vm5, %v3440_v15, %v5737_v47  ;;  %v3459_v40 = vrot.slane %v3457_v10, 4  ;;  %v4464_v5 = vld [vmem:[%s5052_s27 + $0x224] sm:$0x1] }
 0x1e7   : > { %v2827_v57 = vadd.f32 %v2750_v44, %v2540_v27  ;;  %v3472_v47 = vrot.slane %v3470_v43, 4  ;;  %v3598_v15 = vunpack.c.l.b16 %v3445_v33  ;;  %v4755_v27 = vld [vmem:[%s5052_s27 + $0x98] sm:$0x1]  ;;  %v2235_v53 = vor.u32 %v2234_v55, %v2231_v50  ;;  %v4878_v43 = vld [vmem:[%s5052_s27 + $0x150] sm:$0xff]  ;;  %v4466_v33 = vld [vmem:[%s5052_s27 + $0x22c] sm:$0xf] }
 0x1e8   : > { %v3835_v58 = vmax.f32 %v3803_v39, 0.0  ;;  %v2465_v28 = vpop.f32.mrf.mxu1  ;;  %v3599_v39 = vunpack.c.l.b16 %v3455_v19  ;;  %v2392_v21 = vpack.c.b16 %v2371_v49, %v2370_v17  ;;  %v2248_v44 = vshll.u32 %v4464_v5, 16  ;;  %v4465_v49 = vld [vmem:[%s5052_s27 + $0x228] sm:$0xf]  ;;  %v4756_v55 = vld [vmem:[%s5052_s27 + $0x9c] sm:$0xf] }
 0x1e9   : > { %v3037_v63 = vpop.f32.mrf.mxu3  ;;  %v2541_v9 = vadd.f32 %v2465_v28, %v5334_v1  ;;  %v3463_v12 = vor.u32 %v3462_v46, %v3459_v40  ;;  %v2246_v19 = vrot.slane %v2245_v29, 4  ;;  %v4757_v5 = vld [vmem:[%s5052_s27 + $0xa0] sm:$0xf] }
 0x1ea   : > { %v4887_v16 = vpack.c.bf16 %v3835_v58, %v3834_v25  ;;  %v3114_v4 = vadd.f32 %v3037_v63, %v2827_v57  ;;  %v4862_v25 = vld [vmem:[%s5052_s27 + $0x84] sm:$0xff]  ;;  %v3473_v58 = vor.u32 %v3472_v47, %v5780_v2  ;;  %v3476_v57 = vshll.u32 %v4755_v27, 16 }
 0x1eb   : > { %v3693_v13 = vpop.f32.mrf.mxu0  ;;  %v3620_v1 = vpack.c.b16 %v3599_v39, %v3598_v15  ;;  %v2250_v50 = vrot.slane %v2248_v44, 5  ;;  %v2253_v47 = vshrl.u32 %v4465_v49, 16  ;;  %v2256_v15 = vshll.u32 %v4465_v49, 16 }
 0x1ec   : > { %4888 = vst [vmem:[%s5769_s13] sm:$0xff] %v4887_v16   ;;  %v3768_v10 = vadd.f32 %v3691_v60, %v3114_v4  ;;  %v2236_v16 = vrot.slane %v2235_v53, 4  ;;  %v3464_v60 = vrot.slane %v3463_v12, 4  ;;  %v3474_v46 = vrot.slane %v3473_v58, 4 }
 0x1ed   : > { %v3478_v4 = vrot.slane %v3476_v57, 5  ;;  %v2262_v39 = vshll.u32 %v4466_v33, 16  ;;  %v2266_v27 = vshrl.u32 %v4466_v33, 16  ;;  %v3484_v53 = vshll.u32 %v4756_v55, 16 }
 0x1ee   : > { %v2752_v30 = vpop.f32.mrf.mxu2  ;;  %v3804_v51 = vadd.f32 %v5744_v23, %v3768_v10  ;;  %v2241_v29 = vsel %vm5099_vm5, %v2236_v16, %v5776_v11  ;;  %v2251_v44 = vsel %vm5099_vm5, %v2246_v19, %v2250_v50  ;;  %v3490_v12 = vshll.u32 %v4757_v5, 16  ;;  %v4467_v50 = vld [vmem:[%s5052_s27 + $0x230] sm:$0x1] }
 0x1ef   : > { %v2828_v45 = vadd.f32 %v2752_v30, %v2541_v9  ;;  %v3494_v10 = vshrl.u32 %v4757_v5, 16  ;;  %v2255_v11 = vrot.slane %v2253_v47, 4  ;;  %v2268_v33 = vrot.slane %v2266_v27, 4 }
 0x1f0   : > { %v2468_v63 = vpop.f32.mrf.mxu1  ;;  %v3486_v19 = vrot.slane %v3484_v53, 5  ;;  %v2272_v27 = vshll.u32 %v4467_v50, 16 }
 0x1f1   : > { %v3039_v24 = vpop.f32.mrf.mxu3  ;;  %v2542_v30 = vadd.f32 %v2468_v63, %v5344_v48  ;;  %v3469_v48 = vsel %vm5099_vm5, %v3464_v60, %v5780_v2  ;;  %v3479_v63 = vsel %vm5099_vm5, %v3474_v46, %v3478_v4  ;;  %v2372_v60 = vunpack.c.l.b16 %v2241_v29  ;;  %v4758_v46 = vld [vmem:[%s5052_s27 + $0xa4] sm:$0x1] }
 0x1f2   : > { %v3115_v28 = vadd.f32 %v3039_v24, %v2828_v45  ;;  %v3836_v45 = vmax.f32 %v3804_v51, 0.0  ;;  %v3496_v51 = vrot.slane %v3494_v10, 4  ;;  %v3600_v4 = vunpack.c.l.b16 %v3469_v48  ;;  %v4863_v10 = vld [vmem:[%s5052_s27 + $0x90] sm:$0xff] }
 0x1f3   : > { %v5788_v17 = vpop.f32.mrf.mxu0  ;;  %4488 = vmatmul.msk.bf16.gmra.mxu1 %vm320_vm2, %v2392_v21  ;;  %4601 = vmatmul.msk.bf16.gmra.mxu2 %vm320_vm2, %v4862_v25  ;;  %v3601_v5 = vunpack.c.l.b16 %v3479_v63  ;;  %v3500_v53 = vshll.u32 %v4758_v46, 16  ;;  %v2274_v63 = vrot.slane %v2272_v27, 5  ;;  %v4760_v46 = vld [vmem:[%s5052_s27 + $0xac] sm:$0xf] }
 0x1f4   : > { %v3769_v40 = vadd.f32 %v3693_v13, %v3115_v28  ;;  %v3481_v13 = vshrl.u32 %v4756_v55, 16  ;;  %v5814_v55 = vrot.slane %v3490_v12, 5 }
 0x1f6   : > { %4714 = vmatmul.msk.bf16.gmra.mxu3 %vm320_vm2, %v4878_v43  ;;  %4779 = vmatmul.msk.bf16.gmra.mxu0 %vm320_vm2, %v3620_v1  ;;  %v3805_v9 = vadd.f32 %v5744_v23, %v3769_v40  ;;  %v2755_v21 = vpop.f32.mrf.mxu2  ;;  %v2258_v43 = vrot.slane %v2256_v15, 5  ;;  %v5811_v1 = vrot.slane %v2262_v39, 5  ;;  %v3483_v16 = vrot.slane %v3481_v13, 4 }
 0x1f7   : > { %v2829_v25 = vadd.f32 %v2755_v21, %v2542_v30  ;;  %v2373_v40 = vunpack.c.l.b16 %v2251_v44  ;;  %v3497_v13 = vor.u32 %v3496_v51, %v5814_v55 }
 0x1f8   : > { %v3837_v24 = vmax.f32 %v3805_v9, 0.0  ;;  %v2470_v57 = vpop.f32.mrf.mxu1  ;;  %v2259_v47 = vor.u32 %v2258_v43, %v2255_v11  ;;  %v2269_v39 = vor.u32 %v2268_v33, %v5811_v1  ;;  %v3487_v9 = vor.u32 %v3486_v19, %v3483_v16  ;;  %v4468_v16 = vld [vmem:[%s5052_s27 + $0x234] sm:$0xf]  ;;  %v4469_v19 = vld [vmem:[%s5052_s27 + $0x238] sm:$0xf] }
 0x1f9   : > { %v3042_v58 = vpop.f32.mrf.mxu3  ;;  %v2543_v15 = vadd.f32 %v2470_v57, %v5353_v26  ;;  %v2393_v12 = vpack.c.b16 %v2373_v40, %v2372_v60  ;;  %v3498_v43 = vrot.slane %v3497_v13, 4  ;;  %v4759_v40 = vld [vmem:[%s5052_s27 + $0xa8] sm:$0xf] }
 0x1fa   : > { %v4892_v28 = vpack.c.bf16 %v3837_v24, %v3836_v45  ;;  %v3116_v2 = vadd.f32 %v3042_v58, %v2829_v25  ;;  %v4879_v24 = vld [vmem:[%s5052_s27 + $0x15c] sm:$0xff]  ;;  %v3621_v25 = vpack.c.b16 %v3601_v5, %v3600_v4  ;;  %v2260_v26 = vrot.slane %v2259_v47, 4 }
 0x1fb   : > { %v3698_v49 = vpop.f32.mrf.mxu0  ;;  %v2270_v57 = vrot.slane %v2269_v39, 4  ;;  %v3488_v11 = vrot.slane %v3487_v9, 4  ;;  %v2277_v47 = vshrl.u32 %v4468_v16, 16 }
 0x1fc   : > { %4964 = vst [vmem:[%s5769_s13 + $0x8] sm:$0xff] %v4892_v28   ;;  %v3770_v21 = vadd.f32 %v5788_v17, %v3116_v2  ;;  %v3502_v28 = vrot.slane %v3500_v53, 5  ;;  %v2265_v50 = vsel %vm5099_vm5, %v2260_v26, %v5811_v1  ;;  %v2286_v1 = vshll.u32 %v4469_v19, 16 }
 0x1fd   : > { %v3493_v60 = vsel %vm5099_vm5, %v3488_v11, %v5814_v55  ;;  %v3505_v53 = vshrl.u32 %v4759_v40, 16  ;;  %v3514_v55 = vshll.u32 %v4760_v46, 16 }
 0x1fe   : > { %v2757_v30 = vpop.f32.mrf.mxu2  ;;  %v3806_v17 = vadd.f32 %v5744_v23, %v3770_v21  ;;  %v3503_v5 = vsel %vm5099_vm5, %v3498_v43, %v3502_v28  ;;  %v3508_v21 = vshll.u32 %v4759_v40, 16  ;;  %v5847_v11 = vrot.slane %v2286_v1, 5  ;;  %v4761_v28 = vld [vmem:[%s5052_s27 + $0xb0] sm:$0x1] }
 0x1ff   : > { %v2830_v29 = vadd.f32 %v2757_v30, %v2543_v15  ;;  %v2280_v15 = vshll.u32 %v4468_v16, 16  ;;  %v2290_v30 = vshrl.u32 %v4469_v19, 16  ;;  %v5850_v16 = vrot.slane %v3514_v55, 5 }
 0x200   : > { %v2473_v45 = vpop.f32.mrf.mxu1  ;;  %v3838_v39 = vmax.f32 %v3806_v17, 0.0  ;;  %v3507_v17 = vrot.slane %v3505_v53, 4 }
 0x201   : > { %v3044_v44 = vpop.f32.mrf.mxu3  ;;  %v2544_v2 = vadd.f32 %v2473_v45, %v5363_v62  ;;  %v2282_v26 = vrot.slane %v2280_v15, 5  ;;  %v2292_v43 = vrot.slane %v2290_v30, 4  ;;  %v3524_v15 = vshll.u32 %v4761_v28, 16 }
 0x202   : > { %v3117_v58 = vadd.f32 %v3044_v44, %v2830_v29  ;;  %v3518_v29 = vshrl.u32 %v4760_v46, 16 }
 0x203   : > { %v3701_v48 = vpop.f32.mrf.mxu0  ;;  %4489 = vmatmul.msk.bf16.gmra.mxu1 %vm320_vm2, %v2393_v12  ;;  %4602 = vmatmul.msk.bf16.gmra.mxu2 %vm320_vm2, %v4863_v10  ;;  %v2374_v10 = vunpack.c.l.b16 %v2265_v50 }
 0x204   : > { %v3771_v33 = vadd.f32 %v3698_v49, %v3117_v58  ;;  %v2275_v49 = vsel %vm5099_vm5, %v2270_v57, %v2274_v63  ;;  %v3603_v57 = vunpack.c.l.b16 %v3503_v5  ;;  %v4470_v63 = vld [vmem:[%s5052_s27 + $0x23c] sm:$0x1]  ;;  %v3520_v19 = vrot.slane %v3518_v29, 4 }
 0x205   : > { %v2375_v45 = vunpack.c.l.b16 %v2275_v49  ;;  %v4864_v5 = vld [vmem:[%s5052_s27 + $0x9c] sm:$0xff] }
 0x206   : > { %4715 = vmatmul.msk.bf16.gmra.mxu3 %vm320_vm2, %v4879_v24  ;;  %4780 = vmatmul.msk.bf16.gmra.mxu0 %vm320_vm2, %v3621_v25  ;;  %v3807_v51 = vadd.f32 %v5744_v23, %v3771_v33  ;;  %v2760_v4 = vpop.f32.mrf.mxu2  ;;  %v3602_v24 = vunpack.c.l.b16 %v3493_v60  ;;  %v2279_v25 = vrot.slane %v2277_v47, 4  ;;  %v3510_v33 = vrot.slane %v3508_v21, 5  ;;  %v4472_v21 = vld [vmem:[%s5052_s27 + $0x244] sm:$0xf] }
 0x207   : > { %v2831_v62 = vadd.f32 %v2760_v4, %v2544_v2  ;;  %v2394_v2 = vpack.c.b16 %v2375_v45, %v2374_v10  ;;  %v2296_v60 = vshll.u32 %v4470_v63, 16  ;;  %v2293_v47 = vor.u32 %v2292_v43, %v5847_v11  ;;  %v4762_v45 = vld [vmem:[%s5052_s27 + $0xb4] sm:$0xf] }
 0x208   : > { %v3839_v27 = vmax.f32 %v3807_v51, 0.0  ;;  %v2475_v13 = vpop.f32.mrf.mxu1  ;;  %v2283_v49 = vor.u32 %v2282_v26, %v2279_v25  ;;  %v3526_v10 = vrot.slane %v3524_v15, 5  ;;  %v2310_v43 = vshll.u32 %v4472_v21, 16 }
 0x209   : > { %v3047_v9 = vpop.f32.mrf.mxu3  ;;  %v2545_v50 = vadd.f32 %v2475_v13, %v5371_v3  ;;  %v3521_v3 = vor.u32 %v3520_v19, %v5850_v16  ;;  %v4471_v13 = vld [vmem:[%s5052_s27 + $0x240] sm:$0xf]  ;;  %v2298_v53 = vrot.slane %v2296_v60, 5  ;;  %v2314_v28 = vshrl.u32 %v4472_v21, 16 }
 0x20a   : > { %v4897_v44 = vpack.c.bf16 %v3839_v27, %v3838_v39  ;;  %v3118_v58 = vadd.f32 %v3047_v9, %v2831_v62  ;;  %v4880_v39 = vld [vmem:[%s5052_s27 + $0x168] sm:$0xff]  ;;  %v3622_v27 = vpack.c.b16 %v3603_v57, %v3602_v24  ;;  %v3511_v62 = vor.u32 %v3510_v33, %v3507_v17  ;;  %v4763_v24 = vld [vmem:[%s5052_s27 + $0xb8] sm:$0xf] }
 0x20b   : > { %v3703_v12 = vpop.f32.mrf.mxu0  ;;  %v3522_v26 = vrot.slane %v3521_v3, 4  ;;  %v2304_v57 = vshll.u32 %v4471_v13, 16  ;;  %v3529_v33 = vshrl.u32 %v4762_v45, 16  ;;  %v3532_v19 = vshll.u32 %v4762_v45, 16  ;;  %v4473_v3 = vld [vmem:[%s5052_s27 + $0x248] sm:$0x1] }
 0x20c   : > { %4965 = vst [vmem:[%s5769_s13 + $0x10] sm:$0xff] %v4897_v44   ;;  %v3772_v40 = vadd.f32 %v3701_v48, %v3118_v58  ;;  %v2284_v48 = vrot.slane %v2283_v49, 4  ;;  %v2294_v44 = vrot.slane %v2293_v47, 4  ;;  %v3512_v25 = vrot.slane %v3511_v62, 4 }
 0x20d   : > { %v2301_v58 = vshrl.u32 %v4471_v13, 16  ;;  %v3527_v47 = vsel %vm5099_vm5, %v3522_v26, %v3526_v10  ;;  %v5880_v62 = vrot.slane %v2310_v43, 5  ;;  %v3534_v13 = vrot.slane %v3532_v19, 5  ;;  %v4865_v19 = vld [vmem:[%s5052_s27 + $0xa8] sm:$0xff] }
 0x20e   : > { %v2762_v51 = vpop.f32.mrf.mxu2  ;;  %v3808_v55 = vadd.f32 %v5744_v23, %v3772_v40  ;;  %v3605_v10 = vunpack.c.l.b16 %v3527_v47 }
 0x20f   : > { %v2832_v46 = vadd.f32 %v2762_v51, %v2545_v50  ;;  %v3538_v50 = vshll.u32 %v4763_v24, 16  ;;  %v3542_v51 = vshrl.u32 %v4763_v24, 16  ;;  %v2303_v15 = vrot.slane %v2301_v58, 4 }
 0x210   : > { %v2478_v1 = vpop.f32.mrf.mxu1 }
 0x211   : > { %v3049_v4 = vpop.f32.mrf.mxu3 }
 0x212   : > { %v3119_v9 = vadd.f32 %v3049_v4, %v2832_v46  ;;  %v2289_v46 = vsel %vm5099_vm5, %v2284_v48, %v5847_v11  ;;  %v2316_v11 = vrot.slane %v2314_v28, 4  ;;  %v5883_v48 = vrot.slane %v3538_v50, 5 }
 0x213   : > { %v5857_v30 = vpop.f32.mrf.mxu0  ;;  %4490 = vmatmul.msk.bf16.gmra.mxu1 %vm320_vm2, %v2394_v2  ;;  %4603 = vmatmul.msk.bf16.gmra.mxu2 %vm320_vm2, %v4864_v5  ;;  %v3840_v2 = vmax.f32 %v3808_v55, 0.0  ;;  %v3517_v5 = vsel %vm5099_vm5, %v3512_v25, %v5850_v16  ;;  %v2376_v16 = vunpack.c.l.b16 %v2289_v46  ;;  %v2320_v25 = vshll.u32 %v4473_v3, 16  ;;  %v4765_v3 = vld [vmem:[%s5052_s27 + $0xc0] sm:$0xf] }
 0x214   : > { %v3773_v29 = vadd.f32 %v3703_v12, %v3119_v9  ;;  %v2546_v12 = vadd.f32 %v2478_v1, %v5382_v6  ;;  %v2299_v6 = vsel %vm5099_vm5, %v2294_v44, %v2298_v53  ;;  %v3531_v9 = vrot.slane %v3529_v33, 4 }
 0x215   : > { %v3544_v53 = vrot.slane %v3542_v51, 4  ;;  %v2377_v55 = vunpack.c.l.b16 %v2299_v6  ;;  %v3604_v44 = vunpack.c.l.b16 %v3517_v5  ;;  %v2317_v58 = vor.u32 %v2316_v11, %v5880_v62  ;;  %v4881_v51 = vld [vmem:[%s5052_s27 + $0x174] sm:$0xff]  ;;  %v4475_v11 = vld [vmem:[%s5052_s27 + $0x250] sm:$0xf] }
 0x216   : > { %4716 = vmatmul.msk.bf16.gmra.mxu3 %vm320_vm2, %v4880_v39  ;;  %4781 = vmatmul.msk.bf16.gmra.mxu0 %vm320_vm2, %v3622_v27  ;;  %v3809_v63 = vadd.f32 %v5744_v23, %v3773_v29  ;;  %v2765_v17 = vpop.f32.mrf.mxu2  ;;  %v2306_v27 = vrot.slane %v2304_v57, 5  ;;  %v4764_v29 = vld [vmem:[%s5052_s27 + $0xbc] sm:$0x1]  ;;  %v3535_v57 = vor.u32 %v3534_v13, %v3531_v9 }
 0x217   : > { %v2833_v60 = vadd.f32 %v2765_v17, %v2546_v12  ;;  %v3548_v12 = vshll.u32 %v4764_v29, 16  ;;  %v2395_v33 = vpack.c.b16 %v2377_v55, %v2376_v16  ;;  %v2318_v46 = vrot.slane %v2317_v58, 4  ;;  %v4766_v16 = vld [vmem:[%s5052_s27 + $0xc4] sm:$0xf] }
 0x218   : > { %v3841_v49 = vmax.f32 %v3809_v63, 0.0  ;;  %v2480_v4 = vpop.f32.mrf.mxu1  ;;  %v2307_v24 = vor.u32 %v2306_v27, %v2303_v15  ;;  %v3545_v63 = vor.u32 %v3544_v53, %v5883_v48  ;;  %v4474_v15 = vld [vmem:[%s5052_s27 + $0x24c] sm:$0xf] }
 0x219   : > { %v3052_v40 = vpop.f32.mrf.mxu3  ;;  %v2547_v45 = vadd.f32 %v2480_v4, %v5392_v32  ;;  %v3536_v4 = vrot.slane %v3535_v57, 4  ;;  %v3550_v5 = vrot.slane %v3548_v12, 5  ;;  %v3566_v12 = vshrl.u32 %v4766_v16, 16 }
 0x21a   : > { %v4902_v1 = vpack.c.bf16 %v3841_v49, %v3840_v2  ;;  %v3120_v21 = vadd.f32 %v3052_v40, %v2833_v60  ;;  %v3623_v2 = vpack.c.b16 %v3605_v10, %v3604_v44  ;;  %v2308_v60 = vrot.slane %v2307_v24, 4 }
 0x21b   : > { %v3708_v39 = vpop.f32.mrf.mxu0  ;;  %v2322_v40 = vrot.slane %v2320_v25, 5  ;;  %v3546_v6 = vrot.slane %v3545_v63, 4  ;;  %v3541_v53 = vsel %vm5099_vm5, %v3536_v4, %v5883_v48  ;;  %v2325_v10 = vshrl.u32 %v4474_v15, 16  ;;  %v4767_v4 = vld [vmem:[%s5052_s27 + $0xc8] sm:$0x1] }
 0x21c   : > { %4966 = vst [vmem:[%s5769_s13 + $0x18] sm:$0xff] %v4902_v1   ;;  %v3774_v43 = vadd.f32 %v5857_v30, %v3120_v21  ;;  %v2328_v24 = vshll.u32 %v4474_v15, 16  ;;  %v2338_v25 = vshrl.u32 %v4475_v11, 16  ;;  %v3556_v63 = vshll.u32 %v4765_v3, 16 }
 0x21d   : > { %v2323_v13 = vsel %vm5099_vm5, %v2318_v46, %v2322_v40  ;;  %v3551_v21 = vsel %vm5099_vm5, %v3546_v6, %v3550_v5  ;;  %v3562_v48 = vshll.u32 %v4766_v16, 16 }
 0x21e   : > { %v2767_v26 = vpop.f32.mrf.mxu2  ;;  %v3810_v30 = vadd.f32 %v5744_v23, %v3774_v43  ;;  %v3558_v6 = vrot.slane %v3556_v63, 5 }
 0x21f   : > { %v2834_v28 = vadd.f32 %v2767_v26, %v2547_v45  ;;  %v3553_v26 = vshrl.u32 %v4765_v3, 16  ;;  %v3564_v5 = vrot.slane %v3562_v48, 5  ;;  %v4866_v3 = vld [vmem:[%s5052_s27 + $0xb4] sm:$0xff] }
 0x220   : > { %v2483_v50 = vpop.f32.mrf.mxu1  ;;  %v3842_v55 = vmax.f32 %v3810_v30, 0.0  ;;  %v3568_v30 = vrot.slane %v3566_v12, 4 }
 0x221   : > { %v3054_v17 = vpop.f32.mrf.mxu3  ;;  %v2548_v27 = vadd.f32 %v2483_v50, %v5402_v34  ;;  %v2327_v50 = vrot.slane %v2325_v10, 4  ;;  %v3555_v40 = vrot.slane %v3553_v26, 4 }
 0x222   : > { %v3121_v32 = vadd.f32 %v3054_v17, %v2834_v28  ;;  %v2379_v28 = vunpack.c.l.b16 %v2323_v13  ;;  %v4882_v13 = vld [vmem:[%s5052_s27 + $0x180] sm:$0xff] }
 0x223   : > { %v3711_v49 = vpop.f32.mrf.mxu0  ;;  %4491 = vmatmul.msk.bf16.gmra.mxu1 %vm320_vm2, %v2395_v33  ;;  %4604 = vmatmul.msk.bf16.gmra.mxu2 %vm320_vm2, %v4865_v19  ;;  %v3606_v33 = vunpack.c.l.b16 %v3541_v53  ;;  %v3607_v19 = vunpack.c.l.b16 %v3551_v21 }
 0x224   : > { %v3775_v47 = vadd.f32 %v3708_v39, %v3121_v32  ;;  %v2313_v39 = vsel %vm5099_vm5, %v2308_v60, %v5880_v62  ;;  %v2334_v62 = vshll.u32 %v4475_v11, 16  ;;  %v2340_v60 = vrot.slane %v2338_v25, 4 }
 0x225   : > { %v2378_v43 = vunpack.c.l.b16 %v2313_v39 }
 0x226   : > { %4717 = vmatmul.msk.bf16.gmra.mxu3 %vm320_vm2, %v4881_v51  ;;  %4782 = vmatmul.msk.bf16.gmra.mxu0 %vm320_vm2, %v3623_v2  ;;  %v3811_v1 = vadd.f32 %v5744_v23, %v3775_v47  ;;  %v2770_v9 = vpop.f32.mrf.mxu2  ;;  %v4476_v51 = vld [vmem:[%s5052_s27 + $0x254] sm:$0x1]  ;;  %v2330_v2 = vrot.slane %v2328_v24, 5  ;;  %v2336_v32 = vrot.slane %v2334_v62, 5 }
 0x227   : > { %v2835_v29 = vadd.f32 %v2770_v9, %v2548_v27  ;;  %v2396_v11 = vpack.c.b16 %v2379_v28, %v2378_v43  ;;  %v3624_v9 = vpack.c.b16 %v3607_v19, %v3606_v33  ;;  %v2344_v16 = vshll.u32 %v4476_v51, 16 }
 0x228   : > { %v3843_v34 = vmax.f32 %v3811_v1, 0.0  ;;  %v2485_v45 = vpop.f32.mrf.mxu1  ;;  %v2331_v53 = vor.u32 %v2330_v2, %v2327_v50  ;;  %v2341_v21 = vor.u32 %v2340_v60, %v2336_v32 }
 0x229   : > { %v3057_v44 = vpop.f32.mrf.mxu3  ;;  %v2549_v46 = vadd.f32 %v2485_v45, %v5411_v35  ;;  %v3559_v35 = vor.u32 %v3558_v6, %v3555_v40  ;;  %v2346_v62 = vrot.slane %v2344_v16, 5 }
 0x22a   : > { %v4907_v58 = vpack.c.bf16 %v3843_v34, %v3842_v55  ;;  %v3122_v17 = vadd.f32 %v3057_v44, %v2835_v29  ;;  %v3572_v55 = vshll.u32 %v4767_v4, 16  ;;  %v3569_v44 = vor.u32 %v3568_v30, %v3564_v5 }
 0x22b   : > { %v3713_v57 = vpop.f32.mrf.mxu0  ;;  %v2342_v24 = vrot.slane %v2341_v21, 4  ;;  %v3560_v48 = vrot.slane %v3559_v35, 4 }
 0x22c   : > { %4967 = vst [vmem:[%s5769_s13 + $0x20] sm:$0xff] %v4907_v58   ;;  %v3776_v15 = vadd.f32 %v3711_v49, %v3122_v17  ;;  %v2332_v49 = vrot.slane %v2331_v53, 4  ;;  %v3574_v25 = vrot.slane %v3572_v55, 5  ;;  %v6008_v58 = vld [vmem:[#allocation2_spill] sm:$0xff]  ;;  %v3570_v12 = vrot.slane %v3569_v44, 4 }
 0x22d   : > { %v2347_v51 = vsel %vm5099_vm5, %v2342_v24, %v2346_v62  ;;  %v3565_v40 = vsel %vm5099_vm5, %v3560_v48, %v3564_v5  ;;  %v4883_v5 = vld [vmem:[%s5052_s27 + $0x18c] sm:$0xff] }
 0x22e   : > { %v2772_v47 = vpop.f32.mrf.mxu2  ;;  %v3812_v10 = vadd.f32 %v5744_v23, %v3776_v15  ;;  %v2337_v50 = vsel %vm5099_vm5, %v2332_v49, %v2336_v32  ;;  %v2381_v30 = vunpack.c.l.b16 %v2347_v51  ;;  %v6009_v32 = vld [vmem:[#allocation3_spill] sm:$0xff] }
 0x22f   : > { %v2836_v1 = vadd.f32 %v2772_v47, %v2549_v46  ;;  %v3575_v46 = vsel %vm5099_vm5, %v3570_v12, %v3574_v25  ;;  %v2380_v6 = vunpack.c.l.b16 %v2337_v50  ;;  %v3608_v47 = vunpack.c.l.b16 %v3565_v40 }
 0x230   : > { %v2488_v39 = vpop.f32.mrf.mxu1  ;;  %v3844_v43 = vmax.f32 %v3812_v10, 0.0  ;;  %v3609_v15 = vunpack.c.l.b16 %v3575_v46 }
 0x231   : > { %v3059_v27 = vpop.f32.mrf.mxu3  ;;  %v2550_v63 = vadd.f32 %v2488_v39, %v6008_v58  ;;  %v2397_v39 = vpack.c.b16 %v2381_v30, %v2380_v6 }
 0x232   : > { %v3123_v34 = vadd.f32 %v3059_v27, %v2836_v1  ;;  %v3625_v21 = vpack.c.b16 %v3609_v15, %v3608_v47 }
 0x233   : > { %v3716_v29 = vpop.f32.mrf.mxu0  ;;  %4492 = vmatmul.msk.bf16.gmra.mxu1 %vm320_vm2, %v2396_v11  ;;  %4605 = vmatmul.msk.bf16.gmra.mxu2 %vm320_vm2, %v4866_v3 }
 0x234   : > { %v3777_v45 = vadd.f32 %v3713_v57, %v3123_v34 }
 0x236   : > { %4718 = vmatmul.msk.bf16.gmra.mxu3 %vm320_vm2, %v4882_v13  ;;  %4783 = vmatmul.msk.bf16.gmra.mxu0 %vm320_vm2, %v3624_v9  ;;  %v3813_v26 = vadd.f32 %v5744_v23, %v3777_v45  ;;  %v2775_v57 = vpop.f32.mrf.mxu2  ;;  %v4867_v13 = vld [vmem:[%s5052_s27 + $0xc0] sm:$0xff] }
 0x237   : > { %v2837_v17 = vadd.f32 %v2775_v57, %v2550_v63 }
 0x238   : > { %v3845_v28 = vmax.f32 %v3813_v26, 0.0  ;;  %v2490_v19 = vpop.f32.mrf.mxu1 }
 0x239   : > { %v3062_v33 = vpop.f32.mrf.mxu3  ;;  %v2551_v1 = vadd.f32 %v2490_v19, %v6009_v32 }
 0x23a   : > { %v4912_v2 = vpack.c.bf16 %v3845_v28, %v3844_v43  ;;  %v3124_v4 = vadd.f32 %v3062_v33, %v2837_v17 }
 0x23b   : > { %v3718_v60 = vpop.f32.mrf.mxu0 }
 0x23c   : > { %4968 = vst [vmem:[%s5769_s13 + $0x28] sm:$0xff] %v4912_v2   ;;  %v3778_v11 = vadd.f32 %v3716_v29, %v3124_v4 }
 0x23e   : > { %v2777_v27 = vpop.f32.mrf.mxu2  ;;  %v3814_v55 = vadd.f32 %v5744_v23, %v3778_v11 }
 0x23f   : > { %v2838_v3 = vadd.f32 %v2777_v27, %v2551_v1 }
 0x240   : > { %v2493_v53 = vpop.f32.mrf.mxu1  ;;  %v3846_v10 = vmax.f32 %v3814_v55, 0.0 }
 0x241   : > { %v3064_v9 = vpop.f32.mrf.mxu3  ;;  %v2552_v35 = vadd.f32 %v2493_v53, %v5458_v38 }
 0x242   : > { %v3125_v54 = vadd.f32 %v3064_v9, %v2838_v3 }
 0x243   : > { %v3721_v16 = vpop.f32.mrf.mxu0  ;;  %4493 = vmatmul.msk.bf16.gmra.mxu1 %vm320_vm2, %v2397_v39  ;;  %4606 = vmatmul.msk.bf16.gmra.mxu2 %vm320_vm2, %v4867_v13 }
 0x244   : > { %v3779_v34 = vadd.f32 %v3718_v60, %v3125_v54 }
 0x246   : > { %4719 = vmatmul.msk.bf16.gmra.mxu3 %vm320_vm2, %v4883_v5  ;;  %4784 = vmatmul.msk.bf16.gmra.mxu0 %vm320_vm2, %v3625_v21  ;;  %v3815_v29 = vadd.f32 %v5744_v23, %v3779_v34  ;;  %v2780_v44 = vpop.f32.mrf.mxu2 }
 0x247   : > { %v2839_v49 = vadd.f32 %v2780_v44, %v2552_v35 }
 0x248   : > { %v3847_v45 = vmax.f32 %v3815_v29, 0.0  ;;  %v2495_v62 = vpop.f32.mrf.mxu1 }
 0x249   : > { %v3067_v24 = vpop.f32.mrf.mxu3  ;;  %v2553_v63 = vadd.f32 %v2495_v62, %v5467_v41 }
 0x24a   : > { %v4917_v25 = vpack.c.bf16 %v3847_v45, %v3846_v10  ;;  %v3126_v58 = vadd.f32 %v3067_v24, %v2839_v49 }
 0x24b   : > { %v3723_v26 = vpop.f32.mrf.mxu0 }
 0x24c   : > { %4969 = vst [vmem:[%s5769_s13 + $0x30] sm:$0xff] %v4917_v25   ;;  %v3780_v12 = vadd.f32 %v3721_v16, %v3126_v58 }
 0x24e   : > { %v2782_v48 = vpop.f32.mrf.mxu2  ;;  %v3816_v33 = vadd.f32 %v5744_v23, %v3780_v12 }
 0x24f   : > { %v2840_v57 = vadd.f32 %v2782_v48, %v2553_v63 }
 0x250   : > { %v2498_v28 = vpop.f32.mrf.mxu1  ;;  %v3848_v60 = vmax.f32 %v3816_v33, 0.0 }
 0x251   : > { %v3069_v43 = vpop.f32.mrf.mxu3  ;;  %v2554_v51 = vadd.f32 %v2498_v28, %v5487_v52 }
 0x252   : > { %v3127_v17 = vadd.f32 %v3069_v43, %v2840_v57 }
 0x253   : > { %v3726_v38 = vpop.f32.mrf.mxu0 }
 0x254   : > { %v3781_v19 = vadd.f32 %v3723_v26, %v3127_v17 }
 0x256   : > { %v3817_v50 = vadd.f32 %v5744_v23, %v3781_v19  ;;  %v2785_v2 = vpop.f32.mrf.mxu2 }
 0x257   : > { %v2841_v46 = vadd.f32 %v2785_v2, %v2554_v51 }
 0x258   : > { %v3849_v40 = vmax.f32 %v3817_v50, 0.0  ;;  %v2500_v4 = vpop.f32.mrf.mxu1 }
 0x259   : > { %v3072_v41 = vpop.f32.mrf.mxu3  ;;  %v2555_v15 = vadd.f32 %v2500_v4, %v5500_v42 }
 0x25a   : > { %v4922_v6 = vpack.c.bf16 %v3849_v40, %v3848_v60  ;;  %v3128_v47 = vadd.f32 %v3072_v41, %v2841_v46 }
 0x25b   : > { %v3728_v30 = vpop.f32.mrf.mxu0 }
 0x25c   : > { %4970 = vst [vmem:[%s5769_s13 + $0x38] sm:$0xff] %v4922_v6   ;;  %v3782_v1 = vadd.f32 %v3726_v38, %v3128_v47 }
 0x25e   : > { %v2787_v32 = vpop.f32.mrf.mxu2  ;;  %v3818_v39 = vadd.f32 %v5744_v23, %v3782_v1 }
 0x25f   : > { %v2842_v27 = vadd.f32 %v2787_v32, %v2555_v15 }
 0x260   : > { %v2503_v3 = vpop.f32.mrf.mxu1  ;;  %v3850_v54 = vmax.f32 %v3818_v39, 0.0 }
 0x261   : > { %v3074_v11 = vpop.f32.mrf.mxu3  ;;  %v2556_v5 = vadd.f32 %v2503_v3, %v5518_v20 }
 0x262   : > { %v3129_v9 = vadd.f32 %v3074_v11, %v2842_v27 }
 0x263   : > { %v3731_v52 = vpop.f32.mrf.mxu0 }
 0x264   : > { %v3783_v13 = vadd.f32 %v3728_v30, %v3129_v9 }
 0x266   : > { %v3819_v53 = vadd.f32 %v5744_v23, %v3783_v13  ;;  %v2790_v21 = vpop.f32.mrf.mxu2 }
 0x267   : > { %v2843_v55 = vadd.f32 %v2790_v21, %v2556_v5 }
 0x268   : > { %v3851_v16 = vmax.f32 %v3819_v53, 0.0  ;;  %v2505_v34 = vpop.f32.mrf.mxu1 }
 0x269   : > { %v3077_v42 = vpop.f32.mrf.mxu3  ;;  %v2557_v10 = vadd.f32 %v2505_v34, %v5527_v0 }
 0x26a   : > { %v4927_v29 = vpack.c.bf16 %v3851_v16, %v3850_v54  ;;  %v3130_v44 = vadd.f32 %v3077_v42, %v2843_v55  ;;  %v5971_v55 = vld [vmem:[%s6001_s2] ss:$0 sm:$0xff] }
 0x26b   : > { %v3733_v35 = vpop.f32.mrf.mxu0 }
 0x26c   : > { %4971 = vst [vmem:[%s5769_s13 + $0x40] sm:$0xff] %v4927_v29   ;;  %v3784_v49 = vadd.f32 %v3731_v52, %v3130_v44 }
 0x26e   : > { %v2792_v45 = vpop.f32.mrf.mxu2  ;;  %v3820_v58 = vadd.f32 %v5744_v23, %v3784_v49 }
 0x26f   : > { %v2844_v24 = vadd.f32 %v2792_v45, %v2557_v10 }
 0x270   : > { %v2508_v25 = vpop.f32.mrf.mxu1  ;;  %v3852_v43 = vmax.f32 %v3820_v58, 0.0 }
 0x271   : > { %v3079_v62 = vpop.f32.mrf.mxu3  ;;  %v2558_v12 = vadd.f32 %v2508_v25, %v5547_v22 }
 0x272   : > { %v3131_v26 = vadd.f32 %v3079_v62, %v2844_v24 }
 0x273   : > { %v3736_v20 = vpop.f32.mrf.mxu0 }
 0x274   : > { %v3785_v63 = vadd.f32 %v3733_v35, %v3131_v26 }
 0x276   : > { %v3821_v48 = vadd.f32 %v5744_v23, %v3785_v63  ;;  %v2795_v57 = vpop.f32.mrf.mxu2 }
 0x277   : > { %v2845_v17 = vadd.f32 %v2795_v57, %v2558_v12 }
 0x278   : > { %v3853_v28 = vmax.f32 %v3821_v48, 0.0  ;;  %v2510_v38 = vpop.f32.mrf.mxu1 }
 0x279   : > { %v3082_v0 = vpop.f32.mrf.mxu3  ;;  %v2559_v51 = vadd.f32 %v2510_v38, %v5560_v31 }
 0x27a   : > { %v4932_v33 = vpack.c.bf16 %v3853_v28, %v3852_v43  ;;  %v3132_v50 = vadd.f32 %v3082_v0, %v2845_v17 }
 0x27b   : > { %v3738_v19 = vpop.f32.mrf.mxu0 }
 0x27c   : > { %4972 = vst [vmem:[%s5769_s13 + $0x48] sm:$0xff] %v4932_v33   ;;  %v3786_v60 = vadd.f32 %v3736_v20, %v3132_v50 }
 0x27e   : > { %v2797_v2 = vpop.f32.mrf.mxu2  ;;  %v3822_v6 = vadd.f32 %v5744_v23, %v3786_v60 }
 0x27f   : > { %v2846_v40 = vadd.f32 %v2797_v2, %v2559_v51 }
 0x280   : > { %v2513_v41 = vpop.f32.mrf.mxu1  ;;  %v3854_v1 = vmax.f32 %v3822_v6, 0.0 }
 0x281   : > { %v3084_v46 = vpop.f32.mrf.mxu3  ;;  %v2560_v15 = vadd.f32 %v2513_v41, %v5578_v59 }
 0x282   : > { %v3133_v4 = vadd.f32 %v3084_v46, %v2846_v40 }
 0x283   : > { %v3741_v22 = vpop.f32.mrf.mxu0 }
 0x284   : > { %v3787_v30 = vadd.f32 %v3738_v19, %v3133_v4 }
 0x286   : > { %v3823_v47 = vadd.f32 %v5744_v23, %v3787_v30  ;;  %v2800_v32 = vpop.f32.mrf.mxu2 }
 0x287   : > { %v2847_v11 = vadd.f32 %v2800_v32, %v2560_v15 }
 0x288   : > { %v3855_v27 = vmax.f32 %v3823_v47, 0.0  ;;  %v2515_v3 = vpop.f32.mrf.mxu1 }
 0x289   : > { %v3087_v31 = vpop.f32.mrf.mxu3  ;;  %v2561_v13 = vadd.f32 %v2515_v3, %v5588_v14 }
 0x28a   : > { %v4937_v9 = vpack.c.bf16 %v3855_v27, %v3854_v1  ;;  %v3134_v39 = vadd.f32 %v3087_v31, %v2847_v11 }
 0x28b   : > { %v3743_v52 = vpop.f32.mrf.mxu0 }
 0x28c   : > { %4973 = vst [vmem:[%s5769_s13 + $0x50] sm:$0xff] %v4937_v9   ;;  %v3788_v5 = vadd.f32 %v3741_v22, %v3134_v39 }
 0x28e   : > { %v2802_v53 = vpop.f32.mrf.mxu2  ;;  %v3824_v42 = vadd.f32 %v5971_v55, %v3788_v5 }
 0x28f   : > { %v2848_v21 = vadd.f32 %v2802_v53, %v2561_v13 }
 0x290   : > { %v2518_v16 = vpop.f32.mrf.mxu1  ;;  %v3856_v44 = vmax.f32 %v3824_v42, 0.0 }
 0x291   : > { %v3089_v54 = vpop.f32.mrf.mxu3  ;;  %v2562_v14 = vadd.f32 %v2518_v16, %v5610_v7 }
 0x292   : > { %v3135_v23 = vadd.f32 %v3089_v54, %v2848_v21 }
 0x293   : > { %v3746_v59 = vpop.f32.mrf.mxu0 }
 0x294   : > { %v3789_v34 = vadd.f32 %v3743_v52, %v3135_v23 }
 0x296   : > { %v3825_v29 = vadd.f32 %v5971_v55, %v3789_v34  ;;  %v2805_v35 = vpop.f32.mrf.mxu2 }
 0x297   : > { %v2849_v45 = vadd.f32 %v2805_v35, %v2562_v14  ;;  %v6010_v35 = vld [vmem:[#allocation4_spill] sm:$0xff] }
 0x298   : > { %v3857_v10 = vmax.f32 %v3825_v29, 0.0  ;;  %v2520_v24 = vpop.f32.mrf.mxu1 }
 0x299   : > { %v3092_v49 = vpop.f32.mrf.mxu3  ;;  %v2563_v20 = vadd.f32 %v2520_v24, %v5624_v56 }
 0x29a   : > { %v4942_v62 = vpack.c.bf16 %v3857_v10, %v3856_v44  ;;  %v3136_v26 = vadd.f32 %v3092_v49, %v2849_v45 }
 0x29b   : > { %v3748_v25 = vpop.f32.mrf.mxu0 }
 0x29c   : > { %4974 = vst [vmem:[%s5769_s13 + $0x58] sm:$0xff] %v4942_v62   ;;  %v3790_v63 = vadd.f32 %v3746_v59, %v3136_v26 }
 0x29e   : > { %v2807_v58 = vpop.f32.mrf.mxu2  ;;  %v3826_v28 = vadd.f32 %v5971_v55, %v3790_v63 }
 0x29f   : > { %v2850_v48 = vadd.f32 %v2807_v58, %v2563_v20 }
 0x2a0   : > { %v2523_v57 = vpop.f32.mrf.mxu1  ;;  %v3858_v19 = vmax.f32 %v3826_v28, 0.0 }
 0x2a1   : > { %v3094_v12 = vpop.f32.mrf.mxu3  ;;  %v2564_v38 = vadd.f32 %v2523_v57, %v5643_v36 }
 0x2a2   : > { %v3137_v43 = vadd.f32 %v3094_v12, %v2850_v48 }
 0x2a3   : > { %v3751_v7 = vpop.f32.mrf.mxu0 }
 0x2a4   : > { %v3791_v17 = vadd.f32 %v3748_v25, %v3137_v43 }
 0x2a6   : > { %v3827_v0 = vadd.f32 %v5971_v55, %v3791_v17  ;;  %v2810_v33 = vpop.f32.mrf.mxu2 }
 0x2a7   : > { %v2851_v51 = vadd.f32 %v2810_v33, %v2564_v38 }
 0x2a8   : > { %v3859_v50 = vmax.f32 %v3827_v0, 0.0  ;;  %v2525_v2 = vpop.f32.mrf.mxu1 }
 0x2a9   : > { %v3097_v56 = vpop.f32.mrf.mxu3  ;;  %v2565_v41 = vadd.f32 %v2525_v2, %v5652_v8 }
 0x2aa   : > { %v4947_v60 = vpack.c.bf16 %v3859_v50, %v3858_v19  ;;  %v3138_v46 = vadd.f32 %v3097_v56, %v2851_v51 }
 0x2ab   : > { %v3753_v40 = vpop.f32.mrf.mxu0 }
 0x2ac   : > { %4975 = vst [vmem:[%s5769_s13 + $0x60] sm:$0xff] %v4947_v60   ;;  %v3792_v22 = vadd.f32 %v3751_v7, %v3138_v46 }
 0x2ae   : > { %v2812_v4 = vpop.f32.mrf.mxu2  ;;  %v3828_v36 = vadd.f32 %v5971_v55, %v3792_v22 }
 0x2af   : > { %v2852_v6 = vadd.f32 %v2812_v4, %v2565_v41 }
 0x2b0   : > { %v2528_v47 = vpop.f32.mrf.mxu1  ;;  %v3860_v3 = vmax.f32 %v3828_v36, 0.0 }
 0x2b1   : > { %v3099_v30 = vpop.f32.mrf.mxu3  ;;  %v2566_v11 = vadd.f32 %v2528_v47, %v5674_v18 }
 0x2b2   : > { %v3139_v15 = vadd.f32 %v3099_v30, %v2852_v6 }
 0x2b3   : > { %v3756_v1 = vpop.f32.mrf.mxu0 }
 0x2b4   : > { %v3793_v32 = vadd.f32 %v3753_v40, %v3139_v15 }
 0x2b6   : > { %v3829_v27 = vadd.f32 %v5971_v55, %v3793_v32  ;;  %v2815_v31 = vpop.f32.mrf.mxu2 }
 0x2b7   : > { %v2853_v52 = vadd.f32 %v2815_v31, %v2566_v11 }
 0x2b8   : > { %v3861_v9 = vmax.f32 %v3829_v27, 0.0  ;;  %v2530_v39 = vpop.f32.mrf.mxu1 }
 0x2b9   : > { %v3102_v8 = vpop.f32.mrf.mxu3  ;;  %v2567_v5 = vadd.f32 %v2530_v39, %v5687_v61 }
 0x2ba   : > { %v4952_v13 = vpack.c.bf16 %v3861_v9, %v3860_v3  ;;  %v3140_v53 = vadd.f32 %v3102_v8, %v2853_v52 }
 0x2bb   : > { %v3758_v21 = vpop.f32.mrf.mxu0 }
 0x2bc   : > { %4976 = vst [vmem:[%s5769_s13 + $0x68] sm:$0xff] %v4952_v13   ;;  %v3794_v16 = vadd.f32 %v3756_v1, %v3140_v53 }
 0x2be   : > { %v2817_v54 = vpop.f32.mrf.mxu2  ;;  %v3830_v18 = vadd.f32 %v5971_v55, %v3794_v16 }
 0x2bf   : > { %v2854_v23 = vadd.f32 %v2817_v54, %v2567_v5 }
 0x2c0   : > { %v2533_v42 = vpop.f32.mrf.mxu1  ;;  %v3862_v45 = vmax.f32 %v3830_v18, 0.0 }
 0x2c1   : > { %v3104_v59 = vpop.f32.mrf.mxu3  ;;  %v2568_v44 = vadd.f32 %v2533_v42, %v6010_v35 }
 0x2c2   : > { %v3141_v34 = vadd.f32 %v3104_v59, %v2854_v23 }
 0x2c3   : > { %v3761_v62 = vpop.f32.mrf.mxu0 }
 0x2c4   : > { %v3795_v29 = vadd.f32 %v3758_v21, %v3141_v34 }
 0x2c6   : > { %v3831_v14 = vadd.f32 %v5971_v55, %v3795_v29  ;;  %v2820_v10 = vpop.f32.mrf.mxu2 }
 0x2c7   : > { %v2855_v24 = vadd.f32 %v2820_v10, %v2568_v44 }
 0x2c8   : > { %v3863_v49 = vmax.f32 %v3831_v14, 0.0  ;;  %v2535_v26 = vpop.f32.mrf.mxu1 }
 0x2c9   : > { %v3107_v61 = vpop.f32.mrf.mxu3  ;;  %v2569_v58 = vadd.f32 %v2535_v26, %v5717_v37 }
 0x2ca   : > { %v4957_v25 = vpack.c.bf16 %v3863_v49, %v3862_v45  ;;  %v3142_v20 = vadd.f32 %v3107_v61, %v2855_v24 }
 0x2cb   : > { %v3763_v7 = vpop.f32.mrf.mxu0 }
 0x2cc   : > { %4977 = vst [vmem:[%s5769_s13 + $0x70] sm:$0xff] %v4957_v25   ;;  %v3796_v48 = vadd.f32 %v3761_v62, %v3142_v20 }
 0x2ce   : > { %v2822_v63 = vpop.f32.mrf.mxu2  ;;  %v3832_v28 = vadd.f32 %v5971_v55, %v3796_v48 }
 0x2cf   : > { %v2856_v12 = vadd.f32 %v2822_v63, %v2569_v58 }
 0x2d0   : > { %v3864_v38 = vmax.f32 %v3832_v28, 0.0 }
 0x2d1   : > { %v3109_v57 = vpop.f32.mrf.mxu3 }
 0x2d2   : > { %v3143_v43 = vadd.f32 %v3109_v57, %v2856_v12 }
 0x2d4   : > { %v3797_v17 = vadd.f32 %v3763_v7, %v3143_v43 }
 0x2d6   : > { %v3833_v0 = vadd.f32 %v5971_v55, %v3797_v17 }
 0x2d8   : > { %v3865_v33 = vmax.f32 %v3833_v0, 0.0 }
 0x2da   : > { %v4962_v19 = vpack.c.bf16 %v3865_v33, %v3864_v38 }
 0x2dc   : > { %4978 = vst [vmem:[%s5769_s13 + $0x78] sm:$0xff] %v4962_v19  }
 0x2dd PF: > { %s13_s12 = sadd.s32 1, %s5000_s12  }
 0x2de   : > { %p10_p4 = scmp.ge.s32.totalorder %s13_s12, 4  }
 0x2e0   :  { %12 = sbr.rel (!%p10_p4) target bundleno = 1 (0x1), region = 75 }

// kernel: _lambda_.8
= control target key start
LH: loop header
LB: loop body
LE: loop exit
PB: predicated region body
PF: predicated region fallthrough
CT: control target
= control target key end

     0   :  { %s1729_s12 = smov 0   ;;  %s2024_s0 = inlined_call_operand.vmem [shape: bf16[2,4,9,9,16], index: 0, kind: input, shape index: {}]   ;;  %s2025_s1 = inlined_call_operand.vmem [shape: bf16[9,16,128], index: 1, kind: input, shape index: {}]   ;;  %s2026_s2 = inlined_call_operand.vmem [shape: f32[1,128], index: 2, kind: input, shape index: {}]   ;;  %s2027_s3 = inlined_call_operand.vmem [shape: bf16[2,8,8,128], index: 3, kind: output, shape index: {}]  }
   0x1 LB: > { %s1365_s13 = sadd.s32 4294967295, %s1707_s12   ;;  %p1369_p0 = scmp.ge.s32.totalorder %s1707_s12, 1  ;;  %s1707_s12 = sphi %s1729_s12, %s13_s12  }
   0x2   : > { %p137_p1 = scmp.lt.s32.totalorder %s1707_s12, 3 }
   0x4   : > { %p138_p2 = pnand %p1369_p0, %p137_p1 }
   0x5   : > { %p161_p3 = scmp.lt.s32.totalorder (!%p138_p2), %s1365_s13, 1 }
   0x6   : > { %141 = sbr.rel (%p138_p2) target bundleno = 300 (0x12c), region = 32 }
   0xb   : > { %v1641_v0 = vld [vmem:[%s2025_s1 + $0x8] sm:$0xff]  ;;  %v1642_v1 = vld [vmem:[%s2025_s1 + $0x10] sm:$0xff]  ;;  %v1647_v2 = vld [vmem:[%s2025_s1 + $0x18] sm:$0xff]  ;;  %s2031_s13 = smov (!%p161_p3, %s1365_s13), 1  ;;  %vm220_vm0 = vcmask 130048  }
   0xc   : > { %v1636_v3 = vld [vmem:[%s2025_s1] sm:$0xff]  ;;  %1688 = vmatpush.bf16.msra.mxu1 %v1641_v0  ;;  %1689 = vmatpush.bf16.msra.mxu2 %v1641_v0  ;;  %s1691_s24 = smul.u32 288, %s2031_s13  ;;  %v1658_v5 = vld [vmem:[%s2025_s1 + $0x30] sm:$0xff]  ;;  %v1663_v9 = vld [vmem:[%s2025_s1 + $0x38] sm:$0xff]  ;;  %vm345_vm1 = vsmask.f32 3328 }
   0xd   : > { %v1652_v4 = vld [vmem:[%s2025_s1 + $0x20] sm:$0xff]  ;;  %1690 = vmatpush.bf16.msra.mxu3 %v1641_v0  ;;  %240 = vmatpush.bf16.msra.mxu0 %v1641_v0  ;;  %v1653_v18 = vld [vmem:[%s2025_s1 + $0x28] sm:$0xff]  ;;  %vm346_vm2 = vsmask.f32 7440  ;;  %s1631_s11 = sshll.u32 %s2031_s13, 5 }
   0xe   : > { %s1758_s27 = scalar_lea.vmem %s2024_s0, %s1691_s24  ;;  %v1664_v22 = vld [vmem:[%s2025_s1 + $0x40] sm:$0xff]  ;;  %vm1789_vm3 = vmor %vm345_vm1, %vm346_vm2  ;;  %s1996_s16 = scalar_lea.vmem %s2027_s3, %s1631_s11 }
   0xf   : > { %v1389_v6 = vld [vmem:[%s1758_s27 + $0x58] sm:$0xf]  ;;  %v1638_v7 = vld [vmem:[%s1758_s27 + $0x5c] sm:$0xf0]  ;;  %v1393_v8 = vld [vmem:[%s1758_s27 + $0x68] sm:$0xf] }
  0x10   : > { %500 = vmatpush.bf16.msrb.mxu2 %v1642_v1  ;;  %307 = vmatpush.bf16.msrb.mxu1 %v1636_v3  ;;  %v1390_v10 = vor.u32 %v1638_v7, %v1389_v6  ;;  %v1639_v11 = vld [vmem:[%s1758_s27 + $0x6c] sm:$0xf0]  ;;  %v1397_v12 = vld [vmem:[%s1758_s27 + $0x78] sm:$0xf]  ;;  %v1640_v13 = vld [vmem:[%s1758_s27 + $0x7c] sm:$0xf0] }
  0x11   : > { %587 = vmatpush.bf16.msrb.mxu3 %v1647_v2  ;;  %674 = vmatpush.bf16.msrb.mxu0 %v1652_v4  ;;  %v1394_v14 = vor.u32 %v1639_v11, %v1393_v8  ;;  %v1398_v15 = vor.u32 %v1640_v13, %v1397_v12  ;;  %v1385_v16 = vld [vmem:[%s1758_s27 + $0x48] sm:$0xf]  ;;  %v1637_v17 = vld [vmem:[%s1758_s27 + $0x4c] sm:$0xf0]  ;;  %v329_v20 = vld [vmem:[%s1758_s27] sm:$0xf] }
  0x12   : > { %1404 = vmatmul.msk.bf16.vlgmr.msra.gmra.mxu1 %vm220_vm0, %v1390_v10  ;;  %v1386_v19 = vor.u32 %v1637_v17, %v1385_v16  ;;  %v330_v21 = vld [vmem:[%s1758_s27 + $0x4] sm:$0x1]  ;;  %v331_v23 = vld [vmem:[%s1758_s27 + $0x8] sm:$0xf]  ;;  %v332_v24 = vld [vmem:[%s1758_s27 + $0xc] sm:$0x1] }
  0x13   : > { %1405 = vmatmul.msk.bf16.vlgmr.msra.gmra.mxu2 %vm220_vm0, %v1394_v14  ;;  %1406 = vmatmul.msk.bf16.vlgmr.msra.gmra.mxu3 %vm220_vm0, %v1398_v15  ;;  %v349_v25 = vshrl.u32 %v329_v20, 16  ;;  %v352_v26 = vshll.u32 %v329_v20, 16  ;;  %v358_v27 = vshll.u32 %v330_v21, 16  ;;  %v363_v28 = vshrl.u32 %v331_v23, 16  ;;  %v333_v37 = vld [vmem:[%s1758_s27 + $0x10] sm:$0xf] }
  0x14   : > { %1403 = vmatmul.msk.bf16.vlgmr.msra.gmra.mxu0 %vm220_vm0, %v1386_v19  ;;  %v366_v29 = vshll.u32 %v331_v23, 16  ;;  %v372_v30 = vshll.u32 %v332_v24, 16  ;;  %959 = vmatpush.bf16.msra.mxu2 %v1658_v5  ;;  %v335_v41 = vld [vmem:[%s1758_s27 + $0x18] sm:$0xf]  ;;  %v1409_v42 = vld [vmem:[%s1758_s27] sm:$0xf] }
  0x15   : > { %v351_v31 = vrot.slane %v349_v25, 4  ;;  %v354_v32 = vrot.slane %v352_v26, 5  ;;  %1046 = vmatpush.bf16.msra.mxu3 %v1663_v9  ;;  %872 = vmatpush.bf16.msra.mxu1 %v1653_v18  ;;  %v365_v33 = vrot.slane %v363_v28, 4  ;;  %v360_v36 = vrot.slane %v358_v27, 5  ;;  %v1632_v46 = vld [vmem:[%s1758_s27 + $0x4] sm:$0xf0] }
  0x16   : > { %v368_v34 = vrot.slane %v366_v29, 5  ;;  %1244 = vmatpush.bf16.msra.mxu0 %v1664_v22  ;;  %v374_v40 = vrot.slane %v372_v30, 5  ;;  %v377_v44 = vshrl.u32 %v333_v37, 16  ;;  %v380_v45 = vshll.u32 %v333_v37, 16  ;;  %v1453_v51 = vld [vmem:[%s1758_s27 + $0x90] sm:$0xf] }
  0x17   : > { %v355_v35 = vor.u32 %v354_v32, %v351_v31  ;;  %v391_v48 = vshrl.u32 %v335_v41, 16  ;;  %v394_v49 = vshll.u32 %v335_v41, 16  ;;  %v1643_v52 = vld [vmem:[%s1758_s27 + $0x94] sm:$0xf0]  ;;  %v1648_v58 = vld [vmem:[%s1758_s27 + $0xdc] sm:$0xf0]  ;;  %v1410_v0 = vor.u32 %v1632_v46, %v1409_v42 }
  0x18   : > { %v369_v39 = vor.u32 %v368_v34, %v365_v33  ;;  %v379_v53 = vrot.slane %v377_v44, 4  ;;  %v382_v54 = vrot.slane %v380_v45, 5  ;;  %v1487_v57 = vld [vmem:[%s1758_s27 + $0xd8] sm:$0xf]  ;;  %v334_v62 = vld [vmem:[%s1758_s27 + $0x14] sm:$0x1]  ;;  %v1454_v2 = vor.u32 %v1643_v52, %v1453_v51 }
  0x19   : > { %v356_v43 = vrot.slane %v355_v35, 4  ;;  %v393_v59 = vrot.slane %v391_v48, 4  ;;  %v396_v60 = vrot.slane %v394_v49, 5  ;;  %v336_v63 = vld [vmem:[%s1758_s27 + $0x1c] sm:$0x1]  ;;  %v1488_v3 = vor.u32 %v1648_v58, %v1487_v57 }
  0x1a   : > { %v370_v47 = vrot.slane %v369_v39, 4  ;;  %v383_v4 = vor.u32 %v382_v54, %v379_v53  ;;  %v386_v5 = vshll.u32 %v334_v62, 16  ;;  %v400_v7 = vshll.u32 %v336_v63, 16  ;;  %v337_v12 = vld [vmem:[%s1758_s27 + $0x20] sm:$0xf] }
  0x1b   : > { %v361_v50 = vsel %vm1789_vm3, %v356_v43, %v360_v36  ;;  %v397_v6 = vor.u32 %v396_v60, %v393_v59  ;;  %v339_v13 = vld [vmem:[%s1758_s27 + $0x28] sm:$0xf]  ;;  %v405_v14 = vshrl.u32 %v337_v12, 16  ;;  %v408_v15 = vshll.u32 %v337_v12, 16  ;;  %v1413_v20 = vld [vmem:[%s1758_s27 + $0x10] sm:$0xf] }
  0x1c   : > { %v375_v55 = vsel %vm1789_vm3, %v370_v47, %v374_v40  ;;  %v463_v56 = vunpack.c.l.b16 %v361_v50  ;;  %v384_v8 = vrot.slane %v383_v4, 4  ;;  %v388_v9 = vrot.slane %v386_v5, 5  ;;  %v1633_v21 = vld [vmem:[%s1758_s27 + $0x14] sm:$0xf0]  ;;  %v1457_v24 = vld [vmem:[%s1758_s27 + $0xa0] sm:$0xf] }
  0x1d   : > { %v464_v61 = vunpack.c.l.b16 %v375_v55  ;;  %v398_v10 = vrot.slane %v397_v6, 4  ;;  %v402_v11 = vrot.slane %v400_v7, 5  ;;  %v419_v18 = vshrl.u32 %v339_v13, 16  ;;  %v1644_v25 = vld [vmem:[%s1758_s27 + $0xa4] sm:$0xf0] }
  0x1e   : > { %v389_v16 = vsel %vm1789_vm3, %v384_v8, %v388_v9  ;;  %v422_v19 = vshll.u32 %v339_v13, 16  ;;  %v1491_v26 = vld [vmem:[%s1758_s27 + $0xe8] sm:$0xf]  ;;  %v1649_v27 = vld [vmem:[%s1758_s27 + $0xec] sm:$0xf0]  ;;  %v407_v28 = vrot.slane %v405_v14, 4  ;;  %v1414_v34 = vor.u32 %v1633_v21, %v1413_v20 }
  0x1f   : > { %v471_v1 = vpack.c.b16 %v464_v61, %v463_v56  ;;  %v403_v17 = vsel %vm1789_vm3, %v398_v10, %v402_v11  ;;  %v465_v22 = vunpack.c.l.b16 %v389_v16  ;;  %v410_v29 = vrot.slane %v408_v15, 5  ;;  %v338_v32 = vld [vmem:[%s1758_s27 + $0x24] sm:$0x1]  ;;  %v340_v33 = vld [vmem:[%s1758_s27 + $0x2c] sm:$0x1] }
  0x20   : > { %v466_v23 = vunpack.c.l.b16 %v403_v17  ;;  %v421_v30 = vrot.slane %v419_v18, 4  ;;  %v424_v31 = vrot.slane %v422_v19, 5  ;;  %v1458_v36 = vor.u32 %v1644_v25, %v1457_v24  ;;  %v341_v43 = vld [vmem:[%s1758_s27 + $0x30] sm:$0xf]  ;;  %v343_v44 = vld [vmem:[%s1758_s27 + $0x38] sm:$0xf] }
  0x21   : > { %v1492_v37 = vor.u32 %v1649_v27, %v1491_v26  ;;  %v411_v39 = vor.u32 %v410_v29, %v407_v28  ;;  %v414_v40 = vshll.u32 %v338_v32, 16  ;;  %v428_v42 = vshll.u32 %v340_v33, 16  ;;  %v342_v59 = vld [vmem:[%s1758_s27 + $0x34] sm:$0x1]  ;;  %v344_v60 = vld [vmem:[%s1758_s27 + $0x3c] sm:$0x1] }
  0x22   : > { %1427 = vmatmul.msk.bf16.vlgmr.msrb.gmra.mxu1 %vm220_vm0, %v1410_v0  ;;  %v472_v35 = vpack.c.b16 %v466_v23, %v465_v22  ;;  %v425_v41 = vor.u32 %v424_v31, %v421_v30  ;;  %v433_v49 = vshrl.u32 %v341_v43, 16  ;;  %v436_v50 = vshll.u32 %v341_v43, 16  ;;  %v1417_v61 = vld [vmem:[%s1758_s27 + $0x20] sm:$0xf]  ;;  %v1634_v62 = vld [vmem:[%s1758_s27 + $0x24] sm:$0xf0] }
  0x23   : > { %1437 = vmatmul.msk.bf16.vlgmr.msrb.gmra.mxu2 %vm220_vm0, %v471_v1  ;;  %1471 = vmatmul.msk.bf16.vlgmr.msrb.gmra.mxu3 %vm220_vm0, %v1454_v2  ;;  %v412_v45 = vrot.slane %v411_v39, 4  ;;  %v416_v46 = vrot.slane %v414_v40, 5  ;;  %v430_v48 = vrot.slane %v428_v42, 5  ;;  %v447_v51 = vshrl.u32 %v343_v44, 16  ;;  %v1461_v1 = vld [vmem:[%s1758_s27 + $0xb0] sm:$0xf] }
  0x24   : > { %1505 = vmatmul.msk.bf16.vlgmr.msrb.gmra.mxu0 %vm220_vm0, %v1488_v3  ;;  %v426_v47 = vrot.slane %v425_v41, 4  ;;  %v450_v52 = vshll.u32 %v343_v44, 16  ;;  %v435_v55 = vrot.slane %v433_v49, 4  ;;  %v438_v56 = vrot.slane %v436_v50, 5  ;;  %v1645_v2 = vld [vmem:[%s1758_s27 + $0xb4] sm:$0xf0] }
  0x25   : > { %v417_v53 = vsel %vm1789_vm3, %v412_v45, %v416_v46  ;;  %v449_v57 = vrot.slane %v447_v51, 4  ;;  %v1495_v3 = vld [vmem:[%s1758_s27 + $0xf8] sm:$0xf]  ;;  %v1650_v4 = vld [vmem:[%s1758_s27 + $0xfc] sm:$0xf0]  ;;  %v442_v6 = vshll.u32 %v342_v59, 16  ;;  %v1418_v9 = vor.u32 %v1634_v62, %v1417_v61 }
  0x26   : > { %v431_v54 = vsel %vm1789_vm3, %v426_v47, %v430_v48  ;;  %v452_v58 = vrot.slane %v450_v52, 5  ;;  %v467_v63 = vunpack.c.l.b16 %v417_v53  ;;  %v439_v5 = vor.u32 %v438_v56, %v435_v55  ;;  %v1509_v17 = vld [vmem:[%s1758_s27 + $0x90] sm:$0xf]  ;;  %v1511_v18 = vld [vmem:[%s1758_s27 + $0x98] sm:$0xf] }
  0x27   : > { %v468_v0 = vunpack.c.l.b16 %v431_v54  ;;  %v456_v8 = vshll.u32 %v344_v60, 16  ;;  %v1462_v11 = vor.u32 %v1645_v2, %v1461_v1  ;;  %v1496_v12 = vor.u32 %v1650_v4, %v1495_v3  ;;  %v1603_v19 = vld [vmem:[%s1758_s27 + $0x8] sm:$0xf]  ;;  %v1605_v20 = vld [vmem:[%s1758_s27 + $0x10] sm:$0xf] }
  0x28   : > { %v453_v7 = vor.u32 %v452_v58, %v449_v57  ;;  %v440_v13 = vrot.slane %v439_v5, 4  ;;  %v444_v14 = vrot.slane %v442_v6, 5  ;;  %v721_v23 = vshrl.u32 %v1509_v17, 16  ;;  %v1421_v31 = vld [vmem:[%s1758_s27 + $0x30] sm:$0xf] }
  0x29   : > { %v473_v10 = vpack.c.b16 %v468_v0, %v467_v63  ;;  %v458_v16 = vrot.slane %v456_v8, 5  ;;  %v724_v24 = vshll.u32 %v1509_v17, 16  ;;  %v735_v25 = vshrl.u32 %v1511_v18, 16  ;;  %v1635_v32 = vld [vmem:[%s1758_s27 + $0x34] sm:$0xf0] }
  0x2a   : > { %v454_v15 = vrot.slane %v453_v7, 4  ;;  %v445_v21 = vsel %vm1789_vm3, %v440_v13, %v444_v14  ;;  %v738_v26 = vshll.u32 %v1511_v18, 16  ;;  %v1093_v27 = vshrl.u32 %v1603_v19, 16  ;;  %v1512_v43 = vld [vmem:[%s1758_s27 + $0x9c] sm:$0x1] }
  0x2b   : > { %v1096_v28 = vshll.u32 %v1603_v19, 16  ;;  %v1107_v29 = vshrl.u32 %v1605_v20, 16  ;;  %v1110_v30 = vshll.u32 %v1605_v20, 16  ;;  %v469_v33 = vunpack.c.l.b16 %v445_v21  ;;  %v1604_v48 = vld [vmem:[%s1758_s27 + $0xc] sm:$0x1] }
  0x2c   : > { %v459_v22 = vsel %vm1789_vm3, %v454_v15, %v458_v16  ;;  %v723_v39 = vrot.slane %v721_v23, 4  ;;  %v726_v40 = vrot.slane %v724_v24, 5  ;;  %v737_v41 = vrot.slane %v735_v25, 4  ;;  %v1606_v49 = vld [vmem:[%s1758_s27 + $0x14] sm:$0x1] }
  0x2d   : > { %v740_v42 = vrot.slane %v738_v26, 5  ;;  %v1095_v44 = vrot.slane %v1093_v27, 4  ;;  %v1098_v45 = vrot.slane %v1096_v28, 5  ;;  %v1109_v46 = vrot.slane %v1107_v29, 4  ;;  %v1499_v53 = vld [vmem:[%s1758_s27 + $0x108] sm:$0xf] }
  0x2e   : > { %v1112_v47 = vrot.slane %v1110_v30, 5  ;;  %v1422_v50 = vor.u32 %v1635_v32, %v1421_v31  ;;  %v1651_v54 = vld [vmem:[%s1758_s27 + $0x10c] sm:$0xf0]  ;;  %v727_v55 = vor.u32 %v726_v40, %v723_v39  ;;  %v744_v58 = vshll.u32 %v1512_v43, 16  ;;  %v1513_v0 = vld [vmem:[%s1758_s27 + $0xa0] sm:$0xf] }
  0x2f   : > { %v741_v57 = vor.u32 %v740_v42, %v737_v41  ;;  %v1099_v59 = vor.u32 %v1098_v45, %v1095_v44  ;;  %v1102_v60 = vshll.u32 %v1604_v48, 16  ;;  %v1116_v62 = vshll.u32 %v1606_v49, 16  ;;  %v1515_v1 = vld [vmem:[%s1758_s27 + $0xa8] sm:$0xf]  ;;  %v1607_v14 = vld [vmem:[%s1758_s27 + $0x18] sm:$0xf] }
  0x30   : > { %v1113_v61 = vor.u32 %v1112_v47, %v1109_v46  ;;  %v1500_v63 = vor.u32 %v1651_v54, %v1499_v53  ;;  %v728_v2 = vrot.slane %v727_v55, 4  ;;  %v746_v5 = vrot.slane %v744_v58, 5  ;;  %v1609_v15 = vld [vmem:[%s1758_s27 + $0x20] sm:$0xf]  ;;  %v1514_v20 = vld [vmem:[%s1758_s27 + $0xa4] sm:$0x1] }
  0x31   : > { %v742_v4 = vrot.slane %v741_v57, 4  ;;  %v1100_v6 = vrot.slane %v1099_v59, 4  ;;  %v1104_v7 = vrot.slane %v1102_v60, 5  ;;  %v766_v13 = vshll.u32 %v1515_v1, 16  ;;  %v1516_v25 = vld [vmem:[%s1758_s27 + $0xac] sm:$0x1] }
  0x32   : > { %1428 = vmatmul.msk.bf16.gmra.mxu1 %vm220_vm0, %v1414_v34  ;;  %v470_v34 = vunpack.c.l.b16 %v459_v22  ;;  %v1114_v8 = vrot.slane %v1113_v61, 4  ;;  %v1121_v26 = vshrl.u32 %v1607_v14, 16  ;;  %v1124_v27 = vshll.u32 %v1607_v14, 16  ;;  %v1547_v32 = vld [vmem:[%s1758_s27 + $0x8] sm:$0xf] }
  0x33   : > { %1438 = vmatmul.msk.bf16.gmra.mxu2 %vm220_vm0, %v472_v35  ;;  %1472 = vmatmul.msk.bf16.gmra.mxu3 %vm220_vm0, %v1458_v36  ;;  %v1465_v35 = vld [vmem:[%s1758_s27 + $0xc0] sm:$0xf]  ;;  %v1646_v36 = vld [vmem:[%s1758_s27 + $0xc4] sm:$0xf0]  ;;  %v747_v17 = vsel %vm1789_vm3, %v742_v4, %v746_v5  ;;  %v1105_v18 = vsel %vm1789_vm3, %v1100_v6, %v1104_v7  ;;  %v768_v24 = vrot.slane %v766_v13, 5  ;;  %v1135_v28 = vshrl.u32 %v1609_v15, 16 }
  0x34   : > { %1506 = vmatmul.msk.bf16.gmra.mxu0 %vm220_vm0, %v1492_v37  ;;  %v1510_v37 = vld [vmem:[%s1758_s27 + $0x94] sm:$0x1]  ;;  %v474_v51 = vpack.c.b16 %v470_v34, %v469_v33  ;;  %v1466_v52 = vor.u32 %v1646_v36, %v1465_v35  ;;  %v1138_v29 = vshll.u32 %v1609_v15, 16  ;;  %v836_v31 = vunpack.c.l.b16 %v747_v17  ;;  %v1654_v33 = vld [vmem:[%s1758_s27 + $0xc] sm:$0xf0] }
  0x35   : > { %v730_v56 = vshll.u32 %v1510_v37, 16  ;;  %v1207_v34 = vunpack.c.l.b16 %v1105_v18  ;;  %v1581_v36 = vld [vmem:[%s1758_s27 + $0x50] sm:$0xf]  ;;  %v1659_v37 = vld [vmem:[%s1758_s27 + $0x54] sm:$0xf0]  ;;  %v758_v40 = vshll.u32 %v1514_v20, 16 }
  0x36   : > { %v772_v42 = vshll.u32 %v1516_v25, 16  ;;  %v1123_v43 = vrot.slane %v1121_v26, 4  ;;  %v1126_v44 = vrot.slane %v1124_v27, 5  ;;  %v1137_v45 = vrot.slane %v1135_v28, 4  ;;  %v1608_v48 = vld [vmem:[%s1758_s27 + $0x1c] sm:$0x1] }
  0x37   : > { %v732_v3 = vrot.slane %v730_v56, 5  ;;  %v1140_v46 = vrot.slane %v1138_v29, 5  ;;  %v1610_v49 = vld [vmem:[%s1758_s27 + $0x24] sm:$0x1]  ;;  %v760_v54 = vrot.slane %v758_v40, 5  ;;  %v1130_v58 = vshll.u32 %v1608_v48, 16 }
  0x38   : > { %v774_v56 = vrot.slane %v772_v42, 5  ;;  %v1127_v57 = vor.u32 %v1126_v44, %v1123_v43  ;;  %v1144_v60 = vshll.u32 %v1610_v49, 16  ;;  %v1517_v61 = vld [vmem:[%s1758_s27 + $0xb0] sm:$0xf]  ;;  %v1655_v20 = vld [vmem:[%s1758_s27 + $0x1c] sm:$0xf0] }
  0x39   : > { %v733_v16 = vsel %vm1789_vm3, %v728_v2, %v732_v3  ;;  %v1141_v59 = vor.u32 %v1140_v46, %v1137_v45  ;;  %v1132_v3 = vrot.slane %v1130_v58, 5  ;;  %v1613_v6 = vld [vmem:[%s1758_s27 + $0x30] sm:$0xf]  ;;  %v777_v7 = vshrl.u32 %v1517_v61, 16  ;;  %v1518_v26 = vld [vmem:[%s1758_s27 + $0xb4] sm:$0x1] }
  0x3a   : > { %v835_v30 = vunpack.c.l.b16 %v733_v16  ;;  %v1128_v2 = vrot.slane %v1127_v57, 4  ;;  %v1146_v5 = vrot.slane %v1144_v60, 5  ;;  %v1163_v13 = vshrl.u32 %v1613_v6, 16  ;;  %v1520_v27 = vld [vmem:[%s1758_s27 + $0xbc] sm:$0x1] }
  0x3b   : > { %v1142_v4 = vrot.slane %v1141_v59, 4  ;;  %v1166_v14 = vshll.u32 %v1613_v6, 16  ;;  %v786_v40 = vshll.u32 %v1518_v26, 16  ;;  %v800_v42 = vshll.u32 %v1520_v27, 16  ;;  %v1521_v58 = vld [vmem:[%s1758_s27 + $0xc0] sm:$0xf] }
  0x3c   : > { %v843_v47 = vpack.c.b16 %v836_v31, %v835_v30  ;;  %v1133_v17 = vsel %vm1789_vm3, %v1128_v2, %v1132_v3  ;;  %v1660_v30 = vld [vmem:[%s1758_s27 + $0x64] sm:$0xf0] }
  0x3d   : > { %v1147_v18 = vsel %vm1789_vm3, %v1142_v4, %v1146_v5  ;;  %v1209_v31 = vunpack.c.l.b16 %v1133_v17  ;;  %v1523_v59 = vld [vmem:[%s1758_s27 + $0xc8] sm:$0xf] }
  0x3e   : > { %v819_v2 = vshrl.u32 %v1523_v59, 16  ;;  %v822_v3 = vshll.u32 %v1523_v59, 16  ;;  %v1593_v59 = vld [vmem:[%s1758_s27 + $0x80] sm:$0xf] }
  0x42   : > { %1429 = vmatmul.msk.bf16.gmra.mxu1 %vm220_vm0, %v1418_v9  ;;  %v1118_v9 = vrot.slane %v1116_v62, 5  ;;  %v1519_v62 = vld [vmem:[%s1758_s27 + $0xb8] sm:$0xf] }
  0x43   : > { %1439 = vmatmul.msk.bf16.gmra.mxu2 %vm220_vm0, %v473_v10  ;;  %1473 = vmatmul.msk.bf16.gmra.mxu3 %vm220_vm0, %v1462_v11  ;;  %v749_v10 = vshrl.u32 %v1513_v0, 16  ;;  %v752_v11 = vshll.u32 %v1513_v0, 16 }
  0x44   : > { %1507 = vmatmul.msk.bf16.gmra.mxu0 %vm220_vm0, %v1496_v12  ;;  %v763_v12 = vshrl.u32 %v1515_v1, 16  ;;  %v1119_v19 = vsel %vm1789_vm3, %v1114_v8, %v1118_v9  ;;  %v1611_v1 = vld [vmem:[%s1758_s27 + $0x28] sm:$0xf]  ;;  %v780_v8 = vshll.u32 %v1517_v61, 16  ;;  %v791_v9 = vshrl.u32 %v1519_v62, 16 }
  0x45   : > { %v751_v21 = vrot.slane %v749_v10, 4  ;;  %v754_v22 = vrot.slane %v752_v11, 5  ;;  %v1208_v35 = vunpack.c.l.b16 %v1119_v19  ;;  %v794_v10 = vshll.u32 %v1519_v62, 16  ;;  %v1551_v19 = vld [vmem:[%s1758_s27 + $0x18] sm:$0xf] }
  0x46   : > { %v765_v23 = vrot.slane %v763_v12, 4  ;;  %v1149_v11 = vshrl.u32 %v1611_v1, 16  ;;  %v1152_v12 = vshll.u32 %v1611_v1, 16  ;;  %v1552_v43 = vor.u32 %v1655_v20, %v1551_v19  ;;  %v1615_v62 = vld [vmem:[%s1758_s27 + $0x38] sm:$0xf] }
  0x47   : > { %v755_v39 = vor.u32 %v754_v22, %v751_v21  ;;  %v1585_v21 = vld [vmem:[%s1758_s27 + $0x60] sm:$0xf]  ;;  %v779_v22 = vrot.slane %v777_v7, 4  ;;  %v796_v25 = vrot.slane %v794_v10, 5  ;;  %v808_v1 = vshll.u32 %v1521_v58, 16 }
  0x48   : > { %v769_v41 = vor.u32 %v768_v24, %v765_v23  ;;  %v782_v23 = vrot.slane %v780_v8, 5  ;;  %v793_v24 = vrot.slane %v791_v9, 4  ;;  %v1151_v28 = vrot.slane %v1149_v11, 4 }
  0x49   : > { %v756_v53 = vrot.slane %v755_v39, 4  ;;  %v1154_v29 = vrot.slane %v1152_v12, 5  ;;  %v1586_v44 = vor.u32 %v1660_v30, %v1585_v21  ;;  %v1177_v6 = vshrl.u32 %v1615_v62, 16  ;;  %v1555_v12 = vld [vmem:[%s1758_s27 + $0x28] sm:$0xf] }
  0x4a   : > { %v770_v55 = vrot.slane %v769_v41, 4  ;;  %v783_v39 = vor.u32 %v782_v23, %v779_v22  ;;  %v797_v41 = vor.u32 %v796_v25, %v793_v24  ;;  %v1180_v7 = vshll.u32 %v1615_v62, 16  ;;  %v1522_v22 = vld [vmem:[%s1758_s27 + $0xc4] sm:$0x1]  ;;  %v1524_v23 = vld [vmem:[%s1758_s27 + $0xcc] sm:$0x1] }
  0x4b   : > { %v1155_v45 = vor.u32 %v1154_v29, %v1151_v28  ;;  %v810_v17 = vrot.slane %v808_v1, 5  ;;  %v824_v19 = vrot.slane %v822_v3, 5  ;;  %v1179_v24 = vrot.slane %v1177_v6, 4 }
  0x4c   : > { %v775_v0 = vsel %vm1789_vm3, %v770_v55, %v774_v56  ;;  %v1182_v25 = vrot.slane %v1180_v7, 5 }
  0x4d   : > { %v838_v16 = vunpack.c.l.b16 %v775_v0  ;;  %v805_v0 = vshrl.u32 %v1521_v58, 16  ;;  %v1657_v58 = vld [vmem:[%s1758_s27 + $0x3c] sm:$0xf0] }
  0x52   : > { %1430 = vmatmul.msk.bf16.gmra.mxu1 %vm220_vm0, %v1422_v50  ;;  %v1548_v50 = vor.u32 %v1654_v33, %v1547_v32  ;;  %v1210_v32 = vunpack.c.l.b16 %v1147_v18  ;;  %v1612_v33 = vld [vmem:[%s1758_s27 + $0x2c] sm:$0x1]  ;;  %v821_v18 = vrot.slane %v819_v2, 4 }
  0x53   : > { %1440 = vmatmul.msk.bf16.gmra.mxu2 %vm220_vm0, %v474_v51  ;;  %1474 = vmatmul.msk.bf16.gmra.mxu3 %vm220_vm0, %v1466_v52  ;;  %v1582_v51 = vor.u32 %v1659_v37, %v1581_v36  ;;  %v1215_v52 = vpack.c.b16 %v1208_v35, %v1207_v34  ;;  %v1165_v34 = vrot.slane %v1163_v13, 4  ;;  %v1168_v35 = vrot.slane %v1166_v14, 5  ;;  %v1614_v37 = vld [vmem:[%s1758_s27 + $0x34] sm:$0x1]  ;;  %v1656_v13 = vld [vmem:[%s1758_s27 + $0x2c] sm:$0xf0] }
  0x54   : > { %1508 = vmatmul.msk.bf16.gmra.mxu0 %vm220_vm0, %v1500_v63  ;;  %v761_v63 = vsel %vm1789_vm3, %v756_v53, %v760_v54  ;;  %v1158_v46 = vshll.u32 %v1612_v33, 16  ;;  %v1172_v49 = vshll.u32 %v1614_v37, 16  ;;  %v802_v53 = vrot.slane %v800_v42, 5  ;;  %v1589_v14 = vld [vmem:[%s1758_s27 + $0x70] sm:$0xf] }
  0x55   : > { %v837_v15 = vunpack.c.l.b16 %v761_v63  ;;  %v1169_v48 = vor.u32 %v1168_v35, %v1165_v34  ;;  %v1156_v54 = vrot.slane %v1155_v45, 4  ;;  %v1617_v63 = vld [vmem:[%s1758_s27 + $0x40] sm:$0xf]  ;;  %v1556_v29 = vor.u32 %v1656_v13, %v1555_v12 }
  0x56   : > { %v1160_v55 = vrot.slane %v1158_v46, 5  ;;  %v1174_v57 = vrot.slane %v1172_v49, 5  ;;  %v1191_v8 = vshrl.u32 %v1617_v63, 16  ;;  %v1194_v9 = vshll.u32 %v1617_v63, 16 }
  0x57   : > { %v844_v36 = vpack.c.b16 %v838_v16, %v837_v15  ;;  %v1170_v56 = vrot.slane %v1169_v48, 4  ;;  %v1661_v15 = vld [vmem:[%s1758_s27 + $0x74] sm:$0xf0]  ;;  %v807_v16 = vrot.slane %v805_v0, 4  ;;  %v814_v34 = vshll.u32 %v1522_v22, 16 }
  0x58   : > { %v1161_v4 = vsel %vm1789_vm3, %v1156_v54, %v1160_v55  ;;  %v1193_v26 = vrot.slane %v1191_v8, 4  ;;  %v1196_v27 = vrot.slane %v1194_v9, 5  ;;  %v1590_v30 = vor.u32 %v1661_v15, %v1589_v14 }
  0x59   : > { %v1175_v5 = vsel %vm1789_vm3, %v1170_v56, %v1174_v57  ;;  %v1211_v20 = vunpack.c.l.b16 %v1161_v4  ;;  %v811_v33 = vor.u32 %v810_v17, %v807_v16  ;;  %v825_v35 = vor.u32 %v824_v19, %v821_v18  ;;  %v1559_v57 = vld [vmem:[%s1758_s27 + $0x38] sm:$0xf] }
  0x5a   : > { %v1212_v21 = vunpack.c.l.b16 %v1175_v5  ;;  %v1560_v1 = vor.u32 %v1657_v58, %v1559_v57 }
  0x5b   : > { %v826_v45 = vrot.slane %v825_v35, 4 }
  0x5c   : > { %v1217_v37 = vpack.c.b16 %v1212_v21, %v1211_v20 }
  0x62   : > { %1531 = vmatmul.msk.bf16.vlgmr.msra.gmra.mxu1 %vm220_vm0, %v843_v47  ;;  %v1216_v47 = vpack.c.b16 %v1210_v32, %v1209_v31  ;;  %v1616_v31 = vld [vmem:[%s1758_s27 + $0x3c] sm:$0x1]  ;;  %v1618_v32 = vld [vmem:[%s1758_s27 + $0x44] sm:$0x1] }
  0x63   : > { %1565 = vmatmul.msk.bf16.vlgmr.msra.gmra.mxu2 %vm220_vm0, %v1548_v50  ;;  %1599 = vmatmul.msk.bf16.vlgmr.msra.gmra.mxu3 %vm220_vm0, %v1582_v51  ;;  %v784_v50 = vrot.slane %v783_v39, 4  ;;  %v788_v51 = vrot.slane %v786_v40, 5  ;;  %v1183_v39 = vor.u32 %v1182_v25, %v1179_v24  ;;  %v1186_v40 = vshll.u32 %v1616_v31, 16 }
  0x64   : > { %1625 = vmatmul.msk.bf16.vlgmr.msra.gmra.mxu0 %vm220_vm0, %v1215_v52  ;;  %v798_v52 = vrot.slane %v797_v41, 4  ;;  %v1197_v41 = vor.u32 %v1196_v27, %v1193_v26  ;;  %v1200_v42 = vshll.u32 %v1618_v32, 16 }
  0x65   : > { %v789_v60 = vsel %vm1789_vm3, %v784_v50, %v788_v51  ;;  %v1188_v48 = vrot.slane %v1186_v40, 5 }
  0x66   : > { %v803_v61 = vsel %vm1789_vm3, %v798_v52, %v802_v53  ;;  %v839_v10 = vunpack.c.l.b16 %v789_v60  ;;  %v1198_v49 = vrot.slane %v1197_v41, 4  ;;  %v1202_v50 = vrot.slane %v1200_v42, 5  ;;  %v1662_v60 = vld [vmem:[%s1758_s27 + $0x84] sm:$0xf0] }
  0x67   : > { %v840_v11 = vunpack.c.l.b16 %v803_v61  ;;  %v1594_v2 = vor.u32 %v1662_v60, %v1593_v59 }
  0x68   : > { %v1203_v54 = vsel %vm1789_vm3, %v1198_v49, %v1202_v50 }
  0x69   : > { %v845_v28 = vpack.c.b16 %v840_v11, %v839_v10  ;;  %v1214_v62 = vunpack.c.l.b16 %v1203_v54 }
  0x72   : > { %1532 = vmatmul.msk.bf16.gmra.mxu1 %vm220_vm0, %v844_v36  ;;  %v828_v36 = vshll.u32 %v1524_v23, 16 }
  0x73   : > { %1566 = vmatmul.msk.bf16.gmra.mxu2 %vm220_vm0, %v1552_v43  ;;  %1600 = vmatmul.msk.bf16.gmra.mxu3 %vm220_vm0, %v1586_v44  ;;  %v812_v43 = vrot.slane %v811_v33, 4  ;;  %v816_v44 = vrot.slane %v814_v34, 5 }
  0x74   : > { %1626 = vmatmul.msk.bf16.gmra.mxu0 %vm220_vm0, %v1216_v47  ;;  %v830_v46 = vrot.slane %v828_v36, 5  ;;  %v1184_v47 = vrot.slane %v1183_v39, 4 }
  0x75   : > { %v817_v51 = vsel %vm1789_vm3, %v812_v43, %v816_v44 }
  0x76   : > { %v831_v52 = vsel %vm1789_vm3, %v826_v45, %v830_v46  ;;  %v1189_v53 = vsel %vm1789_vm3, %v1184_v47, %v1188_v48  ;;  %v841_v55 = vunpack.c.l.b16 %v817_v51 }
  0x77   : > { %v842_v56 = vunpack.c.l.b16 %v831_v52  ;;  %v1213_v61 = vunpack.c.l.b16 %v1189_v53 }
  0x79   : > { %v846_v63 = vpack.c.b16 %v842_v56, %v841_v55  ;;  %v1218_v3 = vpack.c.b16 %v1214_v62, %v1213_v61 }
  0x82   : > { %1533 = vmatmul.msk.bf16.gmra.mxu1 %vm220_vm0, %v845_v28 }
  0x83   : > { %1567 = vmatmul.msk.bf16.gmra.mxu2 %vm220_vm0, %v1556_v29  ;;  %1601 = vmatmul.msk.bf16.gmra.mxu3 %vm220_vm0, %v1590_v30 }
  0x84   : > { %1627 = vmatmul.msk.bf16.gmra.mxu0 %vm220_vm0, %v1217_v37 }
  0x8f   : > { %v247_v0 = vpop.f32.mrf.mxu1 }
  0x91   : > { %v242_v4 = vpop.f32.mrf.mxu0 }
  0x92   : > { %1534 = vmatmul.msk.bf16.gmra.mxu1 %vm220_vm0, %v846_v63 }
  0x93   : > { %1568 = vmatmul.msk.bf16.gmra.mxu2 %vm220_vm0, %v1560_v1  ;;  %1602 = vmatmul.msk.bf16.gmra.mxu3 %vm220_vm0, %v1594_v2 }
  0x94   : > { %1628 = vmatmul.msk.bf16.gmra.mxu0 %vm220_vm0, %v1218_v3 }
  0x96   : > { %v252_v38 = vpop.f32.mrf.mxu2  ;;  %v257_v5 = vpop.f32.mrf.mxu3 }
  0x97   : > { %v1956_v6 = vpop.f32.mrf.mxu1 }
  0x99   : > { %v244_v7 = vpop.f32.mrf.mxu0 }
  0x9e   : > { %v1958_v8 = vpop.f32.mrf.mxu2  ;;  %v1960_v9 = vpop.f32.mrf.mxu3 }
  0x9f   : > { %v309_v10 = vpop.f32.mrf.mxu1 }
  0xa0   : > { %v310_v11 = vadd.f32 %v309_v10, %v242_v4 }
  0xa1   : > { %v676_v12 = vpop.f32.mrf.mxu0 }
  0xa6   : > { %v502_v13 = vpop.f32.mrf.mxu2  ;;  %v589_v14 = vpop.f32.mrf.mxu3 }
  0xa7   : > { %v522_v15 = vadd.f32 %v502_v13, %v310_v11  ;;  %v311_v16 = vpop.f32.mrf.mxu1 }
  0xa8   : > { %v312_v60 = vadd.f32 %v311_v16, %v244_v7  ;;  %v1987_v7 = vld [vmem:[%s2026_s2] ss:$0 sm:$0xff] }
  0xa9   : > { %v609_v17 = vadd.f32 %v589_v14, %v522_v15  ;;  %v678_v18 = vpop.f32.mrf.mxu0 }
  0xab   : > { %v696_v19 = vadd.f32 %v676_v12, %v609_v17 }
  0xae   : > { %v504_v20 = vpop.f32.mrf.mxu2  ;;  %v591_v21 = vpop.f32.mrf.mxu3 }
  0xaf   : > { %v314_v22 = vpop.f32.mrf.mxu1  ;;  %v523_v62 = vadd.f32 %v504_v20, %v312_v60 }
  0xb0   : > { %v315_v23 = vadd.f32 %v314_v22, %v247_v0 }
  0xb1   : > { %v681_v24 = vpop.f32.mrf.mxu0  ;;  %v610_v2 = vadd.f32 %v591_v21, %v523_v62 }
  0xb3   : > { %v697_v10 = vadd.f32 %v678_v18, %v610_v2 }
  0xb6   : > { %v507_v25 = vpop.f32.mrf.mxu2  ;;  %v594_v26 = vpop.f32.mrf.mxu3 }
  0xb7   : > { %v524_v27 = vadd.f32 %v507_v25, %v315_v23  ;;  %v316_v28 = vpop.f32.mrf.mxu1 }
  0xb8   : > { %v317_v17 = vadd.f32 %v316_v28, %v1956_v6 }
  0xb9   : > { %v611_v29 = vadd.f32 %v594_v26, %v524_v27  ;;  %v1962_v30 = vpop.f32.mrf.mxu0 }
  0xbb   : > { %v698_v31 = vadd.f32 %v681_v24, %v611_v29 }
  0xbe   : > { %v509_v32 = vpop.f32.mrf.mxu2  ;;  %v596_v33 = vpop.f32.mrf.mxu3 }
  0xbf   : > { %v319_v34 = vpop.f32.mrf.mxu1  ;;  %v525_v21 = vadd.f32 %v509_v32, %v317_v17 }
  0xc0   : > { %v320_v35 = vadd.f32 %v319_v34, %v252_v38 }
  0xc1   : > { %v686_v36 = vpop.f32.mrf.mxu0  ;;  %v612_v27 = vadd.f32 %v596_v33, %v525_v21 }
  0xc6   : > { %v512_v37 = vpop.f32.mrf.mxu2  ;;  %v599_v39 = vpop.f32.mrf.mxu3 }
  0xc7   : > { %v526_v40 = vadd.f32 %v512_v37, %v320_v35  ;;  %v1964_v41 = vpop.f32.mrf.mxu1  ;;  %v699_v37 = vadd.f32 %v1962_v30, %v612_v27 }
  0xc9   : > { %v613_v42 = vadd.f32 %v599_v39, %v526_v40  ;;  %v1966_v43 = vpop.f32.mrf.mxu0 }
  0xcb   : > { %v1968_v44 = vadd.f32 %v686_v36, %v613_v42 }
  0xce   : > { %v1970_v45 = vpop.f32.mrf.mxu2  ;;  %v1972_v46 = vpop.f32.mrf.mxu3 }
  0xcf   : > { %v324_v47 = vpop.f32.mrf.mxu1 }
  0xd0   : > { %v325_v48 = vadd.f32 %v324_v47, %v257_v5 }
  0xd1   : > { %v691_v49 = vpop.f32.mrf.mxu0 }
  0xd6   : > { %v517_v50 = vpop.f32.mrf.mxu2  ;;  %v604_v51 = vpop.f32.mrf.mxu3 }
  0xd7   : > { %v528_v52 = vadd.f32 %v517_v50, %v325_v48  ;;  %v1974_v53 = vpop.f32.mrf.mxu1  ;;  %v322_v48 = vadd.f32 %v1964_v41, %v1958_v8 }
  0xd9   : > { %v615_v54 = vadd.f32 %v604_v51, %v528_v52  ;;  %v1976_v55 = vpop.f32.mrf.mxu0  ;;  %v527_v50 = vadd.f32 %v1970_v45, %v322_v48 }
  0xdb   : > { %v1978_v56 = vadd.f32 %v691_v49, %v615_v54  ;;  %v614_v62 = vadd.f32 %v1972_v46, %v527_v50 }
  0xdd   : > { %v701_v45 = vadd.f32 %v1966_v43, %v614_v62 }
  0xde   : > { %v1980_v57 = vpop.f32.mrf.mxu2  ;;  %v1982_v58 = vpop.f32.mrf.mxu3 }
  0xdf   : > { %v874_v59 = vpop.f32.mrf.mxu1 }
  0xe0   : > { %v894_v63 = vadd.f32 %v874_v59, %v696_v19 }
  0xe1   : > { %v1246_v61 = vpop.f32.mrf.mxu0 }
  0xe6   : > { %v961_v0 = vpop.f32.mrf.mxu2  ;;  %v1048_v1 = vpop.f32.mrf.mxu3 }
  0xe7   : > { %v981_v3 = vadd.f32 %v961_v0, %v894_v63  ;;  %v876_v4 = vpop.f32.mrf.mxu1 }
  0xe8   : > { %v895_v11 = vadd.f32 %v876_v4, %v697_v10 }
  0xe9   : > { %v1248_v38 = vpop.f32.mrf.mxu0  ;;  %v1068_v5 = vadd.f32 %v1048_v1, %v981_v3 }
  0xeb   : > { %v1266_v14 = vadd.f32 %v1246_v61, %v1068_v5 }
  0xed   : > { %v1278_v22 = vadd.f32 %v1987_v7, %v1266_v14 }
  0xee   : > { %v963_v12 = vpop.f32.mrf.mxu2  ;;  %v1050_v13 = vpop.f32.mrf.mxu3 }
  0xef   : > { %v982_v15 = vadd.f32 %v963_v12, %v895_v11  ;;  %v879_v16 = vpop.f32.mrf.mxu1  ;;  %v1286_v29 = vmax.f32 %v1278_v22, 0.0  ;;  %v327_v12 = vadd.f32 %v1974_v53, %v1960_v9 }
  0xf0   : > { %v896_v24 = vadd.f32 %v879_v16, %v698_v31 }
  0xf1   : > { %v1069_v19 = vadd.f32 %v1050_v13, %v982_v15  ;;  %v1251_v20 = vpop.f32.mrf.mxu0  ;;  %v529_v13 = vadd.f32 %v1980_v57, %v327_v12 }
  0xf3   : > { %v1267_v23 = vadd.f32 %v1248_v38, %v1069_v19 }
  0xf5   : > { %v1279_v18 = vadd.f32 %v1987_v7, %v1267_v23 }
  0xf6   : > { %v966_v25 = vpop.f32.mrf.mxu2  ;;  %v1053_v26 = vpop.f32.mrf.mxu3 }
  0xf7   : > { %v1287_v34 = vmax.f32 %v1279_v18, 0.0  ;;  %v983_v35 = vadd.f32 %v966_v25, %v896_v24  ;;  %v881_v36 = vpop.f32.mrf.mxu1 }
  0xf8   : > { %v897_v31 = vadd.f32 %v881_v36, %v699_v37 }
  0xf9   : > { %v1668_v6 = vpack.c.bf16 %v1287_v34, %v1286_v29  ;;  %v1253_v28 = vpop.f32.mrf.mxu0  ;;  %v1070_v32 = vadd.f32 %v1053_v26, %v983_v35 }
  0xfb   : > { %1669 = vst [vmem:[%s1996_s16] sm:$0xff] %v1668_v6   ;;  %v1268_v33 = vadd.f32 %v1251_v20, %v1070_v32  ;;  %v616_v20 = vadd.f32 %v1982_v58, %v529_v13 }
  0xfd   : > { %v1280_v51 = vadd.f32 %v1987_v7, %v1268_v33  ;;  %v703_v24 = vadd.f32 %v1976_v55, %v616_v20 }
  0xfe   : > { %v968_v39 = vpop.f32.mrf.mxu2  ;;  %v1055_v40 = vpop.f32.mrf.mxu3 }
  0xff   : > { %v984_v42 = vadd.f32 %v968_v39, %v897_v31  ;;  %v884_v47 = vpop.f32.mrf.mxu1  ;;  %v1288_v63 = vmax.f32 %v1280_v51, 0.0 }
 0x100   : > { %v898_v30 = vadd.f32 %v884_v47, %v1968_v44 }
 0x101   : > { %v1071_v49 = vadd.f32 %v1055_v40, %v984_v42  ;;  %v1256_v54 = vpop.f32.mrf.mxu0 }
 0x103   : > { %v1269_v52 = vadd.f32 %v1253_v28, %v1071_v49 }
 0x105   : > { %v1281_v59 = vadd.f32 %v1987_v7, %v1269_v52 }
 0x106   : > { %v971_v60 = vpop.f32.mrf.mxu2  ;;  %v1058_v61 = vpop.f32.mrf.mxu3 }
 0x107   : > { %v1289_v0 = vmax.f32 %v1281_v59, 0.0  ;;  %v985_v1 = vadd.f32 %v971_v60, %v898_v30  ;;  %v886_v8 = vpop.f32.mrf.mxu1 }
 0x108   : > { %v899_v3 = vadd.f32 %v886_v8, %v701_v45 }
 0x109   : > { %v1673_v41 = vpack.c.bf16 %v1289_v0, %v1288_v63  ;;  %v1072_v2 = vadd.f32 %v1058_v61, %v985_v1  ;;  %v1258_v4 = vpop.f32.mrf.mxu0 }
 0x10b   : > { %1685 = vst [vmem:[%s1996_s16 + $0x8] sm:$0xff] %v1673_v41   ;;  %v1270_v10 = vadd.f32 %v1256_v54, %v1072_v2 }
 0x10d   : > { %v1282_v14 = vadd.f32 %v1987_v7, %v1270_v10 }
 0x10e   : > { %v973_v38 = vpop.f32.mrf.mxu2  ;;  %v1060_v5 = vpop.f32.mrf.mxu3 }
 0x10f   : > { %v986_v11 = vadd.f32 %v973_v38, %v899_v3  ;;  %v889_v44 = vpop.f32.mrf.mxu1  ;;  %v1290_v21 = vmax.f32 %v1282_v14, 0.0 }
 0x110   : > { %v900_v43 = vadd.f32 %v889_v44, %v1978_v56 }
 0x111   : > { %v1073_v46 = vadd.f32 %v1060_v5, %v986_v11  ;;  %v1261_v18 = vpop.f32.mrf.mxu0 }
 0x113   : > { %v1271_v15 = vadd.f32 %v1258_v4, %v1073_v46 }
 0x115   : > { %v1283_v16 = vadd.f32 %v1987_v7, %v1271_v15 }
 0x116   : > { %v976_v17 = vpop.f32.mrf.mxu2  ;;  %v1063_v19 = vpop.f32.mrf.mxu3 }
 0x117   : > { %v1291_v22 = vmax.f32 %v1283_v16, 0.0  ;;  %v987_v23 = vadd.f32 %v976_v17, %v900_v43  ;;  %v891_v53 = vpop.f32.mrf.mxu1 }
 0x118   : > { %v901_v25 = vadd.f32 %v891_v53, %v703_v24 }
 0x119   : > { %v1678_v9 = vpack.c.bf16 %v1291_v22, %v1290_v21  ;;  %v1074_v57 = vadd.f32 %v1063_v19, %v987_v23  ;;  %v1263_v35 = vpop.f32.mrf.mxu0 }
 0x11b   : > { %1686 = vst [vmem:[%s1996_s16 + $0x10] sm:$0xff] %v1678_v9   ;;  %v1272_v27 = vadd.f32 %v1261_v18, %v1074_v57 }
 0x11d   : > { %v1284_v58 = vadd.f32 %v1987_v7, %v1272_v27 }
 0x11e   : > { %v978_v26 = vpop.f32.mrf.mxu2  ;;  %v1065_v56 = vpop.f32.mrf.mxu3 }
 0x11f   : > { %v988_v29 = vadd.f32 %v978_v26, %v901_v25  ;;  %v1292_v28 = vmax.f32 %v1284_v58, 0.0 }
 0x121   : > { %v1075_v34 = vadd.f32 %v1065_v56, %v988_v29 }
 0x123   : > { %v1273_v36 = vadd.f32 %v1263_v35, %v1075_v34 }
 0x125   : > { %v1285_v6 = vadd.f32 %v1987_v7, %v1273_v36 }
 0x127   : > { %v1293_v32 = vmax.f32 %v1285_v6, 0.0 }
 0x129   : > { %v1683_v37 = vpack.c.bf16 %v1293_v32, %v1292_v28 }
 0x12b   : > { %1687 = vst [vmem:[%s1996_s16 + $0x18] sm:$0xff] %v1683_v37  }
 0x12c PF: > { %s13_s12 = sadd.s32 1, %s1707_s12  }
 0x12d   : > { %p10_p4 = scmp.ge.s32.totalorder %s13_s12, 4  }
 0x12f   :  { %12 = sbr.rel (!%p10_p4) target bundleno = 1 (0x1), region = 75 }

// kernel: _lambda_.9
= control target key start
LH: loop header
LB: loop body
LE: loop exit
PB: predicated region body
PF: predicated region fallthrough
CT: control target
= control target key end

     0   :  { %s1045_s12 = smov 0   ;;  %s1211_s0 = inlined_call_operand.vmem [shape: bf16[2,4,5,5,16], index: 0, kind: input, shape index: {}]   ;;  %s1212_s1 = inlined_call_operand.vmem [shape: bf16[9,16,128], index: 1, kind: input, shape index: {}]   ;;  %s1213_s2 = inlined_call_operand.vmem [shape: f32[1,128], index: 2, kind: input, shape index: {}]   ;;  %s1214_s3 = inlined_call_operand.vmem [shape: bf16[2,4,4,128], index: 3, kind: output, shape index: {}]  }
   0x1 LB: > { %s898_s13 = sadd.s32 4294967295, %s1023_s12   ;;  %p902_p0 = scmp.ge.s32.totalorder %s1023_s12, 1  ;;  %s1023_s12 = sphi %s1045_s12, %s13_s12  }
   0x2   : > { %p137_p1 = scmp.lt.s32.totalorder %s1023_s12, 3 }
   0x4   : > { %p138_p2 = pnand %p902_p0, %p137_p1 }
   0x5   : > { %p161_p3 = scmp.lt.s32.totalorder (!%p138_p2), %s898_s13, 1 }
   0x6   : > { %141 = sbr.rel (%p138_p2) target bundleno = 260 (0x104), region = 32 }
   0xb   : > { %v999_v0 = vld [vmem:[%s1212_s1 + $0x8] sm:$0xff]  ;;  %v1000_v1 = vld [vmem:[%s1212_s1 + $0x10] sm:$0xff]  ;;  %s1222_s13 = smov (!%p161_p3, %s898_s13), 1  ;;  %vm204_vm0 = vcmask 130048   ;;  %vm267_vm1 = vcmask 1041408   ;;  %vm271_vm2 = vcmask 1043458  }
   0xc   : > { %214 = vmatpush.bf16.msra.mxu0 %v999_v0  ;;  %382 = vmatpush.bf16.msra.mxu2 %v1000_v1  ;;  %s1007_s18 = smul.u32 80, %s1222_s13  ;;  %vm293_vm3 = vsmask.f32 1280  ;;  %v998_v13 = vld [vmem:[%s1212_s1] sm:$0xff]  ;;  %vm294_vm4 = vsmask.f32 3336 }
   0xd   : > { %vm296_vm5 = vsmask.f32 5392  ;;  %v1001_v15 = vld [vmem:[%s1212_s1 + $0x18] sm:$0xff]  ;;  %248 = vmatpush.bf16.msra.mxu1 %v998_v13  ;;  %vm298_vm6 = vsmask.f32 7448  ;;  %vm1095_vm7 = vmor %vm293_vm3, %vm294_vm4  ;;  %v1002_v52 = vld [vmem:[%s1212_s1 + $0x20] sm:$0xff] }
   0xe   : > { %s1065_s21 = scalar_lea.vmem %s1211_s0, %s1007_s18  ;;  %426 = vmatpush.bf16.msra.mxu3 %v1001_v15  ;;  %vm1103_vm8 = vmor %vm1095_vm7, %vm296_vm5  ;;  %v1004_v15 = vld [vmem:[%s1212_s1 + $0x30] sm:$0xff]  ;;  %s997_s11 = sshll.u32 %s1222_s13, 3 }
   0xf   : > { %v906_v2 = vld [vmem:[%s1065_s21 + $0x14] sm:$0x3]  ;;  %v907_v3 = vld [vmem:[%s1065_s21 + $0x18] sm:$0x3]  ;;  %v908_v4 = vld [vmem:[%s1065_s21 + $0x1c] sm:$0x3]  ;;  %s170_s16 = scalar_lea.vmem %s1214_s3, %s997_s11 }
  0x10   : > { %v909_v5 = vld [vmem:[%s1065_s21 + $0x20] sm:$0x3]  ;;  %187 = vst [vmem:[#allocation1] ss:$4 sm:$0xff] %v906_v2  ;;  %v256_v7 = vld [vmem:[%s1065_s21 + $0x4] sm:$0x7]  ;;  %470 = vmatpush.bf16.msrb.mxu0 %v1002_v52  ;;  %vm1113_vm9 = vmor %vm1103_vm8, %vm298_vm6  ;;  %641 = vmatpush.bf16.msrb.mxu2 %v1004_v15 }
  0x11   : > { %190 = vst [vmem:[#allocation1 + $0x1] ss:$4 sm:$0xff] %v907_v3  ;;  %v255_v6 = vld [vmem:[%s1065_s21] sm:$0x7]  ;;  %v257_v8 = vld [vmem:[%s1065_s21 + $0x8] sm:$0x7] }
  0x12   : > { %193 = vst [vmem:[#allocation1 + $0x2] ss:$4 sm:$0xff] %v908_v4  ;;  %v258_v9 = vld [vmem:[%s1065_s21 + $0xc] sm:$0x7]  ;;  %v263_v10 = vrot.slane %v255_v6, 2  ;;  %v264_v11 = vrot.slane %v256_v7, 2 }
  0x13   : > { %196 = vst [vmem:[#allocation1 + $0x3] ss:$4 sm:$0xff] %v909_v5  ;;  %v265_v12 = vrot.slane %v257_v8, 2  ;;  %v266_v14 = vrot.slane %v258_v9, 2  ;;  %v172_v23 = vld [vmem:[%s1065_s21] sm:$0x3] }
  0x14   : > { %v270_v16 = vsel %vm267_vm1, %v255_v6, %v263_v10  ;;  %v272_v17 = vsel %vm271_vm2, %v255_v6, %v263_v10  ;;  %v277_v18 = vsel %vm267_vm1, %v256_v7, %v264_v11  ;;  %v278_v19 = vsel %vm271_vm2, %v256_v7, %v264_v11  ;;  %v173_v24 = vld [vmem:[%s1065_s21 + $0x4] sm:$0x3]  ;;  %v174_v29 = vld [vmem:[%s1065_s21 + $0x8] sm:$0x3]  ;;  %v175_v30 = vld [vmem:[%s1065_s21 + $0xc] sm:$0x3] }
  0x15   : > { %v274_v20 = vrot.slane %v272_v17, 2  ;;  %v280_v21 = vrot.slane %v278_v19, 2  ;;  %v284_v22 = vsel %vm271_vm2, %v257_v8, %v265_v12  ;;  %v283_v25 = vsel %vm267_vm1, %v257_v8, %v265_v12  ;;  %v951_v6 = vld [vmem:[%s1065_s21 + $0x28] sm:$0x7]  ;;  %v952_v8 = vld [vmem:[%s1065_s21 + $0x2c] sm:$0x7] }
  0x16   : > { %v286_v26 = vrot.slane %v284_v22, 2  ;;  %v290_v27 = vsel %vm271_vm2, %v258_v9, %v266_v14  ;;  %v300_v28 = vshrl.u32 %v270_v16, 16  ;;  %v303_v31 = vshll.u32 %v270_v16, 16  ;;  %v953_v11 = vld [vmem:[%s1065_s21 + $0x30] sm:$0x7] }
  0x17   : > { %v313_v32 = vshrl.u32 %v277_v18, 16  ;;  %v289_v34 = vsel %vm267_vm1, %v258_v9, %v266_v14  ;;  %v292_v35 = vrot.slane %v290_v27, 2  ;;  %v316_v38 = vshll.u32 %v277_v18, 16  ;;  %v1003_v14 = vld [vmem:[%s1212_s1 + $0x28] sm:$0xff]  ;;  %v954_v18 = vld [vmem:[%s1065_s21 + $0x34] sm:$0x7] }
  0x18   : > { %v302_v37 = vrot.slane %v300_v28, 6  ;;  %v305_v39 = vrot.slane %v303_v31, 7  ;;  %v309_v40 = vshll.u32 %v274_v20, 16  ;;  %v326_v42 = vshrl.u32 %v283_v25, 16  ;;  %597 = vmatpush.bf16.msrb.mxu1 %v1003_v14  ;;  %v930_v31 = vld [vmem:[%s1065_s21 + $0x2c] sm:$0x3] }
  0x19   : > { %v315_v41 = vrot.slane %v313_v32, 6  ;;  %v318_v43 = vrot.slane %v316_v38, 7  ;;  %v322_v44 = vshll.u32 %v280_v21, 16  ;;  %v329_v45 = vshll.u32 %v283_v25, 16  ;;  %v931_v32 = vld [vmem:[%s1065_s21 + $0x30] sm:$0x3] }
  0x1a   : > { %v197_v33 = vld.sshfl [vmem:[#allocation1] sm:$0xff pattern:$0x73625140]  ;;  %v335_v46 = vshll.u32 %v286_v26, 16  ;;  %v306_v48 = vor.u32 %v305_v39, %v302_v37  ;;  %v328_v49 = vrot.slane %v326_v42, 6  ;;  %v339_v50 = vshrl.u32 %v289_v34, 16 }
  0x1b   : > { %916 = vmatmul.msk.bf16.vlgmr.msra.gmra.mxu0 %vm204_vm0, %v197_v33  ;;  %222 = vst [vmem:[#allocation1] ss:$4 sm:$0xff] %v172_v23  ;;  %v342_v51 = vshll.u32 %v289_v34, 16  ;;  %v319_v53 = vor.u32 %v318_v43, %v315_v41  ;;  %v331_v54 = vrot.slane %v329_v45, 7  ;;  %v348_v55 = vshll.u32 %v292_v35, 16  ;;  %v1005_v45 = vld [vmem:[%s1212_s1 + $0x38] sm:$0xff] }
  0x1c   : > { %225 = vst [vmem:[#allocation1 + $0x1] ss:$4 sm:$0xff] %v173_v24  ;;  %v307_v56 = vrot.slane %v306_v48, 2  ;;  %v311_v57 = vrot.slane %v309_v40, 7  ;;  %v341_v58 = vrot.slane %v339_v50, 6  ;;  %v324_v62 = vrot.slane %v322_v44, 7  ;;  %685 = vmatpush.bf16.msrb.mxu3 %v1005_v45 }
  0x1d   : > { %228 = vst [vmem:[#allocation1 + $0x2] ss:$4 sm:$0xff] %v174_v29  ;;  %v344_v59 = vrot.slane %v342_v51, 7  ;;  %v320_v61 = vrot.slane %v319_v53, 2  ;;  %v332_v63 = vor.u32 %v331_v54, %v328_v49  ;;  %v337_v0 = vrot.slane %v335_v46, 7 }
  0x1e   : > { %231 = vst [vmem:[#allocation1 + $0x3] ss:$4 sm:$0xff] %v175_v30  ;;  %v350_v3 = vrot.slane %v348_v55, 7  ;;  %v312_v4 = vsel %vm1113_vm9, %v307_v56, %v311_v57  ;;  %v487_v13 = vrot.slane %v951_v6, 2  ;;  %v488_v16 = vrot.slane %v952_v8, 2 }
  0x1f   : > { %v345_v1 = vor.u32 %v344_v59, %v341_v58  ;;  %v333_v2 = vrot.slane %v332_v63, 2  ;;  %v325_v7 = vsel %vm1113_vm9, %v320_v61, %v324_v62  ;;  %v489_v17 = vrot.slane %v953_v11, 2  ;;  %v929_v26 = vld [vmem:[%s1065_s21 + $0x28] sm:$0x3]  ;;  %v932_v36 = vld [vmem:[%s1065_s21 + $0x34] sm:$0x3] }
  0x20   : > { %v493_v19 = vsel %vm267_vm1, %v951_v6, %v487_v13  ;;  %v499_v20 = vsel %vm267_vm1, %v952_v8, %v488_v16  ;;  %v490_v22 = vrot.slane %v954_v18, 2  ;;  %v494_v23 = vsel %vm271_vm2, %v951_v6, %v487_v13  ;;  %v940_v58 = vld [vmem:[%s1065_s21 + $0x3c] sm:$0x3]  ;;  %v941_v59 = vld [vmem:[%s1065_s21 + $0x40] sm:$0x3] }
  0x21   : > { %v346_v5 = vrot.slane %v345_v1, 2  ;;  %v338_v10 = vsel %vm1113_vm9, %v333_v2, %v337_v0  ;;  %v505_v21 = vsel %vm267_vm1, %v953_v11, %v489_v17  ;;  %v500_v24 = vsel %vm271_vm2, %v952_v8, %v488_v16  ;;  %v942_v1 = vld [vmem:[%s1065_s21 + $0x44] sm:$0x3]  ;;  %v985_v15 = vld [vmem:[%s1065_s21 + $0x8] sm:$0x7] }
  0x22   : > { %v515_v25 = vshrl.u32 %v493_v19, 16  ;;  %v506_v27 = vsel %vm271_vm2, %v953_v11, %v489_v17  ;;  %v518_v28 = vshll.u32 %v493_v19, 16  ;;  %v528_v29 = vshrl.u32 %v499_v20, 16  ;;  %v984_v8 = vld [vmem:[%s1065_s21 + $0x4] sm:$0x7] }
  0x23   : > { %v351_v12 = vsel %vm1113_vm9, %v346_v5, %v350_v3  ;;  %v531_v30 = vshll.u32 %v499_v20, 16  ;;  %v541_v33 = vshrl.u32 %v505_v21, 16  ;;  %v544_v34 = vshll.u32 %v505_v21, 16  ;;  %v1006_v11 = vld [vmem:[%s1212_s1 + $0x40] sm:$0xff]  ;;  %v987_v19 = vld [vmem:[%s1065_s21 + $0x10] sm:$0x7] }
  0x24   : > { %v496_v37 = vrot.slane %v494_v23, 2  ;;  %v502_v38 = vrot.slane %v500_v24, 2  ;;  %v508_v39 = vrot.slane %v506_v27, 2  ;;  %v517_v40 = vrot.slane %v515_v25, 6  ;;  %812 = vmatpush.bf16.msra.mxu0 %v1006_v11  ;;  %v963_v11 = vld [vmem:[%s1065_s21 + $0x8] sm:$0x3] }
  0x25   : > { %v232_v9 = vld.sshfl [vmem:[#allocation1] sm:$0xff pattern:$0x73625140]  ;;  %v511_v41 = vsel %vm267_vm1, %v954_v18, %v490_v22  ;;  %v520_v42 = vrot.slane %v518_v28, 7  ;;  %v530_v43 = vrot.slane %v528_v29, 6  ;;  %v533_v44 = vrot.slane %v531_v30, 7 }
  0x26   : > { %356 = vst [vmem:[#allocation1] ss:$4 sm:$0xff] %v312_v4  ;;  %921 = vmatmul.msk.bf16.vlgmr.msra.gmra.mxu1 %vm204_vm0, %v232_v9  ;;  %v512_v46 = vsel %vm271_vm2, %v954_v18, %v490_v22  ;;  %v543_v47 = vrot.slane %v541_v33, 6  ;;  %v546_v48 = vrot.slane %v544_v34, 7  ;;  %v524_v49 = vshll.u32 %v496_v37, 16 }
  0x27   : > { %359 = vst [vmem:[#allocation1 + $0x1] ss:$4 sm:$0xff] %v325_v7  ;;  %v537_v50 = vshll.u32 %v502_v38, 16  ;;  %v554_v51 = vshrl.u32 %v511_v41, 16  ;;  %v557_v52 = vshll.u32 %v511_v41, 16  ;;  %v514_v53 = vrot.slane %v512_v46, 2 }
  0x28   : > { %362 = vst [vmem:[#allocation1 + $0x2] ss:$4 sm:$0xff] %v338_v10  ;;  %v521_v54 = vor.u32 %v520_v42, %v517_v40  ;;  %v534_v55 = vor.u32 %v533_v44, %v530_v43  ;;  %v550_v56 = vshll.u32 %v508_v39, 16  ;;  %v547_v57 = vor.u32 %v546_v48, %v543_v47  ;;  %v943_v9 = vld [vmem:[%s1065_s21 + $0x48] sm:$0x3] }
  0x29   : > { %365 = vst [vmem:[#allocation1 + $0x3] ss:$4 sm:$0xff] %v351_v12  ;;  %v526_v61 = vrot.slane %v524_v49, 7  ;;  %v539_v62 = vrot.slane %v537_v50, 7  ;;  %v556_v63 = vrot.slane %v554_v51, 6  ;;  %v559_v0 = vrot.slane %v557_v52, 7 }
  0x2a   : > { %v522_v2 = vrot.slane %v521_v54, 2  ;;  %v535_v3 = vrot.slane %v534_v55, 2  ;;  %v552_v4 = vrot.slane %v550_v56, 7  ;;  %v563_v5 = vshll.u32 %v514_v53, 16  ;;  %v986_v18 = vld [vmem:[%s1065_s21 + $0xc] sm:$0x7] }
  0x2b   : > { %v548_v7 = vrot.slane %v547_v57, 2  ;;  %v560_v10 = vor.u32 %v559_v0, %v556_v63  ;;  %v702_v12 = vrot.slane %v984_v8, 2  ;;  %v703_v21 = vrot.slane %v985_v15, 2 }
  0x2c   : > { %v527_v13 = vsel %vm1113_vm9, %v522_v2, %v526_v61  ;;  %v565_v14 = vrot.slane %v563_v5, 7  ;;  %v540_v16 = vsel %vm1113_vm9, %v535_v3, %v539_v62  ;;  %v704_v22 = vrot.slane %v986_v18, 2 }
  0x2d   : > { %v553_v17 = vsel %vm1113_vm9, %v548_v7, %v552_v4  ;;  %v708_v20 = vsel %vm267_vm1, %v984_v8, %v702_v12  ;;  %v705_v23 = vrot.slane %v987_v19, 2  ;;  %v709_v24 = vsel %vm271_vm2, %v984_v8, %v702_v12 }
  0x2e   : > { %v561_v25 = vrot.slane %v560_v10, 2  ;;  %v730_v27 = vshrl.u32 %v708_v20, 16  ;;  %v733_v28 = vshll.u32 %v708_v20, 16  ;;  %v714_v29 = vsel %vm267_vm1, %v985_v15, %v703_v21  ;;  %v976_v20 = vld [vmem:[%s1065_s21 + $0x24] sm:$0x3] }
  0x2f   : > { %v715_v30 = vsel %vm271_vm2, %v985_v15, %v703_v21  ;;  %v743_v41 = vshrl.u32 %v714_v29, 16  ;;  %v746_v42 = vshll.u32 %v714_v29, 16  ;;  %v965_v15 = vld [vmem:[%s1065_s21 + $0x10] sm:$0x3] }
  0x30   : > { %v366_v35 = vld.sshfl [vmem:[#allocation1] sm:$0xff pattern:$0x73625140]  ;;  %v717_v33 = vrot.slane %v715_v30, 2  ;;  %v732_v38 = vrot.slane %v730_v27, 6  ;;  %v735_v39 = vrot.slane %v733_v28, 7  ;;  %v566_v50 = vsel %vm1113_vm9, %v561_v25, %v565_v14 }
  0x31   : > { %928 = vmatmul.msk.bf16.vlgmr.msra.gmra.mxu2 %vm204_vm0, %v366_v35  ;;  %400 = vst [vmem:[#allocation1] ss:$4 sm:$0xff] %v929_v26  ;;  %v711_v26 = vrot.slane %v709_v24, 2  ;;  %v726_v35 = vsel %vm267_vm1, %v987_v19, %v705_v23  ;;  %v745_v51 = vrot.slane %v743_v41, 6  ;;  %v748_v52 = vrot.slane %v746_v42, 7 }
  0x32   : > { %403 = vst [vmem:[#allocation1 + $0x1] ss:$4 sm:$0xff] %v930_v31  ;;  %v720_v31 = vsel %vm267_vm1, %v986_v18, %v704_v22  ;;  %v752_v43 = vshll.u32 %v717_v33, 16  ;;  %v736_v46 = vor.u32 %v735_v39, %v732_v38  ;;  %v769_v56 = vshrl.u32 %v726_v35, 16 }
  0x33   : > { %406 = vst [vmem:[#allocation1 + $0x2] ss:$4 sm:$0xff] %v931_v32  ;;  %v721_v32 = vsel %vm271_vm2, %v986_v18, %v704_v22  ;;  %v739_v40 = vshll.u32 %v711_v26, 16  ;;  %v756_v44 = vshrl.u32 %v720_v31, 16  ;;  %v759_v48 = vshll.u32 %v720_v31, 16 }
  0x34   : > { %409 = vst [vmem:[#allocation1 + $0x3] ss:$4 sm:$0xff] %v932_v36  ;;  %v723_v34 = vrot.slane %v721_v32, 2  ;;  %v727_v36 = vsel %vm271_vm2, %v987_v19, %v705_v23  ;;  %v737_v54 = vrot.slane %v736_v46, 2  ;;  %v749_v57 = vor.u32 %v748_v52, %v745_v51  ;;  %v975_v19 = vld [vmem:[%s1065_s21 + $0x20] sm:$0x3] }
  0x35   : > { %v729_v37 = vrot.slane %v727_v36, 2  ;;  %v741_v47 = vrot.slane %v739_v40, 7  ;;  %v758_v53 = vrot.slane %v756_v44, 6  ;;  %v761_v55 = vrot.slane %v759_v48, 7 }
  0x36   : > { %v765_v49 = vshll.u32 %v723_v34, 16  ;;  %v750_v2 = vrot.slane %v749_v57, 2 }
  0x37   : > { %v778_v61 = vshll.u32 %v729_v37, 16  ;;  %v742_v62 = vsel %vm1113_vm9, %v737_v54, %v741_v47  ;;  %v762_v63 = vor.u32 %v761_v55, %v758_v53  ;;  %v1016_v47 = vld [vmem:[%s1213_s2] ss:$0 sm:$0xff] }
  0x38   : > { %v767_v0 = vrot.slane %v765_v49, 7 }
  0x39   : > { %v763_v4 = vrot.slane %v762_v63, 2  ;;  %v780_v7 = vrot.slane %v778_v61, 7 }
  0x3b   : > { %v410_v6 = vld.sshfl [vmem:[#allocation1] sm:$0xff pattern:$0x73625140]  ;;  %v768_v8 = vsel %vm1113_vm9, %v763_v4, %v767_v0 }
  0x3c   : > { %939 = vmatmul.msk.bf16.vlgmr.msra.gmra.mxu3 %vm204_vm0, %v410_v6  ;;  %444 = vst [vmem:[#allocation1] ss:$4 sm:$0xff] %v940_v58  ;;  %v754_v58 = vrot.slane %v752_v43, 7 }
  0x3d   : > { %447 = vst [vmem:[#allocation1 + $0x1] ss:$4 sm:$0xff] %v941_v59  ;;  %v772_v59 = vshll.u32 %v726_v35, 16 }
  0x3e   : > { %450 = vst [vmem:[#allocation1 + $0x2] ss:$4 sm:$0xff] %v942_v1  ;;  %v771_v1 = vrot.slane %v769_v56, 6  ;;  %v755_v5 = vsel %vm1113_vm9, %v750_v2, %v754_v58 }
  0x3f   : > { %453 = vst [vmem:[#allocation1 + $0x3] ss:$4 sm:$0xff] %v943_v9  ;;  %v774_v3 = vrot.slane %v772_v59, 7  ;;  %v962_v9 = vld [vmem:[%s1065_s21 + $0x4] sm:$0x3] }
  0x41   : > { %v775_v6 = vor.u32 %v774_v3, %v771_v1 }
  0x43   : > { %v776_v10 = vrot.slane %v775_v6, 2 }
  0x45   : > { %v781_v14 = vsel %vm1113_vm9, %v776_v10, %v780_v7 }
  0x46   : > { %v454_v45 = vld.sshfl [vmem:[#allocation1] sm:$0xff pattern:$0x73625140] }
  0x47   : > { %950 = vmatmul.msk.bf16.vlgmr.msrb.gmra.mxu0 %vm204_vm0, %v454_v45  ;;  %571 = vst [vmem:[#allocation1] ss:$4 sm:$0xff] %v527_v13  ;;  %v964_v13 = vld [vmem:[%s1065_s21 + $0xc] sm:$0x3] }
  0x48   : > { %574 = vst [vmem:[#allocation1 + $0x1] ss:$4 sm:$0xff] %v540_v16  ;;  %v973_v16 = vld [vmem:[%s1065_s21 + $0x18] sm:$0x3] }
  0x49   : > { %577 = vst [vmem:[#allocation1 + $0x2] ss:$4 sm:$0xff] %v553_v17  ;;  %v974_v17 = vld [vmem:[%s1065_s21 + $0x1c] sm:$0x3] }
  0x4a   : > { %580 = vst [vmem:[#allocation1 + $0x3] ss:$4 sm:$0xff] %v566_v50 }
  0x51   : > { %v581_v12 = vld.sshfl [vmem:[#allocation1] sm:$0xff pattern:$0x73625140] }
  0x52   : > { %961 = vmatmul.msk.bf16.vlgmr.msrb.gmra.mxu1 %vm204_vm0, %v581_v12  ;;  %615 = vst [vmem:[#allocation1] ss:$4 sm:$0xff] %v962_v9 }
  0x53   : > { %618 = vst [vmem:[#allocation1 + $0x1] ss:$4 sm:$0xff] %v963_v11 }
  0x54   : > { %621 = vst [vmem:[#allocation1 + $0x2] ss:$4 sm:$0xff] %v964_v13 }
  0x55   : > { %624 = vst [vmem:[#allocation1 + $0x3] ss:$4 sm:$0xff] %v965_v15 }
  0x5c   : > { %v625_v18 = vld.sshfl [vmem:[#allocation1] sm:$0xff pattern:$0x73625140] }
  0x5d   : > { %972 = vmatmul.msk.bf16.vlgmr.msrb.gmra.mxu2 %vm204_vm0, %v625_v18  ;;  %659 = vst [vmem:[#allocation1] ss:$4 sm:$0xff] %v973_v16 }
  0x5e   : > { %662 = vst [vmem:[#allocation1 + $0x1] ss:$4 sm:$0xff] %v974_v17 }
  0x5f   : > { %665 = vst [vmem:[#allocation1 + $0x2] ss:$4 sm:$0xff] %v975_v19 }
  0x60   : > { %668 = vst [vmem:[#allocation1 + $0x3] ss:$4 sm:$0xff] %v976_v20 }
  0x67   : > { %v669_v60 = vld.sshfl [vmem:[#allocation1] sm:$0xff pattern:$0x73625140] }
  0x68   : > { %983 = vmatmul.msk.bf16.vlgmr.msrb.gmra.mxu3 %vm204_vm0, %v669_v60  ;;  %786 = vst [vmem:[#allocation1] ss:$4 sm:$0xff] %v742_v62 }
  0x69   : > { %789 = vst [vmem:[#allocation1 + $0x1] ss:$4 sm:$0xff] %v755_v5 }
  0x6a   : > { %792 = vst [vmem:[#allocation1 + $0x2] ss:$4 sm:$0xff] %v768_v8 }
  0x6b   : > { %795 = vst [vmem:[#allocation1 + $0x3] ss:$4 sm:$0xff] %v781_v14 }
  0x72   : > { %v796_v21 = vld.sshfl [vmem:[#allocation1] sm:$0xff pattern:$0x73625140] }
  0x73   : > { %994 = vmatmul.msk.bf16.vlgmr.msra.gmra.mxu0 %vm204_vm0, %v796_v21 }
  0x98   : > { %v216_v22 = vpop.f32.mrf.mxu0 }
  0xa0   : > { %v218_v24 = vpop.f32.mrf.mxu0 }
  0xa3   : > { %v250_v23 = vpop.f32.mrf.mxu1 }
  0xa4   : > { %v251_v26 = vadd.f32 %v250_v23, %v216_v22 }
  0xab   : > { %v252_v28 = vpop.f32.mrf.mxu1 }
  0xac   : > { %v253_v35 = vadd.f32 %v252_v28, %v218_v24 }
  0xb4   : > { %v384_v25 = vpop.f32.mrf.mxu2 }
  0xb5   : > { %v389_v29 = vadd.f32 %v384_v25, %v251_v26 }
  0xbc   : > { %v386_v31 = vpop.f32.mrf.mxu2 }
  0xbd   : > { %v390_v39 = vadd.f32 %v386_v31, %v253_v35 }
  0xbf   : > { %v428_v27 = vpop.f32.mrf.mxu3 }
  0xc0   : > { %v433_v32 = vadd.f32 %v428_v27, %v389_v29 }
  0xc4   : > { %v472_v30 = vpop.f32.mrf.mxu0 }
  0xc5   : > { %v477_v36 = vadd.f32 %v472_v30, %v433_v32 }
  0xc7   : > { %v430_v33 = vpop.f32.mrf.mxu3 }
  0xc8   : > { %v434_v41 = vadd.f32 %v430_v33, %v390_v39 }
  0xcc   : > { %v474_v38 = vpop.f32.mrf.mxu0 }
  0xcd   : > { %v478_v46 = vadd.f32 %v474_v38, %v434_v41 }
  0xcf   : > { %v599_v34 = vpop.f32.mrf.mxu1 }
  0xd0   : > { %v604_v40 = vadd.f32 %v599_v34, %v477_v36 }
  0xd7   : > { %v601_v45 = vpop.f32.mrf.mxu1 }
  0xd8   : > { %v605_v50 = vadd.f32 %v601_v45, %v478_v46 }
  0xe0   : > { %v643_v37 = vpop.f32.mrf.mxu2 }
  0xe1   : > { %v648_v42 = vadd.f32 %v643_v37, %v604_v40 }
  0xe8   : > { %v645_v48 = vpop.f32.mrf.mxu2 }
  0xe9   : > { %v649_v52 = vadd.f32 %v645_v48, %v605_v50 }
  0xeb   : > { %v687_v43 = vpop.f32.mrf.mxu3 }
  0xec   : > { %v692_v44 = vadd.f32 %v687_v43, %v648_v42 }
  0xf0   : > { %v814_v49 = vpop.f32.mrf.mxu0 }
  0xf1   : > { %v819_v51 = vadd.f32 %v814_v49, %v692_v44 }
  0xf3   : > { %v825_v53 = vadd.f32 %v1016_v47, %v819_v51  ;;  %v689_v54 = vpop.f32.mrf.mxu3 }
  0xf4   : > { %v693_v56 = vadd.f32 %v689_v54, %v649_v52 }
  0xf5   : > { %v827_v55 = vmax.f32 %v825_v53, 0.0 }
  0xf7   : > { %v831_v57 = vrot.slane %v827_v55, 4  ;;  %v835_v58 = vpack.c.bf16 %v827_v55, %v827_v55 }
  0xf8   : > { %v816_v59 = vpop.f32.mrf.mxu0 }
  0xf9   : > { %v836_v61 = vpack.c.bf16 %v831_v57, %v831_v57  ;;  %839 = vst [vmem:[%s170_s16] sm:$0x3] %v835_v58  ;;  %v820_v62 = vadd.f32 %v816_v59, %v693_v56 }
  0xfb   : > { %840 = vst [vmem:[%s170_s16 + $0x2] sm:$0x3] %v836_v61  ;;  %v826_v63 = vadd.f32 %v1016_v47, %v820_v62 }
  0xfd   : > { %v828_v0 = vmax.f32 %v826_v63, 0.0 }
  0xff   : > { %v832_v1 = vrot.slane %v828_v0, 4  ;;  %v837_v2 = vpack.c.bf16 %v828_v0, %v828_v0 }
 0x101   : > { %v838_v3 = vpack.c.bf16 %v832_v1, %v832_v1  ;;  %841 = vst [vmem:[%s170_s16 + $0x4] sm:$0x3] %v837_v2 }
 0x103   : > { %842 = vst [vmem:[%s170_s16 + $0x6] sm:$0x3] %v838_v3 }
 0x104 PF: > { %s13_s12 = sadd.s32 1, %s1023_s12  }
 0x105   : > { %p10_p4 = scmp.ge.s32.totalorder %s13_s12, 4  }
 0x107   :  { %12 = sbr.rel (!%p10_p4) target bundleno = 1 (0x1), region = 102 }

// kernel: _lambda_.11
= control target key start
LH: loop header
LB: loop body
LE: loop exit
PB: predicated region body
PF: predicated region fallthrough
CT: control target
= control target key end

     0   :  { %s971_s12 = smov 0   ;;  %s1149_s0 = inlined_call_operand.vmem [shape: bf16[2,4,3,3,32], index: 0, kind: input, shape index: {}]   ;;  %s1150_s1 = inlined_call_operand.vmem [shape: bf16[9,32,128], index: 1, kind: input, shape index: {}]   ;;  %s1151_s2 = inlined_call_operand.vmem [shape: f32[1,128], index: 2, kind: input, shape index: {}]   ;;  %s1152_s3 = inlined_call_operand.vmem [shape: bf16[2,2,2,128], index: 3, kind: output, shape index: {}]  }
   0x1 LB: > { %s773_s13 = sadd.s32 4294967295, %s949_s12   ;;  %p777_p0 = scmp.ge.s32.totalorder %s949_s12, 1  ;;  %s949_s12 = sphi %s971_s12, %s13_s12  }
   0x2   : > { %p137_p1 = scmp.lt.s32.totalorder %s949_s12, 3 }
   0x4   : > { %p138_p2 = pnand %p777_p0, %p137_p1 }
   0x5   : > { %p160_p3 = scmp.lt.s32.totalorder (!%p138_p2), %s773_s13, 1 }
   0x6   : > { %141 = sbr.rel (%p138_p2) target bundleno = 234 (0xea), region = 32 }
   0xb   : > { %v918_v0 = vld [vmem:[%s1150_s1 + $0x18] sm:$0xff]  ;;  %v916_v1 = vld [vmem:[%s1150_s1 + $0x8] sm:$0xff]  ;;  %v917_v2 = vld [vmem:[%s1150_s1 + $0x10] sm:$0xff]  ;;  %s1162_s13 = smov (!%p160_p3, %s773_s13), 1  ;;  %vm291_vm0 = vsmask.f32 256 }
   0xc   : > { %v920_v3 = vld [vmem:[%s1150_s1 + $0x28] sm:$0xff]  ;;  %v922_v4 = vld [vmem:[%s1150_s1 + $0x38] sm:$0xff]  ;;  %211 = vmatpush.bf16.msra.mxu0 %v918_v0  ;;  %244 = vmatpush.bf16.msra.mxu1 %v916_v1  ;;  %v915_v5 = vld [vmem:[%s1150_s1] sm:$0xff]  ;;  %vm292_vm1 = vsmask.f32 1284  ;;  %s933_s30 = smul.u32 24, %s1162_s13 }
   0xd   : > { %v919_v6 = vld [vmem:[%s1150_s1 + $0x20] sm:$0xff]  ;;  %v921_v7 = vld [vmem:[%s1150_s1 + $0x30] sm:$0xff]  ;;  %353 = vmatpush.bf16.msra.mxu2 %v920_v3  ;;  %395 = vmatpush.bf16.msra.mxu3 %v922_v4  ;;  %vm294_vm2 = vsmask.f32 2312  ;;  %vm293_vm3 = vmor %vm291_vm0, %vm292_vm1  ;;  %vm296_vm5 = vsmask.f32 3340 }
   0xe   : > { %vm1006_vm4 = vmor %vm293_vm3, %vm294_vm2  ;;  %s1013_s6 = scalar_lea.vmem %s1149_s0, %s933_s30  ;;  %vm261_vm6 = vcmask 1040384   ;;  %vm265_vm7 = vcmask 1042434   ;;  %vm271_vm8 = vcmask 1041409   ;;  %vm273_vm9 = vcmask 1043459   ;;  %v924_v22 = vld [vmem:[%s1150_s1 + $0x48] sm:$0xff]  ;;  %v926_v23 = vld [vmem:[%s1150_s1 + $0x58] sm:$0xff] }
   0xf   : > { %v780_v9 = vld [vmem:[%s1013_s6 + $0x6] sm:$0x1]  ;;  %v781_v10 = vld [vmem:[%s1013_s6 + $0x8] sm:$0x1]  ;;  %vm275_vm10 = vcmask 1042433   ;;  %vm297_vm11 = vmor %vm1006_vm4, %vm296_vm5  ;;  %vm202_vm15 = vcmask 261120  }
  0x10   : > { %212 = vmatpush.bf16.msra.mxu0 %v917_v2  ;;  %245 = vmatpush.bf16.msra.mxu1 %v915_v5  ;;  %185 = vst [vmem:[#allocation1] ss:$9 sm:$0xff] %v780_v9  ;;  %v251_v11 = vld [vmem:[%s1013_s6] sm:$0x3]  ;;  %vm298_vm12 = vsmask.f32 4368 }
  0x11   : > { %354 = vmatpush.bf16.msra.mxu2 %v919_v6  ;;  %396 = vmatpush.bf16.msra.mxu3 %v921_v7  ;;  %188 = vst [vmem:[#allocation1 + $0x1] ss:$9 sm:$0xff] %v781_v10  ;;  %v252_v12 = vld [vmem:[%s1013_s6 + $0x2] sm:$0x3]  ;;  %v255_v13 = vrot.slane %v251_v11, 1  ;;  %v256_v14 = vrot.slane %v251_v11, 2  ;;  %vm1023_vm13 = vmor %vm297_vm11, %vm298_vm12 }
  0x12   : > { %v257_v15 = vrot.slane %v251_v11, 3  ;;  %v258_v16 = vrot.slane %v252_v12, 1  ;;  %v259_v17 = vrot.slane %v252_v12, 2  ;;  %v260_v18 = vrot.slane %v252_v12, 3  ;;  %v170_v24 = vld [vmem:[%s1013_s6] sm:$0x1] }
  0x13   : > { %v272_v19 = vsel %vm271_vm8, %v251_v11, %v255_v13  ;;  %vm300_vm14 = vsmask.f32 5396  ;;  %vm269_vm0 = vcmask 1041408   ;;  %v264_v25 = vsel %vm261_vm6, %v251_v11, %v255_v13  ;;  %v923_v33 = vld [vmem:[%s1150_s1 + $0x40] sm:$0xff]  ;;  %v925_v34 = vld [vmem:[%s1150_s1 + $0x50] sm:$0xff]  ;;  %v928_v47 = vld [vmem:[%s1150_s1 + $0x68] sm:$0xff] }
  0x14   : > { %v274_v21 = vsel %vm273_vm9, %v256_v14, %v257_v15  ;;  %v268_v26 = vsel %vm265_vm7, %v256_v14, %v257_v15  ;;  %v286_v28 = vsel %vm271_vm8, %v252_v12, %v258_v16  ;;  %v281_v29 = vsel %vm261_vm6, %v252_v12, %v258_v16  ;;  %vm1044_vm1 = vmor %vm1023_vm13, %vm300_vm14  ;;  %437 = vmatpush.bf16.msrb.mxu0 %v924_v22  ;;  %v171_v35 = vld [vmem:[%s1013_s6 + $0x2] sm:$0x1]  ;;  %v849_v51 = vld [vmem:[%s1013_s6 + $0xc] sm:$0x3]  ;;  %s779_s4 = sshll.u32 %s1162_s13, 1 }
  0x15   : > { %v276_v27 = vsel %vm275_vm10, %v272_v19, %v274_v21  ;;  %v284_v30 = vsel %vm265_vm7, %v259_v17, %v260_v18  ;;  %v287_v31 = vsel %vm273_vm9, %v259_v17, %v260_v18  ;;  %vm302_vm2 = vsmask.f32 6424  ;;  %526 = vmatpush.bf16.msrb.mxu1 %v926_v23  ;;  %568 = vmatpush.bf16.msrb.mxu2 %v928_v47  ;;  %v850_v52 = vld [vmem:[%s1013_s6 + $0xe] sm:$0x3]  ;;  %v930_v53 = vld [vmem:[%s1150_s1 + $0x78] sm:$0xff]  ;;  %v927_v54 = vld [vmem:[%s1150_s1 + $0x60] sm:$0xff]  ;;  %s168_s7 = scalar_lea.vmem %s1152_s3, %s779_s4 }
  0x16   : > { %v278_v36 = vrot.slane %v276_v27, 1  ;;  %v288_v37 = vsel %vm275_vm10, %v286_v28, %v287_v31  ;;  %v270_v39 = vsel %vm269_vm0, %v264_v25, %v268_v26  ;;  %v285_v41 = vsel %vm269_vm0, %v281_v29, %v284_v30  ;;  %vm303_vm3 = vmor %vm1044_vm1, %vm302_vm2  ;;  %v819_v55 = vld [vmem:[%s1013_s6 + $0xc] sm:$0x1]  ;;  %v820_v59 = vld [vmem:[%s1013_s6 + $0xe] sm:$0x1]  ;;  %610 = vmatpush.bf16.msrb.mxu3 %v930_v53 }
  0x17   : > { %v290_v40 = vrot.slane %v288_v37, 1  ;;  %vm304_vm4 = vsmask.f32 7452  ;;  %v306_v42 = vshrl.u32 %v270_v39, 16  ;;  %v314_v45 = vshrl.u32 %v285_v41, 16  ;;  %v929_v8 = vld [vmem:[%s1150_s1 + $0x70] sm:$0xff] }
  0x18   : > { %v189_v38 = vld [vmem:[#allocation1] sm:$0xff]  ;;  %438 = vmatpush.bf16.msrb.mxu0 %v923_v33  ;;  %v311_v43 = vshll.u32 %v278_v36, 16  ;;  %vm1061_vm5 = vmor %vm303_vm3, %vm304_vm4  ;;  %v449_v56 = vrot.slane %v849_v51, 1  ;;  %v450_v57 = vrot.slane %v849_v51, 2  ;;  %v451_v58 = vrot.slane %v849_v51, 3  ;;  %v932_v9 = vld [vmem:[%s1150_s1 + $0x88] sm:$0xff] }
  0x19   : > { %794 = vmatmul.msk.bf16.vlgmr.msra.gmra.mxu0 %vm202_vm15, %v189_v38  ;;  %219 = vst [vmem:[#allocation1] ss:$9 sm:$0xff] %v170_v24  ;;  %527 = vmatpush.bf16.msrb.mxu1 %v925_v34  ;;  %v319_v46 = vshll.u32 %v290_v40, 16  ;;  %v452_v60 = vrot.slane %v850_v52, 1  ;;  %v453_v61 = vrot.slane %v850_v52, 2  ;;  %v454_v62 = vrot.slane %v850_v52, 3 }
  0x1a   : > { %222 = vst [vmem:[#allocation1 + $0x1] ss:$9 sm:$0xff] %v171_v35  ;;  %v313_v48 = vsel %vm1061_vm5, %v306_v42, %v311_v43  ;;  %569 = vmatpush.bf16.msrb.mxu2 %v927_v54  ;;  %v462_v0 = vsel %vm271_vm8, %v849_v51, %v449_v56  ;;  %v463_v1 = vsel %vm273_vm9, %v450_v57, %v451_v58  ;;  %v834_v10 = vld [vmem:[%s1013_s6 + $0x12] sm:$0x1]  ;;  %v835_v13 = vld [vmem:[%s1013_s6 + $0x14] sm:$0x1] }
  0x1b   : > { %v321_v49 = vsel %vm1061_vm5, %v314_v45, %v319_v46  ;;  %v474_v2 = vsel %vm271_vm8, %v850_v52, %v452_v60  ;;  %v475_v3 = vsel %vm273_vm9, %v453_v61, %v454_v62  ;;  %v464_v4 = vsel %vm275_vm10, %v462_v0, %v463_v1  ;;  %611 = vmatpush.bf16.msrb.mxu3 %v929_v8  ;;  %v931_v23 = vld [vmem:[%s1150_s1 + $0x80] sm:$0xff]  ;;  %v881_v47 = vld [vmem:[%s1013_s6 + $0x8] sm:$0x1] }
  0x1c   : > { %v457_v5 = vsel %vm261_vm6, %v849_v51, %v449_v56  ;;  %v460_v6 = vsel %vm265_vm7, %v450_v57, %v451_v58  ;;  %v476_v7 = vsel %vm275_vm10, %v474_v2, %v475_v3  ;;  %v469_v11 = vsel %vm261_vm6, %v850_v52, %v452_v60  ;;  %699 = vmatpush.bf16.msra.mxu0 %v932_v9  ;;  %v896_v27 = vld [vmem:[%s1013_s6 + $0x2] sm:$0x3]  ;;  %v897_v28 = vld [vmem:[%s1013_s6 + $0x4] sm:$0x3] }
  0x1d   : > { %v472_v12 = vsel %vm265_vm7, %v453_v61, %v454_v62  ;;  %v466_v14 = vrot.slane %v464_v4, 1  ;;  %v461_v16 = vsel %vm269_vm0, %v457_v5, %v460_v6  ;;  %v478_v17 = vrot.slane %v476_v7, 1  ;;  %v866_v29 = vld [vmem:[%s1013_s6 + $0x2] sm:$0x1]  ;;  %v867_v33 = vld [vmem:[%s1013_s6 + $0x4] sm:$0x1] }
  0x1e   : > { %v473_v18 = vsel %vm269_vm0, %v469_v11, %v472_v12  ;;  %v479_v19 = vshrl.u32 %v461_v16, 16  ;;  %v622_v30 = vrot.slane %v896_v27, 1  ;;  %v623_v31 = vrot.slane %v896_v27, 2 }
  0x1f   : > { %v484_v20 = vshll.u32 %v466_v14, 16  ;;  %v487_v21 = vshrl.u32 %v473_v18, 16  ;;  %v492_v22 = vshll.u32 %v478_v17, 16  ;;  %v624_v32 = vrot.slane %v896_v27, 3 }
  0x20   : > { %700 = vmatpush.bf16.msra.mxu0 %v931_v23  ;;  %v625_v34 = vrot.slane %v897_v28, 1  ;;  %v626_v35 = vrot.slane %v897_v28, 2  ;;  %v627_v36 = vrot.slane %v897_v28, 3  ;;  %v635_v38 = vsel %vm271_vm8, %v896_v27, %v622_v30 }
  0x21   : > { %v223_v50 = vld [vmem:[#allocation1] sm:$0xff]  ;;  %v486_v24 = vsel %vm1061_vm5, %v479_v19, %v484_v20  ;;  %v494_v25 = vsel %vm1061_vm5, %v487_v21, %v492_v22  ;;  %v636_v39 = vsel %vm273_vm9, %v623_v31, %v624_v32  ;;  %v630_v43 = vsel %vm261_vm6, %v896_v27, %v622_v30 }
  0x22   : > { %803 = vmatmul.msk.bf16.vlgmr.msra.gmra.mxu1 %vm202_vm15, %v223_v50  ;;  %328 = vst [vmem:[#allocation1] ss:$9 sm:$0xff] %v313_v48  ;;  %v647_v40 = vsel %vm271_vm8, %v897_v28, %v625_v34  ;;  %v648_v41 = vsel %vm273_vm9, %v626_v35, %v627_v36  ;;  %v637_v42 = vsel %vm275_vm10, %v635_v38, %v636_v39  ;;  %v882_v50 = vld [vmem:[%s1013_s6 + $0xa] sm:$0x1]  ;;  %v942_v21 = vld [vmem:[%s1151_s2] ss:$0 sm:$0xff] }
  0x23   : > { %331 = vst [vmem:[#allocation1 + $0x1] ss:$9 sm:$0xff] %v321_v49  ;;  %v633_v45 = vsel %vm265_vm7, %v623_v31, %v624_v32  ;;  %v649_v46 = vsel %vm275_vm10, %v647_v40, %v648_v41  ;;  %v642_v48 = vsel %vm261_vm6, %v897_v28, %v625_v34  ;;  %v645_v49 = vsel %vm265_vm7, %v626_v35, %v627_v36 }
  0x24   : > { %v639_v51 = vrot.slane %v637_v42, 1  ;;  %v634_v53 = vsel %vm269_vm0, %v630_v43, %v633_v45  ;;  %v651_v54 = vrot.slane %v649_v46, 1 }
  0x25   : > { %v652_v56 = vshrl.u32 %v634_v53, 16 }
  0x26   : > { %v657_v57 = vshll.u32 %v639_v51, 16 }
  0x28   : > { %v659_v60 = vsel %vm1061_vm5, %v652_v56, %v657_v57 }
  0x2a   : > { %v332_v63 = vld [vmem:[#allocation1] sm:$0xff] }
  0x2b   : > { %818 = vmatmul.msk.bf16.vlgmr.msra.gmra.mxu2 %vm202_vm15, %v332_v63  ;;  %370 = vst [vmem:[#allocation1] ss:$9 sm:$0xff] %v819_v55  ;;  %v646_v55 = vsel %vm269_vm0, %v642_v48, %v645_v49 }
  0x2c   : > { %373 = vst [vmem:[#allocation1 + $0x1] ss:$9 sm:$0xff] %v820_v59  ;;  %v660_v58 = vshrl.u32 %v646_v55, 16  ;;  %v665_v59 = vshll.u32 %v651_v54, 16 }
  0x2e   : > { %v667_v61 = vsel %vm1061_vm5, %v660_v58, %v665_v59 }
  0x33   : > { %v374_v15 = vld [vmem:[#allocation1] sm:$0xff] }
  0x34   : > { %833 = vmatmul.msk.bf16.vlgmr.msra.gmra.mxu3 %vm202_vm15, %v374_v15  ;;  %412 = vst [vmem:[#allocation1] ss:$9 sm:$0xff] %v834_v10 }
  0x35   : > { %415 = vst [vmem:[#allocation1 + $0x1] ss:$9 sm:$0xff] %v835_v13 }
  0x3c   : > { %v416_v26 = vld [vmem:[#allocation1] sm:$0xff] }
  0x3d   : > { %848 = vmatmul.msk.bf16.vlgmr.msrb.gmra.mxu0 %vm202_vm15, %v416_v26  ;;  %501 = vst [vmem:[#allocation1] ss:$9 sm:$0xff] %v486_v24 }
  0x3e   : > { %504 = vst [vmem:[#allocation1 + $0x1] ss:$9 sm:$0xff] %v494_v25 }
  0x45   : > { %v505_v37 = vld [vmem:[#allocation1] sm:$0xff] }
  0x46   : > { %865 = vmatmul.msk.bf16.vlgmr.msrb.gmra.mxu1 %vm202_vm15, %v505_v37  ;;  %543 = vst [vmem:[#allocation1] ss:$9 sm:$0xff] %v866_v29 }
  0x47   : > { %546 = vst [vmem:[#allocation1 + $0x1] ss:$9 sm:$0xff] %v867_v33 }
  0x4e   : > { %v547_v52 = vld [vmem:[#allocation1] sm:$0xff] }
  0x4f   : > { %880 = vmatmul.msk.bf16.vlgmr.msrb.gmra.mxu2 %vm202_vm15, %v547_v52  ;;  %585 = vst [vmem:[#allocation1] ss:$9 sm:$0xff] %v881_v47 }
  0x50   : > { %588 = vst [vmem:[#allocation1 + $0x1] ss:$9 sm:$0xff] %v882_v50 }
  0x57   : > { %v589_v62 = vld [vmem:[#allocation1] sm:$0xff] }
  0x58   : > { %895 = vmatmul.msk.bf16.vlgmr.msrb.gmra.mxu3 %vm202_vm15, %v589_v62  ;;  %674 = vst [vmem:[#allocation1] ss:$9 sm:$0xff] %v659_v60 }
  0x59   : > { %677 = vst [vmem:[#allocation1 + $0x1] ss:$9 sm:$0xff] %v667_v61 }
  0x60   : > { %v678_v63 = vld [vmem:[#allocation1] sm:$0xff] }
  0x61   : > { %912 = vmatmul.msk.bf16.vlgmr.msra.gmra.mxu0 %vm202_vm15, %v678_v63 }
  0x96   : > { %v214_v0 = vpop.f32.mrf.mxu0 }
  0x9e   : > { %v216_v1 = vpop.f32.mrf.mxu0 }
  0x9f   : > { %v247_v2 = vpop.f32.mrf.mxu1 }
  0xa0   : > { %v248_v10 = vadd.f32 %v247_v2, %v214_v0 }
  0xa7   : > { %v249_v3 = vpop.f32.mrf.mxu1 }
  0xae   : > { %v356_v4 = vpop.f32.mrf.mxu2 }
  0xaf   : > { %v360_v12 = vadd.f32 %v356_v4, %v248_v10 }
  0xb6   : > { %v358_v5 = vpop.f32.mrf.mxu2 }
  0xb7   : > { %v398_v6 = vpop.f32.mrf.mxu3 }
  0xb8   : > { %v402_v13 = vadd.f32 %v398_v6, %v360_v12 }
  0xba   : > { %v440_v7 = vpop.f32.mrf.mxu0 }
  0xbb   : > { %v444_v15 = vadd.f32 %v440_v7, %v402_v13 }
  0xbf   : > { %v400_v8 = vpop.f32.mrf.mxu3 }
  0xc2   : > { %v442_v9 = vpop.f32.mrf.mxu0 }
  0xc3   : > { %v529_v44 = vpop.f32.mrf.mxu1 }
  0xc4   : > { %v533_v16 = vadd.f32 %v529_v44, %v444_v15 }
  0xcb   : > { %v531_v11 = vpop.f32.mrf.mxu1 }
  0xd2   : > { %v571_v14 = vpop.f32.mrf.mxu2 }
  0xd3   : > { %v575_v17 = vadd.f32 %v571_v14, %v533_v16 }
  0xda   : > { %v573_v18 = vpop.f32.mrf.mxu2 }
  0xdb   : > { %v613_v19 = vpop.f32.mrf.mxu3 }
  0xdc   : > { %v617_v20 = vadd.f32 %v613_v19, %v575_v17 }
  0xde   : > { %v702_v22 = vpop.f32.mrf.mxu0 }
  0xdf   : > { %v706_v23 = vadd.f32 %v702_v22, %v617_v20 }
  0xe1   : > { %v711_v24 = vadd.f32 %v942_v21, %v706_v23 }
  0xe3   : > { %v712_v25 = vmax.f32 %v711_v24, 0.0  ;;  %v615_v26 = vpop.f32.mrf.mxu3 }
  0xe5   : > { %v714_v27 = vrot.slane %v712_v25, 2  ;;  %v716_v28 = vpack.c.bf16 %v712_v25, %v712_v25 }
  0xe6   : > { %v704_v29 = vpop.f32.mrf.mxu0 }
  0xe7   : > { %v717_v30 = vpack.c.bf16 %v714_v27, %v714_v27  ;;  %718 = vst [vmem:[%s168_s7] sm:$0x1] %v716_v28 }
  0xe9   : > { %719 = vst [vmem:[%s168_s7 + $0x1] sm:$0x1] %v717_v30 }
  0xea PF: > { %s13_s12 = sadd.s32 1, %s949_s12  }
  0xeb   : > { %p10_p4 = scmp.ge.s32.totalorder %s13_s12, 4  }
  0xed   :  { %12 = sbr.rel (!%p10_p4) target bundleno = 1 (0x1), region = 84 }

// kernel: _lambda_.10
= control target key start
LH: loop header
LB: loop body
LE: loop exit
PB: predicated region body
PF: predicated region fallthrough
CT: control target
= control target key end

     0   :  { %s1358_s12 = smov 0   ;;  %s1589_s0 = inlined_call_operand.vmem [shape: bf16[2,1,6,6,32], index: 0, kind: input, shape index: {}]   ;;  %s1590_s1 = inlined_call_operand.vmem [shape: bf16[9,32,128], index: 1, kind: input, shape index: {}]   ;;  %s1591_s2 = inlined_call_operand.vmem [shape: f32[1,128], index: 2, kind: input, shape index: {}]   ;;  %s1592_s3 = inlined_call_operand.vmem [shape: bf16[2,4,4,128], index: 3, kind: output, shape index: {}]  }
   0x1 LB: > { %s1130_s13 = sadd.s32 4294967295, %s1336_s12   ;;  %p1134_p0 = scmp.ge.s32.totalorder %s1336_s12, 1  ;;  %s1336_s12 = sphi %s1358_s12, %s13_s12  }
   0x2   : > { %p137_p1 = scmp.lt.s32.totalorder %s1336_s12, 3 }
   0x4   : > { %p138_p2 = pnand %p1134_p0, %p137_p1 }
   0x5   : > { %p161_p3 = scmp.lt.s32.totalorder (!%p138_p2), %s1130_s13, 1 }
   0x6   : > { %141 = sbr.rel (%p138_p2) target bundleno = 275 (0x113), region = 32 }
   0xb   : > { %v1305_v0 = vld [vmem:[%s1590_s1 + $0x18] sm:$0xff]  ;;  %v1307_v1 = vld [vmem:[%s1590_s1 + $0x28] sm:$0xff]  ;;  %v1304_v2 = vld [vmem:[%s1590_s1 + $0x10] sm:$0xff]  ;;  %s1598_s13 = smov (!%p161_p3, %s1130_s13), 1  ;;  %vm192_vm0 = vcmask 1041408   ;;  %vm196_vm1 = vcmask 1043458  }
   0xc   : > { %315 = vmatpush.bf16.msra.mxu0 %v1305_v0  ;;  %463 = vmatpush.bf16.msra.mxu2 %v1307_v1  ;;  %v1303_v3 = vld [vmem:[%s1590_s1 + $0x8] sm:$0xff]  ;;  %v1306_v4 = vld [vmem:[%s1590_s1 + $0x20] sm:$0xff]  ;;  %v1309_v5 = vld [vmem:[%s1590_s1 + $0x38] sm:$0xff]  ;;  %s1320_s26 = smul.u32 24, %s1598_s13  ;;  %vm218_vm2 = vsmask.f32 1280 }
   0xd   : > { %355 = vmatpush.bf16.msra.mxu1 %v1303_v3  ;;  %515 = vmatpush.bf16.msra.mxu3 %v1309_v5  ;;  %vm219_vm3 = vsmask.f32 3336  ;;  %vm221_vm4 = vsmask.f32 5392  ;;  %vm223_vm7 = vsmask.f32 7448 }
   0xe   : > { %s1390_s29 = scalar_lea.vmem %s1589_s0, %s1320_s26  ;;  %vm220_vm5 = vmor %vm218_vm2, %vm219_vm3  ;;  %v1302_v62 = vld [vmem:[%s1590_s1] sm:$0xff]  ;;  %v1308_v63 = vld [vmem:[%s1590_s1 + $0x30] sm:$0xff]  ;;  %vm403_vm9 = vcmask 1040384   ;;  %vm404_vm10 = vcmask 1042434   ;;  %vm306_vm11 = vcmask 261120   ;;  %vm406_vm13 = vcmask 1044484  }
   0xf   : > { %v180_v6 = vld [vmem:[%s1390_s29] sm:$0x7]  ;;  %v181_v7 = vld [vmem:[%s1390_s29 + $0x4] sm:$0x7]  ;;  %v182_v8 = vld [vmem:[%s1390_s29 + $0x8] sm:$0x7] }
  0x10   : > { %316 = vmatpush.bf16.msra.mxu0 %v1304_v2  ;;  %464 = vmatpush.bf16.msra.mxu2 %v1306_v4  ;;  %v183_v9 = vld [vmem:[%s1390_s29 + $0xc] sm:$0x7]  ;;  %v188_v10 = vrot.slane %v180_v6, 2  ;;  %v189_v11 = vrot.slane %v181_v7, 2  ;;  %v190_v12 = vrot.slane %v182_v8, 2  ;;  %vm222_vm6 = vmor %vm220_vm5, %vm221_vm4  ;;  %vm408_vm15 = vcmask 1046534  }
  0x11   : > { %v191_v13 = vrot.slane %v183_v9, 2  ;;  %vm1406_vm8 = vmor %vm222_vm6, %vm223_vm7  ;;  %356 = vmatpush.bf16.msra.mxu1 %v1302_v62  ;;  %516 = vmatpush.bf16.msra.mxu3 %v1308_v63  ;;  %v363_v1 = vld [vmem:[%s1390_s29] sm:$0x6]  ;;  %v364_v2 = vld [vmem:[%s1390_s29 + $0x4] sm:$0x6]  ;;  %s1301_s4 = sshll.u32 %s1598_s13, 3 }
  0x12   : > { %v195_v14 = vsel %vm192_vm0, %v180_v6, %v188_v10  ;;  %v197_v15 = vsel %vm196_vm1, %v180_v6, %v188_v10  ;;  %v202_v16 = vsel %vm192_vm0, %v181_v7, %v189_v11  ;;  %v203_v17 = vsel %vm196_vm1, %v181_v7, %v189_v11  ;;  %v365_v3 = vld [vmem:[%s1390_s29 + $0x8] sm:$0x6]  ;;  %v172_v4 = vld [vmem:[%s1390_s29] sm:$0x3]  ;;  %v366_v5 = vld [vmem:[%s1390_s29 + $0xc] sm:$0x6]  ;;  %s170_s7 = scalar_lea.vmem %s1592_s3, %s1301_s4 }
  0x13   : > { %v199_v18 = vrot.slane %v197_v15, 2  ;;  %v205_v19 = vrot.slane %v203_v17, 2  ;;  %v208_v20 = vsel %vm192_vm0, %v182_v8, %v190_v12  ;;  %v209_v21 = vsel %vm196_vm1, %v182_v8, %v190_v12  ;;  %v173_v7 = vld [vmem:[%s1390_s29 + $0x4] sm:$0x3]  ;;  %v174_v8 = vld [vmem:[%s1390_s29 + $0x8] sm:$0x3]  ;;  %vm405_vm12 = vmor %vm403_vm9, %vm404_vm10 }
  0x14   : > { %v211_v22 = vrot.slane %v209_v21, 2  ;;  %v214_v23 = vsel %vm192_vm0, %v183_v9, %v191_v13  ;;  %v215_v24 = vsel %vm196_vm1, %v183_v9, %v191_v13  ;;  %v225_v25 = vshrl.u32 %v195_v14, 16  ;;  %v175_v12 = vld [vmem:[%s1390_s29 + $0xc] sm:$0x3]  ;;  %vm407_vm14 = vmor %vm405_vm12, %vm406_vm13 }
  0x15   : > { %v217_v26 = vrot.slane %v215_v24, 2  ;;  %v228_v27 = vshll.u32 %v195_v14, 16  ;;  %v234_v28 = vshll.u32 %v199_v18, 16  ;;  %v238_v29 = vshrl.u32 %v202_v16, 16  ;;  %v1311_v14 = vld [vmem:[%s1590_s1 + $0x48] sm:$0xff]  ;;  %vm1448_vm2 = vmor %vm407_vm14, %vm408_vm15 }
  0x16   : > { %v227_v30 = vrot.slane %v225_v25, 6  ;;  %v241_v31 = vshll.u32 %v202_v16, 16  ;;  %v247_v32 = vshll.u32 %v205_v19, 16  ;;  %v251_v33 = vshrl.u32 %v208_v20, 16  ;;  %650 = vmatpush.bf16.msrb.mxu0 %v1311_v14  ;;  %v1310_v19 = vld [vmem:[%s1590_s1 + $0x40] sm:$0xff] }
  0x17   : > { %v230_v34 = vrot.slane %v228_v27, 7  ;;  %v240_v35 = vrot.slane %v238_v29, 6  ;;  %v254_v36 = vshll.u32 %v208_v20, 16  ;;  %v236_v37 = vrot.slane %v234_v28, 7 }
  0x18   : > { %v243_v38 = vrot.slane %v241_v31, 7  ;;  %v253_v39 = vrot.slane %v251_v33, 6  ;;  %v260_v40 = vshll.u32 %v211_v22, 16  ;;  %v264_v43 = vshrl.u32 %v214_v23, 16  ;;  %v1200_v33 = vld [vmem:[%s1390_s29 + $0xc] sm:$0x7] }
  0x19   : > { %v231_v41 = vor.u32 %v230_v34, %v227_v30  ;;  %v256_v42 = vrot.slane %v254_v36, 7  ;;  %v267_v44 = vshll.u32 %v214_v23, 16  ;;  %v249_v47 = vrot.slane %v247_v32, 7  ;;  %v1199_v30 = vld [vmem:[%s1390_s29 + $0x8] sm:$0x7] }
  0x1a   : > { %v244_v46 = vor.u32 %v243_v38, %v240_v35  ;;  %v262_v48 = vrot.slane %v260_v40, 7  ;;  %v273_v49 = vshll.u32 %v217_v26, 16  ;;  %v266_v52 = vrot.slane %v264_v43, 6  ;;  %v1198_v26 = vld [vmem:[%s1390_s29 + $0x4] sm:$0x7]  ;;  %651 = vmatpush.bf16.msrb.mxu0 %v1310_v19 }
  0x1b   : > { %v232_v50 = vrot.slane %v231_v41, 2  ;;  %v257_v51 = vor.u32 %v256_v42, %v253_v39  ;;  %v269_v53 = vrot.slane %v267_v44, 7  ;;  %v371_v6 = vrot.slane %v363_v1, 2  ;;  %v1201_v36 = vld [vmem:[%s1390_s29 + $0x10] sm:$0x7] }
  0x1c   : > { %v245_v54 = vrot.slane %v244_v46, 2  ;;  %v275_v58 = vrot.slane %v273_v49, 7  ;;  %v372_v9 = vrot.slane %v364_v2, 2  ;;  %v373_v11 = vrot.slane %v365_v3, 2 }
  0x1d   : > { %v237_v55 = vsel %vm1406_vm8, %v232_v50, %v236_v37  ;;  %v258_v56 = vrot.slane %v257_v51, 2  ;;  %v270_v57 = vor.u32 %v269_v53, %v266_v52  ;;  %v374_v13 = vrot.slane %v366_v5, 2  ;;  %v1315_v50 = vld [vmem:[%s1590_s1 + $0x68] sm:$0xff]  ;;  %v1312_v52 = vld [vmem:[%s1590_s1 + $0x50] sm:$0xff] }
  0x1e   : > { %v250_v59 = vsel %vm1406_vm8, %v245_v54, %v249_v47  ;;  %283 = vst [vmem:[#allocation1] ss:$4 sm:$0xff] %v237_v55  ;;  %v377_v15 = vsel %vm192_vm0, %v363_v1, %v371_v6  ;;  %v379_v16 = vsel %vm196_vm1, %v363_v1, %v371_v6  ;;  %v384_v17 = vsel %vm192_vm0, %v364_v2, %v372_v9  ;;  %v1181_v1 = vld [vmem:[%s1390_s29 + $0x4] sm:$0x3]  ;;  %v1182_v6 = vld [vmem:[%s1390_s29 + $0x8] sm:$0x3] }
  0x1f   : > { %v263_v60 = vsel %vm1406_vm8, %v258_v56, %v262_v48  ;;  %v271_v61 = vrot.slane %v270_v57, 2  ;;  %286 = vst [vmem:[#allocation1 + $0x1] ss:$4 sm:$0xff] %v250_v59  ;;  %v386_v18 = vsel %vm196_vm1, %v364_v2, %v372_v9  ;;  %v391_v20 = vsel %vm192_vm0, %v365_v3, %v373_v11  ;;  %v1313_v48 = vld [vmem:[%s1590_s1 + $0x58] sm:$0xff]  ;;  %805 = vmatpush.bf16.msrb.mxu2 %v1315_v50 }
  0x20   : > { %289 = vst [vmem:[#allocation1 + $0x2] ss:$4 sm:$0xff] %v263_v60  ;;  %v393_v21 = vsel %vm196_vm1, %v365_v3, %v373_v11  ;;  %v398_v22 = vsel %vm192_vm0, %v366_v5, %v374_v13  ;;  %v400_v23 = vsel %vm196_vm1, %v366_v5, %v374_v13  ;;  %v1160_v24 = vrot.slane %v377_v15, 9  ;;  %753 = vmatpush.bf16.msrb.mxu1 %v1313_v48 }
  0x21   : > { %v276_v0 = vsel %vm1406_vm8, %v271_v61, %v275_v58  ;;  %v1161_v25 = vrot.slane %v379_v16, 9  ;;  %v1162_v28 = vrot.slane %v384_v17, 9  ;;  %v1163_v29 = vrot.slane %v386_v18, 9  ;;  %v1184_v18 = vld [vmem:[%s1390_s29 + $0x10] sm:$0x3] }
  0x22   : > { %292 = vst [vmem:[#allocation1 + $0x3] ss:$4 sm:$0xff] %v276_v0  ;;  %v1164_v31 = vrot.slane %v391_v20, 9  ;;  %v1165_v32 = vrot.slane %v393_v21, 9  ;;  %v1166_v34 = vrot.slane %v398_v22, 9  ;;  %v1167_v35 = vrot.slane %v400_v23, 9 }
  0x23   : > { %v533_v37 = vrot.slane %v1198_v26, 2  ;;  %v413_v38 = vsel %vm1448_vm2, %v1160_v24, %v1161_v25  ;;  %v534_v39 = vrot.slane %v1199_v30, 2  ;;  %v417_v40 = vsel %vm1448_vm2, %v1162_v28, %v1163_v29  ;;  %v1317_v23 = vld [vmem:[%s1590_s1 + $0x78] sm:$0xff]  ;;  %v1314_v24 = vld [vmem:[%s1590_s1 + $0x60] sm:$0xff] }
  0x24   : > { %v535_v41 = vrot.slane %v1200_v33, 2  ;;  %v421_v43 = vsel %vm1448_vm2, %v1164_v31, %v1165_v32  ;;  %v536_v44 = vrot.slane %v1201_v36, 2  ;;  %v425_v46 = vsel %vm1448_vm2, %v1166_v34, %v1167_v35  ;;  %754 = vmatpush.bf16.msrb.mxu1 %v1312_v52  ;;  %940 = vmatpush.bf16.msrb.mxu3 %v1317_v23  ;;  %v1215_v34 = vld [vmem:[%s1390_s29 + $0x4] sm:$0x6] }
  0x25   : > { %v539_v47 = vsel %vm192_vm0, %v1198_v26, %v533_v37  ;;  %v545_v49 = vsel %vm192_vm0, %v1199_v30, %v534_v39  ;;  %v540_v56 = vsel %vm196_vm1, %v1198_v26, %v533_v37  ;;  %v546_v59 = vsel %vm196_vm1, %v1199_v30, %v534_v39  ;;  %806 = vmatpush.bf16.msrb.mxu2 %v1314_v24  ;;  %v1216_v37 = vld [vmem:[%s1390_s29 + $0x8] sm:$0x6] }
  0x26   : > { %v551_v51 = vsel %vm192_vm0, %v1200_v33, %v535_v41  ;;  %v557_v53 = vsel %vm192_vm0, %v1201_v36, %v536_v44  ;;  %v561_v54 = vshrl.u32 %v539_v47, 16  ;;  %v564_v55 = vshll.u32 %v539_v47, 16 }
  0x27   : > { %v574_v57 = vshrl.u32 %v545_v49, 16  ;;  %v577_v58 = vshll.u32 %v545_v49, 16  ;;  %v587_v60 = vshrl.u32 %v551_v51, 16  ;;  %v590_v61 = vshll.u32 %v551_v51, 16 }
  0x28   : > { %v552_v62 = vsel %vm196_vm1, %v1200_v33, %v535_v41  ;;  %v600_v63 = vshrl.u32 %v557_v53, 16  ;;  %v603_v0 = vshll.u32 %v557_v53, 16  ;;  %v542_v2 = vrot.slane %v540_v56, 2 }
  0x29   : > { %v293_v10 = vld.sshfl [vmem:[#allocation1] sm:$0xff pattern:$0x73625140]  ;;  %v558_v3 = vsel %vm196_vm1, %v1201_v36, %v536_v44  ;;  %v566_v5 = vrot.slane %v564_v55, 7  ;;  %v579_v9 = vrot.slane %v577_v58, 7  ;;  %v554_v11 = vrot.slane %v552_v62, 2 }
  0x2a   : > { %1150 = vmatmul.msk.bf16.vlgmr.msra.gmra.mxu0 %vm306_vm11, %v293_v10  ;;  %324 = vst [vmem:[#allocation1] ss:$4 sm:$0xff] %v172_v4  ;;  %v563_v4 = vrot.slane %v561_v54, 6  ;;  %v1183_v10 = vld [vmem:[%s1390_s29 + $0xc] sm:$0x3]  ;;  %v592_v13 = vrot.slane %v590_v61, 7 }
  0x2b   : > { %327 = vst [vmem:[#allocation1 + $0x1] ss:$4 sm:$0xff] %v173_v7  ;;  %v548_v7 = vrot.slane %v546_v59, 2  ;;  %v560_v15 = vrot.slane %v558_v3, 2  ;;  %v602_v16 = vrot.slane %v600_v63, 6  ;;  %v605_v17 = vrot.slane %v603_v0, 7 }
  0x2c   : > { %330 = vst [vmem:[#allocation1 + $0x2] ss:$4 sm:$0xff] %v174_v8  ;;  %v576_v8 = vrot.slane %v574_v57, 6  ;;  %v567_v19 = vor.u32 %v566_v5, %v563_v4  ;;  %v570_v20 = vshll.u32 %v542_v2, 16  ;;  %v596_v26 = vshll.u32 %v554_v11, 16  ;;  %v1316_v54 = vld [vmem:[%s1590_s1 + $0x70] sm:$0xff] }
  0x2d   : > { %333 = vst [vmem:[#allocation1 + $0x3] ss:$4 sm:$0xff] %v175_v12  ;;  %v589_v12 = vrot.slane %v587_v60, 6  ;;  %v583_v22 = vshll.u32 %v548_v7, 16  ;;  %v606_v28 = vor.u32 %v605_v17, %v602_v16  ;;  %v609_v29 = vshll.u32 %v560_v15, 16  ;;  %v1319_v55 = vld [vmem:[%s1590_s1 + $0x88] sm:$0xff]  ;;  %941 = vmatpush.bf16.msrb.mxu3 %v1316_v54 }
  0x2e   : > { %v580_v21 = vor.u32 %v579_v9, %v576_v8  ;;  %v568_v30 = vrot.slane %v567_v19, 2  ;;  %v572_v31 = vrot.slane %v570_v20, 7  ;;  %v598_v36 = vrot.slane %v596_v26, 7  ;;  %1043 = vmatpush.bf16.msra.mxu0 %v1319_v55  ;;  %v1257_v0 = vld [vmem:[%s1390_s29 + $0x8] sm:$0x7] }
  0x2f   : > { %v593_v25 = vor.u32 %v592_v13, %v589_v12  ;;  %v585_v33 = vrot.slane %v583_v22, 7  ;;  %v611_v39 = vrot.slane %v609_v29, 7  ;;  %v1258_v3 = vld [vmem:[%s1390_s29 + $0xc] sm:$0x7]  ;;  %v1260_v9 = vld [vmem:[%s1390_s29 + $0x14] sm:$0x7] }
  0x30   : > { %v581_v32 = vrot.slane %v580_v21, 2  ;;  %v573_v41 = vsel %vm1406_vm8, %v568_v30, %v572_v31  ;;  %v824_v12 = vrot.slane %v1258_v3, 2  ;;  %v826_v17 = vrot.slane %v1260_v9, 2  ;;  %v1318_v29 = vld [vmem:[%s1590_s1 + $0x80] sm:$0xff]  ;;  %v1243_v54 = vld [vmem:[%s1390_s29 + $0x14] sm:$0x3] }
  0x31   : > { %v594_v35 = vrot.slane %v593_v25, 2 }
  0x32   : > { %v586_v44 = vsel %vm1406_vm8, %v581_v32, %v585_v33  ;;  %v835_v20 = vsel %vm192_vm0, %v1258_v3, %v824_v12  ;;  %v847_v22 = vsel %vm192_vm0, %v1260_v9, %v826_v17  ;;  %v836_v30 = vsel %vm196_vm1, %v1258_v3, %v824_v12  ;;  %1044 = vmatpush.bf16.msra.mxu0 %v1318_v29  ;;  %v1274_v3 = vld [vmem:[%s1390_s29 + $0x8] sm:$0x6] }
  0x33   : > { %v599_v48 = vsel %vm1406_vm8, %v594_v35, %v598_v36  ;;  %v864_v26 = vshrl.u32 %v835_v20, 16  ;;  %v893_v35 = vshll.u32 %v847_v22, 16  ;;  %v1240_v36 = vld [vmem:[%s1390_s29 + $0x8] sm:$0x3]  ;;  %v958_v12 = vrot.slane %v1274_v3, 2 }
  0x34   : > { %v334_v42 = vld.sshfl [vmem:[#allocation1] sm:$0xff pattern:$0x73625140] }
  0x35   : > { %432 = vst [vmem:[#allocation1] ss:$4 sm:$0xff] %v413_v38  ;;  %1159 = vmatmul.msk.bf16.vlgmr.msra.gmra.mxu1 %vm306_vm11, %v334_v42  ;;  %v607_v38 = vrot.slane %v606_v28, 2  ;;  %v1218_v42 = vld [vmem:[%s1390_s29 + $0x10] sm:$0x6]  ;;  %v867_v28 = vshll.u32 %v835_v20, 16  ;;  %v964_v20 = vsel %vm192_vm0, %v1274_v3, %v958_v12 }
  0x36   : > { %435 = vst [vmem:[#allocation1 + $0x1] ss:$4 sm:$0xff] %v417_v40  ;;  %v1217_v40 = vld [vmem:[%s1390_s29 + $0xc] sm:$0x6]  ;;  %v671_v51 = vrot.slane %v1218_v42, 2 }
  0x37   : > { %438 = vst [vmem:[#allocation1 + $0x2] ss:$4 sm:$0xff] %v421_v43  ;;  %v668_v43 = vrot.slane %v1215_v34, 2  ;;  %v670_v49 = vrot.slane %v1217_v40, 2  ;;  %v612_v50 = vsel %vm1406_vm8, %v607_v38, %v611_v39  ;;  %v848_v38 = vsel %vm196_vm1, %v1260_v9, %v826_v17  ;;  %v1276_v9 = vld [vmem:[%s1390_s29 + $0x10] sm:$0x6] }
  0x38   : > { %441 = vst [vmem:[#allocation1 + $0x3] ss:$4 sm:$0xff] %v425_v46  ;;  %v669_v46 = vrot.slane %v1216_v37, 2  ;;  %v695_v60 = vsel %vm192_vm0, %v1218_v42, %v671_v51  ;;  %v697_v61 = vsel %vm196_vm1, %v1218_v42, %v671_v51  ;;  %v838_v42 = vrot.slane %v836_v30, 2 }
  0x39   : > { %v674_v52 = vsel %vm192_vm0, %v1215_v34, %v668_v43  ;;  %v676_v53 = vsel %vm196_vm1, %v1215_v34, %v668_v43  ;;  %v688_v58 = vsel %vm192_vm0, %v1217_v40, %v670_v49  ;;  %v690_v59 = vsel %vm196_vm1, %v1217_v40, %v670_v49 }
  0x3a   : > { %v681_v56 = vsel %vm192_vm0, %v1216_v37, %v669_v46  ;;  %v683_v57 = vsel %vm196_vm1, %v1216_v37, %v669_v46  ;;  %v1219_v62 = vrot.slane %v674_v52, 9  ;;  %v1220_v63 = vrot.slane %v676_v53, 9  ;;  %v1242_v46 = vld [vmem:[%s1390_s29 + $0x10] sm:$0x3] }
  0x3b   : > { %v1222_v2 = vrot.slane %v683_v57, 9  ;;  %v1223_v4 = vrot.slane %v688_v58, 9  ;;  %v1224_v5 = vrot.slane %v690_v59, 9  ;;  %v1225_v7 = vrot.slane %v695_v60, 9 }
  0x3c   : > { %v1226_v8 = vrot.slane %v697_v61, 9  ;;  %v703_v11 = vsel %vm1448_vm2, %v1219_v62, %v1220_v63  ;;  %v890_v34 = vshrl.u32 %v847_v22, 16  ;;  %v866_v43 = vrot.slane %v864_v26, 6 }
  0x3d   : > { %v711_v16 = vsel %vm1448_vm2, %v1223_v4, %v1224_v5  ;;  %v850_v51 = vrot.slane %v848_v38, 2  ;;  %v895_v53 = vrot.slane %v893_v35, 7  ;;  %v873_v58 = vshll.u32 %v838_v42, 16 }
  0x3e   : > { %v892_v52 = vrot.slane %v890_v34, 6  ;;  %v960_v17 = vrot.slane %v1276_v9, 2 }
  0x3f   : > { %v442_v14 = vld.sshfl [vmem:[#allocation1] sm:$0xff pattern:$0x73625140]  ;;  %v899_v62 = vshll.u32 %v850_v51, 16 }
  0x40   : > { %1180 = vmatmul.msk.bf16.vlgmr.msra.gmra.mxu2 %vm306_vm11, %v442_v14  ;;  %484 = vst [vmem:[#allocation1] ss:$4 sm:$0xff] %v1181_v1  ;;  %v1221_v1 = vrot.slane %v681_v56, 9  ;;  %v896_v61 = vor.u32 %v895_v53, %v892_v52 }
  0x41   : > { %487 = vst [vmem:[#allocation1 + $0x1] ss:$4 sm:$0xff] %v1182_v6  ;;  %v1259_v6 = vld [vmem:[%s1390_s29 + $0x10] sm:$0x7] }
  0x42   : > { %490 = vst [vmem:[#allocation1 + $0x2] ss:$4 sm:$0xff] %v1183_v10  ;;  %v823_v10 = vrot.slane %v1257_v0, 2  ;;  %v707_v13 = vsel %vm1448_vm2, %v1221_v1, %v1222_v2  ;;  %v825_v14 = vrot.slane %v1259_v6, 2  ;;  %v875_v2 = vrot.slane %v873_v58, 7 }
  0x43   : > { %493 = vst [vmem:[#allocation1 + $0x3] ss:$4 sm:$0xff] %v1184_v18  ;;  %v715_v18 = vsel %vm1448_vm2, %v1225_v7, %v1226_v8  ;;  %v897_v7 = vrot.slane %v896_v61, 2  ;;  %v901_v8 = vrot.slane %v899_v62, 7 }
  0x44   : > { %v829_v19 = vsel %vm192_vm0, %v1257_v0, %v823_v10  ;;  %v841_v21 = vsel %vm192_vm0, %v1259_v6, %v825_v14  ;;  %v830_v25 = vsel %vm196_vm1, %v1257_v0, %v823_v10  ;;  %v842_v33 = vsel %vm196_vm1, %v1259_v6, %v825_v14  ;;  %v1275_v6 = vld [vmem:[%s1390_s29 + $0xc] sm:$0x6] }
  0x45   : > { %v851_v23 = vshrl.u32 %v829_v19, 16  ;;  %v854_v24 = vshll.u32 %v829_v19, 16  ;;  %v877_v31 = vshrl.u32 %v841_v21, 16  ;;  %v880_v32 = vshll.u32 %v841_v21, 16 }
  0x46   : > { %v832_v37 = vrot.slane %v830_v25, 2  ;;  %v959_v14 = vrot.slane %v1275_v6, 2  ;;  %v966_v21 = vsel %vm196_vm1, %v1274_v3, %v958_v12  ;;  %v980_v25 = vsel %vm196_vm1, %v1276_v9, %v960_v17  ;;  %v1329_v3 = vld [vmem:[%s1591_s2] ss:$0 sm:$0xff] }
  0x47   : > { %v853_v39 = vrot.slane %v851_v23, 6  ;;  %v856_v40 = vrot.slane %v854_v24, 7  ;;  %v882_v49 = vrot.slane %v880_v32, 7  ;;  %v978_v24 = vsel %vm192_vm0, %v1276_v9, %v960_v17 }
  0x48   : > { %v860_v56 = vshll.u32 %v832_v37, 16  ;;  %v971_v22 = vsel %vm192_vm0, %v1275_v6, %v959_v14  ;;  %v973_v23 = vsel %vm196_vm1, %v1275_v6, %v959_v14  ;;  %v1279_v29 = vrot.slane %v966_v21, 9 }
  0x49   : > { %v857_v55 = vor.u32 %v856_v40, %v853_v39  ;;  %v1280_v30 = vrot.slane %v971_v22, 9  ;;  %v1282_v32 = vrot.slane %v978_v24, 9 }
  0x4a   : > { %v494_v47 = vld.sshfl [vmem:[#allocation1] sm:$0xff pattern:$0x73625140]  ;;  %v862_v0 = vrot.slane %v860_v56, 7 }
  0x4b   : > { %1197 = vmatmul.msk.bf16.vlgmr.msra.gmra.mxu3 %vm306_vm11, %v494_v47  ;;  %619 = vst [vmem:[#allocation1] ss:$4 sm:$0xff] %v573_v41  ;;  %v1241_v41 = vld [vmem:[%s1390_s29 + $0xc] sm:$0x3]  ;;  %v844_v47 = vrot.slane %v842_v33, 2  ;;  %v858_v63 = vrot.slane %v857_v55, 2 }
  0x4c   : > { %622 = vst [vmem:[#allocation1 + $0x1] ss:$4 sm:$0xff] %v586_v44  ;;  %v869_v44 = vrot.slane %v867_v28, 7  ;;  %v1278_v28 = vrot.slane %v964_v20, 9  ;;  %v1283_v33 = vrot.slane %v980_v25, 9 }
  0x4d   : > { %625 = vst [vmem:[#allocation1 + $0x2] ss:$4 sm:$0xff] %v599_v48  ;;  %v879_v48 = vrot.slane %v877_v31, 6  ;;  %v886_v60 = vshll.u32 %v844_v47, 16  ;;  %v863_v10 = vsel %vm1406_vm8, %v858_v63, %v862_v0  ;;  %v1281_v31 = vrot.slane %v973_v23, 9 }
  0x4e   : > { %628 = vst [vmem:[#allocation1 + $0x3] ss:$4 sm:$0xff] %v612_v50  ;;  %v870_v57 = vor.u32 %v869_v44, %v866_v43  ;;  %v1001_v39 = vsel %vm1448_vm2, %v1282_v32, %v1283_v33 }
  0x4f   : > { %v883_v59 = vor.u32 %v882_v49, %v879_v48  ;;  %v888_v5 = vrot.slane %v886_v60, 7  ;;  %v997_v37 = vsel %vm1448_vm2, %v1280_v30, %v1281_v31 }
  0x50   : > { %v871_v1 = vrot.slane %v870_v57, 2 }
  0x51   : > { %v884_v4 = vrot.slane %v883_v59, 2 }
  0x55   : > { %v629_v15 = vld.sshfl [vmem:[#allocation1] sm:$0xff pattern:$0x73625140] }
  0x56   : > { %1214 = vmatmul.msk.bf16.vlgmr.msrb.gmra.mxu0 %vm306_vm11, %v629_v15  ;;  %722 = vst [vmem:[#allocation1] ss:$4 sm:$0xff] %v703_v11  ;;  %v1277_v11 = vld [vmem:[%s1390_s29 + $0x14] sm:$0x6] }
  0x57   : > { %725 = vst [vmem:[#allocation1 + $0x1] ss:$4 sm:$0xff] %v707_v13  ;;  %v876_v13 = vsel %vm1406_vm8, %v871_v1, %v875_v2  ;;  %v961_v19 = vrot.slane %v1277_v11, 2 }
  0x58   : > { %728 = vst [vmem:[#allocation1 + $0x2] ss:$4 sm:$0xff] %v711_v16  ;;  %v889_v16 = vsel %vm1406_vm8, %v884_v4, %v888_v5 }
  0x59   : > { %731 = vst [vmem:[#allocation1 + $0x3] ss:$4 sm:$0xff] %v715_v18  ;;  %v902_v18 = vsel %vm1406_vm8, %v897_v7, %v901_v8  ;;  %v985_v45 = vsel %vm192_vm0, %v1277_v11, %v961_v19  ;;  %v987_v26 = vsel %vm196_vm1, %v1277_v11, %v961_v19 }
  0x5a   : > { %v1284_v34 = vrot.slane %v985_v45, 9  ;;  %v1285_v35 = vrot.slane %v987_v26, 9 }
  0x5c   : > { %v1005_v40 = vsel %vm1448_vm2, %v1284_v34, %v1285_v35 }
  0x60   : > { %v732_v50 = vld.sshfl [vmem:[#allocation1] sm:$0xff pattern:$0x73625140] }
  0x61   : > { %1239 = vmatmul.msk.bf16.vlgmr.msrb.gmra.mxu1 %vm306_vm11, %v732_v50  ;;  %774 = vst [vmem:[#allocation1] ss:$4 sm:$0xff] %v1240_v36  ;;  %v993_v36 = vsel %vm1448_vm2, %v1278_v28, %v1279_v29 }
  0x62   : > { %777 = vst [vmem:[#allocation1 + $0x1] ss:$4 sm:$0xff] %v1241_v41 }
  0x63   : > { %780 = vst [vmem:[#allocation1 + $0x2] ss:$4 sm:$0xff] %v1242_v46 }
  0x64   : > { %783 = vst [vmem:[#allocation1 + $0x3] ss:$4 sm:$0xff] %v1243_v54 }
  0x6b   : > { %v784_v15 = vld.sshfl [vmem:[#allocation1] sm:$0xff pattern:$0x73625140] }
  0x6c   : > { %1256 = vmatmul.msk.bf16.vlgmr.msrb.gmra.mxu2 %vm306_vm11, %v784_v15  ;;  %909 = vst [vmem:[#allocation1] ss:$4 sm:$0xff] %v863_v10 }
  0x6d   : > { %912 = vst [vmem:[#allocation1 + $0x1] ss:$4 sm:$0xff] %v876_v13 }
  0x6e   : > { %915 = vst [vmem:[#allocation1 + $0x2] ss:$4 sm:$0xff] %v889_v16 }
  0x6f   : > { %918 = vst [vmem:[#allocation1 + $0x3] ss:$4 sm:$0xff] %v902_v18 }
  0x76   : > { %v919_v38 = vld.sshfl [vmem:[#allocation1] sm:$0xff pattern:$0x73625140] }
  0x77   : > { %1273 = vmatmul.msk.bf16.vlgmr.msrb.gmra.mxu3 %vm306_vm11, %v919_v38  ;;  %1012 = vst [vmem:[#allocation1] ss:$4 sm:$0xff] %v993_v36 }
  0x78   : > { %1015 = vst [vmem:[#allocation1 + $0x1] ss:$4 sm:$0xff] %v997_v37 }
  0x79   : > { %1018 = vst [vmem:[#allocation1 + $0x2] ss:$4 sm:$0xff] %v1001_v39 }
  0x7a   : > { %1021 = vst [vmem:[#allocation1 + $0x3] ss:$4 sm:$0xff] %v1005_v40 }
  0x81   : > { %v1022_v41 = vld.sshfl [vmem:[#allocation1] sm:$0xff pattern:$0x73625140] }
  0x82   : > { %1298 = vmatmul.msk.bf16.vlgmr.msra.gmra.mxu0 %vm306_vm11, %v1022_v41 }
  0xa7   : > { %v318_v42 = vpop.f32.mrf.mxu0 }
  0xaf   : > { %v320_v44 = vpop.f32.mrf.mxu0 }
  0xb2   : > { %v358_v43 = vpop.f32.mrf.mxu1 }
  0xb3   : > { %v359_v47 = vadd.f32 %v358_v43, %v318_v42 }
  0xba   : > { %v360_v49 = vpop.f32.mrf.mxu1 }
  0xbb   : > { %v361_v55 = vadd.f32 %v360_v49, %v320_v44 }
  0xc3   : > { %v466_v46 = vpop.f32.mrf.mxu2 }
  0xc4   : > { %v471_v50 = vadd.f32 %v466_v46, %v359_v47 }
  0xcb   : > { %v468_v52 = vpop.f32.mrf.mxu2 }
  0xcc   : > { %v472_v59 = vadd.f32 %v468_v52, %v361_v55 }
  0xce   : > { %v518_v48 = vpop.f32.mrf.mxu3 }
  0xcf   : > { %v523_v53 = vadd.f32 %v518_v48, %v471_v50 }
  0xd3   : > { %v653_v51 = vpop.f32.mrf.mxu0 }
  0xd4   : > { %v658_v56 = vadd.f32 %v653_v51, %v523_v53 }
  0xd6   : > { %v520_v27 = vpop.f32.mrf.mxu3 }
  0xd7   : > { %v524_v61 = vadd.f32 %v520_v27, %v472_v59 }
  0xdb   : > { %v655_v58 = vpop.f32.mrf.mxu0 }
  0xdc   : > { %v659_v2 = vadd.f32 %v655_v58, %v524_v61 }
  0xde   : > { %v756_v54 = vpop.f32.mrf.mxu1 }
  0xdf   : > { %v761_v60 = vadd.f32 %v756_v54, %v658_v56 }
  0xe6   : > { %v758_v1 = vpop.f32.mrf.mxu1 }
  0xe7   : > { %v762_v6 = vadd.f32 %v758_v1, %v659_v2 }
  0xef   : > { %v808_v57 = vpop.f32.mrf.mxu2 }
  0xf0   : > { %v813_v62 = vadd.f32 %v808_v57, %v761_v60 }
  0xf7   : > { %v810_v4 = vpop.f32.mrf.mxu2 }
  0xf8   : > { %v814_v8 = vadd.f32 %v810_v4, %v762_v6 }
  0xfa   : > { %v943_v63 = vpop.f32.mrf.mxu3 }
  0xfb   : > { %v948_v0 = vadd.f32 %v943_v63, %v813_v62 }
  0xff   : > { %v1046_v5 = vpop.f32.mrf.mxu0 }
 0x100   : > { %v1051_v7 = vadd.f32 %v1046_v5, %v948_v0 }
 0x102   : > { %v1057_v9 = vadd.f32 %v1329_v3, %v1051_v7  ;;  %v945_v10 = vpop.f32.mrf.mxu3 }
 0x103   : > { %v949_v12 = vadd.f32 %v945_v10, %v814_v8 }
 0x104   : > { %v1059_v11 = vmax.f32 %v1057_v9, 0.0 }
 0x106   : > { %v1063_v13 = vrot.slane %v1059_v11, 4  ;;  %v1067_v14 = vpack.c.bf16 %v1059_v11, %v1059_v11 }
 0x107   : > { %v1048_v15 = vpop.f32.mrf.mxu0 }
 0x108   : > { %v1068_v16 = vpack.c.bf16 %v1063_v13, %v1063_v13  ;;  %1071 = vst [vmem:[%s170_s7] sm:$0x3] %v1067_v14  ;;  %v1052_v17 = vadd.f32 %v1048_v15, %v949_v12 }
 0x10a   : > { %1072 = vst [vmem:[%s170_s7 + $0x2] sm:$0x3] %v1068_v16  ;;  %v1058_v18 = vadd.f32 %v1329_v3, %v1052_v17 }
 0x10c   : > { %v1060_v19 = vmax.f32 %v1058_v18, 0.0 }
 0x10e   : > { %v1064_v20 = vrot.slane %v1060_v19, 4  ;;  %v1069_v21 = vpack.c.bf16 %v1060_v19, %v1060_v19 }
 0x110   : > { %v1070_v22 = vpack.c.bf16 %v1064_v20, %v1064_v20  ;;  %1073 = vst [vmem:[%s170_s7 + $0x4] sm:$0x3] %v1069_v21 }
 0x112   : > { %1074 = vst [vmem:[%s170_s7 + $0x6] sm:$0x3] %v1070_v22 }
 0x113 PF: > { %s13_s12 = sadd.s32 1, %s1336_s12  }
 0x114   : > { %p10_p4 = scmp.ge.s32.totalorder %s13_s12, 4  }
 0x116   :  { %12 = sbr.rel (!%p10_p4) target bundleno = 1 (0x1), region = 99 }

// kernel: _lambda_.13
= control target key start
LH: loop header
LB: loop body
LE: loop exit
PB: predicated region body
PF: predicated region fallthrough
CT: control target
= control target key end

     0   :  { %s179_s0 = inlined_call_operand.vmem [shape: f32[2,128], index: 0, kind: input, shape index: {}]   ;;  %s180_s1 = inlined_call_operand.vmem [shape: f32[128,128], index: 1, kind: input, shape index: {}]   ;;  %s181_s2 = inlined_call_operand.vmem [shape: f32[1,128], index: 2, kind: input, shape index: {}]   ;;  %s182_s3 = inlined_call_operand.hbm [shape: f32[2,128], index: 3, kind: output, shape index: {}]  }
   0x1   :  { %v31_v0 = vld [vmem:[%s180_s1 + $0x78] sm:$0xff]  ;;  %v30_v1 = vld [vmem:[%s180_s1 + $0x70] sm:$0xff]  ;;  %v29_v2 = vld [vmem:[%s180_s1 + $0x68] sm:$0xff] }
   0x2   :  { %36 = vmatpush.msra.mxu0 %v31_v0  ;;  %v28_v3 = vld [vmem:[%s180_s1 + $0x60] sm:$0xff]  ;;  %v27_v4 = vld [vmem:[%s180_s1 + $0x58] sm:$0xff] }
   0x4   :  { %37 = vmatpush.msra.mxu0 %v30_v1 }
   0x6   :  { %38 = vmatpush.msra.mxu0 %v29_v2 }
   0x7   :  { %8 = vsyncpa [#allocation3], 0  ;;  %v26_v5 = vld [vmem:[%s180_s1 + $0x50] sm:$0xff]  ;;  %v25_v6 = vld [vmem:[%s180_s1 + $0x48] sm:$0xff]  ;;  %s101_s21 = smov [#allocation2]   ;;  %s64_s25 = sshll.u32 %s182_s3, 4  ;;  %s65_s25 = int_to_ptr.hbm [resolvable:$true] %s64_s25 }
   0x8   :  { %39 = vmatpush.msra.mxu0 %v28_v3  ;;  %v24_v7 = vld [vmem:[%s180_s1 + $0x40] sm:$0xff]  ;;  %v23_v8 = vld [vmem:[%s180_s1 + $0x38] sm:$0xff]  ;;  %v22_v9 = vld [vmem:[%s180_s1 + $0x30] sm:$0xff]  ;;  %s62_s22 = sshll.u32 %s101_s21, 4  ;;  %s63_s22 = int_to_ptr.vmem [resolvable:$true] %s62_s22 }
   0x9   :  { %v21_v10 = vld [vmem:[%s180_s1 + $0x28] sm:$0xff]  ;;  %v20_v11 = vld [vmem:[%s180_s1 + $0x20] sm:$0xff]  ;;  %v19_v12 = vld [vmem:[%s180_s1 + $0x18] sm:$0xff] }
   0xa   :  { %40 = vmatpush.msra.mxu0 %v27_v4  ;;  %v18_v13 = vld [vmem:[%s180_s1 + $0x10] sm:$0xff]  ;;  %v17_v14 = vld [vmem:[%s180_s1 + $0x8] sm:$0xff]  ;;  %v16_v15 = vld [vmem:[%s180_s1] sm:$0xff] }
   0xb   :  { %v15_v16 = vld [vmem:[%s179_s0] sm:$0x3] }
   0xc   :  { %41 = vmatpush.msra.mxu0 %v26_v5  ;;  %v74_v17 = vld [vmem:[%s181_s2] ss:$0 sm:$0xff] }
   0xe   :  { %42 = vmatpush.msra.mxu0 %v25_v6 }
  0x10   :  { %43 = vmatpush.msra.mxu0 %v24_v7 }
  0x12   :  { %44 = vmatpush.msra.mxu0 %v23_v8 }
  0x14   :  { %45 = vmatpush.msra.mxu0 %v22_v9 }
  0x16   :  { %46 = vmatpush.msra.mxu0 %v21_v10 }
  0x18   :  { %47 = vmatpush.msra.mxu0 %v20_v11 }
  0x1a   :  { %48 = vmatpush.msra.mxu0 %v19_v12 }
  0x1c   :  { %49 = vmatpush.msra.mxu0 %v18_v13 }
  0x1e   :  { %50 = vmatpush.msra.mxu0 %v17_v14 }
  0x20   :  { %51 = vmatpush.msra.mxu0 %v16_v15 }
  0x21   :  { %52 = vmatmul.f32.vlgmr.msra.gmra.mxu0 %v15_v16 }
  0x9e   :  { %v53_v18 = vpop.f32.mrf.mxu0 }
  0x9f   :  { %v54_v19 = vadd.f32 %v74_v17, %v53_v18 }
  0xa1   :  { %56 = vst [vmem:[#allocation2] sm:$0x3] %v54_v19 }
  0xa2   :  { %67 = dma.vmem_to_hbm [thread:$0]  %s63_s22, 32, %s65_s25, [#allocation3]  }
  0xa3   :  { %99 = dma.done.wait [#allocation3], 32  }
  0xa4   :  { %100 = vsyncadd [#allocation3], 4294967264 }
  0xa5   :  { %72 = vsyncpa [#allocation3], 1 }

// kernel: _lambda_.12
= control target key start
LH: loop header
LB: loop body
LE: loop exit
PB: predicated region body
PF: predicated region fallthrough
CT: control target
= control target key end

     0   :  { %s990_s12 = smov 0   ;;  %s1139_s0 = inlined_call_operand.vmem [shape: bf16[2,4,2,2,64], index: 0, kind: input, shape index: {}]   ;;  %s1140_s1 = inlined_call_operand.vmem [shape: bf16[9,64,128], index: 1, kind: input, shape index: {}]   ;;  %s1141_s2 = inlined_call_operand.vmem [shape: f32[1,128], index: 2, kind: input, shape index: {}]   ;;  %s1142_s3 = inlined_call_operand.vmem [shape: f32[2,1,128], index: 3, kind: output, shape index: {}]  }
   0x1 LB: > { %s688_s13 = sadd.s32 4294967295, %s968_s12   ;;  %p692_p0 = scmp.ge.s32.totalorder %s968_s12, 1  ;;  %s968_s12 = sphi %s990_s12, %s13_s12  }
   0x2   : > { %p136_p1 = scmp.lt.s32.totalorder %s968_s12, 3 }
   0x4   : > { %p137_p2 = pnand %p692_p0, %p136_p1 }
   0x5   : > { %p157_p3 = scmp.lt.s32.totalorder (!%p137_p2), %s688_s13, 1 }
   0x6   : > { %140 = sbr.rel (%p137_p2) target bundleno = 193 (0xc1), region = 32 }
   0xb   : > { %v925_v0 = vld [vmem:[%s1140_s1 + $0x38] sm:$0xff]  ;;  %v924_v4 = vld [vmem:[%s1140_s1 + $0x30] sm:$0xff]  ;;  %s1144_s13 = smov (!%p157_p3, %s688_s13), 1  ;;  %v923_v8 = vld [vmem:[%s1140_s1 + $0x28] sm:$0xff]  ;;  %vm209_vm0 = vcmask 523264  }
   0xc   : > { %v921_v1 = vld [vmem:[%s1140_s1 + $0x18] sm:$0xff]  ;;  %217 = vmatpush.bf16.msra.mxu0 %v925_v0  ;;  %v920_v5 = vld [vmem:[%s1140_s1 + $0x10] sm:$0xff]  ;;  %s693_s30 = sshll.u32 %s1144_s13, 3  ;;  %v919_v9 = vld [vmem:[%s1140_s1 + $0x8] sm:$0xff]  ;;  %s163_s20 = scalar_lea.vmem %s1142_s3, %s1144_s13 }
   0xd   : > { %v929_v2 = vld [vmem:[%s1140_s1 + $0x58] sm:$0xff]  ;;  %257 = vmatpush.bf16.msra.mxu1 %v921_v1  ;;  %v928_v6 = vld [vmem:[%s1140_s1 + $0x50] sm:$0xff]  ;;  %s1028_s6 = scalar_lea.vmem %s1139_s0, %s693_s30  ;;  %v927_v11 = vld [vmem:[%s1140_s1 + $0x48] sm:$0xff] }
   0xe   : > { %v933_v3 = vld [vmem:[%s1140_s1 + $0x78] sm:$0xff]  ;;  %310 = vmatpush.bf16.msra.mxu2 %v929_v2  ;;  %v932_v7 = vld [vmem:[%s1140_s1 + $0x70] sm:$0xff]  ;;  %v165_v10 = vld [vmem:[%s1028_s6] sm:$0x1] }
   0xf   : > { %362 = vmatpush.bf16.msra.mxu3 %v933_v3  ;;  %v931_v12 = vld [vmem:[%s1140_s1 + $0x68] sm:$0xff]  ;;  %275 = vst [vmem:[#allocation1] ss:$9 sm:$0xff] %v165_v10  ;;  %v922_v13 = vld [vmem:[%s1140_s1 + $0x20] sm:$0xff]  ;;  %v937_v17 = vld [vmem:[%s1140_s1 + $0x98] sm:$0xff] }
  0x10   : > { %218 = vmatpush.bf16.msra.mxu0 %v924_v4  ;;  %v918_v14 = vld [vmem:[%s1140_s1] sm:$0xff]  ;;  %v945_v18 = vld [vmem:[%s1140_s1 + $0xd8] sm:$0xff]  ;;  %v936_v25 = vld [vmem:[%s1140_s1 + $0x90] sm:$0xff] }
  0x11   : > { %258 = vmatpush.bf16.msra.mxu1 %v920_v5  ;;  %v926_v15 = vld [vmem:[%s1140_s1 + $0x40] sm:$0xff]  ;;  %v949_v23 = vld [vmem:[%s1140_s1 + $0xf8] sm:$0xff]  ;;  %v944_v26 = vld [vmem:[%s1140_s1 + $0xd0] sm:$0xff] }
  0x12   : > { %311 = vmatpush.bf16.msra.mxu2 %v928_v6  ;;  %v930_v16 = vld [vmem:[%s1140_s1 + $0x60] sm:$0xff]  ;;  %v941_v24 = vld [vmem:[%s1140_s1 + $0xb8] sm:$0xff]  ;;  %v948_v27 = vld [vmem:[%s1140_s1 + $0xf0] sm:$0xff] }
  0x13   : > { %363 = vmatpush.bf16.msra.mxu3 %v932_v7  ;;  %v694_v19 = vld [vmem:[%s1028_s6 + $0x2] sm:$0x1]  ;;  %v762_v21 = vld [vmem:[%s1028_s6 + $0x4] sm:$0x1]  ;;  %v940_v28 = vld [vmem:[%s1140_s1 + $0xb0] sm:$0xff] }
  0x14   : > { %219 = vmatpush.bf16.msra.mxu0 %v923_v8  ;;  %v935_v29 = vld [vmem:[%s1140_s1 + $0x88] sm:$0xff]  ;;  %v839_v32 = vld [vmem:[%s1028_s6 + $0x1] sm:$0x1]  ;;  %v953_v37 = vld [vmem:[%s1140_s1 + $0x118] sm:$0xff] }
  0x15   : > { %259 = vmatpush.bf16.msra.mxu1 %v919_v9  ;;  %v943_v30 = vld [vmem:[%s1140_s1 + $0xc8] sm:$0xff]  ;;  %v934_v35 = vld [vmem:[%s1140_s1 + $0x80] sm:$0xff]  ;;  %v952_v43 = vld [vmem:[%s1140_s1 + $0x110] sm:$0xff] }
  0x16   : > { %312 = vmatpush.bf16.msra.mxu2 %v927_v11  ;;  %v276_v20 = vld [vmem:[#allocation1] sm:$0xff]  ;;  %v947_v33 = vld [vmem:[%s1140_s1 + $0xe8] sm:$0xff] }
  0x17   : > { %364 = vmatpush.bf16.msra.mxu3 %v931_v12  ;;  %v277_v22 = vshrl.u32 %v276_v20, 16  ;;  %433 = vst [vmem:[#allocation1] ss:$9 sm:$0xff] %v762_v21  ;;  %v939_v34 = vld [vmem:[%s1140_s1 + $0xa8] sm:$0xff]  ;;  %v942_v36 = vld [vmem:[%s1140_s1 + $0xc0] sm:$0xff] }
  0x18   : > { %220 = vmatpush.bf16.msra.mxu0 %v922_v13  ;;  %v946_v38 = vld [vmem:[%s1140_s1 + $0xe0] sm:$0xff]  ;;  %v951_v44 = vld [vmem:[%s1140_s1 + $0x108] sm:$0xff] }
  0x19   : > { %260 = vmatpush.bf16.msra.mxu1 %v918_v14  ;;  %v938_v39 = vld [vmem:[%s1140_s1 + $0xa0] sm:$0xff] }
  0x1a   : > { %313 = vmatpush.bf16.msra.mxu2 %v926_v15  ;;  %v788_v40 = vld [vmem:[%s1028_s6 + $0x6] sm:$0x1]  ;;  %v865_v41 = vld [vmem:[%s1028_s6 + $0x3] sm:$0x1]  ;;  %v636_v8 = vld [vmem:[%s1141_s2] sm:$0x1] }
  0x1b   : > { %365 = vmatpush.bf16.msra.mxu3 %v930_v16  ;;  %719 = vmatmul.msk.bf16.vlgmr.msra.gmra.mxu0 %vm209_vm0, %v694_v19  ;;  %v950_v45 = vld [vmem:[%s1140_s1 + $0x100] sm:$0xff] }
  0x1c   : > { %414 = vmatpush.bf16.msrb.mxu0 %v937_v17  ;;  %736 = vmatmul.msk.bf16.vlgmr.msra.gmra.mxu1 %vm209_vm0, %v165_v10 }
  0x1d   : > { %761 = vmatmul.msk.bf16.vlgmr.msra.gmra.mxu2 %vm209_vm0, %v277_v22  ;;  %468 = vmatpush.bf16.msrb.mxu1 %v941_v24 }
  0x1e   : > { %520 = vmatpush.bf16.msrb.mxu2 %v945_v18  ;;  %787 = vmatmul.msk.bf16.vlgmr.msra.gmra.mxu3 %vm209_vm0, %v762_v21  ;;  %v434_v31 = vld [vmem:[#allocation1] sm:$0xff] }
  0x1f   : > { %572 = vmatpush.bf16.msrb.mxu3 %v949_v23  ;;  %591 = vst [vmem:[#allocation1] ss:$9 sm:$0xff] %v839_v32  ;;  %v435_v42 = vshrl.u32 %v434_v31, 16 }
  0x20   : > { %415 = vmatpush.bf16.msrb.mxu0 %v936_v25 }
  0x21   : > { %469 = vmatpush.bf16.msrb.mxu1 %v940_v28 }
  0x22   : > { %521 = vmatpush.bf16.msrb.mxu2 %v944_v26 }
  0x23   : > { %573 = vmatpush.bf16.msrb.mxu3 %v948_v27 }
  0x24   : > { %416 = vmatpush.bf16.msrb.mxu0 %v935_v29 }
  0x25   : > { %470 = vmatpush.bf16.msrb.mxu1 %v939_v34 }
  0x26   : > { %522 = vmatpush.bf16.msrb.mxu2 %v943_v30  ;;  %v592_v46 = vld [vmem:[#allocation1] sm:$0xff] }
  0x27   : > { %574 = vmatpush.bf16.msrb.mxu3 %v947_v33  ;;  %v593_v47 = vshrl.u32 %v592_v46, 16 }
  0x28   : > { %417 = vmatpush.bf16.msrb.mxu0 %v934_v35 }
  0x29   : > { %471 = vmatpush.bf16.msrb.mxu1 %v938_v39 }
  0x2a   : > { %523 = vmatpush.bf16.msrb.mxu2 %v942_v36 }
  0x2b   : > { %575 = vmatpush.bf16.msrb.mxu3 %v946_v38  ;;  %813 = vmatmul.msk.bf16.vlgmr.msrb.gmra.mxu0 %vm209_vm0, %v788_v40 }
  0x2c   : > { %626 = vmatpush.bf16.msra.mxu0 %v953_v37  ;;  %838 = vmatmul.msk.bf16.vlgmr.msrb.gmra.mxu1 %vm209_vm0, %v435_v42 }
  0x2d   : > { %864 = vmatmul.msk.bf16.vlgmr.msrb.gmra.mxu2 %vm209_vm0, %v839_v32 }
  0x2e   : > { %890 = vmatmul.msk.bf16.vlgmr.msrb.gmra.mxu3 %vm209_vm0, %v865_v41 }
  0x30   : > { %627 = vmatpush.bf16.msra.mxu0 %v952_v43 }
  0x34   : > { %628 = vmatpush.bf16.msra.mxu0 %v951_v44 }
  0x38   : > { %629 = vmatpush.bf16.msra.mxu0 %v950_v45 }
  0x3b   : > { %915 = vmatmul.msk.bf16.vlgmr.msra.gmra.mxu0 %vm209_vm0, %v593_v47 }
  0x98   : > { %v222_v48 = vpop.f32.mrf.mxu0 }
  0x99   : > { %v262_v49 = vpop.f32.mrf.mxu1 }
  0x9a   : > { %v263_v54 = vadd.f32 %v262_v49, %v222_v48 }
  0xa0   : > { %v315_v50 = vpop.f32.mrf.mxu2  ;;  %v224_v52 = vpop.f32.mrf.mxu0 }
  0xa1   : > { %v367_v51 = vpop.f32.mrf.mxu3  ;;  %v264_v53 = vpop.f32.mrf.mxu1  ;;  %v319_v55 = vadd.f32 %v315_v50, %v263_v54 }
  0xa3   : > { %v371_v60 = vadd.f32 %v367_v51, %v319_v55 }
  0xa8   : > { %v317_v56 = vpop.f32.mrf.mxu2  ;;  %v419_v58 = vpop.f32.mrf.mxu0 }
  0xa9   : > { %v369_v57 = vpop.f32.mrf.mxu3  ;;  %v473_v59 = vpop.f32.mrf.mxu1  ;;  %v423_v61 = vadd.f32 %v419_v58, %v371_v60 }
  0xab   : > { %v477_v1 = vadd.f32 %v473_v59, %v423_v61 }
  0xb0   : > { %v525_v62 = vpop.f32.mrf.mxu2  ;;  %v421_v0 = vpop.f32.mrf.mxu0 }
  0xb1   : > { %v577_v63 = vpop.f32.mrf.mxu3  ;;  %v475_v2 = vpop.f32.mrf.mxu1  ;;  %v529_v3 = vadd.f32 %v525_v62, %v477_v1 }
  0xb3   : > { %v581_v4 = vadd.f32 %v577_v63, %v529_v3 }
  0xb8   : > { %v527_v5 = vpop.f32.mrf.mxu2  ;;  %v631_v7 = vpop.f32.mrf.mxu0 }
  0xb9   : > { %v579_v6 = vpop.f32.mrf.mxu3  ;;  %v635_v9 = vadd.f32 %v631_v7, %v581_v4 }
  0xbb   : > { %v637_v10 = vadd.f32 %v636_v8, %v635_v9 }
  0xbd   : > { %v638_v11 = vmax.f32 %v637_v10, 0.0 }
  0xbf   : > { %640 = vst [vmem:[%s163_s20] sm:$0x1] %v638_v11 }
  0xc0   : > { %v633_v12 = vpop.f32.mrf.mxu0 }
  0xc1 PF: > { %s13_s12 = sadd.s32 1, %s968_s12  }
  0xc2   : > { %p10_p4 = scmp.ge.s32.totalorder %s13_s12, 4  }
  0xc4   :  { %12 = sbr.rel (!%p10_p4) target bundleno = 1 (0x1), region = 75 }

</bundles_post_ra>
